<compile_context>
chip_gen: v7x
topology: tpu7x:2x2x1
jax: 0.10.0
libtpu: 0.0.40
codegen_flags: <defaults>
</compile_context>

<pallas_src>
import functools

import jax
import jax.numpy as jnp
from jax import lax
from jax.experimental import pallas as pl
from jax.experimental.pallas import tpu as pltpu


def _round_up(x, m):
    return ((x + m - 1) // m) * m


@functools.lru_cache()
def _physical_vmem_bytes():
    """Generation-aware physical VMEM (v5e/v6e: 128 MiB, v7x: 64 MiB)."""
    try:
        info = pltpu.get_tpu_info()
        for name in ("vmem_capacity_bytes", "vmem_size_bytes", "vmem_bytes"):
            v = getattr(info, name, None)
            if v:
                return int(v)
    except Exception:
        pass
    return 64 * 1024 * 1024  # conservative fallback (v7x-sized)


def _vmem_limit():
    # ~25% headroom for the compiler, capped at 100 MiB (v5e/v6e get ~96 MiB,
    # v7x gets ~48 MiB).
    return min((_physical_vmem_bytes() * 3) // 4, 100 * 1024 * 1024)


def _pick_ck(c):
    """Input-channel (reduction) tile for the fused head convs."""
    if c <= 512:
        return c
    cap = 512 if _physical_vmem_bytes() >= 100 * 1024 * 1024 else 256
    for cand in (cap, 256, 128):
        if c % cand == 0:
            return cand
    return c


# ----------------------------------------------------------------------------
# Kernels
# ----------------------------------------------------------------------------
def _mm_bias_relu_kernel(a_ref, w_ref, bias_ref, o_ref, acc_ref):
    """K-tiled (M,K)x(K,N) matmul (bf16 operands, f32 accum) + bias + ReLU."""
    k = pl.program_id(1)

    @pl.when(k == 0)
    def _init():
        acc_ref[...] = jnp.zeros_like(acc_ref)

    acc_ref[...] += jnp.dot(a_ref[...], w_ref[...],
                            preferred_element_type=jnp.float32)

    @pl.when(k == pl.num_programs(1) - 1)
    def _fin():
        y = acc_ref[...] + bias_ref[...]
        o_ref[...] = jnp.maximum(y, 0.0).astype(o_ref.dtype)


def _make_head_kernel(H, W, dmax, dilations):
    """Fused ASPP head: 1x1 branch + 3 dilated 3x3 branches in one c4 pass.

    grid = (batch, input-channel tiles).  Per step the unpadded (H, W, ck)
    block is copied into a zeroed (H+2*dmax, W+2*dmax, ck) VMEM scratch; each
    branch accumulates its shifted-window matmuls into its own f32 accumulator
    (one accumulator load/store per branch per step).  Taps whose window lies
    entirely in zero padding are skipped at trace time.
    """
    def kernel(x_ref, w0_ref, w13_ref, bias_ref, o_ref, xpad_ref, acc_ref):
        k = pl.program_id(1)

        @pl.when(k == 0)
        def _init():
            acc_ref[...] = jnp.zeros_like(acc_ref)
            xpad_ref[...] = jnp.zeros_like(xpad_ref)

        x_c = x_ref[0]                                  # (H, W, ck)
        ck = x_c.shape[-1]
        xpad_ref[dmax:dmax + H, dmax:dmax + W, :] = x_c
        x2d = x_c.reshape(H * W, ck)

        # 1x1 branch
        acc_ref[0] += jnp.dot(x2d, w0_ref[...],
                              preferred_element_type=jnp.float32)

        # dilated 3x3 branches
        for bi, d in enumerate(dilations):
            acc = acc_ref[bi + 1]
            for t in range(9):
                ky, kx = divmod(t, 3)
                dy, dx = (ky - 1) * d, (kx - 1) * d
                if abs(dy) >= H or abs(dx) >= W:
                    continue  # window entirely in zero padding -> contributes 0
                if dy == 0 and dx == 0:
                    win2d = x2d
                else:
                    r0, c0 = dmax + dy, dmax + dx
                    win2d = xpad_ref[r0:r0 + H, c0:c0 + W, :].reshape(H * W, ck)
                acc = acc + jnp.dot(win2d, w13_ref[bi, t],
                                    preferred_element_type=jnp.float32)
            acc_ref[bi + 1] = acc

        @pl.when(k == pl.num_programs(1) - 1)
        def _fin():
            for bi in range(4):
                o_ref[bi, 0] = jnp.maximum(acc_ref[bi] + bias_ref[bi],
                                           0.0).astype(o_ref.dtype)
    return kernel


def _branch_merge_kernel(br_ref, w_ref, pool_ref, w4_ref, bias_ref, o_ref,
                         acc_ref):
    """1x1 projection over the virtual 5-branch concat.

    Spatial branches are streamed one per reduction step; the spatially
    constant pool-branch contribution is added per batch at finalize.
    """
    r = pl.program_id(2)

    @pl.when(r == 0)
    def _init():
        acc_ref[...] = jnp.zeros_like(acc_ref)

    acc_ref[...] += jnp.dot(br_ref[0, 0], w_ref[0],
                            preferred_element_type=jnp.float32)

    @pl.when(r == pl.num_programs(2) - 1)
    def _fin():
        pool = jnp.dot(pool_ref[0], w4_ref[...],
                       preferred_element_type=jnp.float32)       # (8, Np)
        y = acc_ref[...] + pool[0:1] + bias_ref[...]
        o_ref[0] = jnp.maximum(y, 0.0).astype(o_ref.dtype)


def _make_fuse3x3_kernel(n, TH, W):
    """H-tiled 3x3 (d=1) conv over a virtual channel concat of n inputs.

    refs = [x0_main, x0_tail, ..., w_0..w_{n-1}, bias, out].  main is the
    (TH, W+2, Ci) row block, tail the 2-row halo below it (same HBM array).
    """
    def kernel(*refs):
        x_refs = refs[:2 * n]
        w_refs = refs[2 * n:3 * n]
        bias_ref = refs[3 * n]
        o_ref = refs[3 * n + 1]
        Np = o_ref.shape[-1]

        acc = jnp.zeros((TH * W, Np), jnp.float32)
        for i in range(n):
            main = x_refs[2 * i][0]        # (TH, W+2, Ci)
            tail = x_refs[2 * i + 1][0]    # (2,  W+2, Ci)
            full = jnp.concatenate([main, tail], axis=0)   # (TH+2, W+2, Ci)
            ci = main.shape[-1]
            for t in range(9):
                ky, kx = divmod(t, 3)
                win = full[ky:ky + TH, kx:kx + W, :].reshape(TH * W, ci)
                acc = acc + jnp.dot(win, w_refs[i][t],
                                    preferred_element_type=jnp.float32)
        o_ref[0] = jnp.maximum(acc + bias_ref[...], 0.0).astype(o_ref.dtype)
    return kernel


def _make_pool_kernel(hw, ts):
    """Spatially tiled global mean: running f32 sum, masked partial tiles."""
    def kernel(x_ref, o_ref, acc_ref):
        s = pl.program_id(1)

        @pl.when(s == 0)
        def _init():
            acc_ref[...] = jnp.zeros_like(acc_ref)

        x = x_ref[0].astype(jnp.float32)                       # (ts, C)
        rows = s * ts + lax.broadcasted_iota(jnp.int32, x.shape, 0)
        x = jnp.where(rows < hw, x, 0.0)
        acc_ref[...] += jnp.sum(x, axis=0, keepdims=True)

        @pl.when(s == pl.num_programs(1) - 1)
        def _fin():
            o_ref[0] = (acc_ref[...] * (1.0 / hw)).astype(o_ref.dtype)
    return kernel


# ----------------------------------------------------------------------------
# Wrappers
# ----------------------------------------------------------------------------
def matmul_bias_relu(a, w, bias, *, out_dtype=jnp.bfloat16):
    """a: (M,K) bf16, w: (K,Np) bf16 (BN pre-folded), bias: (Np,) f32."""
    orig_m, K = a.shape
    Np = w.shape[-1]
    m = orig_m
    if m < 8:
        a = jnp.pad(a, ((0, 8 - m), (0, 0)))
        m = 8
    tm = 512 if m >= 512 else _round_up(m, 8)
    gm = pl.cdiv(m, tm)
    tk = K
    if K > 512:
        for cand in (512, 256, 128):
            if K % cand == 0:
                tk = cand
                break
    gk = K // tk

    out = pl.pallas_call(
        _mm_bias_relu_kernel,
        out_shape=jax.ShapeDtypeStruct((m, Np), out_dtype),
        grid=(gm, gk),
        in_specs=[
            pl.BlockSpec((tm, tk), lambda i, k: (i, k)),
            pl.BlockSpec((tk, Np), lambda i, k: (k, 0)),
            pl.BlockSpec((1, Np), lambda i, k: (0, 0)),
        ],
        out_specs=pl.BlockSpec((tm, Np), lambda i, k: (i, 0)),
        scratch_shapes=[pltpu.VMEM((tm, Np), jnp.float32)],
        compiler_params=pltpu.CompilerParams(
            dimension_semantics=("parallel", "arbitrary"),
            vmem_limit_bytes=_vmem_limit()),
    )(a, w, bias.reshape(1, Np).astype(jnp.float32))
    return out[:orig_m]


def conv1x1_bn_relu(x_nhwc, w, bias):
    B, H, W, C = x_nhwc.shape
    y = matmul_bias_relu(x_nhwc.reshape(B * H * W, C), w, bias)
    return y.reshape(B, H, W, y.shape[-1])


def fused_head_convs(c4, w0, w13, bias, *, dilations=(12, 24, 36),
                     out_dtype=jnp.bfloat16):
    """One c4 pass -> stacked (4, B, H*W, Np) branch activations (b0,b1,b2,b3)."""
    B, H, W, C = c4.shape
    Np = w0.shape[-1]
    dmax = max(dilations)
    ck = _pick_ck(C)
    gk = C // ck
    Hp, Wp = H + 2 * dmax, W + 2 * dmax

    return pl.pallas_call(
        _make_head_kernel(H, W, dmax, dilations),
        out_shape=jax.ShapeDtypeStruct((4, B, H * W, Np), out_dtype),
        grid=(B, gk),
        in_specs=[
            pl.BlockSpec((1, H, W, ck), lambda b, k: (b, 0, 0, k)),
            pl.BlockSpec((ck, Np), lambda b, k: (k, 0)),
            pl.BlockSpec((3, 9, ck, Np), lambda b, k: (0, 0, k, 0)),
            pl.BlockSpec((4, Np), lambda b, k: (0, 0)),
        ],
        out_specs=pl.BlockSpec((4, 1, H * W, Np), lambda b, k: (0, b, 0, 0)),
        scratch_shapes=[pltpu.VMEM((Hp, Wp, ck), c4.dtype),
                        pltpu.VMEM((4, H * W, Np), jnp.float32)],
        compiler_params=pltpu.CompilerParams(
            dimension_semantics=("parallel", "arbitrary"),
            vmem_limit_bytes=_vmem_limit()),
    )(c4, w0, w13, bias)


def global_avg_pool(x_nhwc):
    """(B, H, W, C) -> (B, C) spatial mean with a tiled running-sum reduction."""
    B, H, W, C = x_nhwc.shape
    hw = H * W
    x = x_nhwc.reshape(B, hw, C)
    ts = hw if hw <= 2048 else 1024
    gs = pl.cdiv(hw, ts)
    out = pl.pallas_call(
        _make_pool_kernel(hw, ts),
        out_shape=jax.ShapeDtypeStruct((B, 1, C), x.dtype),
        grid=(B, gs),
        in_specs=[pl.BlockSpec((1, ts, C), lambda b, s: (b, s, 0))],
        out_specs=pl.BlockSpec((1, 1, C), lambda b, s: (b, 0, 0)),
        scratch_shapes=[pltpu.VMEM((1, C), jnp.float32)],
        compiler_params=pltpu.CompilerParams(
            dimension_semantics=("parallel", "arbitrary"),
            vmem_limit_bytes=_vmem_limit()),
    )(x)
    return out.reshape(B, C)


def branch_merge_1x1(branches, proj_w, pool_row, proj_pool_w, bias,
                     *, out_dtype=jnp.bfloat16):
    """Projection over the virtual 5-branch concat.

    branches: (4, B, M, Kp) bf16; proj_w: (4, Kp, Np); pool_row: (B, Kp)
    (ReLU'd global-pool branch); proj_pool_w: (Kp, Np)."""
    R, B, M, Kp = branches.shape
    Np = proj_w.shape[-1]
    tm = 512 if M >= 512 else _round_up(M, 8)
    gm = pl.cdiv(M, tm)
    # 8 identical rows so the tiny per-batch matmul uses a native sublane tile.
    pool8 = jnp.broadcast_to(pool_row.reshape(B, 1, Kp), (B, 8, Kp))

    return pl.pallas_call(
        _branch_merge_kernel,
        out_shape=jax.ShapeDtypeStruct((B, M, Np), out_dtype),
        grid=(B, gm, R),
        in_specs=[
            pl.BlockSpec((1, 1, tm, Kp), lambda b, i, r: (r, b, i, 0)),
            pl.BlockSpec((1, Kp, Np), lambda b, i, r: (r, 0, 0)),
            pl.BlockSpec((1, 8, Kp), lambda b, i, r: (b, 0, 0)),
            pl.BlockSpec((Kp, Np), lambda b, i, r: (0, 0)),
            pl.BlockSpec((1, Np), lambda b, i, r: (0, 0)),
        ],
        out_specs=pl.BlockSpec((1, tm, Np), lambda b, i, r: (b, i, 0)),
        scratch_shapes=[pltpu.VMEM((tm, Np), jnp.float32)],
        compiler_params=pltpu.CompilerParams(
            dimension_semantics=("parallel", "parallel", "arbitrary"),
            vmem_limit_bytes=_vmem_limit()),
    )(branches, proj_w, pool8, proj_pool_w,
      bias.reshape(1, Np).astype(jnp.float32))


def fuse_conv3x3(inputs, bias, *, out_dtype=jnp.bfloat16):
    """H-tiled 3x3 conv (padding=1) + folded BN + ReLU over a virtual concat.

    inputs: list of (x (B,H,W,Ci) bf16, w (9,Ci,Np) bf16) sharing (B,H,W)."""
    B, H, W, _ = inputs[0][0].shape
    Np = inputs[0][1].shape[-1]
    n = len(inputs)
    TH = 16 if H >= 64 else 8
    Ht = _round_up(H, TH)
    n_h = Ht // TH
    Wp = W + 2

    operands, in_specs = [], []
    for x, _ in inputs:
        Ci = x.shape[-1]
        # d=1 halo padding in HBM is ~few % overhead (unlike the dilated convs).
        xp = jnp.pad(x, ((0, 0), (1, 1 + Ht - H), (1, 1), (0, 0)))
        operands += [xp, xp]
        in_specs += [
            pl.BlockSpec((1, TH, Wp, Ci), lambda b, h: (b, h, 0, 0)),
            pl.BlockSpec((1, 2, Wp, Ci),
                         lambda b, h: (b, (h + 1) * (TH // 2), 0, 0)),
        ]
    for _, w in inputs:
        operands.append(w)
        in_specs.append(pl.BlockSpec((9,) + w.shape[1:], lambda b, h: (0, 0, 0)))
    operands.append(bias.reshape(1, Np).astype(jnp.float32))
    in_specs.append(pl.BlockSpec((1, Np), lambda b, h: (0, 0)))

    out = pl.pallas_call(
        _make_fuse3x3_kernel(n, TH, W),
        out_shape=jax.ShapeDtypeStruct((B, H * W, Np), out_dtype),
        grid=(B, n_h),
        in_specs=in_specs,
        out_specs=pl.BlockSpec((1, TH * W, Np), lambda b, h: (b, h, 0)),
        compiler_params=pltpu.CompilerParams(
            dimension_semantics=("parallel", "parallel"),
            vmem_limit_bytes=_vmem_limit()),
    )(*operands)
    return out.reshape(B, H, W, Np)


# ----------------------------------------------------------------------------
# Bilinear upsample (align_corners=True) — plain JAX (gather-based), bf16 out.
# ----------------------------------------------------------------------------
def bilinear_resize_align_corners(x, out_h, out_w):
    B, h, w, C = x.shape

    def coords(out_size, in_size):
        if out_size == 1 or in_size == 1:
            src = jnp.zeros((out_size,), jnp.float32)
        else:
            src = jnp.arange(out_size, dtype=jnp.float32) * (
                (in_size - 1) / (out_size - 1))
        i0 = jnp.clip(jnp.floor(src).astype(jnp.int32), 0, in_size - 1)
        i1 = jnp.clip(i0 + 1, 0, in_size - 1)
        t = src - i0.astype(jnp.float32)
        return i0, i1, t

    r0, r1, tr = coords(out_h, h)
    c0, c1, tc = coords(out_w, w)
    xf = x.astype(jnp.float32)
    top, bot = xf[:, r0], xf[:, r1]
    rows = top * (1.0 - tr)[None, :, None, None] + bot * tr[None, :, None, None]
    left, right = rows[:, :, c0], rows[:, :, c1]
    out = (left * (1.0 - tc)[None, None, :, None]
           + right * tc[None, None, :, None])
    return out.astype(jnp.bfloat16)


# ----------------------------------------------------------------------------
# Parameters: deterministic, BN folded, output channels lane-padded to 128.
# ----------------------------------------------------------------------------
def make_aspp_params(key, low_level_channels, high_level_channels):
    hi, lo = high_level_channels, low_level_channels
    oc = hi // 8
    ocp = _round_up(oc, 128)
    c48p = _round_up(48, 128)

    keys = iter(jax.random.split(key, 64))
    nk = lambda: next(keys)  # noqa: E731

    def bn_fold(c):
        gamma = jax.random.uniform(nk(), (c,), minval=0.5, maxval=1.5)
        beta = 0.1 * jax.random.normal(nk(), (c,))
        mean = 0.1 * jax.random.normal(nk(), (c,))
        var = jax.random.uniform(nk(), (c,), minval=0.5, maxval=1.5)
        scale = gamma / jnp.sqrt(var + 1e-5)
        return scale.astype(jnp.float32), (beta - mean * scale).astype(jnp.float32)

    def mk1x1(cin, cout):
        w = 0.05 * jax.random.normal(nk(), (cin, cout))
        s, b = bn_fold(cout)
        cp = _round_up(cout, 128)
        w = jnp.pad(w * s[None, :], ((0, 0), (0, cp - cout)))
        b = jnp.pad(b, (0, cp - cout))
        return w.astype(jnp.bfloat16), b.astype(jnp.float32)

    def mk3x3(cin, cout, cin_pad=None):
        w = 0.05 * jax.random.normal(nk(), (3, 3, cin, cout))
        s, b = bn_fold(cout)
        cp_out = _round_up(cout, 128)
        cp_in = cin if cin_pad is None else cin_pad
        w = jnp.pad(w * s[None, None, None, :],
                    ((0, 0), (0, 0), (0, cp_in - cin), (0, cp_out - cout)))
        b = jnp.pad(b, (0, cp_out - cout))
        return (w.reshape(9, cp_in, cp_out).astype(jnp.bfloat16),
                b.astype(jnp.float32))

    p = {}
    # ASPP head branches (1x1, three dilated 3x3, global-pool 1x1).
    b0_w, b0_b = mk1x1(hi, oc)
    b1_w, b1_b = mk3x3(hi, oc)
    b2_w, b2_b = mk3x3(hi, oc)
    b3_w, b3_b = mk3x3(hi, oc)
    p["b0_w"] = b0_w
    p["b13_w"] = jnp.stack([b1_w, b2_w, b3_w], axis=0)          # (3, 9, hi, ocp)
    p["head_b"] = jnp.stack([b0_b, b1_b, b2_b, b3_b], axis=0)   # (4, ocp)
    p["b4_w"], p["b4_b"] = mk1x1(hi, oc)

    # 1x1 projection over the (virtual) 5-branch concat: 4 spatial groups
    # stacked for the streamed reduction, pool group kept separate.
    w = 0.05 * jax.random.normal(nk(), (5 * oc, oc))
    s, b = bn_fold(oc)
    w = w * s[None, :]
    groups = [jnp.pad(w[g * oc:(g + 1) * oc, :], ((0, ocp - oc), (0, ocp - oc)))
              for g in range(5)]
    p["proj_w"] = jnp.stack(groups[:4], axis=0).astype(jnp.bfloat16)  # (4,ocp,ocp)
    p["proj_pool_w"] = groups[4].astype(jnp.bfloat16)                 # (ocp,ocp)
    p["proj_b"] = jnp.pad(b, (0, ocp - oc)).astype(jnp.float32)

    # reduce: low-level -> 48 (lane-padded to 128).
    p["red_w"], p["red_b"] = mk1x1(lo, 48)

    # fuse conv #1: 3x3 over the virtual concat [reduce(c1), head_up].
    w = 0.05 * jax.random.normal(nk(), (3, 3, 48 + oc, 256))
    s, b = bn_fold(256)
    w = w * s[None, None, None, :]
    wr = jnp.pad(w[:, :, :48, :], ((0, 0), (0, 0), (0, c48p - 48), (0, 0)))
    wh = jnp.pad(w[:, :, 48:, :], ((0, 0), (0, 0), (0, ocp - oc), (0, 0)))
    p["f1r_w"] = wr.reshape(9, c48p, 256).astype(jnp.bfloat16)
    p["f1h_w"] = wh.reshape(9, ocp, 256).astype(jnp.bfloat16)
    p["f1_b"] = b.astype(jnp.float32)

    # fuse conv #2: 3x3, 256 -> 256.
    p["f2_w"], p["f2_b"] = mk3x3(256, 256)
    return p


# ----------------------------------------------------------------------------
# ASPP forward
# ----------------------------------------------------------------------------
def aspp_forward(params, c4_nchw, c1_nchw):
    p = params
    c4 = jnp.transpose(c4_nchw, (0, 2, 3, 1)).astype(jnp.bfloat16)
    c1 = jnp.transpose(c1_nchw, (0, 2, 3, 1)).astype(jnp.bfloat16)
    B, H4, W4, _ = c4.shape
    _, H1, W1, _ = c1.shape
    ocp = p["b0_w"].shape[-1]

    # ---- head: single fused pass over c4 (b0 + three dilated branches) ----
    branches = fused_head_convs(c4, p["b0_w"], p["b13_w"], p["head_b"],
                                dilations=(12, 24, 36))   # (4, B, H4*W4, ocp)

    # global-pool branch: tiled mean + tiny 1x1 (no spatial broadcast in HBM)
    pooled = global_avg_pool(c4)                          # (B, C4)
    b4 = matmul_bias_relu(pooled, p["b4_w"], p["b4_b"])   # (B, ocp)

    # 1x1 projection over the virtual 5-branch concat
    head = branch_merge_1x1(branches, p["proj_w"], b4, p["proj_pool_w"],
                            p["proj_b"])                  # (B, H4*W4, ocp)
    head = head.reshape(B, H4, W4, ocp)

    # ---- upsample high-level features to c1 resolution ----
    head_up = bilinear_resize_align_corners(head, H1, W1)

    # ---- reduce low-level features ----
    red = conv1x1_bn_relu(c1, p["red_w"], p["red_b"])     # (B, H1, W1, 128)

    # ---- fuse: H-tiled 3x3 convs over the virtual concat [red, head_up] ----
    f1 = fuse_conv3x3([(red, p["f1r_w"]), (head_up, p["f1h_w"])], p["f1_b"])
    out = fuse_conv3x3([(f1, p["f2_w"])], p["f2_b"])
    # Dropout(0.1) is identity at inference.
    return jnp.transpose(out.astype(jnp.float32), (0, 3, 1, 2))  # NCHW


if __name__ == "__main__":
    key = jax.random.PRNGKey(0)
    k_params, k_c4, k_c1 = jax.random.split(key, 3)

    B = 2
    low_level_channels = 4
    high_level_channels = 32          # -> ASPP head output channels = 4
    H4, W4 = 8, 8                     # high-level (c4) spatial
    H1, W1 = 16, 16                   # low-level  (c1) spatial

    params = make_aspp_params(k_params, low_level_channels, high_level_channels)
    c4 = jax.random.normal(k_c4, (B, high_level_channels, H4, W4), jnp.float32)
    c1 = jax.random.normal(k_c1, (B, low_level_channels, H1, W1), jnp.float32)

    fwd = jax.jit(functools.partial(aspp_forward, params))
    out = fwd(c4, c1)
    jax.block_until_ready(out)
    assert out.shape == (B, 256, H1, W1), out.shape
    assert bool(jnp.all(jnp.isfinite(out)))
    print("KERNEL_OK")
</pallas_src>

<mosaic_0001>
module attributes {stable_mosaic.version = 11 : i64} {
  func.func @kernel(%arg0: i32, %arg1: i32, %arg2: memref<1x64x32xbf16, #tpu.memory_space<vmem>>, %arg3: memref<1x1x32xbf16, #tpu.memory_space<vmem>>, %arg4: memref<1x32xf32, #tpu.memory_space<vmem>>) attributes {dimension_semantics = [#tpu.dimension_semantics<parallel>, #tpu.dimension_semantics<arbitrary>], iteration_bounds = array<i64: 2, 1>, scalar_prefetch = 0 : i64, scratch_operands = 1 : i64, tpu.core_type = #tpu.core_type<tc>, window_params = [{transform_indices = @transform_0, window_bounds = array<i64: 1, 64, 32>}, {transform_indices = @transform_1, window_bounds = array<i64: 1, 1, 32>}]} {
    %c0_i32 = arith.constant 0 : i32
    %0 = arith.cmpi eq, %arg1, %c0_i32 : i32
    %1 = arith.extui %0 : i1 to i32
    %c0_i32_0 = arith.constant 0 : i32
    %2 = arith.cmpi ne, %1, %c0_i32_0 : i32
    scf.if %2 {
      %cst_11 = arith.constant 0.000000e+00 : f32
      %22 = vector.broadcast %cst_11 : f32 to vector<1x32xf32>
      %c0_12 = arith.constant 0 : index
      %c0_13 = arith.constant 0 : index
      %23 = vector.load %arg4[%c0_12, %c0_13] : memref<1x32xf32, #tpu.memory_space<vmem>>, vector<1x32xf32>
      tpu.vector_store %arg4[%c0_12, %c0_13], %22 {strides = array<i32>} : memref<1x32xf32, #tpu.memory_space<vmem>>, vector<1x32xf32>,
    } else {
    }
    %c0 = arith.constant 0 : index
    %c0_1 = arith.constant 0 : index
    %c0_2 = arith.constant 0 : index
    %3 = vector.load %arg2[%c0, %c0_1, %c0_2] : memref<1x64x32xbf16, #tpu.memory_space<vmem>>, vector<1x64x32xbf16>
    %4 = vector.shape_cast %3 : vector<1x64x32xbf16> to vector<64x32xbf16>
    %5 = arith.extf %4 : vector<64x32xbf16> to vector<64x32xf32>
    %c64_i32 = arith.constant 64 : i32
    %6 = arith.muli %arg1, %c64_i32 : i32
    %7 = tpu.iota {dimensions = array<i32: 0>} : vector<64x32xi32>
    %8 = vector.broadcast %6 : i32 to vector<64x32xi32>
    %9 = arith.addi %8, %7 : vector<64x32xi32>
    %c64_i32_3 = arith.constant 64 : i32
    %10 = vector.broadcast %c64_i32_3 : i32 to vector<64x32xi32>
    %11 = arith.cmpi slt, %9, %10 : vector<64x32xi32>
    %cst = arith.constant 0.000000e+00 : f32
    %12 = vector.broadcast %cst : f32 to vector<64x32xf32>
    %13 = arith.select %11, %5, %12 : vector<64x32xi1>, vector<64x32xf32>
    %c0_4 = arith.constant 0 : index
    %c0_5 = arith.constant 0 : index
    %14 = vector.load %arg4[%c0_4, %c0_5] : memref<1x32xf32, #tpu.memory_space<vmem>>, vector<1x32xf32>
    %cst_6 = arith.constant dense<0.000000e+00> : vector<32xf32>
    %15 = vector.multi_reduction <add>, %13, %cst_6 [0] : vector<64x32xf32> to vector<32xf32>
    %16 = vector.shape_cast %15 : vector<32xf32> to vector<1x32xf32>
    %17 = arith.addf %14, %16 : vector<1x32xf32>
    %c0_7 = arith.constant 0 : index
    %c0_8 = arith.constant 0 : index
    %18 = vector.load %arg4[%c0_7, %c0_8] : memref<1x32xf32, #tpu.memory_space<vmem>>, vector<1x32xf32>
    tpu.vector_store %arg4[%c0_7, %c0_8], %17 {strides = array<i32>} : memref<1x32xf32, #tpu.memory_space<vmem>>, vector<1x32xf32>,
    %c0_i32_9 = arith.constant 0 : i32
    %19 = arith.cmpi eq, %arg1, %c0_i32_9 : i32
    %20 = arith.extui %19 : i1 to i32
    %c0_i32_10 = arith.constant 0 : i32
    %21 = arith.cmpi ne, %20, %c0_i32_10 : i32
    scf.if %21 {
      %c0_11 = arith.constant 0 : index
      %c0_12 = arith.constant 0 : index
      %22 = vector.load %arg4[%c0_11, %c0_12] : memref<1x32xf32, #tpu.memory_space<vmem>>, vector<1x32xf32>
      %cst_13 = arith.constant 1.562500e-02 : f32
      %23 = vector.broadcast %cst_13 : f32 to vector<1x32xf32>
      %24 = arith.mulf %22, %23 : vector<1x32xf32>
      %25 = arith.truncf %24 : vector<1x32xf32> to vector<1x32xbf16>
      %c0_14 = arith.constant 0 : index
      %c0_15 = arith.constant 0 : index
      %c0_16 = arith.constant 0 : index
      %26 = vector.load %arg3[%c0_14, %c0_15, %c0_16] : memref<1x1x32xbf16, #tpu.memory_space<vmem>>, vector<1x1x32xbf16>
      %27 = vector.shape_cast %26 : vector<1x1x32xbf16> to vector<1x32xbf16>
      %28 = vector.shape_cast %25 : vector<1x32xbf16> to vector<1x1x32xbf16>
      tpu.vector_store %arg3[%c0_14, %c0_15, %c0_16], %28 {strides = array<i32>} : memref<1x1x32xbf16, #tpu.memory_space<vmem>>, vector<1x1x32xbf16>,
    } else {
    }
    return
  }
  func.func @transform_0(%arg0: i32, %arg1: i32) -> (i32, i32, i32) {
    %c0_i32 = arith.constant 0 : i32
    %c0_i32_0 = arith.constant 0 : i32
    return %arg0, %arg1, %c0_i32 : i32, i32, i32
  }
  func.func @transform_1(%arg0: i32, %arg1: i32) -> (i32, i32, i32) {
    %c0_i32 = arith.constant 0 : i32
    %c0_i32_0 = arith.constant 0 : i32
    %c0_i32_1 = arith.constant 0 : i32
    return %arg0, %c0_i32, %c0_i32_0 : i32, i32, i32
  }
}

module attributes {stable_mosaic.version = 11 : i64} {
  func.func @_mm_bias_relu_kernel(%arg0: i32, %arg1: i32, %arg2: memref<8x32xbf16, #tpu.memory_space<vmem>>, %arg3: memref<32x128xbf16, #tpu.memory_space<vmem>>, %arg4: memref<1x128xf32, #tpu.memory_space<vmem>>, %arg5: memref<8x128xbf16, #tpu.memory_space<vmem>>, %arg6: memref<8x128xf32, #tpu.memory_space<vmem>>) attributes {dimension_semantics = [#tpu.dimension_semantics<parallel>, #tpu.dimension_semantics<arbitrary>], iteration_bounds = array<i64: 1, 1>, scalar_prefetch = 0 : i64, scratch_operands = 1 : i64, tpu.core_type = #tpu.core_type<tc>, window_params = [{transform_indices = @transform_0, window_bounds = array<i64: 8, 32>}, {transform_indices = @transform_1, window_bounds = array<i64: 32, 128>}, {pipeline_mode = #tpu.pipeline_mode<synchronous>, transform_indices = @transform_2, window_bounds = array<i64: 1, 128>}, {transform_indices = @transform_3, window_bounds = array<i64: 8, 128>}]} {
    %c0_i32 = arith.constant 0 : i32
    %0 = arith.cmpi eq, %arg1, %c0_i32 : i32
    %1 = arith.extui %0 : i1 to i32
    %c0_i32_0 = arith.constant 0 : i32
    %2 = arith.cmpi ne, %1, %c0_i32_0 : i32
    scf.if %2 {
      %cst_10 = arith.constant 0.000000e+00 : f32
      %12 = vector.broadcast %cst_10 : f32 to vector<8x128xf32>
      %c0_11 = arith.constant 0 : index
      %c0_12 = arith.constant 0 : index
      %13 = vector.load %arg6[%c0_11, %c0_12] : memref<8x128xf32, #tpu.memory_space<vmem>>, vector<8x128xf32>
      tpu.vector_store %arg6[%c0_11, %c0_12], %12 {strides = array<i32>} : memref<8x128xf32, #tpu.memory_space<vmem>>, vector<8x128xf32>,
    } else {
    }
    %c0 = arith.constant 0 : index
    %c0_1 = arith.constant 0 : index
    %3 = vector.load %arg6[%c0, %c0_1] : memref<8x128xf32, #tpu.memory_space<vmem>>, vector<8x128xf32>
    %c0_2 = arith.constant 0 : index
    %c0_3 = arith.constant 0 : index
    %4 = vector.load %arg2[%c0_2, %c0_3] : memref<8x32xbf16, #tpu.memory_space<vmem>>, vector<8x32xbf16>
    %c0_4 = arith.constant 0 : index
    %c0_5 = arith.constant 0 : index
    %5 = vector.load %arg3[%c0_4, %c0_5] : memref<32x128xbf16, #tpu.memory_space<vmem>>, vector<32x128xbf16>
    %cst = arith.constant dense<0.000000e+00> : vector<8x128xf32>
    %6 = tpu.matmul %4, %5, %cst {dimension_numbers = #tpu.dot_dimension_numbers<[1], [0], [0], [1], [0, 0, 1, 1], [], []>} : vector<8x32xbf16>, vector<32x128xbf16>, vector<8x128xf32> -> vector<8x128xf32>
    %7 = arith.addf %3, %6 : vector<8x128xf32>
    %c0_6 = arith.constant 0 : index
    %c0_7 = arith.constant 0 : index
    %8 = vector.load %arg6[%c0_6, %c0_7] : memref<8x128xf32, #tpu.memory_space<vmem>>, vector<8x128xf32>
    tpu.vector_store %arg6[%c0_6, %c0_7], %7 {strides = array<i32>} : memref<8x128xf32, #tpu.memory_space<vmem>>, vector<8x128xf32>,
    %c0_i32_8 = arith.constant 0 : i32
    %9 = arith.cmpi eq, %arg1, %c0_i32_8 : i32
    %10 = arith.extui %9 : i1 to i32
    %c0_i32_9 = arith.constant 0 : i32
    %11 = arith.cmpi ne, %10, %c0_i32_9 : i32
    scf.if %11 {
      %c0_10 = arith.constant 0 : index
      %c0_11 = arith.constant 0 : index
      %12 = vector.load %arg6[%c0_10, %c0_11] : memref<8x128xf32, #tpu.memory_space<vmem>>, vector<8x128xf32>
      %c0_12 = arith.constant 0 : index
      %c0_13 = arith.constant 0 : index
      %13 = vector.load %arg4[%c0_12, %c0_13] : memref<1x128xf32, #tpu.memory_space<vmem>>, vector<1x128xf32>
      %14 = vector.broadcast %13 : vector<1x128xf32> to vector<8x128xf32>
      %15 = arith.addf %12, %14 : vector<8x128xf32>
      %cst_14 = arith.constant 0.000000e+00 : f32
      %16 = vector.broadcast %cst_14 : f32 to vector<8x128xf32>
      %17 = arith.maximumf %15, %16 : vector<8x128xf32>
      %18 = arith.truncf %17 : vector<8x128xf32> to vector<8x128xbf16>
      %c0_15 = arith.constant 0 : index
      %c0_16 = arith.constant 0 : index
      %19 = vector.load %arg5[%c0_15, %c0_16] : memref<8x128xbf16, #tpu.memory_space<vmem>>, vector<8x128xbf16>
      tpu.vector_store %arg5[%c0_15, %c0_16], %18 {strides = array<i32>} : memref<8x128xbf16, #tpu.memory_space<vmem>>, vector<8x128xbf16>,
    } else {
    }
    return
  }
  func.func @transform_0(%arg0: i32, %arg1: i32) -> (i32, i32) {
    %c0_i32 = arith.constant 0 : i32
    return %arg0, %arg1 : i32, i32
  }
  func.func @transform_1(%arg0: i32, %arg1: i32) -> (i32, i32) {
    %c0_i32 = arith.constant 0 : i32
    %c0_i32_0 = arith.constant 0 : i32
    return %arg1, %c0_i32 : i32, i32
  }
  func.func @transform_2(%arg0: i32, %arg1: i32) -> (i32, i32) {
    %c0_i32 = arith.constant 0 : i32
    %c0_i32_0 = arith.constant 0 : i32
    %c0_i32_1 = arith.constant 0 : i32
    return %c0_i32, %c0_i32_0 : i32, i32
  }
  func.func @transform_3(%arg0: i32, %arg1: i32) -> (i32, i32) {
    %c0_i32 = arith.constant 0 : i32
    %c0_i32_0 = arith.constant 0 : i32
    return %arg0, %c0_i32 : i32, i32
  }
}

module attributes {stable_mosaic.version = 11 : i64} {
  func.func @_mm_bias_relu_kernel(%arg0: i32, %arg1: i32, %arg2: memref<512x4xbf16, #tpu.memory_space<vmem>>, %arg3: memref<4x128xbf16, #tpu.memory_space<vmem>>, %arg4: memref<1x128xf32, #tpu.memory_space<vmem>>, %arg5: memref<512x128xbf16, #tpu.memory_space<vmem>>, %arg6: memref<512x128xf32, #tpu.memory_space<vmem>>) attributes {dimension_semantics = [#tpu.dimension_semantics<parallel>, #tpu.dimension_semantics<arbitrary>], iteration_bounds = array<i64: 1, 1>, scalar_prefetch = 0 : i64, scratch_operands = 1 : i64, tpu.core_type = #tpu.core_type<tc>, window_params = [{transform_indices = @transform_0, window_bounds = array<i64: 512, 4>}, {transform_indices = @transform_1, window_bounds = array<i64: 4, 128>}, {pipeline_mode = #tpu.pipeline_mode<synchronous>, transform_indices = @transform_2, window_bounds = array<i64: 1, 128>}, {transform_indices = @transform_3, window_bounds = array<i64: 512, 128>}]} {
    %c0_i32 = arith.constant 0 : i32
    %0 = arith.cmpi eq, %arg1, %c0_i32 : i32
    %1 = arith.extui %0 : i1 to i32
    %c0_i32_0 = arith.constant 0 : i32
    %2 = arith.cmpi ne, %1, %c0_i32_0 : i32
    scf.if %2 {
      %cst_10 = arith.constant 0.000000e+00 : f32
      %12 = vector.broadcast %cst_10 : f32 to vector<512x128xf32>
      %c0_11 = arith.constant 0 : index
      %c0_12 = arith.constant 0 : index
      %13 = vector.load %arg6[%c0_11, %c0_12] : memref<512x128xf32, #tpu.memory_space<vmem>>, vector<512x128xf32>
      tpu.vector_store %arg6[%c0_11, %c0_12], %12 {strides = array<i32>} : memref<512x128xf32, #tpu.memory_space<vmem>>, vector<512x128xf32>,
    } else {
    }
    %c0 = arith.constant 0 : index
    %c0_1 = arith.constant 0 : index
    %3 = vector.load %arg6[%c0, %c0_1] : memref<512x128xf32, #tpu.memory_space<vmem>>, vector<512x128xf32>
    %c0_2 = arith.constant 0 : index
    %c0_3 = arith.constant 0 : index
    %4 = vector.load %arg2[%c0_2, %c0_3] : memref<512x4xbf16, #tpu.memory_space<vmem>>, vector<512x4xbf16>
    %c0_4 = arith.constant 0 : index
    %c0_5 = arith.constant 0 : index
    %5 = vector.load %arg3[%c0_4, %c0_5] : memref<4x128xbf16, #tpu.memory_space<vmem>>, vector<4x128xbf16>
    %cst = arith.constant dense<0.000000e+00> : vector<512x128xf32>
    %6 = tpu.matmul %4, %5, %cst {dimension_numbers = #tpu.dot_dimension_numbers<[1], [0], [0], [1], [0, 0, 1, 1], [], []>} : vector<512x4xbf16>, vector<4x128xbf16>, vector<512x128xf32> -> vector<512x128xf32>
    %7 = arith.addf %3, %6 : vector<512x128xf32>
    %c0_6 = arith.constant 0 : index
    %c0_7 = arith.constant 0 : index
    %8 = vector.load %arg6[%c0_6, %c0_7] : memref<512x128xf32, #tpu.memory_space<vmem>>, vector<512x128xf32>
    tpu.vector_store %arg6[%c0_6, %c0_7], %7 {strides = array<i32>} : memref<512x128xf32, #tpu.memory_space<vmem>>, vector<512x128xf32>,
    %c0_i32_8 = arith.constant 0 : i32
    %9 = arith.cmpi eq, %arg1, %c0_i32_8 : i32
    %10 = arith.extui %9 : i1 to i32
    %c0_i32_9 = arith.constant 0 : i32
    %11 = arith.cmpi ne, %10, %c0_i32_9 : i32
    scf.if %11 {
      %c0_10 = arith.constant 0 : index
      %c0_11 = arith.constant 0 : index
      %12 = vector.load %arg6[%c0_10, %c0_11] : memref<512x128xf32, #tpu.memory_space<vmem>>, vector<512x128xf32>
      %c0_12 = arith.constant 0 : index
      %c0_13 = arith.constant 0 : index
      %13 = vector.load %arg4[%c0_12, %c0_13] : memref<1x128xf32, #tpu.memory_space<vmem>>, vector<1x128xf32>
      %14 = vector.broadcast %13 : vector<1x128xf32> to vector<512x128xf32>
      %15 = arith.addf %12, %14 : vector<512x128xf32>
      %cst_14 = arith.constant 0.000000e+00 : f32
      %16 = vector.broadcast %cst_14 : f32 to vector<512x128xf32>
      %17 = arith.maximumf %15, %16 : vector<512x128xf32>
      %18 = arith.truncf %17 : vector<512x128xf32> to vector<512x128xbf16>
      %c0_15 = arith.constant 0 : index
      %c0_16 = arith.constant 0 : index
      %19 = vector.load %arg5[%c0_15, %c0_16] : memref<512x128xbf16, #tpu.memory_space<vmem>>, vector<512x128xbf16>
      tpu.vector_store %arg5[%c0_15, %c0_16], %18 {strides = array<i32>} : memref<512x128xbf16, #tpu.memory_space<vmem>>, vector<512x128xbf16>,
    } else {
    }
    return
  }
  func.func @transform_0(%arg0: i32, %arg1: i32) -> (i32, i32) {
    %c0_i32 = arith.constant 0 : i32
    return %arg0, %arg1 : i32, i32
  }
  func.func @transform_1(%arg0: i32, %arg1: i32) -> (i32, i32) {
    %c0_i32 = arith.constant 0 : i32
    %c0_i32_0 = arith.constant 0 : i32
    return %arg1, %c0_i32 : i32, i32
  }
  func.func @transform_2(%arg0: i32, %arg1: i32) -> (i32, i32) {
    %c0_i32 = arith.constant 0 : i32
    %c0_i32_0 = arith.constant 0 : i32
    %c0_i32_1 = arith.constant 0 : i32
    return %c0_i32, %c0_i32_0 : i32, i32
  }
  func.func @transform_3(%arg0: i32, %arg1: i32) -> (i32, i32) {
    %c0_i32 = arith.constant 0 : i32
    %c0_i32_0 = arith.constant 0 : i32
    return %arg0, %c0_i32 : i32, i32
  }
}

module attributes {stable_mosaic.version = 11 : i64} {
  func.func @_branch_merge_kernel(%arg0: i32, %arg1: i32, %arg2: i32, %arg3: memref<1x1x64x128xbf16, #tpu.memory_space<vmem>>, %arg4: memref<1x128x128xbf16, #tpu.memory_space<vmem>>, %arg5: memref<1x8x128xbf16, #tpu.memory_space<vmem>>, %arg6: memref<128x128xbf16, #tpu.memory_space<vmem>>, %arg7: memref<1x128xf32, #tpu.memory_space<vmem>>, %arg8: memref<1x64x128xbf16, #tpu.memory_space<vmem>>, %arg9: memref<64x128xf32, #tpu.memory_space<vmem>>) attributes {dimension_semantics = [#tpu.dimension_semantics<parallel>, #tpu.dimension_semantics<parallel>, #tpu.dimension_semantics<arbitrary>], iteration_bounds = array<i64: 2, 1, 4>, scalar_prefetch = 0 : i64, scratch_operands = 1 : i64, tpu.core_type = #tpu.core_type<tc>, window_params = [{transform_indices = @transform_0, window_bounds = array<i64: 1, 1, 64, 128>}, {transform_indices = @transform_1, window_bounds = array<i64: 1, 128, 128>}, {transform_indices = @transform_2, window_bounds = array<i64: 1, 8, 128>}, {pipeline_mode = #tpu.pipeline_mode<synchronous>, transform_indices = @transform_3, window_bounds = array<i64: 128, 128>}, {pipeline_mode = #tpu.pipeline_mode<synchronous>, transform_indices = @transform_4, window_bounds = array<i64: 1, 128>}, {transform_indices = @transform_5, window_bounds = array<i64: 1, 64, 128>}]} {
    %c0_i32 = arith.constant 0 : i32
    %0 = arith.cmpi eq, %arg2, %c0_i32 : i32
    %1 = arith.extui %0 : i1 to i32
    %c0_i32_0 = arith.constant 0 : i32
    %2 = arith.cmpi ne, %1, %c0_i32_0 : i32
    scf.if %2 {
      %cst_12 = arith.constant 0.000000e+00 : f32
      %14 = vector.broadcast %cst_12 : f32 to vector<64x128xf32>
      %c0_13 = arith.constant 0 : index
      %c0_14 = arith.constant 0 : index
      %15 = vector.load %arg9[%c0_13, %c0_14] : memref<64x128xf32, #tpu.memory_space<vmem>>, vector<64x128xf32>
      tpu.vector_store %arg9[%c0_13, %c0_14], %14 {strides = array<i32>} : memref<64x128xf32, #tpu.memory_space<vmem>>, vector<64x128xf32>,
    } else {
    }
    %c0 = arith.constant 0 : index
    %c0_1 = arith.constant 0 : index
    %3 = vector.load %arg9[%c0, %c0_1] : memref<64x128xf32, #tpu.memory_space<vmem>>, vector<64x128xf32>
    %c0_2 = arith.constant 0 : index
    %c0_3 = arith.constant 0 : index
    %c0_4 = arith.constant 0 : index
    %c0_5 = arith.constant 0 : index
    %4 = vector.load %arg3[%c0_2, %c0_3, %c0_4, %c0_5] : memref<1x1x64x128xbf16, #tpu.memory_space<vmem>>, vector<1x1x64x128xbf16>
    %5 = vector.shape_cast %4 : vector<1x1x64x128xbf16> to vector<64x128xbf16>
    %c0_6 = arith.constant 0 : index
    %c0_7 = arith.constant 0 : index
    %c0_8 = arith.constant 0 : index
    %6 = vector.load %arg4[%c0_6, %c0_7, %c0_8] : memref<1x128x128xbf16, #tpu.memory_space<vmem>>, vector<1x128x128xbf16>
    %7 = vector.shape_cast %6 : vector<1x128x128xbf16> to vector<128x128xbf16>
    %cst = arith.constant dense<0.000000e+00> : vector<64x128xf32>
    %8 = tpu.matmul %5, %7, %cst {dimension_numbers = #tpu.dot_dimension_numbers<[1], [0], [0], [1], [0, 0, 1, 1], [], []>} : vector<64x128xbf16>, vector<128x128xbf16>, vector<64x128xf32> -> vector<64x128xf32>
    %9 = arith.addf %3, %8 : vector<64x128xf32>
    %c0_9 = arith.constant 0 : index
    %c0_10 = arith.constant 0 : index
    %10 = vector.load %arg9[%c0_9, %c0_10] : memref<64x128xf32, #tpu.memory_space<vmem>>, vector<64x128xf32>
    tpu.vector_store %arg9[%c0_9, %c0_10], %9 {strides = array<i32>} : memref<64x128xf32, #tpu.memory_space<vmem>>, vector<64x128xf32>,
    %c3_i32 = arith.constant 3 : i32
    %11 = arith.cmpi eq, %arg2, %c3_i32 : i32
    %12 = arith.extui %11 : i1 to i32
    %c0_i32_11 = arith.constant 0 : i32
    %13 = arith.cmpi ne, %12, %c0_i32_11 : i32
    scf.if %13 {
      %c0_12 = arith.constant 0 : index
      %c0_13 = arith.constant 0 : index
      %c0_14 = arith.constant 0 : index
      %14 = vector.load %arg5[%c0_12, %c0_13, %c0_14] : memref<1x8x128xbf16, #tpu.memory_space<vmem>>, vector<1x8x128xbf16>
      %15 = vector.shape_cast %14 : vector<1x8x128xbf16> to vector<8x128xbf16>
      %c0_15 = arith.constant 0 : index
      %c0_16 = arith.constant 0 : index
      %16 = vector.load %arg6[%c0_15, %c0_16] : memref<128x128xbf16, #tpu.memory_space<vmem>>, vector<128x128xbf16>
      %cst_17 = arith.constant dense<0.000000e+00> : vector<8x128xf32>
      %17 = tpu.matmul %15, %16, %cst_17 {dimension_numbers = #tpu.dot_dimension_numbers<[1], [0], [0], [1], [0, 0, 1, 1], [], []>} : vector<8x128xbf16>, vector<128x128xbf16>, vector<8x128xf32> -> vector<8x128xf32>
      %c0_18 = arith.constant 0 : index
      %c0_19 = arith.constant 0 : index
      %18 = vector.load %arg9[%c0_18, %c0_19] : memref<64x128xf32, #tpu.memory_space<vmem>>, vector<64x128xf32>
      %19 = vector.extract_strided_slice %17 {offsets = [0, 0], sizes = [1, 128], strides = [1, 1]} : vector<8x128xf32> to vector<1x128xf32>
      %20 = vector.broadcast %19 : vector<1x128xf32> to vector<64x128xf32>
      %21 = arith.addf %18, %20 : vector<64x128xf32>
      %c0_20 = arith.constant 0 : index
      %c0_21 = arith.constant 0 : index
      %22 = vector.load %arg7[%c0_20, %c0_21] : memref<1x128xf32, #tpu.memory_space<vmem>>, vector<1x128xf32>
      %23 = vector.broadcast %22 : vector<1x128xf32> to vector<64x128xf32>
      %24 = arith.addf %21, %23 : vector<64x128xf32>
      %cst_22 = arith.constant 0.000000e+00 : f32
      %25 = vector.broadcast %cst_22 : f32 to vector<64x128xf32>
      %26 = arith.maximumf %24, %25 : vector<64x128xf32>
      %27 = arith.truncf %26 : vector<64x128xf32> to vector<64x128xbf16>
      %c0_23 = arith.constant 0 : index
      %c0_24 = arith.constant 0 : index
      %c0_25 = arith.constant 0 : index
      %28 = vector.load %arg8[%c0_23, %c0_24, %c0_25] : memref<1x64x128xbf16, #tpu.memory_space<vmem>>, vector<1x64x128xbf16>
      %29 = vector.shape_cast %28 : vector<1x64x128xbf16> to vector<64x128xbf16>
      %30 = vector.shape_cast %27 : vector<64x128xbf16> to vector<1x64x128xbf16>
      tpu.vector_store %arg8[%c0_23, %c0_24, %c0_25], %30 {strides = array<i32>} : memref<1x64x128xbf16, #tpu.memory_space<vmem>>, vector<1x64x128xbf16>,
    } else {
    }
    return
  }
  func.func @transform_0(%arg0: i32, %arg1: i32, %arg2: i32) -> (i32, i32, i32, i32) {
    %c0_i32 = arith.constant 0 : i32
    %c0_i32_0 = arith.constant 0 : i32
    return %arg2, %arg0, %arg1, %c0_i32 : i32, i32, i32, i32
  }
  func.func @transform_1(%arg0: i32, %arg1: i32, %arg2: i32) -> (i32, i32, i32) {
    %c0_i32 = arith.constant 0 : i32
    %c0_i32_0 = arith.constant 0 : i32
    %c0_i32_1 = arith.constant 0 : i32
    return %arg2, %c0_i32, %c0_i32_0 : i32, i32, i32
  }
  func.func @transform_2(%arg0: i32, %arg1: i32, %arg2: i32) -> (i32, i32, i32) {
    %c0_i32 = arith.constant 0 : i32
    %c0_i32_0 = arith.constant 0 : i32
    %c0_i32_1 = arith.constant 0 : i32
    return %arg0, %c0_i32, %c0_i32_0 : i32, i32, i32
  }
  func.func @transform_3(%arg0: i32, %arg1: i32, %arg2: i32) -> (i32, i32) {
    %c0_i32 = arith.constant 0 : i32
    %c0_i32_0 = arith.constant 0 : i32
    %c0_i32_1 = arith.constant 0 : i32
    return %c0_i32, %c0_i32_0 : i32, i32
  }
  func.func @transform_4(%arg0: i32, %arg1: i32, %arg2: i32) -> (i32, i32) {
    %c0_i32 = arith.constant 0 : i32
    %c0_i32_0 = arith.constant 0 : i32
    %c0_i32_1 = arith.constant 0 : i32
    return %c0_i32, %c0_i32_0 : i32, i32
  }
  func.func @transform_5(%arg0: i32, %arg1: i32, %arg2: i32) -> (i32, i32, i32) {
    %c0_i32 = arith.constant 0 : i32
    %c0_i32_0 = arith.constant 0 : i32
    return %arg0, %arg1, %c0_i32 : i32, i32, i32
  }
}

module attributes {stable_mosaic.version = 11 : i64} {
  func.func @kernel(%arg0: i32, %arg1: i32, %arg2: memref<1x8x8x32xbf16, #tpu.memory_space<vmem>>, %arg3: memref<32x128xbf16, #tpu.memory_space<vmem>>, %arg4: memref<3x9x32x128xbf16, #tpu.memory_space<vmem>>, %arg5: memref<4x128xf32, #tpu.memory_space<vmem>>, %arg6: memref<4x1x64x128xbf16, #tpu.memory_space<vmem>>, %arg7: memref<80x80x32xbf16, #tpu.memory_space<vmem>>, %arg8: memref<4x64x128xf32, #tpu.memory_space<vmem>>) attributes {dimension_semantics = [#tpu.dimension_semantics<parallel>, #tpu.dimension_semantics<arbitrary>], iteration_bounds = array<i64: 2, 1>, scalar_prefetch = 0 : i64, scratch_operands = 2 : i64, tpu.core_type = #tpu.core_type<tc>, window_params = [{transform_indices = @transform_0, window_bounds = array<i64: 1, 8, 8, 32>}, {transform_indices = @transform_1, window_bounds = array<i64: 32, 128>}, {transform_indices = @transform_2, window_bounds = array<i64: 3, 9, 32, 128>}, {pipeline_mode = #tpu.pipeline_mode<synchronous>, transform_indices = @transform_3, window_bounds = array<i64: 4, 128>}, {transform_indices = @transform_4, window_bounds = array<i64: 4, 1, 64, 128>}]} {
    %c0_i32 = arith.constant 0 : i32
    %0 = arith.cmpi eq, %arg1, %c0_i32 : i32
    %1 = arith.extui %0 : i1 to i32
    %c0_i32_0 = arith.constant 0 : i32
    %2 = arith.cmpi ne, %1, %c0_i32_0 : i32
    scf.if %2 {
      %cst_45 = arith.constant 0.000000e+00 : f32
      %45 = vector.broadcast %cst_45 : f32 to vector<4x64x128xf32>
      %c0_46 = arith.constant 0 : index
      %c0_47 = arith.constant 0 : index
      %c0_48 = arith.constant 0 : index
      %46 = vector.load %arg8[%c0_46, %c0_47, %c0_48] : memref<4x64x128xf32, #tpu.memory_space<vmem>>, vector<4x64x128xf32>
      tpu.vector_store %arg8[%c0_46, %c0_47, %c0_48], %45 {strides = array<i32>} : memref<4x64x128xf32, #tpu.memory_space<vmem>>, vector<4x64x128xf32>,
      %cst_49 = arith.constant 0.000000e+00 : bf16
      %47 = vector.broadcast %cst_49 : bf16 to vector<80x80x32xbf16>
      %c0_50 = arith.constant 0 : index
      %c0_51 = arith.constant 0 : index
      %c0_52 = arith.constant 0 : index
      %48 = vector.load %arg7[%c0_50, %c0_51, %c0_52] : memref<80x80x32xbf16, #tpu.memory_space<vmem>>, vector<80x80x32xbf16>
      tpu.vector_store %arg7[%c0_50, %c0_51, %c0_52], %47 {strides = array<i32>} : memref<80x80x32xbf16, #tpu.memory_space<vmem>>, vector<80x80x32xbf16>,
    } else {
    }
    %c0 = arith.constant 0 : index
    %c0_1 = arith.constant 0 : index
    %c0_2 = arith.constant 0 : index
    %c0_3 = arith.constant 0 : index
    %3 = vector.load %arg2[%c0, %c0_1, %c0_2, %c0_3] : memref<1x8x8x32xbf16, #tpu.memory_space<vmem>>, vector<1x8x8x32xbf16>
    %4 = vector.shape_cast %3 : vector<1x8x8x32xbf16> to vector<8x8x32xbf16>
    %c36 = arith.constant 36 : index
    %c36_4 = arith.constant 36 : index
    %c0_5 = arith.constant 0 : index
    %5 = vector.load %arg7[%c36, %c36_4, %c0_5] : memref<80x80x32xbf16, #tpu.memory_space<vmem>>, vector<8x8x32xbf16>
    tpu.vector_store %arg7[%c36, %c36_4, %c0_5], %4 {strides = array<i32>} : memref<80x80x32xbf16, #tpu.memory_space<vmem>>, vector<8x8x32xbf16>,
    %6 = vector.shape_cast %4 : vector<8x8x32xbf16> to vector<64x32xbf16>
    %c0_6 = arith.constant 0 : index
    %c0_7 = arith.constant 0 : index
    %c0_8 = arith.constant 0 : index
    %7 = vector.load %arg8[%c0_6, %c0_7, %c0_8] : memref<4x64x128xf32, #tpu.memory_space<vmem>>, vector<1x64x128xf32>
    %8 = vector.shape_cast %7 : vector<1x64x128xf32> to vector<64x128xf32>
    %c0_9 = arith.constant 0 : index
    %c0_10 = arith.constant 0 : index
    %9 = vector.load %arg3[%c0_9, %c0_10] : memref<32x128xbf16, #tpu.memory_space<vmem>>, vector<32x128xbf16>
    %cst = arith.constant dense<0.000000e+00> : vector<64x128xf32>
    %10 = tpu.matmul %6, %9, %cst {dimension_numbers = #tpu.dot_dimension_numbers<[1], [0], [0], [1], [0, 0, 1, 1], [], []>} : vector<64x32xbf16>, vector<32x128xbf16>, vector<64x128xf32> -> vector<64x128xf32>
    %11 = arith.addf %8, %10 : vector<64x128xf32>
    %c0_11 = arith.constant 0 : index
    %c0_12 = arith.constant 0 : index
    %c0_13 = arith.constant 0 : index
    %12 = vector.load %arg8[%c0_11, %c0_12, %c0_13] : memref<4x64x128xf32, #tpu.memory_space<vmem>>, vector<1x64x128xf32>
    %13 = vector.shape_cast %12 : vector<1x64x128xf32> to vector<64x128xf32>
    %14 = vector.shape_cast %11 : vector<64x128xf32> to vector<1x64x128xf32>
    tpu.vector_store %arg8[%c0_11, %c0_12, %c0_13], %14 {strides = array<i32>} : memref<4x64x128xf32, #tpu.memory_space<vmem>>, vector<1x64x128xf32>,
    %c1 = arith.constant 1 : index
    %c0_14 = arith.constant 0 : index
    %c0_15 = arith.constant 0 : index
    %15 = vector.load %arg8[%c1, %c0_14, %c0_15] : memref<4x64x128xf32, #tpu.memory_space<vmem>>, vector<1x64x128xf32>
    %16 = vector.shape_cast %15 : vector<1x64x128xf32> to vector<64x128xf32>
    %c0_16 = arith.constant 0 : index
    %c4 = arith.constant 4 : index
    %c0_17 = arith.constant 0 : index
    %c0_18 = arith.constant 0 : index
    %17 = vector.load %arg4[%c0_16, %c4, %c0_17, %c0_18] : memref<3x9x32x128xbf16, #tpu.memory_space<vmem>>, vector<1x1x32x128xbf16>
    %18 = vector.shape_cast %17 : vector<1x1x32x128xbf16> to vector<32x128xbf16>
    %cst_19 = arith.constant dense<0.000000e+00> : vector<64x128xf32>
    %19 = tpu.matmul %6, %18, %cst_19 {dimension_numbers = #tpu.dot_dimension_numbers<[1], [0], [0], [1], [0, 0, 1, 1], [], []>} : vector<64x32xbf16>, vector<32x128xbf16>, vector<64x128xf32> -> vector<64x128xf32>
    %20 = arith.addf %16, %19 : vector<64x128xf32>
    %c1_20 = arith.constant 1 : index
    %c0_21 = arith.constant 0 : index
    %c0_22 = arith.constant 0 : index
    %21 = vector.load %arg8[%c1_20, %c0_21, %c0_22] : memref<4x64x128xf32, #tpu.memory_space<vmem>>, vector<1x64x128xf32>
    %22 = vector.shape_cast %21 : vector<1x64x128xf32> to vector<64x128xf32>
    %23 = vector.shape_cast %20 : vector<64x128xf32> to vector<1x64x128xf32>
    tpu.vector_store %arg8[%c1_20, %c0_21, %c0_22], %23 {strides = array<i32>} : memref<4x64x128xf32, #tpu.memory_space<vmem>>, vector<1x64x128xf32>,
    %c2 = arith.constant 2 : index
    %c0_23 = arith.constant 0 : index
    %c0_24 = arith.constant 0 : index
    %24 = vector.load %arg8[%c2, %c0_23, %c0_24] : memref<4x64x128xf32, #tpu.memory_space<vmem>>, vector<1x64x128xf32>
    %25 = vector.shape_cast %24 : vector<1x64x128xf32> to vector<64x128xf32>
    %c1_25 = arith.constant 1 : index
    %c4_26 = arith.constant 4 : index
    %c0_27 = arith.constant 0 : index
    %c0_28 = arith.constant 0 : index
    %26 = vector.load %arg4[%c1_25, %c4_26, %c0_27, %c0_28] : memref<3x9x32x128xbf16, #tpu.memory_space<vmem>>, vector<1x1x32x128xbf16>
    %27 = vector.shape_cast %26 : vector<1x1x32x128xbf16> to vector<32x128xbf16>
    %cst_29 = arith.constant dense<0.000000e+00> : vector<64x128xf32>
    %28 = tpu.matmul %6, %27, %cst_29 {dimension_numbers = #tpu.dot_dimension_numbers<[1], [0], [0], [1], [0, 0, 1, 1], [], []>} : vector<64x32xbf16>, vector<32x128xbf16>, vector<64x128xf32> -> vector<64x128xf32>
    %29 = arith.addf %25, %28 : vector<64x128xf32>
    %c2_30 = arith.constant 2 : index
    %c0_31 = arith.constant 0 : index
    %c0_32 = arith.constant 0 : index
    %30 = vector.load %arg8[%c2_30, %c0_31, %c0_32] : memref<4x64x128xf32, #tpu.memory_space<vmem>>, vector<1x64x128xf32>
    %31 = vector.shape_cast %30 : vector<1x64x128xf32> to vector<64x128xf32>
    %32 = vector.shape_cast %29 : vector<64x128xf32> to vector<1x64x128xf32>
    tpu.vector_store %arg8[%c2_30, %c0_31, %c0_32], %32 {strides = array<i32>} : memref<4x64x128xf32, #tpu.memory_space<vmem>>, vector<1x64x128xf32>,
    %c3 = arith.constant 3 : index
    %c0_33 = arith.constant 0 : index
    %c0_34 = arith.constant 0 : index
    %33 = vector.load %arg8[%c3, %c0_33, %c0_34] : memref<4x64x128xf32, #tpu.memory_space<vmem>>, vector<1x64x128xf32>
    %34 = vector.shape_cast %33 : vector<1x64x128xf32> to vector<64x128xf32>
    %c2_35 = arith.constant 2 : index
    %c4_36 = arith.constant 4 : index
    %c0_37 = arith.constant 0 : index
    %c0_38 = arith.constant 0 : index
    %35 = vector.load %arg4[%c2_35, %c4_36, %c0_37, %c0_38] : memref<3x9x32x128xbf16, #tpu.memory_space<vmem>>, vector<1x1x32x128xbf16>
    %36 = vector.shape_cast %35 : vector<1x1x32x128xbf16> to vector<32x128xbf16>
    %cst_39 = arith.constant dense<0.000000e+00> : vector<64x128xf32>
    %37 = tpu.matmul %6, %36, %cst_39 {dimension_numbers = #tpu.dot_dimension_numbers<[1], [0], [0], [1], [0, 0, 1, 1], [], []>} : vector<64x32xbf16>, vector<32x128xbf16>, vector<64x128xf32> -> vector<64x128xf32>
    %38 = arith.addf %34, %37 : vector<64x128xf32>
    %c3_40 = arith.constant 3 : index
    %c0_41 = arith.constant 0 : index
    %c0_42 = arith.constant 0 : index
    %39 = vector.load %arg8[%c3_40, %c0_41, %c0_42] : memref<4x64x128xf32, #tpu.memory_space<vmem>>, vector<1x64x128xf32>
    %40 = vector.shape_cast %39 : vector<1x64x128xf32> to vector<64x128xf32>
    %41 = vector.shape_cast %38 : vector<64x128xf32> to vector<1x64x128xf32>
    tpu.vector_store %arg8[%c3_40, %c0_41, %c0_42], %41 {strides = array<i32>} : memref<4x64x128xf32, #tpu.memory_space<vmem>>, vector<1x64x128xf32>,
    %c0_i32_43 = arith.constant 0 : i32
    %42 = arith.cmpi eq, %arg1, %c0_i32_43 : i32
    %43 = arith.extui %42 : i1 to i32
    %c0_i32_44 = arith.constant 0 : i32
    %44 = arith.cmpi ne, %43, %c0_i32_44 : i32
    scf.if %44 {
      %c0_45 = arith.constant 0 : index
      %c0_46 = arith.constant 0 : index
      %c0_47 = arith.constant 0 : index
      %45 = vector.load %arg8[%c0_45, %c0_46, %c0_47] : memref<4x64x128xf32, #tpu.memory_space<vmem>>, vector<1x64x128xf32>
      %46 = vector.shape_cast %45 : vector<1x64x128xf32> to vector<64x128xf32>
      %c0_48 = arith.constant 0 : index
      %c0_49 = arith.constant 0 : index
      %47 = vector.load %arg5[%c0_48, %c0_49] : memref<4x128xf32, #tpu.memory_space<vmem>>, vector<1x128xf32>
      %48 = vector.shape_cast %47 : vector<1x128xf32> to vector<128xf32>
      %49 = vector.shape_cast %48 : vector<128xf32> to vector<1x128xf32>
      %50 = vector.broadcast %49 : vector<1x128xf32> to vector<64x128xf32>
      %51 = arith.addf %46, %50 : vector<64x128xf32>
      %cst_50 = arith.constant 0.000000e+00 : f32
      %52 = vector.broadcast %cst_50 : f32 to vector<64x128xf32>
      %53 = arith.maximumf %51, %52 : vector<64x128xf32>
      %54 = arith.truncf %53 : vector<64x128xf32> to vector<64x128xbf16>
      %c0_51 = arith.constant 0 : index
      %c0_52 = arith.constant 0 : index
      %c0_53 = arith.constant 0 : index
      %c0_54 = arith.constant 0 : index
      %55 = vector.load %arg6[%c0_51, %c0_52, %c0_53, %c0_54] : memref<4x1x64x128xbf16, #tpu.memory_space<vmem>>, vector<1x1x64x128xbf16>
      %56 = vector.shape_cast %55 : vector<1x1x64x128xbf16> to vector<64x128xbf16>
      %57 = vector.shape_cast %54 : vector<64x128xbf16> to vector<1x1x64x128xbf16>
      tpu.vector_store %arg6[%c0_51, %c0_52, %c0_53, %c0_54], %57 {strides = array<i32>} : memref<4x1x64x128xbf16, #tpu.memory_space<vmem>>, vector<1x1x64x128xbf16>,
      %c1_55 = arith.constant 1 : index
      %c0_56 = arith.constant 0 : index
      %c0_57 = arith.constant 0 : index
      %58 = vector.load %arg8[%c1_55, %c0_56, %c0_57] : memref<4x64x128xf32, #tpu.memory_space<vmem>>, vector<1x64x128xf32>
      %59 = vector.shape_cast %58 : vector<1x64x128xf32> to vector<64x128xf32>
      %c1_58 = arith.constant 1 : index
      %c0_59 = arith.constant 0 : index
      %60 = vector.load %arg5[%c1_58, %c0_59] : memref<4x128xf32, #tpu.memory_space<vmem>>, vector<1x128xf32>
      %61 = vector.shape_cast %60 : vector<1x128xf32> to vector<128xf32>
      %62 = vector.shape_cast %61 : vector<128xf32> to vector<1x128xf32>
      %63 = vector.broadcast %62 : vector<1x128xf32> to vector<64x128xf32>
      %64 = arith.addf %59, %63 : vector<64x128xf32>
      %cst_60 = arith.constant 0.000000e+00 : f32
      %65 = vector.broadcast %cst_60 : f32 to vector<64x128xf32>
      %66 = arith.maximumf %64, %65 : vector<64x128xf32>
      %67 = arith.truncf %66 : vector<64x128xf32> to vector<64x128xbf16>
      %c1_61 = arith.constant 1 : index
      %c0_62 = arith.constant 0 : index
      %c0_63 = arith.constant 0 : index
      %c0_64 = arith.constant 0 : index
      %68 = vector.load %arg6[%c1_61, %c0_62, %c0_63, %c0_64] : memref<4x1x64x128xbf16, #tpu.memory_space<vmem>>, vector<1x1x64x128xbf16>
      %69 = vector.shape_cast %68 : vector<1x1x64x128xbf16> to vector<64x128xbf16>
      %70 = vector.shape_cast %67 : vector<64x128xbf16> to vector<1x1x64x128xbf16>
      tpu.vector_store %arg6[%c1_61, %c0_62, %c0_63, %c0_64], %70 {strides = array<i32>} : memref<4x1x64x128xbf16, #tpu.memory_space<vmem>>, vector<1x1x64x128xbf16>,
      %c2_65 = arith.constant 2 : index
      %c0_66 = arith.constant 0 : index
      %c0_67 = arith.constant 0 : index
      %71 = vector.load %arg8[%c2_65, %c0_66, %c0_67] : memref<4x64x128xf32, #tpu.memory_space<vmem>>, vector<1x64x128xf32>
      %72 = vector.shape_cast %71 : vector<1x64x128xf32> to vector<64x128xf32>
      %c2_68 = arith.constant 2 : index
      %c0_69 = arith.constant 0 : index
      %73 = vector.load %arg5[%c2_68, %c0_69] : memref<4x128xf32, #tpu.memory_space<vmem>>, vector<1x128xf32>
      %74 = vector.shape_cast %73 : vector<1x128xf32> to vector<128xf32>
      %75 = vector.shape_cast %74 : vector<128xf32> to vector<1x128xf32>
      %76 = vector.broadcast %75 : vector<1x128xf32> to vector<64x128xf32>
      %77 = arith.addf %72, %76 : vector<64x128xf32>
      %cst_70 = arith.constant 0.000000e+00 : f32
      %78 = vector.broadcast %cst_70 : f32 to vector<64x128xf32>
      %79 = arith.maximumf %77, %78 : vector<64x128xf32>
      %80 = arith.truncf %79 : vector<64x128xf32> to vector<64x128xbf16>
      %c2_71 = arith.constant 2 : index
      %c0_72 = arith.constant 0 : index
      %c0_73 = arith.constant 0 : index
      %c0_74 = arith.constant 0 : index
      %81 = vector.load %arg6[%c2_71, %c0_72, %c0_73, %c0_74] : memref<4x1x64x128xbf16, #tpu.memory_space<vmem>>, vector<1x1x64x128xbf16>
      %82 = vector.shape_cast %81 : vector<1x1x64x128xbf16> to vector<64x128xbf16>
      %83 = vector.shape_cast %80 : vector<64x128xbf16> to vector<1x1x64x128xbf16>
      tpu.vector_store %arg6[%c2_71, %c0_72, %c0_73, %c0_74], %83 {strides = array<i32>} : memref<4x1x64x128xbf16, #tpu.memory_space<vmem>>, vector<1x1x64x128xbf16>,
      %c3_75 = arith.constant 3 : index
      %c0_76 = arith.constant 0 : index
      %c0_77 = arith.constant 0 : index
      %84 = vector.load %arg8[%c3_75, %c0_76, %c0_77] : memref<4x64x128xf32, #tpu.memory_space<vmem>>, vector<1x64x128xf32>
      %85 = vector.shape_cast %84 : vector<1x64x128xf32> to vector<64x128xf32>
      %c3_78 = arith.constant 3 : index
      %c0_79 = arith.constant 0 : index
      %86 = vector.load %arg5[%c3_78, %c0_79] : memref<4x128xf32, #tpu.memory_space<vmem>>, vector<1x128xf32>
      %87 = vector.shape_cast %86 : vector<1x128xf32> to vector<128xf32>
      %88 = vector.shape_cast %87 : vector<128xf32> to vector<1x128xf32>
      %89 = vector.broadcast %88 : vector<1x128xf32> to vector<64x128xf32>
      %90 = arith.addf %85, %89 : vector<64x128xf32>
      %cst_80 = arith.constant 0.000000e+00 : f32
      %91 = vector.broadcast %cst_80 : f32 to vector<64x128xf32>
      %92 = arith.maximumf %90, %91 : vector<64x128xf32>
      %93 = arith.truncf %92 : vector<64x128xf32> to vector<64x128xbf16>
      %c3_81 = arith.constant 3 : index
      %c0_82 = arith.constant 0 : index
      %c0_83 = arith.constant 0 : index
      %c0_84 = arith.constant 0 : index
      %94 = vector.load %arg6[%c3_81, %c0_82, %c0_83, %c0_84] : memref<4x1x64x128xbf16, #tpu.memory_space<vmem>>, vector<1x1x64x128xbf16>
      %95 = vector.shape_cast %94 : vector<1x1x64x128xbf16> to vector<64x128xbf16>
      %96 = vector.shape_cast %93 : vector<64x128xbf16> to vector<1x1x64x128xbf16>
      tpu.vector_store %arg6[%c3_81, %c0_82, %c0_83, %c0_84], %96 {strides = array<i32>} : memref<4x1x64x128xbf16, #tpu.memory_space<vmem>>, vector<1x1x64x128xbf16>,
    } else {
    }
    return
  }
  func.func @transform_0(%arg0: i32, %arg1: i32) -> (i32, i32, i32, i32) {
    %c0_i32 = arith.constant 0 : i32
    %c0_i32_0 = arith.constant 0 : i32
    %c0_i32_1 = arith.constant 0 : i32
    return %arg0, %c0_i32, %c0_i32_0, %arg1 : i32, i32, i32, i32
  }
  func.func @transform_1(%arg0: i32, %arg1: i32) -> (i32, i32) {
    %c0_i32 = arith.constant 0 : i32
    %c0_i32_0 = arith.constant 0 : i32
    return %arg1, %c0_i32 : i32, i32
  }
  func.func @transform_2(%arg0: i32, %arg1: i32) -> (i32, i32, i32, i32) {
    %c0_i32 = arith.constant 0 : i32
    %c0_i32_0 = arith.constant 0 : i32
    %c0_i32_1 = arith.constant 0 : i32
    %c0_i32_2 = arith.constant 0 : i32
    return %c0_i32, %c0_i32_0, %arg1, %c0_i32_1 : i32, i32, i32, i32
  }
  func.func @transform_3(%arg0: i32, %arg1: i32) -> (i32, i32) {
    %c0_i32 = arith.constant 0 : i32
    %c0_i32_0 = arith.constant 0 : i32
    %c0_i32_1 = arith.constant 0 : i32
    return %c0_i32, %c0_i32_0 : i32, i32
  }
  func.func @transform_4(%arg0: i32, %arg1: i32) -> (i32, i32, i32, i32) {
    %c0_i32 = arith.constant 0 : i32
    %c0_i32_0 = arith.constant 0 : i32
    %c0_i32_1 = arith.constant 0 : i32
    %c0_i32_2 = arith.constant 0 : i32
    return %c0_i32, %arg0, %c0_i32_0, %c0_i32_1 : i32, i32, i32, i32
  }
}

module attributes {stable_mosaic.version = 11 : i64} {
  func.func @kernel(%arg0: i32, %arg1: i32, %arg2: memref<1x8x18x128xbf16, #tpu.memory_space<vmem>>, %arg3: memref<1x2x18x128xbf16, #tpu.memory_space<vmem>>, %arg4: memref<1x8x18x128xbf16, #tpu.memory_space<vmem>>, %arg5: memref<1x2x18x128xbf16, #tpu.memory_space<vmem>>, %arg6: memref<9x128x256xbf16, #tpu.memory_space<vmem>>, %arg7: memref<9x128x256xbf16, #tpu.memory_space<vmem>>, %arg8: memref<1x256xf32, #tpu.memory_space<vmem>>, %arg9: memref<1x128x256xbf16, #tpu.memory_space<vmem>>) attributes {dimension_semantics = [#tpu.dimension_semantics<parallel>, #tpu.dimension_semantics<parallel>], iteration_bounds = array<i64: 2, 2>, scalar_prefetch = 0 : i64, scratch_operands = 0 : i64, tpu.core_type = #tpu.core_type<tc>, window_params = [{transform_indices = @transform_0, window_bounds = array<i64: 1, 8, 18, 128>}, {transform_indices = @transform_1, window_bounds = array<i64: 1, 2, 18, 128>}, {transform_indices = @transform_2, window_bounds = array<i64: 1, 8, 18, 128>}, {transform_indices = @transform_3, window_bounds = array<i64: 1, 2, 18, 128>}, {pipeline_mode = #tpu.pipeline_mode<synchronous>, transform_indices = @transform_4, window_bounds = array<i64: 9, 128, 256>}, {pipeline_mode = #tpu.pipeline_mode<synchronous>, transform_indices = @transform_5, window_bounds = array<i64: 9, 128, 256>}, {pipeline_mode = #tpu.pipeline_mode<synchronous>, transform_indices = @transform_6, window_bounds = array<i64: 1, 256>}, {transform_indices = @transform_7, window_bounds = array<i64: 1, 128, 256>}]} {
    %cst = arith.constant 0.000000e+00 : f32
    %0 = vector.broadcast %cst : f32 to vector<128x256xf32>
    %c0 = arith.constant 0 : index
    %c0_0 = arith.constant 0 : index
    %c0_1 = arith.constant 0 : index
    %c0_2 = arith.constant 0 : index
    %1 = vector.load %arg2[%c0, %c0_0, %c0_1, %c0_2] : memref<1x8x18x128xbf16, #tpu.memory_space<vmem>>, vector<1x8x18x128xbf16>
    %2 = vector.shape_cast %1 : vector<1x8x18x128xbf16> to vector<8x18x128xbf16>
    %c0_3 = arith.constant 0 : index
    %c0_4 = arith.constant 0 : index
    %c0_5 = arith.constant 0 : index
    %c0_6 = arith.constant 0 : index
    %3 = vector.load %arg3[%c0_3, %c0_4, %c0_5, %c0_6] : memref<1x2x18x128xbf16, #tpu.memory_space<vmem>>, vector<1x2x18x128xbf16>
    %4 = vector.shape_cast %3 : vector<1x2x18x128xbf16> to vector<2x18x128xbf16>
    %5 = tpu.concatenate %2, %4 in 0 : vector<8x18x128xbf16>, vector<2x18x128xbf16> -> vector<10x18x128xbf16>
    %6 = vector.extract_strided_slice %5 {offsets = [0, 0, 0], sizes = [8, 16, 128], strides = [1, 1, 1]} : vector<10x18x128xbf16> to vector<8x16x128xbf16>
    %7 = vector.shape_cast %6 : vector<8x16x128xbf16> to vector<128x128xbf16>
    %c0_7 = arith.constant 0 : index
    %c0_8 = arith.constant 0 : index
    %c0_9 = arith.constant 0 : index
    %8 = vector.load %arg6[%c0_7, %c0_8, %c0_9] : memref<9x128x256xbf16, #tpu.memory_space<vmem>>, vector<1x128x256xbf16>
    %9 = vector.shape_cast %8 : vector<1x128x256xbf16> to vector<128x256xbf16>
    %cst_10 = arith.constant dense<0.000000e+00> : vector<128x256xf32>
    %10 = tpu.matmul %7, %9, %cst_10 {dimension_numbers = #tpu.dot_dimension_numbers<[1], [0], [0], [1], [0, 0, 1, 1], [], []>} : vector<128x128xbf16>, vector<128x256xbf16>, vector<128x256xf32> -> vector<128x256xf32>
    %11 = arith.addf %0, %10 : vector<128x256xf32>
    %12 = vector.extract_strided_slice %5 {offsets = [0, 1, 0], sizes = [8, 16, 128], strides = [1, 1, 1]} : vector<10x18x128xbf16> to vector<8x16x128xbf16>
    %13 = vector.shape_cast %12 : vector<8x16x128xbf16> to vector<128x128xbf16>
    %c1 = arith.constant 1 : index
    %c0_11 = arith.constant 0 : index
    %c0_12 = arith.constant 0 : index
    %14 = vector.load %arg6[%c1, %c0_11, %c0_12] : memref<9x128x256xbf16, #tpu.memory_space<vmem>>, vector<1x128x256xbf16>
    %15 = vector.shape_cast %14 : vector<1x128x256xbf16> to vector<128x256xbf16>
    %cst_13 = arith.constant dense<0.000000e+00> : vector<128x256xf32>
    %16 = tpu.matmul %13, %15, %cst_13 {dimension_numbers = #tpu.dot_dimension_numbers<[1], [0], [0], [1], [0, 0, 1, 1], [], []>} : vector<128x128xbf16>, vector<128x256xbf16>, vector<128x256xf32> -> vector<128x256xf32>
    %17 = arith.addf %11, %16 : vector<128x256xf32>
    %18 = vector.extract_strided_slice %5 {offsets = [0, 2, 0], sizes = [8, 16, 128], strides = [1, 1, 1]} : vector<10x18x128xbf16> to vector<8x16x128xbf16>
    %19 = vector.shape_cast %18 : vector<8x16x128xbf16> to vector<128x128xbf16>
    %c2 = arith.constant 2 : index
    %c0_14 = arith.constant 0 : index
    %c0_15 = arith.constant 0 : index
    %20 = vector.load %arg6[%c2, %c0_14, %c0_15] : memref<9x128x256xbf16, #tpu.memory_space<vmem>>, vector<1x128x256xbf16>
    %21 = vector.shape_cast %20 : vector<1x128x256xbf16> to vector<128x256xbf16>
    %cst_16 = arith.constant dense<0.000000e+00> : vector<128x256xf32>
    %22 = tpu.matmul %19, %21, %cst_16 {dimension_numbers = #tpu.dot_dimension_numbers<[1], [0], [0], [1], [0, 0, 1, 1], [], []>} : vector<128x128xbf16>, vector<128x256xbf16>, vector<128x256xf32> -> vector<128x256xf32>
    %23 = arith.addf %17, %22 : vector<128x256xf32>
    %24 = vector.extract_strided_slice %5 {offsets = [1, 0, 0], sizes = [8, 16, 128], strides = [1, 1, 1]} : vector<10x18x128xbf16> to vector<8x16x128xbf16>
    %25 = vector.shape_cast %24 : vector<8x16x128xbf16> to vector<128x128xbf16>
    %c3 = arith.constant 3 : index
    %c0_17 = arith.constant 0 : index
    %c0_18 = arith.constant 0 : index
    %26 = vector.load %arg6[%c3, %c0_17, %c0_18] : memref<9x128x256xbf16, #tpu.memory_space<vmem>>, vector<1x128x256xbf16>
    %27 = vector.shape_cast %26 : vector<1x128x256xbf16> to vector<128x256xbf16>
    %cst_19 = arith.constant dense<0.000000e+00> : vector<128x256xf32>
    %28 = tpu.matmul %25, %27, %cst_19 {dimension_numbers = #tpu.dot_dimension_numbers<[1], [0], [0], [1], [0, 0, 1, 1], [], []>} : vector<128x128xbf16>, vector<128x256xbf16>, vector<128x256xf32> -> vector<128x256xf32>
    %29 = arith.addf %23, %28 : vector<128x256xf32>
    %30 = vector.extract_strided_slice %5 {offsets = [1, 1, 0], sizes = [8, 16, 128], strides = [1, 1, 1]} : vector<10x18x128xbf16> to vector<8x16x128xbf16>
    %31 = vector.shape_cast %30 : vector<8x16x128xbf16> to vector<128x128xbf16>
    %c4 = arith.constant 4 : index
    %c0_20 = arith.constant 0 : index
    %c0_21 = arith.constant 0 : index
    %32 = vector.load %arg6[%c4, %c0_20, %c0_21] : memref<9x128x256xbf16, #tpu.memory_space<vmem>>, vector<1x128x256xbf16>
    %33 = vector.shape_cast %32 : vector<1x128x256xbf16> to vector<128x256xbf16>
    %cst_22 = arith.constant dense<0.000000e+00> : vector<128x256xf32>
    %34 = tpu.matmul %31, %33, %cst_22 {dimension_numbers = #tpu.dot_dimension_numbers<[1], [0], [0], [1], [0, 0, 1, 1], [], []>} : vector<128x128xbf16>, vector<128x256xbf16>, vector<128x256xf32> -> vector<128x256xf32>
    %35 = arith.addf %29, %34 : vector<128x256xf32>
    %36 = vector.extract_strided_slice %5 {offsets = [1, 2, 0], sizes = [8, 16, 128], strides = [1, 1, 1]} : vector<10x18x128xbf16> to vector<8x16x128xbf16>
    %37 = vector.shape_cast %36 : vector<8x16x128xbf16> to vector<128x128xbf16>
    %c5 = arith.constant 5 : index
    %c0_23 = arith.constant 0 : index
    %c0_24 = arith.constant 0 : index
    %38 = vector.load %arg6[%c5, %c0_23, %c0_24] : memref<9x128x256xbf16, #tpu.memory_space<vmem>>, vector<1x128x256xbf16>
    %39 = vector.shape_cast %38 : vector<1x128x256xbf16> to vector<128x256xbf16>
    %cst_25 = arith.constant dense<0.000000e+00> : vector<128x256xf32>
    %40 = tpu.matmul %37, %39, %cst_25 {dimension_numbers = #tpu.dot_dimension_numbers<[1], [0], [0], [1], [0, 0, 1, 1], [], []>} : vector<128x128xbf16>, vector<128x256xbf16>, vector<128x256xf32> -> vector<128x256xf32>
    %41 = arith.addf %35, %40 : vector<128x256xf32>
    %42 = vector.extract_strided_slice %5 {offsets = [2, 0, 0], sizes = [8, 16, 128], strides = [1, 1, 1]} : vector<10x18x128xbf16> to vector<8x16x128xbf16>
    %43 = vector.shape_cast %42 : vector<8x16x128xbf16> to vector<128x128xbf16>
    %c6 = arith.constant 6 : index
    %c0_26 = arith.constant 0 : index
    %c0_27 = arith.constant 0 : index
    %44 = vector.load %arg6[%c6, %c0_26, %c0_27] : memref<9x128x256xbf16, #tpu.memory_space<vmem>>, vector<1x128x256xbf16>
    %45 = vector.shape_cast %44 : vector<1x128x256xbf16> to vector<128x256xbf16>
    %cst_28 = arith.constant dense<0.000000e+00> : vector<128x256xf32>
    %46 = tpu.matmul %43, %45, %cst_28 {dimension_numbers = #tpu.dot_dimension_numbers<[1], [0], [0], [1], [0, 0, 1, 1], [], []>} : vector<128x128xbf16>, vector<128x256xbf16>, vector<128x256xf32> -> vector<128x256xf32>
    %47 = arith.addf %41, %46 : vector<128x256xf32>
    %48 = vector.extract_strided_slice %5 {offsets = [2, 1, 0], sizes = [8, 16, 128], strides = [1, 1, 1]} : vector<10x18x128xbf16> to vector<8x16x128xbf16>
    %49 = vector.shape_cast %48 : vector<8x16x128xbf16> to vector<128x128xbf16>
    %c7 = arith.constant 7 : index
    %c0_29 = arith.constant 0 : index
    %c0_30 = arith.constant 0 : index
    %50 = vector.load %arg6[%c7, %c0_29, %c0_30] : memref<9x128x256xbf16, #tpu.memory_space<vmem>>, vector<1x128x256xbf16>
    %51 = vector.shape_cast %50 : vector<1x128x256xbf16> to vector<128x256xbf16>
    %cst_31 = arith.constant dense<0.000000e+00> : vector<128x256xf32>
    %52 = tpu.matmul %49, %51, %cst_31 {dimension_numbers = #tpu.dot_dimension_numbers<[1], [0], [0], [1], [0, 0, 1, 1], [], []>} : vector<128x128xbf16>, vector<128x256xbf16>, vector<128x256xf32> -> vector<128x256xf32>
    %53 = arith.addf %47, %52 : vector<128x256xf32>
    %54 = vector.extract_strided_slice %5 {offsets = [2, 2, 0], sizes = [8, 16, 128], strides = [1, 1, 1]} : vector<10x18x128xbf16> to vector<8x16x128xbf16>
    %55 = vector.shape_cast %54 : vector<8x16x128xbf16> to vector<128x128xbf16>
    %c8 = arith.constant 8 : index
    %c0_32 = arith.constant 0 : index
    %c0_33 = arith.constant 0 : index
    %56 = vector.load %arg6[%c8, %c0_32, %c0_33] : memref<9x128x256xbf16, #tpu.memory_space<vmem>>, vector<1x128x256xbf16>
    %57 = vector.shape_cast %56 : vector<1x128x256xbf16> to vector<128x256xbf16>
    %cst_34 = arith.constant dense<0.000000e+00> : vector<128x256xf32>
    %58 = tpu.matmul %55, %57, %cst_34 {dimension_numbers = #tpu.dot_dimension_numbers<[1], [0], [0], [1], [0, 0, 1, 1], [], []>} : vector<128x128xbf16>, vector<128x256xbf16>, vector<128x256xf32> -> vector<128x256xf32>
    %59 = arith.addf %53, %58 : vector<128x256xf32>
    %c0_35 = arith.constant 0 : index
    %c0_36 = arith.constant 0 : index
    %c0_37 = arith.constant 0 : index
    %c0_38 = arith.constant 0 : index
    %60 = vector.load %arg4[%c0_35, %c0_36, %c0_37, %c0_38] : memref<1x8x18x128xbf16, #tpu.memory_space<vmem>>, vector<1x8x18x128xbf16>
    %61 = vector.shape_cast %60 : vector<1x8x18x128xbf16> to vector<8x18x128xbf16>
    %c0_39 = arith.constant 0 : index
    %c0_40 = arith.constant 0 : index
    %c0_41 = arith.constant 0 : index
    %c0_42 = arith.constant 0 : index
    %62 = vector.load %arg5[%c0_39, %c0_40, %c0_41, %c0_42] : memref<1x2x18x128xbf16, #tpu.memory_space<vmem>>, vector<1x2x18x128xbf16>
    %63 = vector.shape_cast %62 : vector<1x2x18x128xbf16> to vector<2x18x128xbf16>
    %64 = tpu.concatenate %61, %63 in 0 : vector<8x18x128xbf16>, vector<2x18x128xbf16> -> vector<10x18x128xbf16>
    %65 = vector.extract_strided_slice %64 {offsets = [0, 0, 0], sizes = [8, 16, 128], strides = [1, 1, 1]} : vector<10x18x128xbf16> to vector<8x16x128xbf16>
    %66 = vector.shape_cast %65 : vector<8x16x128xbf16> to vector<128x128xbf16>
    %c0_43 = arith.constant 0 : index
    %c0_44 = arith.constant 0 : index
    %c0_45 = arith.constant 0 : index
    %67 = vector.load %arg7[%c0_43, %c0_44, %c0_45] : memref<9x128x256xbf16, #tpu.memory_space<vmem>>, vector<1x128x256xbf16>
    %68 = vector.shape_cast %67 : vector<1x128x256xbf16> to vector<128x256xbf16>
    %cst_46 = arith.constant dense<0.000000e+00> : vector<128x256xf32>
    %69 = tpu.matmul %66, %68, %cst_46 {dimension_numbers = #tpu.dot_dimension_numbers<[1], [0], [0], [1], [0, 0, 1, 1], [], []>} : vector<128x128xbf16>, vector<128x256xbf16>, vector<128x256xf32> -> vector<128x256xf32>
    %70 = arith.addf %59, %69 : vector<128x256xf32>
    %71 = vector.extract_strided_slice %64 {offsets = [0, 1, 0], sizes = [8, 16, 128], strides = [1, 1, 1]} : vector<10x18x128xbf16> to vector<8x16x128xbf16>
    %72 = vector.shape_cast %71 : vector<8x16x128xbf16> to vector<128x128xbf16>
    %c1_47 = arith.constant 1 : index
    %c0_48 = arith.constant 0 : index
    %c0_49 = arith.constant 0 : index
    %73 = vector.load %arg7[%c1_47, %c0_48, %c0_49] : memref<9x128x256xbf16, #tpu.memory_space<vmem>>, vector<1x128x256xbf16>
    %74 = vector.shape_cast %73 : vector<1x128x256xbf16> to vector<128x256xbf16>
    %cst_50 = arith.constant dense<0.000000e+00> : vector<128x256xf32>
    %75 = tpu.matmul %72, %74, %cst_50 {dimension_numbers = #tpu.dot_dimension_numbers<[1], [0], [0], [1], [0, 0, 1, 1], [], []>} : vector<128x128xbf16>, vector<128x256xbf16>, vector<128x256xf32> -> vector<128x256xf32>
    %76 = arith.addf %70, %75 : vector<128x256xf32>
    %77 = vector.extract_strided_slice %64 {offsets = [0, 2, 0], sizes = [8, 16, 128], strides = [1, 1, 1]} : vector<10x18x128xbf16> to vector<8x16x128xbf16>
    %78 = vector.shape_cast %77 : vector<8x16x128xbf16> to vector<128x128xbf16>
    %c2_51 = arith.constant 2 : index
    %c0_52 = arith.constant 0 : index
    %c0_53 = arith.constant 0 : index
    %79 = vector.load %arg7[%c2_51, %c0_52, %c0_53] : memref<9x128x256xbf16, #tpu.memory_space<vmem>>, vector<1x128x256xbf16>
    %80 = vector.shape_cast %79 : vector<1x128x256xbf16> to vector<128x256xbf16>
    %cst_54 = arith.constant dense<0.000000e+00> : vector<128x256xf32>
    %81 = tpu.matmul %78, %80, %cst_54 {dimension_numbers = #tpu.dot_dimension_numbers<[1], [0], [0], [1], [0, 0, 1, 1], [], []>} : vector<128x128xbf16>, vector<128x256xbf16>, vector<128x256xf32> -> vector<128x256xf32>
    %82 = arith.addf %76, %81 : vector<128x256xf32>
    %83 = vector.extract_strided_slice %64 {offsets = [1, 0, 0], sizes = [8, 16, 128], strides = [1, 1, 1]} : vector<10x18x128xbf16> to vector<8x16x128xbf16>
    %84 = vector.shape_cast %83 : vector<8x16x128xbf16> to vector<128x128xbf16>
    %c3_55 = arith.constant 3 : index
    %c0_56 = arith.constant 0 : index
    %c0_57 = arith.constant 0 : index
    %85 = vector.load %arg7[%c3_55, %c0_56, %c0_57] : memref<9x128x256xbf16, #tpu.memory_space<vmem>>, vector<1x128x256xbf16>
    %86 = vector.shape_cast %85 : vector<1x128x256xbf16> to vector<128x256xbf16>
    %cst_58 = arith.constant dense<0.000000e+00> : vector<128x256xf32>
    %87 = tpu.matmul %84, %86, %cst_58 {dimension_numbers = #tpu.dot_dimension_numbers<[1], [0], [0], [1], [0, 0, 1, 1], [], []>} : vector<128x128xbf16>, vector<128x256xbf16>, vector<128x256xf32> -> vector<128x256xf32>
    %88 = arith.addf %82, %87 : vector<128x256xf32>
    %89 = vector.extract_strided_slice %64 {offsets = [1, 1, 0], sizes = [8, 16, 128], strides = [1, 1, 1]} : vector<10x18x128xbf16> to vector<8x16x128xbf16>
    %90 = vector.shape_cast %89 : vector<8x16x128xbf16> to vector<128x128xbf16>
    %c4_59 = arith.constant 4 : index
    %c0_60 = arith.constant 0 : index
    %c0_61 = arith.constant 0 : index
    %91 = vector.load %arg7[%c4_59, %c0_60, %c0_61] : memref<9x128x256xbf16, #tpu.memory_space<vmem>>, vector<1x128x256xbf16>
    %92 = vector.shape_cast %91 : vector<1x128x256xbf16> to vector<128x256xbf16>
    %cst_62 = arith.constant dense<0.000000e+00> : vector<128x256xf32>
    %93 = tpu.matmul %90, %92, %cst_62 {dimension_numbers = #tpu.dot_dimension_numbers<[1], [0], [0], [1], [0, 0, 1, 1], [], []>} : vector<128x128xbf16>, vector<128x256xbf16>, vector<128x256xf32> -> vector<128x256xf32>
    %94 = arith.addf %88, %93 : vector<128x256xf32>
    %95 = vector.extract_strided_slice %64 {offsets = [1, 2, 0], sizes = [8, 16, 128], strides = [1, 1, 1]} : vector<10x18x128xbf16> to vector<8x16x128xbf16>
    %96 = vector.shape_cast %95 : vector<8x16x128xbf16> to vector<128x128xbf16>
    %c5_63 = arith.constant 5 : index
    %c0_64 = arith.constant 0 : index
    %c0_65 = arith.constant 0 : index
    %97 = vector.load %arg7[%c5_63, %c0_64, %c0_65] : memref<9x128x256xbf16, #tpu.memory_space<vmem>>, vector<1x128x256xbf16>
    %98 = vector.shape_cast %97 : vector<1x128x256xbf16> to vector<128x256xbf16>
    %cst_66 = arith.constant dense<0.000000e+00> : vector<128x256xf32>
    %99 = tpu.matmul %96, %98, %cst_66 {dimension_numbers = #tpu.dot_dimension_numbers<[1], [0], [0], [1], [0, 0, 1, 1], [], []>} : vector<128x128xbf16>, vector<128x256xbf16>, vector<128x256xf32> -> vector<128x256xf32>
    %100 = arith.addf %94, %99 : vector<128x256xf32>
    %101 = vector.extract_strided_slice %64 {offsets = [2, 0, 0], sizes = [8, 16, 128], strides = [1, 1, 1]} : vector<10x18x128xbf16> to vector<8x16x128xbf16>
    %102 = vector.shape_cast %101 : vector<8x16x128xbf16> to vector<128x128xbf16>
    %c6_67 = arith.constant 6 : index
    %c0_68 = arith.constant 0 : index
    %c0_69 = arith.constant 0 : index
    %103 = vector.load %arg7[%c6_67, %c0_68, %c0_69] : memref<9x128x256xbf16, #tpu.memory_space<vmem>>, vector<1x128x256xbf16>
    %104 = vector.shape_cast %103 : vector<1x128x256xbf16> to vector<128x256xbf16>
    %cst_70 = arith.constant dense<0.000000e+00> : vector<128x256xf32>
    %105 = tpu.matmul %102, %104, %cst_70 {dimension_numbers = #tpu.dot_dimension_numbers<[1], [0], [0], [1], [0, 0, 1, 1], [], []>} : vector<128x128xbf16>, vector<128x256xbf16>, vector<128x256xf32> -> vector<128x256xf32>
    %106 = arith.addf %100, %105 : vector<128x256xf32>
    %107 = vector.extract_strided_slice %64 {offsets = [2, 1, 0], sizes = [8, 16, 128], strides = [1, 1, 1]} : vector<10x18x128xbf16> to vector<8x16x128xbf16>
    %108 = vector.shape_cast %107 : vector<8x16x128xbf16> to vector<128x128xbf16>
    %c7_71 = arith.constant 7 : index
    %c0_72 = arith.constant 0 : index
    %c0_73 = arith.constant 0 : index
    %109 = vector.load %arg7[%c7_71, %c0_72, %c0_73] : memref<9x128x256xbf16, #tpu.memory_space<vmem>>, vector<1x128x256xbf16>
    %110 = vector.shape_cast %109 : vector<1x128x256xbf16> to vector<128x256xbf16>
    %cst_74 = arith.constant dense<0.000000e+00> : vector<128x256xf32>
    %111 = tpu.matmul %108, %110, %cst_74 {dimension_numbers = #tpu.dot_dimension_numbers<[1], [0], [0], [1], [0, 0, 1, 1], [], []>} : vector<128x128xbf16>, vector<128x256xbf16>, vector<128x256xf32> -> vector<128x256xf32>
    %112 = arith.addf %106, %111 : vector<128x256xf32>
    %113 = vector.extract_strided_slice %64 {offsets = [2, 2, 0], sizes = [8, 16, 128], strides = [1, 1, 1]} : vector<10x18x128xbf16> to vector<8x16x128xbf16>
    %114 = vector.shape_cast %113 : vector<8x16x128xbf16> to vector<128x128xbf16>
    %c8_75 = arith.constant 8 : index
    %c0_76 = arith.constant 0 : index
    %c0_77 = arith.constant 0 : index
    %115 = vector.load %arg7[%c8_75, %c0_76, %c0_77] : memref<9x128x256xbf16, #tpu.memory_space<vmem>>, vector<1x128x256xbf16>
    %116 = vector.shape_cast %115 : vector<1x128x256xbf16> to vector<128x256xbf16>
    %cst_78 = arith.constant dense<0.000000e+00> : vector<128x256xf32>
    %117 = tpu.matmul %114, %116, %cst_78 {dimension_numbers = #tpu.dot_dimension_numbers<[1], [0], [0], [1], [0, 0, 1, 1], [], []>} : vector<128x128xbf16>, vector<128x256xbf16>, vector<128x256xf32> -> vector<128x256xf32>
    %118 = arith.addf %112, %117 : vector<128x256xf32>
    %c0_79 = arith.constant 0 : index
    %c0_80 = arith.constant 0 : index
    %119 = vector.load %arg8[%c0_79, %c0_80] : memref<1x256xf32, #tpu.memory_space<vmem>>, vector<1x256xf32>
    %120 = vector.broadcast %119 : vector<1x256xf32> to vector<128x256xf32>
    %121 = arith.addf %118, %120 : vector<128x256xf32>
    %cst_81 = arith.constant 0.000000e+00 : f32
    %122 = vector.broadcast %cst_81 : f32 to vector<128x256xf32>
    %123 = arith.maximumf %121, %122 : vector<128x256xf32>
    %124 = arith.truncf %123 : vector<128x256xf32> to vector<128x256xbf16>
    %c0_82 = arith.constant 0 : index
    %c0_83 = arith.constant 0 : index
    %c0_84 = arith.constant 0 : index
    %125 = vector.load %arg9[%c0_82, %c0_83, %c0_84] : memref<1x128x256xbf16, #tpu.memory_space<vmem>>, vector<1x128x256xbf16>
    %126 = vector.shape_cast %125 : vector<1x128x256xbf16> to vector<128x256xbf16>
    %127 = vector.shape_cast %124 : vector<128x256xbf16> to vector<1x128x256xbf16>
    tpu.vector_store %arg9[%c0_82, %c0_83, %c0_84], %127 {strides = array<i32>} : memref<1x128x256xbf16, #tpu.memory_space<vmem>>, vector<1x128x256xbf16>,
    return
  }
  func.func @transform_0(%arg0: i32, %arg1: i32) -> (i32, i32, i32, i32) {
    %c0_i32 = arith.constant 0 : i32
    %c0_i32_0 = arith.constant 0 : i32
    %c0_i32_1 = arith.constant 0 : i32
    return %arg0, %arg1, %c0_i32, %c0_i32_0 : i32, i32, i32, i32
  }
  func.func @transform_1(%arg0: i32, %arg1: i32) -> (i32, i32, i32, i32) {
    %c1_i32 = arith.constant 1 : i32
    %0 = arith.addi %arg1, %c1_i32 : i32
    %c4_i32 = arith.constant 4 : i32
    %1 = arith.muli %0, %c4_i32 : i32
    %c0_i32 = arith.constant 0 : i32
    %c0_i32_0 = arith.constant 0 : i32
    %c0_i32_1 = arith.constant 0 : i32
    return %arg0, %1, %c0_i32, %c0_i32_0 : i32, i32, i32, i32
  }
  func.func @transform_2(%arg0: i32, %arg1: i32) -> (i32, i32, i32, i32) {
    %c0_i32 = arith.constant 0 : i32
    %c0_i32_0 = arith.constant 0 : i32
    %c0_i32_1 = arith.constant 0 : i32
    return %arg0, %arg1, %c0_i32, %c0_i32_0 : i32, i32, i32, i32
  }
  func.func @transform_3(%arg0: i32, %arg1: i32) -> (i32, i32, i32, i32) {
    %c1_i32 = arith.constant 1 : i32
    %0 = arith.addi %arg1, %c1_i32 : i32
    %c4_i32 = arith.constant 4 : i32
    %1 = arith.muli %0, %c4_i32 : i32
    %c0_i32 = arith.constant 0 : i32
    %c0_i32_0 = arith.constant 0 : i32
    %c0_i32_1 = arith.constant 0 : i32
    return %arg0, %1, %c0_i32, %c0_i32_0 : i32, i32, i32, i32
  }
  func.func @transform_4(%arg0: i32, %arg1: i32) -> (i32, i32, i32) {
    %c0_i32 = arith.constant 0 : i32
    %c0_i32_0 = arith.constant 0 : i32
    %c0_i32_1 = arith.constant 0 : i32
    %c0_i32_2 = arith.constant 0 : i32
    return %c0_i32, %c0_i32_0, %c0_i32_1 : i32, i32, i32
  }
  func.func @transform_5(%arg0: i32, %arg1: i32) -> (i32, i32, i32) {
    %c0_i32 = arith.constant 0 : i32
    %c0_i32_0 = arith.constant 0 : i32
    %c0_i32_1 = arith.constant 0 : i32
    %c0_i32_2 = arith.constant 0 : i32
    return %c0_i32, %c0_i32_0, %c0_i32_1 : i32, i32, i32
  }
  func.func @transform_6(%arg0: i32, %arg1: i32) -> (i32, i32) {
    %c0_i32 = arith.constant 0 : i32
    %c0_i32_0 = arith.constant 0 : i32
    %c0_i32_1 = arith.constant 0 : i32
    return %c0_i32, %c0_i32_0 : i32, i32
  }
  func.func @transform_7(%arg0: i32, %arg1: i32) -> (i32, i32, i32) {
    %c0_i32 = arith.constant 0 : i32
    %c0_i32_0 = arith.constant 0 : i32
    return %arg0, %arg1, %c0_i32 : i32, i32, i32
  }
}

module attributes {stable_mosaic.version = 11 : i64} {
  func.func @kernel(%arg0: i32, %arg1: i32, %arg2: memref<1x8x18x256xbf16, #tpu.memory_space<vmem>>, %arg3: memref<1x2x18x256xbf16, #tpu.memory_space<vmem>>, %arg4: memref<9x256x256xbf16, #tpu.memory_space<vmem>>, %arg5: memref<1x256xf32, #tpu.memory_space<vmem>>, %arg6: memref<1x128x256xbf16, #tpu.memory_space<vmem>>) attributes {dimension_semantics = [#tpu.dimension_semantics<parallel>, #tpu.dimension_semantics<parallel>], iteration_bounds = array<i64: 2, 2>, scalar_prefetch = 0 : i64, scratch_operands = 0 : i64, tpu.core_type = #tpu.core_type<tc>, window_params = [{transform_indices = @transform_0, window_bounds = array<i64: 1, 8, 18, 256>}, {transform_indices = @transform_1, window_bounds = array<i64: 1, 2, 18, 256>}, {pipeline_mode = #tpu.pipeline_mode<synchronous>, transform_indices = @transform_2, window_bounds = array<i64: 9, 256, 256>}, {pipeline_mode = #tpu.pipeline_mode<synchronous>, transform_indices = @transform_3, window_bounds = array<i64: 1, 256>}, {transform_indices = @transform_4, window_bounds = array<i64: 1, 128, 256>}]} {
    %cst = arith.constant 0.000000e+00 : f32
    %0 = vector.broadcast %cst : f32 to vector<128x256xf32>
    %c0 = arith.constant 0 : index
    %c0_0 = arith.constant 0 : index
    %c0_1 = arith.constant 0 : index
    %c0_2 = arith.constant 0 : index
    %1 = vector.load %arg2[%c0, %c0_0, %c0_1, %c0_2] : memref<1x8x18x256xbf16, #tpu.memory_space<vmem>>, vector<1x8x18x256xbf16>
    %2 = vector.shape_cast %1 : vector<1x8x18x256xbf16> to vector<8x18x256xbf16>
    %c0_3 = arith.constant 0 : index
    %c0_4 = arith.constant 0 : index
    %c0_5 = arith.constant 0 : index
    %c0_6 = arith.constant 0 : index
    %3 = vector.load %arg3[%c0_3, %c0_4, %c0_5, %c0_6] : memref<1x2x18x256xbf16, #tpu.memory_space<vmem>>, vector<1x2x18x256xbf16>
    %4 = vector.shape_cast %3 : vector<1x2x18x256xbf16> to vector<2x18x256xbf16>
    %5 = tpu.concatenate %2, %4 in 0 : vector<8x18x256xbf16>, vector<2x18x256xbf16> -> vector<10x18x256xbf16>
    %6 = vector.extract_strided_slice %5 {offsets = [0, 0, 0], sizes = [8, 16, 256], strides = [1, 1, 1]} : vector<10x18x256xbf16> to vector<8x16x256xbf16>
    %7 = vector.shape_cast %6 : vector<8x16x256xbf16> to vector<128x256xbf16>
    %c0_7 = arith.constant 0 : index
    %c0_8 = arith.constant 0 : index
    %c0_9 = arith.constant 0 : index
    %8 = vector.load %arg4[%c0_7, %c0_8, %c0_9] : memref<9x256x256xbf16, #tpu.memory_space<vmem>>, vector<1x256x256xbf16>
    %9 = vector.shape_cast %8 : vector<1x256x256xbf16> to vector<256x256xbf16>
    %cst_10 = arith.constant dense<0.000000e+00> : vector<128x256xf32>
    %10 = tpu.matmul %7, %9, %cst_10 {dimension_numbers = #tpu.dot_dimension_numbers<[1], [0], [0], [1], [0, 0, 1, 1], [], []>} : vector<128x256xbf16>, vector<256x256xbf16>, vector<128x256xf32> -> vector<128x256xf32>
    %11 = arith.addf %0, %10 : vector<128x256xf32>
    %12 = vector.extract_strided_slice %5 {offsets = [0, 1, 0], sizes = [8, 16, 256], strides = [1, 1, 1]} : vector<10x18x256xbf16> to vector<8x16x256xbf16>
    %13 = vector.shape_cast %12 : vector<8x16x256xbf16> to vector<128x256xbf16>
    %c1 = arith.constant 1 : index
    %c0_11 = arith.constant 0 : index
    %c0_12 = arith.constant 0 : index
    %14 = vector.load %arg4[%c1, %c0_11, %c0_12] : memref<9x256x256xbf16, #tpu.memory_space<vmem>>, vector<1x256x256xbf16>
    %15 = vector.shape_cast %14 : vector<1x256x256xbf16> to vector<256x256xbf16>
    %cst_13 = arith.constant dense<0.000000e+00> : vector<128x256xf32>
    %16 = tpu.matmul %13, %15, %cst_13 {dimension_numbers = #tpu.dot_dimension_numbers<[1], [0], [0], [1], [0, 0, 1, 1], [], []>} : vector<128x256xbf16>, vector<256x256xbf16>, vector<128x256xf32> -> vector<128x256xf32>
    %17 = arith.addf %11, %16 : vector<128x256xf32>
    %18 = vector.extract_strided_slice %5 {offsets = [0, 2, 0], sizes = [8, 16, 256], strides = [1, 1, 1]} : vector<10x18x256xbf16> to vector<8x16x256xbf16>
    %19 = vector.shape_cast %18 : vector<8x16x256xbf16> to vector<128x256xbf16>
    %c2 = arith.constant 2 : index
    %c0_14 = arith.constant 0 : index
    %c0_15 = arith.constant 0 : index
    %20 = vector.load %arg4[%c2, %c0_14, %c0_15] : memref<9x256x256xbf16, #tpu.memory_space<vmem>>, vector<1x256x256xbf16>
    %21 = vector.shape_cast %20 : vector<1x256x256xbf16> to vector<256x256xbf16>
    %cst_16 = arith.constant dense<0.000000e+00> : vector<128x256xf32>
    %22 = tpu.matmul %19, %21, %cst_16 {dimension_numbers = #tpu.dot_dimension_numbers<[1], [0], [0], [1], [0, 0, 1, 1], [], []>} : vector<128x256xbf16>, vector<256x256xbf16>, vector<128x256xf32> -> vector<128x256xf32>
    %23 = arith.addf %17, %22 : vector<128x256xf32>
    %24 = vector.extract_strided_slice %5 {offsets = [1, 0, 0], sizes = [8, 16, 256], strides = [1, 1, 1]} : vector<10x18x256xbf16> to vector<8x16x256xbf16>
    %25 = vector.shape_cast %24 : vector<8x16x256xbf16> to vector<128x256xbf16>
    %c3 = arith.constant 3 : index
    %c0_17 = arith.constant 0 : index
    %c0_18 = arith.constant 0 : index
    %26 = vector.load %arg4[%c3, %c0_17, %c0_18] : memref<9x256x256xbf16, #tpu.memory_space<vmem>>, vector<1x256x256xbf16>
    %27 = vector.shape_cast %26 : vector<1x256x256xbf16> to vector<256x256xbf16>
    %cst_19 = arith.constant dense<0.000000e+00> : vector<128x256xf32>
    %28 = tpu.matmul %25, %27, %cst_19 {dimension_numbers = #tpu.dot_dimension_numbers<[1], [0], [0], [1], [0, 0, 1, 1], [], []>} : vector<128x256xbf16>, vector<256x256xbf16>, vector<128x256xf32> -> vector<128x256xf32>
    %29 = arith.addf %23, %28 : vector<128x256xf32>
    %30 = vector.extract_strided_slice %5 {offsets = [1, 1, 0], sizes = [8, 16, 256], strides = [1, 1, 1]} : vector<10x18x256xbf16> to vector<8x16x256xbf16>
    %31 = vector.shape_cast %30 : vector<8x16x256xbf16> to vector<128x256xbf16>
    %c4 = arith.constant 4 : index
    %c0_20 = arith.constant 0 : index
    %c0_21 = arith.constant 0 : index
    %32 = vector.load %arg4[%c4, %c0_20, %c0_21] : memref<9x256x256xbf16, #tpu.memory_space<vmem>>, vector<1x256x256xbf16>
    %33 = vector.shape_cast %32 : vector<1x256x256xbf16> to vector<256x256xbf16>
    %cst_22 = arith.constant dense<0.000000e+00> : vector<128x256xf32>
    %34 = tpu.matmul %31, %33, %cst_22 {dimension_numbers = #tpu.dot_dimension_numbers<[1], [0], [0], [1], [0, 0, 1, 1], [], []>} : vector<128x256xbf16>, vector<256x256xbf16>, vector<128x256xf32> -> vector<128x256xf32>
    %35 = arith.addf %29, %34 : vector<128x256xf32>
    %36 = vector.extract_strided_slice %5 {offsets = [1, 2, 0], sizes = [8, 16, 256], strides = [1, 1, 1]} : vector<10x18x256xbf16> to vector<8x16x256xbf16>
    %37 = vector.shape_cast %36 : vector<8x16x256xbf16> to vector<128x256xbf16>
    %c5 = arith.constant 5 : index
    %c0_23 = arith.constant 0 : index
    %c0_24 = arith.constant 0 : index
    %38 = vector.load %arg4[%c5, %c0_23, %c0_24] : memref<9x256x256xbf16, #tpu.memory_space<vmem>>, vector<1x256x256xbf16>
    %39 = vector.shape_cast %38 : vector<1x256x256xbf16> to vector<256x256xbf16>
    %cst_25 = arith.constant dense<0.000000e+00> : vector<128x256xf32>
    %40 = tpu.matmul %37, %39, %cst_25 {dimension_numbers = #tpu.dot_dimension_numbers<[1], [0], [0], [1], [0, 0, 1, 1], [], []>} : vector<128x256xbf16>, vector<256x256xbf16>, vector<128x256xf32> -> vector<128x256xf32>
    %41 = arith.addf %35, %40 : vector<128x256xf32>
    %42 = vector.extract_strided_slice %5 {offsets = [2, 0, 0], sizes = [8, 16, 256], strides = [1, 1, 1]} : vector<10x18x256xbf16> to vector<8x16x256xbf16>
    %43 = vector.shape_cast %42 : vector<8x16x256xbf16> to vector<128x256xbf16>
    %c6 = arith.constant 6 : index
    %c0_26 = arith.constant 0 : index
    %c0_27 = arith.constant 0 : index
    %44 = vector.load %arg4[%c6, %c0_26, %c0_27] : memref<9x256x256xbf16, #tpu.memory_space<vmem>>, vector<1x256x256xbf16>
    %45 = vector.shape_cast %44 : vector<1x256x256xbf16> to vector<256x256xbf16>
    %cst_28 = arith.constant dense<0.000000e+00> : vector<128x256xf32>
    %46 = tpu.matmul %43, %45, %cst_28 {dimension_numbers = #tpu.dot_dimension_numbers<[1], [0], [0], [1], [0, 0, 1, 1], [], []>} : vector<128x256xbf16>, vector<256x256xbf16>, vector<128x256xf32> -> vector<128x256xf32>
    %47 = arith.addf %41, %46 : vector<128x256xf32>
    %48 = vector.extract_strided_slice %5 {offsets = [2, 1, 0], sizes = [8, 16, 256], strides = [1, 1, 1]} : vector<10x18x256xbf16> to vector<8x16x256xbf16>
    %49 = vector.shape_cast %48 : vector<8x16x256xbf16> to vector<128x256xbf16>
    %c7 = arith.constant 7 : index
    %c0_29 = arith.constant 0 : index
    %c0_30 = arith.constant 0 : index
    %50 = vector.load %arg4[%c7, %c0_29, %c0_30] : memref<9x256x256xbf16, #tpu.memory_space<vmem>>, vector<1x256x256xbf16>
    %51 = vector.shape_cast %50 : vector<1x256x256xbf16> to vector<256x256xbf16>
    %cst_31 = arith.constant dense<0.000000e+00> : vector<128x256xf32>
    %52 = tpu.matmul %49, %51, %cst_31 {dimension_numbers = #tpu.dot_dimension_numbers<[1], [0], [0], [1], [0, 0, 1, 1], [], []>} : vector<128x256xbf16>, vector<256x256xbf16>, vector<128x256xf32> -> vector<128x256xf32>
    %53 = arith.addf %47, %52 : vector<128x256xf32>
    %54 = vector.extract_strided_slice %5 {offsets = [2, 2, 0], sizes = [8, 16, 256], strides = [1, 1, 1]} : vector<10x18x256xbf16> to vector<8x16x256xbf16>
    %55 = vector.shape_cast %54 : vector<8x16x256xbf16> to vector<128x256xbf16>
    %c8 = arith.constant 8 : index
    %c0_32 = arith.constant 0 : index
    %c0_33 = arith.constant 0 : index
    %56 = vector.load %arg4[%c8, %c0_32, %c0_33] : memref<9x256x256xbf16, #tpu.memory_space<vmem>>, vector<1x256x256xbf16>
    %57 = vector.shape_cast %56 : vector<1x256x256xbf16> to vector<256x256xbf16>
    %cst_34 = arith.constant dense<0.000000e+00> : vector<128x256xf32>
    %58 = tpu.matmul %55, %57, %cst_34 {dimension_numbers = #tpu.dot_dimension_numbers<[1], [0], [0], [1], [0, 0, 1, 1], [], []>} : vector<128x256xbf16>, vector<256x256xbf16>, vector<128x256xf32> -> vector<128x256xf32>
    %59 = arith.addf %53, %58 : vector<128x256xf32>
    %c0_35 = arith.constant 0 : index
    %c0_36 = arith.constant 0 : index
    %60 = vector.load %arg5[%c0_35, %c0_36] : memref<1x256xf32, #tpu.memory_space<vmem>>, vector<1x256xf32>
    %61 = vector.broadcast %60 : vector<1x256xf32> to vector<128x256xf32>
    %62 = arith.addf %59, %61 : vector<128x256xf32>
    %cst_37 = arith.constant 0.000000e+00 : f32
    %63 = vector.broadcast %cst_37 : f32 to vector<128x256xf32>
    %64 = arith.maximumf %62, %63 : vector<128x256xf32>
    %65 = arith.truncf %64 : vector<128x256xf32> to vector<128x256xbf16>
    %c0_38 = arith.constant 0 : index
    %c0_39 = arith.constant 0 : index
    %c0_40 = arith.constant 0 : index
    %66 = vector.load %arg6[%c0_38, %c0_39, %c0_40] : memref<1x128x256xbf16, #tpu.memory_space<vmem>>, vector<1x128x256xbf16>
    %67 = vector.shape_cast %66 : vector<1x128x256xbf16> to vector<128x256xbf16>
    %68 = vector.shape_cast %65 : vector<128x256xbf16> to vector<1x128x256xbf16>
    tpu.vector_store %arg6[%c0_38, %c0_39, %c0_40], %68 {strides = array<i32>} : memref<1x128x256xbf16, #tpu.memory_space<vmem>>, vector<1x128x256xbf16>,
    return
  }
  func.func @transform_0(%arg0: i32, %arg1: i32) -> (i32, i32, i32, i32) {
    %c0_i32 = arith.constant 0 : i32
    %c0_i32_0 = arith.constant 0 : i32
    %c0_i32_1 = arith.constant 0 : i32
    return %arg0, %arg1, %c0_i32, %c0_i32_0 : i32, i32, i32, i32
  }
  func.func @transform_1(%arg0: i32, %arg1: i32) -> (i32, i32, i32, i32) {
    %c1_i32 = arith.constant 1 : i32
    %0 = arith.addi %arg1, %c1_i32 : i32
    %c4_i32 = arith.constant 4 : i32
    %1 = arith.muli %0, %c4_i32 : i32
    %c0_i32 = arith.constant 0 : i32
    %c0_i32_0 = arith.constant 0 : i32
    %c0_i32_1 = arith.constant 0 : i32
    return %arg0, %1, %c0_i32, %c0_i32_0 : i32, i32, i32, i32
  }
  func.func @transform_2(%arg0: i32, %arg1: i32) -> (i32, i32, i32) {
    %c0_i32 = arith.constant 0 : i32
    %c0_i32_0 = arith.constant 0 : i32
    %c0_i32_1 = arith.constant 0 : i32
    %c0_i32_2 = arith.constant 0 : i32
    return %c0_i32, %c0_i32_0, %c0_i32_1 : i32, i32, i32
  }
  func.func @transform_3(%arg0: i32, %arg1: i32) -> (i32, i32) {
    %c0_i32 = arith.constant 0 : i32
    %c0_i32_0 = arith.constant 0 : i32
    %c0_i32_1 = arith.constant 0 : i32
    return %c0_i32, %c0_i32_0 : i32, i32
  }
  func.func @transform_4(%arg0: i32, %arg1: i32) -> (i32, i32, i32) {
    %c0_i32 = arith.constant 0 : i32
    %c0_i32_0 = arith.constant 0 : i32
    return %arg0, %arg1, %c0_i32 : i32, i32, i32
  }
}

</mosaic_0001>

<bundles_post_ra>
// kernel: aspp_forward.8
= control target key start
LH: loop header
LB: loop body
LE: loop exit
PB: predicated region body
PF: predicated region fallthrough
CT: control target
= control target key end

     0   :  { %s386_s6 = smov 0   ;;  %s388_s7 = smov 0   ;;  %s434_s0 = inlined_call_operand.vmem [shape: bf16[2,64,32], index: 0, kind: input, shape index: {}]   ;;  %s435_s1 = inlined_call_operand.vmem [shape: bf16[2,1,32], index: 1, kind: output, shape index: {}]  }
   0x1   :  { %s390_s8 = smov 0  }
   0x2 LB: > { %s23_s9 = sadd.s32 1, %s369_s7  ;;  %p301_p0 = scmp.ge.s32.totalorder %s373_s8, 1  ;;  %s373_s8 = sphi %s390_s8, %s11_s8   ;;  %s369_s7 = sphi %s388_s7, %s437_s7   ;;  %s365_s6 = sphi %s386_s6, %s436_s6  }
   0x3   : > { %p25_p1 = scmp.ge.s32.totalorder %s23_s9, 2  ;;  %p106_p2 = scmp.lt.s32.totalorder %s373_s8, 3 }
   0x5   : > { %s439_s9 = smov (%p25_p1, %s23_s9), 0  ;;  %p107_p3 = pnand %p301_p0, %p106_p2 }
   0x6   : > { %vm145_vm0 = vcmask (!%p107_p3), 253952   ;;  %p129_p4 = scmp.lt.s32.totalorder (!%p107_p3), %s365_s6, 1  ;;  %v375_v0 = vmov (!%p107_p3), 0.0   ;;  %vm199_vm1 = vcmask (!%p107_p3), 261120   ;;  %vm231_vm2 = vsmask.f32 (!%p107_p3), 256 }
   0x7   : > { %110 = sbr.rel (%p107_p3) target bundleno = 63 (0x3f), region = 24  ;;  %146 = vst.msk [vmem:[#allocation2] sm:$0x1] (!%p107_p3), %vm145_vm0, %v375_v0  ;;  %vm232_vm3 = vmand (!%p107_p3), %vm145_vm0, %vm231_vm2 }
   0xe   : > { %s441_s6 = smov (!%p129_p4, %s365_s6), 1  ;;  %v198_v33 = vld [vmem:[#allocation2] sm:$0x1] }
   0xf   : > { %s306_s10 = sshll.u32 %s441_s6, 5  ;;  %s140_s16 = scalar_lea.vmem %s435_s1, %s441_s6 }
  0x10   : > { %s136_s13 = scalar_lea.vmem %s434_s0, %s306_s10  ;;  %v233_v38 = vld [vmem:[%s140_s16] sm:$0x1] }
  0x11   : > { %v308_v1 = vld [vmem:[%s136_s13] sm:$0xff]   ;;  %v323_v2 = vld [vmem:[%s136_s13 + $0x8] sm:$0xff]   ;;  %v324_v3 = vld [vmem:[%s136_s13 + $0x10] sm:$0xff]  }
  0x12   : > { %v309_v4 = vunpack.c.l.bf16 %v308_v1  ;;  %v310_v5 = vunpack.c.h.bf16 %v308_v1  ;;  %v313_v6 = vunpack.c.l.bf16 %v323_v2  ;;  %v314_v7 = vunpack.c.h.bf16 %v323_v2  ;;  %v325_v12 = vld [vmem:[%s136_s13 + $0x18] sm:$0xff]  }
  0x13   : > { %v317_v8 = vunpack.c.l.bf16 %v324_v3  ;;  %v318_v14 = vunpack.c.h.bf16 %v324_v3  ;;  %v321_v17 = vunpack.c.l.bf16 %v325_v12  ;;  %v322_v20 = vunpack.c.h.bf16 %v325_v12 }
  0x14   : > { %v200_v9 = vsel %vm199_vm1, %v309_v4, 0.0  ;;  %v201_v10 = vsel %vm199_vm1, %v310_v5, 0.0  ;;  %v203_v11 = vsel %vm199_vm1, %v313_v6, 0.0  ;;  %v205_v15 = vsel %vm199_vm1, %v314_v7, 0.0 }
  0x15   : > { %v202_v13 = vadd.f32 %v201_v10, %v200_v9  ;;  %v207_v18 = vsel %vm199_vm1, %v317_v8, 0.0  ;;  %v209_v21 = vsel %vm199_vm1, %v318_v14, 0.0  ;;  %v211_v23 = vsel %vm199_vm1, %v321_v17, 0.0 }
  0x16   : > { %v213_v25 = vsel %vm199_vm1, %v322_v20, 0.0 }
  0x17   : > { %v204_v16 = vadd.f32 %v203_v11, %v202_v13 }
  0x19   : > { %v206_v19 = vadd.f32 %v205_v15, %v204_v16 }
  0x1b   : > { %v208_v22 = vadd.f32 %v207_v18, %v206_v19 }
  0x1d   : > { %v210_v24 = vadd.f32 %v209_v21, %v208_v22 }
  0x1f   : > { %v212_v26 = vadd.f32 %v211_v23, %v210_v24 }
  0x21   : > { %v214_v27 = vadd.f32 %v213_v25, %v212_v26 }
  0x23   : > { %v215_v28 = vrot.slane %v214_v27, 4 }
  0x25   : > { %v216_v29 = vadd.f32 %v215_v28, %v214_v27 }
  0x27   : > { %v217_v30 = vrot.slane %v216_v29, 2 }
  0x29   : > { %v218_v31 = vadd.f32 %v217_v30, %v216_v29 }
  0x2b   : > { %v219_v32 = vrot.slane %v218_v31, 1 }
  0x2d   : > { %v220_v34 = vadd.f32 %v219_v32, %v218_v31 }
  0x2f   : > { %v221_v35 = vadd.f32 %v220_v34, %v198_v33 }
  0x31   : > { %223 = vst.msk [vmem:[#allocation2] sm:$0x1] %vm145_vm0, %v221_v35 }
  0x38   : > { %v227_v36 = vld [vmem:[#allocation2] sm:$0x1] }
  0x39   : > { %v228_v37 = vmul.f32 0.015625, %v227_v36 }
  0x3b   : > { %v229_v39 = vpack.c.bf16 %v228_v37, %v228_v37 }
  0x3d   : > { %v234_v40 = vsel %vm232_vm3, %v229_v39, %v233_v38 }
  0x3e   : > { %235 = vst [vmem:[%s140_s16] sm:$0x1] %v234_v40 }
  0x3f PF: > { %s11_s8 = sadd.s32 1, %s373_s8   ;;  %s436_s6 = smov %s369_s7 }
  0x40   : > { %p8_p5 = scmp.ge.s32.totalorder %s11_s8, 4   ;;  %s437_s7 = smov %s439_s9 }
  0x42   :  { %10 = sbr.rel (!%p8_p5) target bundleno = 2 (0x2), region = 62 }

// kernel: aspp_forward.9
= control target key start
LH: loop header
LB: loop body
LE: loop exit
PB: predicated region body
PF: predicated region fallthrough
CT: control target
= control target key end

     0   :  { %8 = vsyncpa [#allocation4], 0  ;;  %s258_s0 = inlined_call_operand.vmem [shape: bf16[8,32], index: 0, kind: input, shape index: {}]   ;;  %s259_s1 = inlined_call_operand.hbm [shape: bf16[32,128], index: 1, kind: input, shape index: {}]   ;;  %s260_s2 = inlined_call_operand.hbm [shape: f32[1,128], index: 2, kind: input, shape index: {}]   ;;  %s261_s3 = inlined_call_operand.vmem [shape: bf16[8,128], index: 3, kind: output, shape index: {}]  }
   0x1   :  { %9 = vsyncpa [#allocation6], 0  ;;  %s202_s12 = smov [#allocation3]   ;;  %s154_s16 = scalar_lea.hbm %s259_s1, 256 }
   0x2   :  { %s17_s13 = sshll.u32 %s202_s12, 4  ;;  %p155_p0 = scmp.ne.s32.totalorder %s259_s1, %s154_s16  ;;  %s18_s13 = int_to_ptr.vmem [resolvable:$true] %s17_s13 }
   0x3   :  { %p158_p1 = scmp.lt.u32.totalorder %s154_s16, %s259_s1 }
   0x5   :  { %p160_p2 = pnand %p158_p1, %p155_p0 }
   0x7   :  { %163 = shalt.err (!%p160_p2)
}
   0x8   :  { %s164_s21 = scalar_lea.vmem %s18_s13, 256  ;;  %p169_p4 = scmp.lt.s32.totalorder %s18_s13, %s18_s13 }
   0x9   :  { %p165_p3 = scmp.ne.s32.totalorder %s18_s13, %s164_s21  ;;  %p170_p5 = scmp.lt.s32.totalorder %s164_s21, %s164_s21 }
   0xb   :  { %p171_p6 = por %p170_p5, %p169_p4 }
   0xd   :  { %p172_p7 = pnand %p171_p6, %p165_p3 }
   0xf   :  { %175 = shalt.err (!%p172_p7)
}
  0x10   :  { %s203_s22 = smov 64   ;;  %s204_s23 = smov 4  }
  0x11   :  { %23 = dma.hbm_to_vmem [thread:$0]  %s259_s1, 256, %s18_s13, [#allocation4], %s203_s22, %s203_s22, %s204_s23  }
  0x12   :  { %s205_s26 = smov [#allocation5]   ;;  %s176_s30 = scalar_lea.hbm %s260_s2, 16 }
  0x13   :  { %s30_s27 = sshll.u32 %s205_s26, 4  ;;  %p177_p8 = scmp.ne.s32.totalorder %s260_s2, %s176_s30  ;;  %s31_s27 = int_to_ptr.vmem [resolvable:$true] %s30_s27 }
  0x14   :  { %p180_p9 = scmp.lt.u32.totalorder %s176_s30, %s260_s2 }
  0x16   :  { %p182_p10 = pnand %p180_p9, %p177_p8 }
  0x18   :  { %185 = shalt.err (!%p182_p10)
}
  0x19   :  { %s186_s8 = scalar_lea.vmem %s31_s27, 16  ;;  %s190_s1 = scalar_lea.vmem %s31_s27, 32 }
  0x1a   :  { %p187_p11 = scmp.ne.s32.totalorder %s31_s27, %s186_s8  ;;  %p191_p12 = scmp.lt.s32.totalorder %s31_s27, %s31_s27 }
  0x1b   :  { %p192_p13 = scmp.lt.s32.totalorder %s190_s1, %s186_s8 }
  0x1d   :  { %p193_p0 = por %p192_p13, %p191_p12 }
  0x1f   :  { %p194_p1 = pnand %p193_p0, %p187_p11 }
  0x21   :  { %197 = shalt.err (!%p194_p1)
}
  0x22   :  { %33 = dma.hbm_to_vmem [thread:$0]  %s260_s2, 16, %s31_s27, [#allocation6]  }
  0x23   :  { %198 = dma.done.wait [#allocation4], 256  }
  0x24   :  { %199 = vsyncadd [#allocation4], 4294967040 }
  0x25   :  { %200 = dma.done.wait [#allocation6], 16  }
  0x26   :  { %201 = vsyncadd [#allocation6], 4294967280  ;;  %v206_v0 = vmov 0.0   ;;  %vm207_vm0 = vmmov 0   ;;  %v152_v1 = vld [vmem:[#allocation3] sm:$0xff]   ;;  %v153_v2 = vld [vmem:[#allocation3 + $0x8] sm:$0xff]  }
  0x27   :  { %138 = vmatprep.subr.bf16.mxu0 %v206_v0  ;;  %142 = vmatprep.mubr.msk.bf16.mxu0 %vm207_vm0, %v206_v0  ;;  %v47_v3 = vld [vmem:[%s258_s0] sm:$0xf]  ;;  %vm64_vm1 = vcmask 261120   ;;  %v134_v4 = vld [vmem:[#allocation5] ss:$0 sm:$0xff] }
  0x28   :  { %139 = vmatpush3.bf16.msra.mxu0 %v152_v1 }
  0x29   :  { %140 = vmatprep.subr.bf16.mxu0 %v206_v0 }
  0x2c   :  { %141 = vmatpush3.bf16.msra.mxu0 %v153_v2 }
  0x2f   :  { %143 = vmatmul.mubr.msk.bf16.vlgmr.msra.gmra.mrb[0].mxu0 %vm64_vm1, %v47_v3 }
 0x102   :  { %v102_v5 = vpop.f32.mrb[0].mxu0 }
 0x103   :  { %v121_v6 = vadd.f32 %v134_v4, %v102_v5  ;;  %v144_v7 = vpop.f32.mrb[1].mxu0 }
 0x104   :  { %v105_v8 = vpop.f32.mrb[2].mxu0 }
 0x105   :  { %v122_v9 = vmax.f32 %v121_v6, 0.0  ;;  %v145_v10 = vpop.f32.mrb[3].mxu0 }
 0x107   :  { %v123_v11 = vpack.c.bf16 %v122_v9, %v122_v9 }
 0x109   :  { %124 = vst [vmem:[%s261_s3] sm:$0xf] %v123_v11 }
 0x10a   :  { %129 = vsyncpa [#allocation4], 1 }
 0x10b   :  { %130 = vsyncpa [#allocation6], 1 }

// kernel: aspp_forward.10
= control target key start
LH: loop header
LB: loop body
LE: loop exit
PB: predicated region body
PF: predicated region fallthrough
CT: control target
= control target key end

     0   :  { %s1131_s18 = smov 0   ;;  %s1133_s19 = smov 0   ;;  %s1246_s0 = inlined_call_operand.vmem [shape: bf16[4,2,64,128], index: 0, kind: input, shape index: {}]   ;;  %s1247_s1 = inlined_call_operand.vmem [shape: bf16[4,128,128], index: 1, kind: input, shape index: {}]   ;;  %s1248_s2 = inlined_call_operand.vmem [shape: bf16[2,8,128], index: 2, kind: input, shape index: {}]   ;;  %s1249_s3 = inlined_call_operand.vmem [shape: bf16[128,128], index: 3, kind: input, shape index: {}]   ;;  %s1250_s4 = inlined_call_operand.vmem [shape: f32[1,128], index: 4, kind: input, shape index: {}]   ;;  %s1251_s5 = inlined_call_operand.vmem [shape: bf16[2,64,128], index: 5, kind: output, shape index: {}]  }
   0x1   :  { %s1135_s20 = smov 0   ;;  %s1137_s21 = smov 0  }
   0x2   :  { %s1139_s22 = smov 0  }
   0x3 LB: > { %s27_s23 = sadd.s32 1, %s1088_s20  ;;  %s34_s24 = sadd.s32 1, %s1092_s21  ;;  %s1096_s22 = sphi %s1139_s22, %s15_s22   ;;  %s1092_s21 = sphi %s1137_s21, %s1255_s21   ;;  %s1088_s20 = sphi %s1135_s20, %s1254_s20   ;;  %s1084_s19 = sphi %s1133_s19, %s1253_s19   ;;  %s1080_s18 = sphi %s1131_s18, %s1252_s18  }
   0x4   : > { %p28_p0 = scmp.ge.s32.totalorder %s27_s23, 4  ;;  %p839_p1 = scmp.ge.s32.totalorder %s1096_s22, 1 }
   0x5   : > { %p240_p2 = scmp.lt.s32.totalorder %s1096_s22, 9 }
   0x6   : > { %s1257_s23 = smov (%p28_p0, %s27_s23), 0  ;;  %s1259_s24 = smov (!%p28_p0, %s34_s24), %s1092_s21 }
   0x7   : > { %p241_p3 = pnand %p839_p1, %p240_p2  ;;  %p36_p4 = scmp.ge.s32.totalorder %s1259_s24, 2 }
   0x8   : > { %p290_p5 = scmp.lt.s32.totalorder (!%p241_p3), %s1080_s18, 3  ;;  %p292_p6 = scmp.lt.s32.totalorder (!%p241_p3), %s1084_s19, 1 }
   0x9   : > { %s1261_s24 = smov (%p36_p4, %s1259_s24), 0  ;;  %244 = sbr.rel (%p241_p3) target bundleno = 495 (0x1ef), region = 40 }
   0xa   : > { %p848_p7 = scmp.ne.s32.totalorder (!%p241_p3), %s1080_s18, 0 }
  0x10   : > { %s291_s25 = scalar_select %p290_p5, %s1080_s18, 3 }
  0x11   : > { %s1263_s19 = smov (!%p292_p6, %s1084_s19), 1  ;;  %326 = sbr.rel (%p848_p7) target bundleno = 24 (0x18), region = 44 }
  0x12   : > { %s841_s26 = sshll.u32 %s291_s25, 4  ;;  %s881_s27 = sshll.u32 %s291_s25, 6  ;;  %v1098_v0 = vmov (!%p848_p7), 0.0  }
  0x13   : > { %s840_s28 = sshll.u32 %s1263_s19, 3  ;;  %s1168_s6 = scalar_lea.vmem %s1247_s1, %s881_s27  ;;  %327 = vst [vmem:[#allocation2] sm:$0xff] (!%p848_p7), %v1098_v0  ;;  %328 = vst [vmem:[#allocation2 + $0x8] sm:$0xff] (!%p848_p7), %v1098_v0 }
  0x14   : > { %s299_s7 = sadd.s32 %s841_s26, %s840_s28  ;;  %s845_s8 = sshll.u32 %s1263_s19, 2  ;;  %329 = vst [vmem:[#allocation2 + $0x10] sm:$0xff] (!%p848_p7), %v1098_v0  ;;  %330 = vst [vmem:[#allocation2 + $0x18] sm:$0xff] (!%p848_p7), %v1098_v0 }
  0x15   : > { %s842_s9 = sshll.u32 %s299_s7, 2  ;;  %s1173_s12 = scalar_lea.vmem %s1248_s2, %s845_s8  ;;  %331 = vst [vmem:[#allocation2 + $0x20] sm:$0xff] (!%p848_p7), %v1098_v0  ;;  %332 = vst [vmem:[#allocation2 + $0x28] sm:$0xff] (!%p848_p7), %v1098_v0 }
  0x16   : > { %s1178_s15 = scalar_lea.vmem %s1246_s0, %s842_s9  ;;  %s882_s16 = sshll.u32 %s1263_s19, 5  ;;  %333 = vst [vmem:[#allocation2 + $0x30] sm:$0xff] (!%p848_p7), %v1098_v0  ;;  %334 = vst [vmem:[#allocation2 + $0x38] sm:$0xff] (!%p848_p7), %v1098_v0 }
  0x17   : > { %s1183_s29 = scalar_lea.vmem %s1251_s5, %s882_s16 }
  0x18 PF: > { %v1038_v1 = vld [vmem:[%s1168_s6] sm:$0xff]   ;;  %v1039_v2 = vld [vmem:[%s1168_s6 + $0x8] sm:$0xff]   ;;  %v1040_v3 = vld [vmem:[%s1168_s6 + $0x10] sm:$0xff]   ;;  %p861_p8 = scmp.ne.s32.totalorder %s1080_s18, 3 }
  0x19   : > { %935 = vmatprep.subr.bf16.mxu0 %v1038_v1  ;;  %979 = vmatprep.subr.bf16.mxu1 %v1038_v1  ;;  %v1041_v4 = vld [vmem:[%s1168_s6 + $0x18] sm:$0xff]   ;;  %v1046_v5 = vld [vmem:[%s1178_s15] sm:$0xff]   ;;  %v1047_v6 = vld [vmem:[%s1178_s15 + $0x10] sm:$0xff]   ;;  %v1099_v38 = vmov (!%p861_p8), 0.0   ;;  %vm1100_vm0 = vmmov (!%p861_p8), 0   ;;  %v637_v47 = vlaneseq (!%p861_p8) }
  0x1a   : > { %936 = vmatpush3.bf16.msra.mxu0 %v1038_v1  ;;  %987 = vmatpush3.bf16.msra.mxu1 %v1038_v1  ;;  %v1042_v7 = vld [vmem:[%s1168_s6 + $0x20] sm:$0xff]   ;;  %v1043_v8 = vld [vmem:[%s1168_s6 + $0x28] sm:$0xff]   ;;  %v1044_v9 = vld [vmem:[%s1168_s6 + $0x30] sm:$0xff]  }
  0x1b   : > { %937 = vmatprep.subr.bf16.mxu0 %v1039_v2  ;;  %980 = vmatprep.subr.bf16.mxu1 %v1039_v2  ;;  %v1045_v10 = vld [vmem:[%s1168_s6 + $0x38] sm:$0xff]   ;;  %v1048_v11 = vld [vmem:[%s1178_s15 + $0x8] sm:$0xff]   ;;  %v337_v13 = vld [vmem:[#allocation2 + $0x10] sm:$0xff]  ;;  %v638_v48 = vshrl.u32 (!%p861_p8), %v637_v47, 7 }
  0x1c   : > { %951 = vmatprep.mubr.bf16.mxu0 %v1046_v5  ;;  %955 = vmatprep.mubr.bf16.mxu1 %v1047_v6  ;;  %v1049_v12 = vld [vmem:[%s1178_s15 + $0x18] sm:$0xff]   ;;  %v335_v15 = vld [vmem:[#allocation2] sm:$0xff]  ;;  %v336_v25 = vld [vmem:[#allocation2 + $0x8] sm:$0xff] }
  0x1d   : > { %v341_v14 = vld [vmem:[#allocation2 + $0x30] sm:$0xff]  ;;  %v339_v16 = vld [vmem:[#allocation2 + $0x20] sm:$0xff]  ;;  %v338_v19 = vld [vmem:[#allocation2 + $0x18] sm:$0xff]  ;;  %v639_v49 = vsub.s32 (!%p861_p8), 0, %v638_v48 }
  0x1e   : > { %938 = vmatpush3.bf16.msra.mxu0 %v1039_v2  ;;  %988 = vmatpush3.bf16.msra.mxu1 %v1039_v2  ;;  %v342_v20 = vld [vmem:[#allocation2 + $0x38] sm:$0xff]  ;;  %v340_v26 = vld [vmem:[#allocation2 + $0x28] sm:$0xff]  ;;  %v1050_v37 = vld [vmem:[%s1249_s3] sm:$0xff] (!%p861_p8)  }
  0x1f   : > { %939 = vmatprep.subr.bf16.mxu0 %v1040_v3  ;;  %981 = vmatprep.subr.bf16.mxu1 %v1040_v3  ;;  %v1051_v39 = vld [vmem:[%s1249_s3 + $0x8] sm:$0xff] (!%p861_p8)   ;;  %v1052_v40 = vld [vmem:[%s1249_s3 + $0x10] sm:$0xff] (!%p861_p8)   ;;  %v1053_v41 = vld [vmem:[%s1249_s3 + $0x18] sm:$0xff] (!%p861_p8)  }
  0x20   : > { %v1054_v42 = vld [vmem:[%s1249_s3 + $0x20] sm:$0xff] (!%p861_p8)   ;;  %v1055_v43 = vld [vmem:[%s1249_s3 + $0x28] sm:$0xff] (!%p861_p8)   ;;  %v1056_v44 = vld [vmem:[%s1249_s3 + $0x30] sm:$0xff] (!%p861_p8)  }
  0x21   : > { %v1057_v45 = vld [vmem:[%s1249_s3 + $0x38] sm:$0xff] (!%p861_p8)   ;;  %v524_v46 = vld [vmem:[%s1173_s12] sm:$0xf] (!%p861_p8) }
  0x22   : > { %940 = vmatpush3.bf16.msra.mxu0 %v1040_v3  ;;  %989 = vmatpush3.bf16.msra.mxu1 %v1040_v3  ;;  %v870_v61 = vld [vmem:[%s1250_s4] ss:$0 sm:$0xff] (!%p861_p8) }
  0x23   : > { %941 = vmatprep.subr.bf16.mxu0 %v1041_v4  ;;  %982 = vmatprep.subr.bf16.mxu1 %v1041_v4 }
  0x26   : > { %942 = vmatpush3.bf16.msra.mxu0 %v1041_v4  ;;  %990 = vmatpush3.bf16.msra.mxu1 %v1041_v4 }
  0x27   : > { %943 = vmatprep.subr.bf16.mxu0 %v1042_v7  ;;  %983 = vmatprep.subr.bf16.mxu1 %v1042_v7 }
  0x2a   : > { %944 = vmatpush3.bf16.msra.mxu0 %v1042_v7  ;;  %991 = vmatpush3.bf16.msra.mxu1 %v1042_v7 }
  0x2b   : > { %945 = vmatprep.subr.bf16.mxu0 %v1043_v8  ;;  %984 = vmatprep.subr.bf16.mxu1 %v1043_v8 }
  0x2e   : > { %946 = vmatpush3.bf16.msra.mxu0 %v1043_v8  ;;  %992 = vmatpush3.bf16.msra.mxu1 %v1043_v8 }
  0x2f   : > { %947 = vmatprep.subr.bf16.mxu0 %v1044_v9  ;;  %985 = vmatprep.subr.bf16.mxu1 %v1044_v9 }
  0x32   : > { %948 = vmatpush3.bf16.msra.mxu0 %v1044_v9  ;;  %993 = vmatpush3.bf16.msra.mxu1 %v1044_v9 }
  0x33   : > { %949 = vmatprep.subr.bf16.mxu0 %v1045_v10  ;;  %986 = vmatprep.subr.bf16.mxu1 %v1045_v10 }
  0x36   : > { %950 = vmatpush3.bf16.msra.mxu0 %v1045_v10  ;;  %994 = vmatpush3.bf16.msra.mxu1 %v1045_v10 }
  0x37   : > { %959 = vmatprep.subr.bf16.mxu0 (!%p861_p8), %v1099_v38 }
  0x39   : > { %952 = vmatmul.mubr.bf16.vlgmr.msra.gmra.mrb[0].mxu0 %v1048_v11  ;;  %956 = vmatmul.mubr.bf16.vlgmr.msra.gmra.mrb[0].mxu1 %v1049_v12 }
  0x3a   : > { %960 = vmatpush3.bf16.msra.mxu0 (!%p861_p8), %v1050_v37  ;;  %975 = vmatprep.mubr.msk.bf16.mxu0 (!%p861_p8), %vm1100_vm0, %v1099_v38 }
  0x3b   : > { %961 = vmatprep.subr.bf16.mxu0 (!%p861_p8), %v1099_v38 }
  0x3e   : > { %962 = vmatpush3.bf16.msra.mxu0 (!%p861_p8), %v1051_v39 }
  0x3f   : > { %963 = vmatprep.subr.bf16.mxu0 (!%p861_p8), %v1099_v38 }
  0x42   : > { %964 = vmatpush3.bf16.msra.mxu0 (!%p861_p8), %v1052_v40 }
  0x43   : > { %965 = vmatprep.subr.bf16.mxu0 (!%p861_p8), %v1099_v38 }
  0x46   : > { %966 = vmatpush3.bf16.msra.mxu0 (!%p861_p8), %v1053_v41 }
  0x47   : > { %967 = vmatprep.subr.bf16.mxu0 (!%p861_p8), %v1099_v38 }
  0x4a   : > { %968 = vmatpush3.bf16.msra.mxu0 (!%p861_p8), %v1054_v42 }
  0x4b   : > { %969 = vmatprep.subr.bf16.mxu0 (!%p861_p8), %v1099_v38 }
  0x4e   : > { %970 = vmatpush3.bf16.msra.mxu0 (!%p861_p8), %v1055_v43 }
  0x4f   : > { %971 = vmatprep.subr.bf16.mxu0 (!%p861_p8), %v1099_v38 }
  0x52   : > { %972 = vmatpush3.bf16.msra.mxu0 (!%p861_p8), %v1056_v44 }
  0x53   : > { %973 = vmatprep.subr.bf16.mxu0 (!%p861_p8), %v1099_v38 }
  0x56   : > { %974 = vmatpush3.bf16.msra.mxu0 (!%p861_p8), %v1057_v45 }
 0x10c   : > { %v953_v17 = vpop.f32.mrb[0].mxu0  ;;  %v957_v18 = vpop.f32.mrb[0].mxu1  ;;  %523 = sbr.rel (%p861_p8) target bundleno = 495 (0x1ef), region = 48 }
 0x10d   : > { %v506_v21 = vadd.f32 %v953_v17, %v337_v13  ;;  %v510_v22 = vadd.f32 %v957_v18, %v341_v14  ;;  %v473_v23 = vpop.f32.mrb[1].mxu0  ;;  %v489_v24 = vpop.f32.mrb[1].mxu1 }
 0x10e   : > { %v504_v27 = vadd.f32 %v473_v23, %v335_v15  ;;  %v508_v28 = vadd.f32 %v489_v24, %v339_v16  ;;  %v954_v29 = vpop.f32.mrb[2].mxu0  ;;  %v958_v30 = vpop.f32.mrb[2].mxu1 }
 0x10f   : > { %514 = vst [vmem:[#allocation2 + $0x10] sm:$0xff] %v506_v21  ;;  %518 = vst [vmem:[#allocation2 + $0x30] sm:$0xff] %v510_v22  ;;  %v507_v31 = vadd.f32 %v954_v29, %v338_v19  ;;  %v511_v32 = vadd.f32 %v958_v30, %v342_v20  ;;  %v476_v33 = vpop.f32.mrb[3].mxu0  ;;  %v492_v34 = vpop.f32.mrb[3].mxu1  ;;  %976 = vmatmul.mubr.bf16.vlgmr.msra.gmra.mrb[0].mxu0 (!%p861_p8), %v524_v46 }
 0x110   : > { %512 = vst [vmem:[#allocation2] sm:$0xff] %v504_v27  ;;  %516 = vst [vmem:[#allocation2 + $0x20] sm:$0xff] %v508_v28  ;;  %v505_v35 = vadd.f32 %v476_v33, %v336_v25  ;;  %v509_v36 = vadd.f32 %v492_v34, %v340_v26 }
 0x111   : > { %515 = vst [vmem:[#allocation2 + $0x18] sm:$0xff] %v507_v31  ;;  %519 = vst [vmem:[#allocation2 + $0x38] sm:$0xff] %v511_v32 }
 0x112   : > { %513 = vst [vmem:[#allocation2 + $0x8] sm:$0xff] %v505_v35  ;;  %517 = vst [vmem:[#allocation2 + $0x28] sm:$0xff] %v509_v36 }
 0x116   : > { %v631_v53 = vld [vmem:[#allocation2 + $0x10] sm:$0xff] }
 0x117   : > { %v629_v50 = vld [vmem:[#allocation2] sm:$0xff]  ;;  %v635_v57 = vld [vmem:[#allocation2 + $0x30] sm:$0xff] }
 0x118   : > { %v632_v54 = vld [vmem:[#allocation2 + $0x18] sm:$0xff]  ;;  %v633_v55 = vld [vmem:[#allocation2 + $0x20] sm:$0xff] }
 0x119   : > { %v630_v51 = vld [vmem:[#allocation2 + $0x8] sm:$0xff]  ;;  %v636_v58 = vld [vmem:[#allocation2 + $0x38] sm:$0xff] }
 0x11a   : > { %v634_v56 = vld [vmem:[#allocation2 + $0x28] sm:$0xff] }
 0x1e2   : > { %v623_v52 = vpop.f32.mrb[0].mxu0 }
 0x1e3   : > { %v640_v59 = vrot.slane %v623_v52, %v639_v49  ;;  %v977_v60 = vpop.f32.mrb[1].mxu0 }
 0x1e4   : > { %v626_v62 = vpop.f32.mrb[2].mxu0 }
 0x1e5   : > { %v641_v63 = vadd.f32 %v640_v59, %v629_v50  ;;  %v642_v0 = vadd.f32 %v640_v59, %v630_v51  ;;  %v643_v1 = vadd.f32 %v640_v59, %v631_v53  ;;  %v644_v2 = vadd.f32 %v640_v59, %v632_v54  ;;  %v978_v3 = vpop.f32.mrb[3].mxu0 }
 0x1e6   : > { %v645_v4 = vadd.f32 %v640_v59, %v633_v55  ;;  %v646_v5 = vadd.f32 %v640_v59, %v634_v56  ;;  %v647_v6 = vadd.f32 %v640_v59, %v635_v57  ;;  %v648_v7 = vadd.f32 %v640_v59, %v636_v58 }
 0x1e7   : > { %v656_v8 = vadd.f32 %v870_v61, %v641_v63  ;;  %v657_v9 = vadd.f32 %v870_v61, %v642_v0  ;;  %v658_v10 = vadd.f32 %v870_v61, %v643_v1  ;;  %v659_v11 = vadd.f32 %v870_v61, %v644_v2 }
 0x1e8   : > { %v660_v12 = vadd.f32 %v870_v61, %v645_v4  ;;  %v661_v13 = vadd.f32 %v870_v61, %v646_v5  ;;  %v662_v14 = vadd.f32 %v870_v61, %v647_v6  ;;  %v663_v15 = vadd.f32 %v870_v61, %v648_v7 }
 0x1e9   : > { %v664_v16 = vmax.f32 %v656_v8, 0.0  ;;  %v665_v17 = vmax.f32 %v657_v9, 0.0  ;;  %v666_v18 = vmax.f32 %v658_v10, 0.0  ;;  %v667_v19 = vmax.f32 %v659_v11, 0.0 }
 0x1ea   : > { %v668_v20 = vmax.f32 %v660_v12, 0.0  ;;  %v669_v21 = vmax.f32 %v661_v13, 0.0  ;;  %v670_v22 = vmax.f32 %v662_v14, 0.0  ;;  %v671_v23 = vmax.f32 %v663_v15, 0.0 }
 0x1eb   : > { %v894_v24 = vpack.c.bf16 %v665_v17, %v664_v16  ;;  %v899_v25 = vpack.c.bf16 %v667_v19, %v666_v18 }
 0x1ec   : > { %v904_v26 = vpack.c.bf16 %v669_v21, %v668_v20  ;;  %v909_v27 = vpack.c.bf16 %v671_v23, %v670_v22 }
 0x1ed   : > { %895 = vst [vmem:[%s1183_s29] sm:$0xff] %v894_v24   ;;  %911 = vst [vmem:[%s1183_s29 + $0x8] sm:$0xff] %v899_v25  }
 0x1ee   : > { %912 = vst [vmem:[%s1183_s29 + $0x10] sm:$0xff] %v904_v26   ;;  %913 = vst [vmem:[%s1183_s29 + $0x18] sm:$0xff] %v909_v27  }
 0x1ef PF: > { %s15_s22 = sadd.s32 1, %s1096_s22   ;;  %s1252_s18 = smov %s1088_s20 }
 0x1f0   : > { %p12_p9 = scmp.ge.s32.totalorder %s15_s22, 10   ;;  %s1253_s19 = smov %s1092_s21 }
 0x1f1   : > { %s1254_s20 = smov %s1257_s23  ;;  %s1255_s21 = smov %s1261_s24 }
 0x1f2   :  { %14 = sbr.rel (!%p12_p9) target bundleno = 3 (0x3), region = 84 }

// kernel: aspp_forward.11
= control target key start
LH: loop header
LB: loop body
LE: loop exit
PB: predicated region body
PF: predicated region fallthrough
CT: control target
= control target key end

     0   :  { %8 = vsyncpa [#allocation4], 0  ;;  %s2347_s0 = inlined_call_operand.vmem [shape: bf16[512,4], index: 0, kind: input, shape index: {}]   ;;  %s2348_s1 = inlined_call_operand.hbm [shape: bf16[4,128], index: 1, kind: input, shape index: {}]   ;;  %s2349_s2 = inlined_call_operand.hbm [shape: f32[1,128], index: 2, kind: input, shape index: {}]   ;;  %s2350_s3 = inlined_call_operand.vmem [shape: bf16[512,128], index: 3, kind: output, shape index: {}]  }
   0x1   :  { %9 = vsyncpa [#allocation6], 0  ;;  %s2011_s12 = smov [#allocation3]   ;;  %s2012_s14 = smov [#allocation5]  }
   0x2   :  { %s18_s13 = sshll.u32 %s2011_s12, 4  ;;  %s28_s15 = sshll.u32 %s2012_s14, 4  ;;  %s19_s13 = int_to_ptr.vmem [resolvable:$true] %s18_s13  ;;  %s29_s15 = int_to_ptr.vmem [resolvable:$true] %s28_s15 }
   0x3   :  { %s1963_s18 = scalar_lea.hbm %s2348_s1, 32 }
   0x4   :  { %p1964_p0 = scmp.ne.s32.totalorder %s2348_s1, %s1963_s18  ;;  %p1967_p1 = scmp.lt.u32.totalorder %s1963_s18, %s2348_s1 }
   0x6   :  { %p1969_p2 = pnand %p1967_p1, %p1964_p0 }
   0x8   :  { %1972 = shalt.err (!%p1969_p2)
}
   0x9   :  { %s1973_s23 = scalar_lea.vmem %s19_s13, 32  ;;  %p1978_p4 = scmp.lt.s32.totalorder %s19_s13, %s19_s13 }
   0xa   :  { %p1974_p3 = scmp.ne.s32.totalorder %s19_s13, %s1973_s23  ;;  %p1979_p5 = scmp.lt.s32.totalorder %s1973_s23, %s1973_s23 }
   0xc   :  { %p1980_p6 = por %p1979_p5, %p1978_p4 }
   0xe   :  { %p1981_p7 = pnand %p1980_p6, %p1974_p3 }
  0x10   :  { %1984 = shalt.err (!%p1981_p7)
}
  0x11   :  { %21 = dma.hbm_to_vmem [thread:$0]  %s2348_s1, 32, %s19_s13, [#allocation4]  }
  0x12   :  { %s1985_s28 = scalar_lea.hbm %s2349_s2, 16 }
  0x13   :  { %p1986_p8 = scmp.ne.s32.totalorder %s2349_s2, %s1985_s28  ;;  %p1989_p9 = scmp.lt.u32.totalorder %s1985_s28, %s2349_s2 }
  0x15   :  { %p1991_p10 = pnand %p1989_p9, %p1986_p8 }
  0x17   :  { %1994 = shalt.err (!%p1991_p10)
}
  0x18   :  { %s1995_s6 = scalar_lea.vmem %s29_s15, 16  ;;  %s1999_s7 = scalar_lea.vmem %s29_s15, 32 }
  0x19   :  { %p1996_p11 = scmp.ne.s32.totalorder %s29_s15, %s1995_s6  ;;  %p2000_p12 = scmp.lt.s32.totalorder %s29_s15, %s29_s15 }
  0x1a   :  { %p2001_p13 = scmp.lt.s32.totalorder %s1999_s7, %s1995_s6 }
  0x1c   :  { %p2002_p0 = por %p2001_p13, %p2000_p12 }
  0x1e   :  { %p2003_p1 = pnand %p2002_p0, %p1996_p11 }
  0x20   :  { %2006 = shalt.err (!%p2003_p1)
}
  0x21   :  { %31 = dma.hbm_to_vmem [thread:$0]  %s2349_s2, 16, %s29_s15, [#allocation6]  }
  0x22   :  { %2007 = dma.done.wait [#allocation4], 32  }
  0x23   :  { %2008 = vsyncadd [#allocation4], 4294967264 }
  0x24   :  { %2009 = dma.done.wait [#allocation6], 16  }
  0x25   :  { %2010 = vsyncadd [#allocation6], 4294967280  ;;  %vm493_vm0 = vcmask 1041408   ;;  %vm396_vm1 = vcmask 31744   ;;  %v235_v0 = vld [vmem:[#allocation3] sm:$0x3] }
  0x26   :  { %1927 = vmatprep.subr.msk.bf16.mxu0 %vm493_vm0, %v235_v0  ;;  %1928 = vmatprep.subr.msk.bf16.mxu1 %vm493_vm0, %v235_v0  ;;  %v495_v1 = vsel %vm493_vm0, %v235_v0, 0  ;;  %v1931_v2 = vld [vmem:[%s2347_s0] sm:$0xff]   ;;  %v1933_v4 = vld [vmem:[%s2347_s0 + $0x8] sm:$0xff]   ;;  %v1935_v6 = vld [vmem:[%s2347_s0 + $0x10] sm:$0xff]  }
  0x27   :  { %1860 = vmatpush3.bf16.msra.mxu0 %v495_v1  ;;  %1926 = vmatpush3.bf16.msra.mxu1 %v495_v1  ;;  %v1932_v3 = vld [vmem:[%s2347_s0 + $0x80] sm:$0xff]   ;;  %v1934_v5 = vld [vmem:[%s2347_s0 + $0x88] sm:$0xff]   ;;  %v1936_v7 = vld [vmem:[%s2347_s0 + $0x90] sm:$0xff]  }
  0x28   :  { %1861 = vmatprep.mubr.msk.bf16.mxu0 %vm396_vm1, %v1931_v2  ;;  %1893 = vmatprep.mubr.msk.bf16.mxu1 %vm396_vm1, %v1932_v3  ;;  %v1937_v8 = vld [vmem:[%s2347_s0 + $0x18] sm:$0xff]   ;;  %v1939_v10 = vld [vmem:[%s2347_s0 + $0x20] sm:$0xff]   ;;  %v1941_v12 = vld [vmem:[%s2347_s0 + $0x28] sm:$0xff]  }
  0x29   :  { %v1938_v9 = vld [vmem:[%s2347_s0 + $0x98] sm:$0xff]   ;;  %v1940_v11 = vld [vmem:[%s2347_s0 + $0xa0] sm:$0xff]   ;;  %v1942_v13 = vld [vmem:[%s2347_s0 + $0xa8] sm:$0xff]  }
  0x2a   :  { %1862 = vmatmul.mubr.msk.bf16.vlgmr.msra.gmra.mrb[0].mxu0 %vm396_vm1, %v1933_v4  ;;  %1894 = vmatmul.mubr.msk.bf16.vlgmr.msra.gmra.mrb[0].mxu1 %vm396_vm1, %v1934_v5  ;;  %v1943_v14 = vld [vmem:[%s2347_s0 + $0x30] sm:$0xff]   ;;  %v1945_v16 = vld [vmem:[%s2347_s0 + $0x38] sm:$0xff]   ;;  %v1947_v18 = vld [vmem:[%s2347_s0 + $0x40] sm:$0xff]  }
  0x2b   :  { %1865 = vmatprep.mubr.msk.bf16.mxu0 %vm396_vm1, %v1935_v6  ;;  %1897 = vmatprep.mubr.msk.bf16.mxu1 %vm396_vm1, %v1936_v7  ;;  %v1944_v15 = vld [vmem:[%s2347_s0 + $0xb0] sm:$0xff]   ;;  %v1946_v17 = vld [vmem:[%s2347_s0 + $0xb8] sm:$0xff]   ;;  %v1948_v19 = vld [vmem:[%s2347_s0 + $0xc0] sm:$0xff]  }
  0x2c   :  { %v1949_v20 = vld [vmem:[%s2347_s0 + $0x48] sm:$0xff]   ;;  %v1951_v22 = vld [vmem:[%s2347_s0 + $0x50] sm:$0xff]   ;;  %v1953_v24 = vld [vmem:[%s2347_s0 + $0x58] sm:$0xff]  }
  0x2d   :  { %v1950_v21 = vld [vmem:[%s2347_s0 + $0xc8] sm:$0xff]   ;;  %v1952_v23 = vld [vmem:[%s2347_s0 + $0xd0] sm:$0xff]   ;;  %v1954_v25 = vld [vmem:[%s2347_s0 + $0xd8] sm:$0xff]  }
  0x2e   :  { %v1955_v26 = vld [vmem:[%s2347_s0 + $0x60] sm:$0xff]   ;;  %v1957_v28 = vld [vmem:[%s2347_s0 + $0x68] sm:$0xff]   ;;  %v1959_v30 = vld [vmem:[%s2347_s0 + $0x70] sm:$0xff]  }
  0x2f   :  { %v1956_v27 = vld [vmem:[%s2347_s0 + $0xe0] sm:$0xff]   ;;  %v1958_v29 = vld [vmem:[%s2347_s0 + $0xe8] sm:$0xff]   ;;  %v1960_v31 = vld [vmem:[%s2347_s0 + $0xf0] sm:$0xff]  }
  0x30   :  { %v1961_v32 = vld [vmem:[%s2347_s0 + $0x78] sm:$0xff]   ;;  %v2185_v34 = vld [vmem:[#allocation5] ss:$0 sm:$0xff] }
  0x31   :  { %v1962_v33 = vld [vmem:[%s2347_s0 + $0xf8] sm:$0xff]  }
  0x32   :  { %1866 = vmatmul.mubr.msk.bf16.gmra.mrb[4].mxu0 %vm396_vm1, %v1937_v8  ;;  %1898 = vmatmul.mubr.msk.bf16.gmra.mrb[4].mxu1 %vm396_vm1, %v1938_v9 }
  0x33   :  { %1869 = vmatprep.mubr.msk.bf16.mxu0 %vm396_vm1, %v1939_v10  ;;  %1901 = vmatprep.mubr.msk.bf16.mxu1 %vm396_vm1, %v1940_v11 }
  0x3a   :  { %1870 = vmatmul.mubr.msk.bf16.gmra.mrb[8].mxu0 %vm396_vm1, %v1941_v12  ;;  %1902 = vmatmul.mubr.msk.bf16.gmra.mrb[8].mxu1 %vm396_vm1, %v1942_v13 }
  0x3b   :  { %1873 = vmatprep.mubr.msk.bf16.mxu0 %vm396_vm1, %v1943_v14  ;;  %1905 = vmatprep.mubr.msk.bf16.mxu1 %vm396_vm1, %v1944_v15 }
  0x42   :  { %1874 = vmatmul.mubr.msk.bf16.gmra.mrb[12].mxu0 %vm396_vm1, %v1945_v16  ;;  %1906 = vmatmul.mubr.msk.bf16.gmra.mrb[12].mxu1 %vm396_vm1, %v1946_v17 }
  0x43   :  { %1877 = vmatprep.mubr.msk.bf16.mxu0 %vm396_vm1, %v1947_v18  ;;  %1909 = vmatprep.mubr.msk.bf16.mxu1 %vm396_vm1, %v1948_v19 }
  0x4a   :  { %1878 = vmatmul.mubr.msk.bf16.gmra.mrb[16].mxu0 %vm396_vm1, %v1949_v20  ;;  %1910 = vmatmul.mubr.msk.bf16.gmra.mrb[16].mxu1 %vm396_vm1, %v1950_v21 }
  0x4b   :  { %1881 = vmatprep.mubr.msk.bf16.mxu0 %vm396_vm1, %v1951_v22  ;;  %1913 = vmatprep.mubr.msk.bf16.mxu1 %vm396_vm1, %v1952_v23 }
  0x52   :  { %1882 = vmatmul.mubr.msk.bf16.gmra.mrb[20].mxu0 %vm396_vm1, %v1953_v24  ;;  %1914 = vmatmul.mubr.msk.bf16.gmra.mrb[20].mxu1 %vm396_vm1, %v1954_v25 }
  0x53   :  { %1885 = vmatprep.mubr.msk.bf16.mxu0 %vm396_vm1, %v1955_v26  ;;  %1917 = vmatprep.mubr.msk.bf16.mxu1 %vm396_vm1, %v1956_v27 }
  0x5a   :  { %1886 = vmatmul.mubr.msk.bf16.gmra.mrb[24].mxu0 %vm396_vm1, %v1957_v28  ;;  %1918 = vmatmul.mubr.msk.bf16.gmra.mrb[24].mxu1 %vm396_vm1, %v1958_v29 }
  0x5b   :  { %1889 = vmatprep.mubr.msk.bf16.mxu0 %vm396_vm1, %v1959_v30  ;;  %1921 = vmatprep.mubr.msk.bf16.mxu1 %vm396_vm1, %v1960_v31 }
  0x62   :  { %1890 = vmatmul.mubr.msk.bf16.gmra.mrb[28].mxu0 %vm396_vm1, %v1961_v32  ;;  %1922 = vmatmul.mubr.msk.bf16.gmra.mrb[28].mxu1 %vm396_vm1, %v1962_v33 }
  0xfd   :  { %v1863_v35 = vpop.f32.mrb[0].mxu0  ;;  %v1895_v37 = vpop.f32.mrb[0].mxu1 }
  0xfe   :  { %v990_v36 = vadd.f32 %v1863_v35, %v2185_v34  ;;  %v531_v38 = vpop.f32.mrb[1].mxu0  ;;  %v1022_v39 = vadd.f32 %v1895_v37, %v2185_v34  ;;  %v659_v41 = vpop.f32.mrb[1].mxu1 }
  0xff   :  { %v988_v40 = vadd.f32 %v2185_v34, %v531_v38  ;;  %v1864_v42 = vpop.f32.mrb[2].mxu0  ;;  %v1020_v43 = vadd.f32 %v2185_v34, %v659_v41  ;;  %v1896_v45 = vpop.f32.mrb[2].mxu1 }
 0x100   :  { %v991_v44 = vadd.f32 %v1864_v42, %v2185_v34  ;;  %v534_v46 = vpop.f32.mrb[3].mxu0  ;;  %v1023_v47 = vadd.f32 %v1896_v45, %v2185_v34  ;;  %v662_v49 = vpop.f32.mrb[3].mxu1  ;;  %v1054_v50 = vmax.f32 %v990_v36, 0.0  ;;  %v1086_v53 = vmax.f32 %v1022_v39, 0.0 }
 0x101   :  { %v989_v48 = vadd.f32 %v2185_v34, %v534_v46  ;;  %v1021_v52 = vadd.f32 %v2185_v34, %v662_v49  ;;  %v1052_v54 = vmax.f32 %v988_v40, 0.0  ;;  %v1084_v57 = vmax.f32 %v1020_v43, 0.0 }
 0x102   :  { %v1055_v51 = vmax.f32 %v991_v44, 0.0  ;;  %v1087_v55 = vmax.f32 %v1023_v47, 0.0 }
 0x103   :  { %v1053_v56 = vmax.f32 %v989_v48, 0.0  ;;  %v1085_v59 = vmax.f32 %v1021_v52, 0.0 }
 0x104   :  { %v1643_v58 = vpack.c.bf16 %v1055_v51, %v1054_v50  ;;  %v1723_v60 = vpack.c.bf16 %v1087_v55, %v1086_v53 }
 0x105   :  { %v1638_v61 = vpack.c.bf16 %v1053_v56, %v1052_v54  ;;  %v1867_v62 = vpop.f32.mrb[4].mxu0  ;;  %v1718_v63 = vpack.c.bf16 %v1085_v59, %v1084_v57  ;;  %v1899_v1 = vpop.f32.mrb[4].mxu1 }
 0x106   :  { %1795 = vst [vmem:[%s2350_s3 + $0x8] sm:$0xff] %v1643_v58   ;;  %v994_v0 = vadd.f32 %v1867_v62, %v2185_v34  ;;  %v547_v2 = vpop.f32.mrb[5].mxu0  ;;  %1811 = vst [vmem:[%s2350_s3 + $0x88] sm:$0xff] %v1723_v60   ;;  %v1026_v3 = vadd.f32 %v1899_v1, %v2185_v34  ;;  %v675_v5 = vpop.f32.mrb[5].mxu1 }
 0x107   :  { %1639 = vst [vmem:[%s2350_s3] sm:$0xff] %v1638_v61   ;;  %v992_v4 = vadd.f32 %v2185_v34, %v547_v2  ;;  %v1868_v6 = vpop.f32.mrb[6].mxu0  ;;  %1810 = vst [vmem:[%s2350_s3 + $0x80] sm:$0xff] %v1718_v63   ;;  %v1024_v7 = vadd.f32 %v2185_v34, %v675_v5  ;;  %v1900_v9 = vpop.f32.mrb[6].mxu1 }
 0x108   :  { %v995_v8 = vadd.f32 %v1868_v6, %v2185_v34  ;;  %v550_v10 = vpop.f32.mrb[7].mxu0  ;;  %v1027_v11 = vadd.f32 %v1900_v9, %v2185_v34  ;;  %v678_v13 = vpop.f32.mrb[7].mxu1  ;;  %v1058_v14 = vmax.f32 %v994_v0, 0.0  ;;  %v1090_v17 = vmax.f32 %v1026_v3, 0.0 }
 0x109   :  { %v993_v12 = vadd.f32 %v2185_v34, %v550_v10  ;;  %v1025_v16 = vadd.f32 %v2185_v34, %v678_v13  ;;  %v1056_v18 = vmax.f32 %v992_v4, 0.0  ;;  %v1088_v21 = vmax.f32 %v1024_v7, 0.0 }
 0x10a   :  { %v1059_v15 = vmax.f32 %v995_v8, 0.0  ;;  %v1091_v19 = vmax.f32 %v1027_v11, 0.0 }
 0x10b   :  { %v1057_v20 = vmax.f32 %v993_v12, 0.0  ;;  %v1089_v23 = vmax.f32 %v1025_v16, 0.0 }
 0x10c   :  { %v1653_v22 = vpack.c.bf16 %v1059_v15, %v1058_v14  ;;  %v1733_v24 = vpack.c.bf16 %v1091_v19, %v1090_v17 }
 0x10d   :  { %v1648_v25 = vpack.c.bf16 %v1057_v20, %v1056_v18  ;;  %v1871_v26 = vpop.f32.mrb[8].mxu0  ;;  %v1728_v27 = vpack.c.bf16 %v1089_v23, %v1088_v21  ;;  %v1903_v29 = vpop.f32.mrb[8].mxu1 }
 0x10e   :  { %1797 = vst [vmem:[%s2350_s3 + $0x18] sm:$0xff] %v1653_v22   ;;  %v998_v28 = vadd.f32 %v1871_v26, %v2185_v34  ;;  %v563_v30 = vpop.f32.mrb[9].mxu0  ;;  %1813 = vst [vmem:[%s2350_s3 + $0x98] sm:$0xff] %v1733_v24   ;;  %v1030_v31 = vadd.f32 %v1903_v29, %v2185_v34  ;;  %v691_v33 = vpop.f32.mrb[9].mxu1 }
 0x10f   :  { %1796 = vst [vmem:[%s2350_s3 + $0x10] sm:$0xff] %v1648_v25   ;;  %v996_v32 = vadd.f32 %v2185_v34, %v563_v30  ;;  %v1872_v35 = vpop.f32.mrb[10].mxu0  ;;  %1812 = vst [vmem:[%s2350_s3 + $0x90] sm:$0xff] %v1728_v27   ;;  %v1028_v36 = vadd.f32 %v2185_v34, %v691_v33  ;;  %v1904_v38 = vpop.f32.mrb[10].mxu1 }
 0x110   :  { %v999_v37 = vadd.f32 %v1872_v35, %v2185_v34  ;;  %v566_v39 = vpop.f32.mrb[11].mxu0  ;;  %v1031_v40 = vadd.f32 %v1904_v38, %v2185_v34  ;;  %v694_v42 = vpop.f32.mrb[11].mxu1  ;;  %v1062_v43 = vmax.f32 %v998_v28, 0.0  ;;  %v1094_v46 = vmax.f32 %v1030_v31, 0.0 }
 0x111   :  { %v997_v41 = vadd.f32 %v2185_v34, %v566_v39  ;;  %v1029_v45 = vadd.f32 %v2185_v34, %v694_v42  ;;  %v1060_v47 = vmax.f32 %v996_v32, 0.0  ;;  %v1092_v50 = vmax.f32 %v1028_v36, 0.0 }
 0x112   :  { %v1063_v44 = vmax.f32 %v999_v37, 0.0  ;;  %v1095_v48 = vmax.f32 %v1031_v40, 0.0 }
 0x113   :  { %v1061_v49 = vmax.f32 %v997_v41, 0.0  ;;  %v1093_v52 = vmax.f32 %v1029_v45, 0.0 }
 0x114   :  { %v1663_v51 = vpack.c.bf16 %v1063_v44, %v1062_v43  ;;  %v1743_v53 = vpack.c.bf16 %v1095_v48, %v1094_v46 }
 0x115   :  { %v1658_v54 = vpack.c.bf16 %v1061_v49, %v1060_v47  ;;  %v1875_v55 = vpop.f32.mrb[12].mxu0  ;;  %v1738_v56 = vpack.c.bf16 %v1093_v52, %v1092_v50  ;;  %v1907_v58 = vpop.f32.mrb[12].mxu1 }
 0x116   :  { %1799 = vst [vmem:[%s2350_s3 + $0x28] sm:$0xff] %v1663_v51   ;;  %v1002_v57 = vadd.f32 %v1875_v55, %v2185_v34  ;;  %v579_v59 = vpop.f32.mrb[13].mxu0  ;;  %1815 = vst [vmem:[%s2350_s3 + $0xa8] sm:$0xff] %v1743_v53   ;;  %v1034_v60 = vadd.f32 %v1907_v58, %v2185_v34  ;;  %v707_v62 = vpop.f32.mrb[13].mxu1 }
 0x117   :  { %1798 = vst [vmem:[%s2350_s3 + $0x20] sm:$0xff] %v1658_v54   ;;  %v1000_v61 = vadd.f32 %v2185_v34, %v579_v59  ;;  %v1876_v63 = vpop.f32.mrb[14].mxu0  ;;  %1814 = vst [vmem:[%s2350_s3 + $0xa0] sm:$0xff] %v1738_v56   ;;  %v1032_v0 = vadd.f32 %v2185_v34, %v707_v62  ;;  %v1908_v2 = vpop.f32.mrb[14].mxu1 }
 0x118   :  { %v1003_v1 = vadd.f32 %v1876_v63, %v2185_v34  ;;  %v582_v3 = vpop.f32.mrb[15].mxu0  ;;  %v1035_v4 = vadd.f32 %v1908_v2, %v2185_v34  ;;  %v710_v6 = vpop.f32.mrb[15].mxu1  ;;  %v1066_v7 = vmax.f32 %v1002_v57, 0.0  ;;  %v1098_v10 = vmax.f32 %v1034_v60, 0.0 }
 0x119   :  { %v1001_v5 = vadd.f32 %v2185_v34, %v582_v3  ;;  %v1033_v9 = vadd.f32 %v2185_v34, %v710_v6  ;;  %v1064_v11 = vmax.f32 %v1000_v61, 0.0  ;;  %v1096_v14 = vmax.f32 %v1032_v0, 0.0 }
 0x11a   :  { %v1067_v8 = vmax.f32 %v1003_v1, 0.0  ;;  %v1099_v12 = vmax.f32 %v1035_v4, 0.0 }
 0x11b   :  { %v1065_v13 = vmax.f32 %v1001_v5, 0.0  ;;  %v1097_v16 = vmax.f32 %v1033_v9, 0.0 }
 0x11c   :  { %v1673_v15 = vpack.c.bf16 %v1067_v8, %v1066_v7  ;;  %v1753_v17 = vpack.c.bf16 %v1099_v12, %v1098_v10 }
 0x11d   :  { %v1668_v18 = vpack.c.bf16 %v1065_v13, %v1064_v11  ;;  %v1879_v19 = vpop.f32.mrb[16].mxu0  ;;  %v1748_v20 = vpack.c.bf16 %v1097_v16, %v1096_v14  ;;  %v1911_v22 = vpop.f32.mrb[16].mxu1 }
 0x11e   :  { %1801 = vst [vmem:[%s2350_s3 + $0x38] sm:$0xff] %v1673_v15   ;;  %v1006_v21 = vadd.f32 %v1879_v19, %v2185_v34  ;;  %v595_v23 = vpop.f32.mrb[17].mxu0  ;;  %1817 = vst [vmem:[%s2350_s3 + $0xb8] sm:$0xff] %v1753_v17   ;;  %v1038_v24 = vadd.f32 %v1911_v22, %v2185_v34  ;;  %v723_v26 = vpop.f32.mrb[17].mxu1 }
 0x11f   :  { %1800 = vst [vmem:[%s2350_s3 + $0x30] sm:$0xff] %v1668_v18   ;;  %v1004_v25 = vadd.f32 %v2185_v34, %v595_v23  ;;  %v1880_v27 = vpop.f32.mrb[18].mxu0  ;;  %1816 = vst [vmem:[%s2350_s3 + $0xb0] sm:$0xff] %v1748_v20   ;;  %v1036_v28 = vadd.f32 %v2185_v34, %v723_v26  ;;  %v1912_v30 = vpop.f32.mrb[18].mxu1 }
 0x120   :  { %v1007_v29 = vadd.f32 %v1880_v27, %v2185_v34  ;;  %v598_v31 = vpop.f32.mrb[19].mxu0  ;;  %v1039_v32 = vadd.f32 %v1912_v30, %v2185_v34  ;;  %v726_v35 = vpop.f32.mrb[19].mxu1  ;;  %v1070_v36 = vmax.f32 %v1006_v21, 0.0  ;;  %v1102_v39 = vmax.f32 %v1038_v24, 0.0 }
 0x121   :  { %v1005_v33 = vadd.f32 %v2185_v34, %v598_v31  ;;  %v1037_v38 = vadd.f32 %v2185_v34, %v726_v35  ;;  %v1068_v40 = vmax.f32 %v1004_v25, 0.0  ;;  %v1100_v43 = vmax.f32 %v1036_v28, 0.0 }
 0x122   :  { %v1071_v37 = vmax.f32 %v1007_v29, 0.0  ;;  %v1103_v41 = vmax.f32 %v1039_v32, 0.0 }
 0x123   :  { %v1069_v42 = vmax.f32 %v1005_v33, 0.0  ;;  %v1101_v45 = vmax.f32 %v1037_v38, 0.0 }
 0x124   :  { %v1683_v44 = vpack.c.bf16 %v1071_v37, %v1070_v36  ;;  %v1763_v46 = vpack.c.bf16 %v1103_v41, %v1102_v39 }
 0x125   :  { %v1678_v47 = vpack.c.bf16 %v1069_v42, %v1068_v40  ;;  %v1883_v48 = vpop.f32.mrb[20].mxu0  ;;  %v1758_v49 = vpack.c.bf16 %v1101_v45, %v1100_v43  ;;  %v1915_v51 = vpop.f32.mrb[20].mxu1 }
 0x126   :  { %1803 = vst [vmem:[%s2350_s3 + $0x48] sm:$0xff] %v1683_v44   ;;  %v1010_v50 = vadd.f32 %v1883_v48, %v2185_v34  ;;  %v611_v52 = vpop.f32.mrb[21].mxu0  ;;  %1819 = vst [vmem:[%s2350_s3 + $0xc8] sm:$0xff] %v1763_v46   ;;  %v1042_v53 = vadd.f32 %v1915_v51, %v2185_v34  ;;  %v739_v55 = vpop.f32.mrb[21].mxu1 }
 0x127   :  { %1802 = vst [vmem:[%s2350_s3 + $0x40] sm:$0xff] %v1678_v47   ;;  %v1008_v54 = vadd.f32 %v2185_v34, %v611_v52  ;;  %v1884_v56 = vpop.f32.mrb[22].mxu0  ;;  %1818 = vst [vmem:[%s2350_s3 + $0xc0] sm:$0xff] %v1758_v49   ;;  %v1040_v57 = vadd.f32 %v2185_v34, %v739_v55  ;;  %v1916_v59 = vpop.f32.mrb[22].mxu1 }
 0x128   :  { %v1011_v58 = vadd.f32 %v1884_v56, %v2185_v34  ;;  %v614_v60 = vpop.f32.mrb[23].mxu0  ;;  %v1043_v61 = vadd.f32 %v1916_v59, %v2185_v34  ;;  %v742_v63 = vpop.f32.mrb[23].mxu1  ;;  %v1074_v0 = vmax.f32 %v1010_v50, 0.0  ;;  %v1106_v3 = vmax.f32 %v1042_v53, 0.0 }
 0x129   :  { %v1009_v62 = vadd.f32 %v2185_v34, %v614_v60  ;;  %v1041_v2 = vadd.f32 %v2185_v34, %v742_v63  ;;  %v1072_v4 = vmax.f32 %v1008_v54, 0.0  ;;  %v1104_v7 = vmax.f32 %v1040_v57, 0.0 }
 0x12a   :  { %v1075_v1 = vmax.f32 %v1011_v58, 0.0  ;;  %v1107_v5 = vmax.f32 %v1043_v61, 0.0 }
 0x12b   :  { %v1073_v6 = vmax.f32 %v1009_v62, 0.0  ;;  %v1105_v9 = vmax.f32 %v1041_v2, 0.0 }
 0x12c   :  { %v1693_v8 = vpack.c.bf16 %v1075_v1, %v1074_v0  ;;  %v1773_v10 = vpack.c.bf16 %v1107_v5, %v1106_v3 }
 0x12d   :  { %v1688_v11 = vpack.c.bf16 %v1073_v6, %v1072_v4  ;;  %v1887_v12 = vpop.f32.mrb[24].mxu0  ;;  %v1768_v13 = vpack.c.bf16 %v1105_v9, %v1104_v7  ;;  %v1919_v15 = vpop.f32.mrb[24].mxu1 }
 0x12e   :  { %1805 = vst [vmem:[%s2350_s3 + $0x58] sm:$0xff] %v1693_v8   ;;  %v1014_v14 = vadd.f32 %v1887_v12, %v2185_v34  ;;  %v627_v16 = vpop.f32.mrb[25].mxu0  ;;  %1821 = vst [vmem:[%s2350_s3 + $0xd8] sm:$0xff] %v1773_v10   ;;  %v1046_v17 = vadd.f32 %v1919_v15, %v2185_v34  ;;  %v755_v19 = vpop.f32.mrb[25].mxu1 }
 0x12f   :  { %1804 = vst [vmem:[%s2350_s3 + $0x50] sm:$0xff] %v1688_v11   ;;  %v1012_v18 = vadd.f32 %v2185_v34, %v627_v16  ;;  %v1888_v20 = vpop.f32.mrb[26].mxu0  ;;  %1820 = vst [vmem:[%s2350_s3 + $0xd0] sm:$0xff] %v1768_v13   ;;  %v1044_v21 = vadd.f32 %v2185_v34, %v755_v19  ;;  %v1920_v23 = vpop.f32.mrb[26].mxu1 }
 0x130   :  { %v1015_v22 = vadd.f32 %v1888_v20, %v2185_v34  ;;  %v630_v24 = vpop.f32.mrb[27].mxu0  ;;  %v1047_v25 = vadd.f32 %v1920_v23, %v2185_v34  ;;  %v758_v27 = vpop.f32.mrb[27].mxu1  ;;  %v1078_v28 = vmax.f32 %v1014_v14, 0.0  ;;  %v1110_v31 = vmax.f32 %v1046_v17, 0.0 }
 0x131   :  { %v1013_v26 = vadd.f32 %v2185_v34, %v630_v24  ;;  %v1045_v30 = vadd.f32 %v2185_v34, %v758_v27  ;;  %v1076_v32 = vmax.f32 %v1012_v18, 0.0  ;;  %v1108_v36 = vmax.f32 %v1044_v21, 0.0 }
 0x132   :  { %v1079_v29 = vmax.f32 %v1015_v22, 0.0  ;;  %v1111_v33 = vmax.f32 %v1047_v25, 0.0 }
 0x133   :  { %v1077_v35 = vmax.f32 %v1013_v26, 0.0  ;;  %v1109_v38 = vmax.f32 %v1045_v30, 0.0 }
 0x134   :  { %v1703_v37 = vpack.c.bf16 %v1079_v29, %v1078_v28  ;;  %v1783_v39 = vpack.c.bf16 %v1111_v33, %v1110_v31 }
 0x135   :  { %v1698_v40 = vpack.c.bf16 %v1077_v35, %v1076_v32  ;;  %v1891_v41 = vpop.f32.mrb[28].mxu0  ;;  %v1778_v42 = vpack.c.bf16 %v1109_v38, %v1108_v36  ;;  %v1923_v44 = vpop.f32.mrb[28].mxu1 }
 0x136   :  { %1807 = vst [vmem:[%s2350_s3 + $0x68] sm:$0xff] %v1703_v37   ;;  %v1018_v43 = vadd.f32 %v1891_v41, %v2185_v34  ;;  %v643_v45 = vpop.f32.mrb[29].mxu0  ;;  %1823 = vst [vmem:[%s2350_s3 + $0xe8] sm:$0xff] %v1783_v39   ;;  %v1050_v46 = vadd.f32 %v1923_v44, %v2185_v34  ;;  %v771_v48 = vpop.f32.mrb[29].mxu1 }
 0x137   :  { %1806 = vst [vmem:[%s2350_s3 + $0x60] sm:$0xff] %v1698_v40   ;;  %v1016_v47 = vadd.f32 %v2185_v34, %v643_v45  ;;  %v1892_v49 = vpop.f32.mrb[30].mxu0  ;;  %1822 = vst [vmem:[%s2350_s3 + $0xe0] sm:$0xff] %v1778_v42   ;;  %v1048_v50 = vadd.f32 %v2185_v34, %v771_v48  ;;  %v1924_v52 = vpop.f32.mrb[30].mxu1 }
 0x138   :  { %v1019_v51 = vadd.f32 %v1892_v49, %v2185_v34  ;;  %v646_v53 = vpop.f32.mrb[31].mxu0  ;;  %v1051_v54 = vadd.f32 %v1924_v52, %v2185_v34  ;;  %v774_v56 = vpop.f32.mrb[31].mxu1  ;;  %v1082_v57 = vmax.f32 %v1018_v43, 0.0  ;;  %v1114_v60 = vmax.f32 %v1050_v46, 0.0 }
 0x139   :  { %v1017_v55 = vadd.f32 %v2185_v34, %v646_v53  ;;  %v1049_v59 = vadd.f32 %v2185_v34, %v774_v56  ;;  %v1080_v61 = vmax.f32 %v1016_v47, 0.0  ;;  %v1112_v0 = vmax.f32 %v1048_v50, 0.0 }
 0x13a   :  { %v1083_v58 = vmax.f32 %v1019_v51, 0.0  ;;  %v1115_v62 = vmax.f32 %v1051_v54, 0.0 }
 0x13b   :  { %v1081_v63 = vmax.f32 %v1017_v55, 0.0  ;;  %v1113_v2 = vmax.f32 %v1049_v59, 0.0 }
 0x13c   :  { %v1713_v1 = vpack.c.bf16 %v1083_v58, %v1082_v57  ;;  %v1793_v3 = vpack.c.bf16 %v1115_v62, %v1114_v60 }
 0x13d   :  { %v1708_v4 = vpack.c.bf16 %v1081_v63, %v1080_v61  ;;  %v1788_v5 = vpack.c.bf16 %v1113_v2, %v1112_v0 }
 0x13e   :  { %1809 = vst [vmem:[%s2350_s3 + $0x78] sm:$0xff] %v1713_v1   ;;  %1825 = vst [vmem:[%s2350_s3 + $0xf8] sm:$0xff] %v1793_v3  }
 0x13f   :  { %1808 = vst [vmem:[%s2350_s3 + $0x70] sm:$0xff] %v1708_v4   ;;  %1824 = vst [vmem:[%s2350_s3 + $0xf0] sm:$0xff] %v1788_v5  }
 0x140   :  { %1440 = vsyncpa [#allocation4], 1 }
 0x141   :  { %1441 = vsyncpa [#allocation6], 1 }

// kernel: aspp_forward.7
= control target key start
LH: loop header
LB: loop body
LE: loop exit
PB: predicated region body
PF: predicated region fallthrough
CT: control target
= control target key end

     0   :  { %9 = vsyncpa [#allocation5], 0  ;;  %s2518_s0 = inlined_call_operand.vmem [shape: bf16[2,8,8,32], index: 0, kind: input, shape index: {}]   ;;  %s2519_s1 = inlined_call_operand.hbm [shape: bf16[32,128], index: 1, kind: input, shape index: {}]   ;;  %s2520_s2 = inlined_call_operand.vmem [shape: bf16[3,9,32,128], index: 2, kind: input, shape index: {}]   ;;  %s2521_s3 = inlined_call_operand.hbm [shape: f32[4,128], index: 3, kind: input, shape index: {}]   ;;  %s2522_s4 = inlined_call_operand.vmem [shape: bf16[4,2,64,128], index: 4, kind: output, shape index: {}]  }
   0x1   :  { %10 = vsyncpa [#allocation7], 0  ;;  %s2312_s15 = smov 0   ;;  %s2314_s16 = smov 0  }
   0x2   :  { %s2316_s17 = smov 0   ;;  %s2318_s18 = smov 0  }
   0x3   :  { %s2320_s19 = smov 0  }
   0x4 LB: > { %s1772_s20 = sadd.s32 4294967295, %s2281_s19   ;;  %s28_s21 = sadd.s32 1, %s2277_s18  ;;  %s2281_s19 = sphi %s2320_s19, %s16_s19   ;;  %s2277_s18 = sphi %s2318_s18, %s2536_s18   ;;  %s2273_s17 = sphi %s2316_s17, %s2535_s17   ;;  %s2269_s16 = sphi %s2314_s16, %s2534_s16   ;;  %s2265_s15 = sphi %s2312_s15, %s2533_s15  }
   0x5   : > { %p30_p0 = scmp.ge.s32.totalorder %s28_s21, 2  ;;  %s136_s22 = sadd.s32 1, %s2269_s16 }
   0x6   : > { %p146_p1 = scmp.ne.s32.totalorder %s2269_s16, %s2265_s15  ;;  %p147_p2 = scmp.eq.s32.totalorder %s1772_s20, 1 }
   0x7   : > { %s2538_s21 = smov (%p30_p0, %s28_s21), 0  ;;  %p1774_p4 = scmp.ge.s32.totalorder %s2281_s19, 1 }
   0x8   : > { %p2344_p3 = por %p147_p2, %p146_p1  ;;  %s133_s24 = ssub.s32 %s2277_s18, %s2538_s21 }
   0x9   : > { %p160_p5 = scmp.lt.s32.totalorder %s2281_s19, 3  ;;  %p134_p6 = scmp.eq.s32.totalorder %s133_s24, 0 }
   0xa   : > { %s2526_s23 = scalar_select %p2344_p3, 1, 0 }
   0xb   : > { %p2352_p7 = pnand %p1774_p4, %p160_p5  ;;  %p2356_p8 = scmp.eq.s32.totalorder %s1772_s20, 0 }
   0xc   : > { %s2361_s27 = scalar_select %p134_p6, %s2269_s16, %s136_s22  }
   0xd   : > { %s2527_s25 = scalar_select %p2352_p7, 1, 0 }
   0xe   : > { %s2528_s26 = scalar_select %p2356_p8, 1, 0 }
   0xf   : > { %p2107_p9 = pneg %p2352_p7  ;;  %s2283_s28 = smov [#allocation4]  }
  0x10   : > { %s175_s29 = sshll.u32 %s2283_s28, 4  ;;  %s2284_s5 = smov [#allocation6]   ;;  %s176_s29 = int_to_ptr.vmem [resolvable:$true] %s175_s29 }
  0x11   : > { %p2367_p10 = pnand %p2356_p8, %p2107_p9  ;;  %s198_s6 = sshll.u32 %s2284_s5, 4  ;;  %s199_s6 = int_to_ptr.vmem [resolvable:$true] %s198_s6 }
  0x12   : > { %s2179_s9 = scalar_lea.hbm %s2519_s1, 256 }
  0x13   : > { %p2180_p11 = scmp.ne.s32.totalorder %s2519_s1, %s2179_s9  ;;  %p2181_p12 = pneg %p2367_p10 }
  0x14   : > { %p2186_p1 = scmp.lt.u32.totalorder %s2179_s9, %s2519_s1 }
  0x15   : > { %p2182_p13 = pnand %p2181_p12, %p2180_p11 }
  0x17   : > { %p2183_p0 = pneg %p2182_p13 }
  0x19   : > { %p2188_p2 = pnand %p2186_p1, %p2183_p0 }
  0x1b   : > { %2191 = shalt.err (!%p2188_p2)
}
  0x1c   : > { %s2192_s14 = scalar_lea.vmem %s176_s29, 256  ;;  %p2200_p9 = scmp.lt.s32.totalorder %s176_s29, %s176_s29 }
  0x1d   : > { %p2193_p4 = scmp.ne.s32.totalorder %s176_s29, %s2192_s14  ;;  %p2201_p3 = scmp.lt.s32.totalorder %s2192_s14, %s2192_s14 }
  0x1f   : > { %p2195_p5 = pnand %p2193_p4, %p2181_p12  ;;  %p2202_p8 = por %p2201_p3, %p2200_p9 }
  0x21   : > { %p2196_p6 = pneg %p2195_p5 }
  0x23   : > { %p2203_p7 = pnand %p2202_p8, %p2196_p6 }
  0x25   : > { %2206 = shalt.err (!%p2203_p7)
}
  0x26   : > { %s2285_s20 = smov 64   ;;  %s2286_s22 = smov 4  }
  0x27   : > { %2110 = dma.hbm_to_vmem [thread:$0]  (!%p2367_p10), %s2519_s1, 256, %s176_s29, [#allocation5], %s2285_s20, %s2285_s20, %s2286_s22  }
  0x28   : > { %s2207_s8 = scalar_lea.hbm %s2521_s3, 64 }
  0x29   : > { %p2208_p3 = scmp.ne.s32.totalorder %s2521_s3, %s2207_s8  ;;  %p2214_p11 = scmp.lt.u32.totalorder %s2207_s8, %s2521_s3 }
  0x2b   : > { %p2210_p7 = pnand %p2208_p3, %p2181_p12 }
  0x2d   : > { %p2211_p8 = pneg %p2210_p7 }
  0x2f   : > { %p2216_p13 = pnand %p2214_p11, %p2211_p8 }
  0x31   : > { %2219 = shalt.err (!%p2216_p13)
}
  0x32   : > { %s2220_s29 = scalar_lea.vmem %s199_s6, 64  ;;  %p2228_p4 = scmp.lt.s32.totalorder %s199_s6, %s199_s6 }
  0x33   : > { %p2221_p0 = scmp.ne.s32.totalorder %s199_s6, %s2220_s29  ;;  %p2229_p5 = scmp.lt.s32.totalorder %s2220_s29, %s2220_s29 }
  0x35   : > { %p2223_p1 = pnand %p2221_p0, %p2181_p12  ;;  %p2230_p6 = por %p2229_p5, %p2228_p4 }
  0x37   : > { %p2224_p2 = pneg %p2223_p1 }
  0x39   : > { %p2231_p9 = pnand %p2230_p6, %p2224_p2 }
  0x3b   : > { %2234 = shalt.err (!%p2231_p9)
}
  0x3c   : > { %2113 = dma.hbm_to_vmem [thread:$0]  (!%p2367_p10), %s2521_s3, 64, %s199_s6, [#allocation7]  }
  0x3d   : > { %p2530_p3 = scmp.ne.s32.totalorder %s2527_s25, 0 }
  0x3e   : > { %p2531_p7 = scmp.ne.s32.totalorder (!%p2530_p3), %s2528_s26, 0 }
  0x3f   : > { %222 = sbr.rel (%p2530_p3) target bundleno = 338 (0x152), region = 36 }
  0x46   : > { %2256 = dma.done.wait (%p2531_p7), [#allocation5], 256  }
  0x47   : > { %2258 = vsyncadd (%p2531_p7), [#allocation5], 4294967040 }
  0x48   : > { %2260 = dma.done.wait (%p2531_p7), [#allocation7], 64  }
  0x49   : > { %2262 = vsyncadd (%p2531_p7), [#allocation7], 4294967232  ;;  %p259_p12 = scmp.lt.s32.totalorder %s2273_s17, 1  ;;  %vm311_vm0 = vcmask 261120   ;;  %v2163_v0 = vld [vmem:[#allocation4] sm:$0xff]   ;;  %v2165_v2 = vld [vmem:[#allocation4 + $0x8] sm:$0xff]  }
  0x4a   : > { %v2164_v1 = vld [vmem:[%s2520_s2 + $0x40] sm:$0xff]   ;;  %2051 = vmatprep.subr.bf16.mxu0 %v2163_v0  ;;  %v2166_v3 = vld [vmem:[%s2520_s2 + $0x48] sm:$0xff]   ;;  %v2171_v10 = vld [vmem:[%s2520_s2 + $0xd0] sm:$0xff]   ;;  %s256_s14 = sand.u32 1, %s2265_s15   ;;  %p2532_p10 = scmp.ne.s32.totalorder %s2526_s23, 0 }
  0x4b   : > { %s260_s30 = scalar_select %p259_p12, %s2273_s17, 1  ;;  %2063 = vmatprep.subr.bf16.mxu1 %v2164_v1  ;;  %2052 = vmatpush3.bf16.msra.mxu0 %v2163_v0  ;;  %v2172_v11 = vld [vmem:[%s2520_s2 + $0x160] sm:$0xff]   ;;  %v2177_v15 = vld [vmem:[%s2520_s2 + $0xd8] sm:$0xff]   ;;  %v2178_v18 = vld [vmem:[%s2520_s2 + $0x168] sm:$0xff]  }
  0x4c   : > { %2064 = vmatpush3.bf16.msra.mxu1 %v2164_v1  ;;  %2053 = vmatprep.subr.bf16.mxu0 %v2165_v2  ;;  %v1833_v20 = vld [vmem:[#allocation6] ss:$0 sm:$0xff]  ;;  %v1842_v21 = vld [vmem:[#allocation6 + $0x1] ss:$0 sm:$0xff] }
  0x4d   : > { %s1898_s6 = sshll.u32 %s260_s30, 5  ;;  %2065 = vmatprep.subr.bf16.mxu1 %v2166_v3  ;;  %s1782_s30 = sshll.u32 %s256_s14, 7 }
  0x4e   : > { %s266_s28 = scalar_lea.vmem %s2518_s0, %s1898_s6  ;;  %s2463_s15 = scalar_lea.vmem [#allocation8], %s1782_s30 }
  0x4f   : > { %v712_v4 = vld [vmem:[%s266_s28] sm:$0xf]  ;;  %v713_v5 = vld [vmem:[%s266_s28 + $0x4] sm:$0xf]  ;;  %v714_v6 = vld [vmem:[%s266_s28 + $0x8] sm:$0xf]  ;;  %2054 = vmatpush3.bf16.msra.mxu0 %v2165_v2 }
  0x50   : > { %v1793_v7 = vcombine.low %v712_v4, %v713_v5  ;;  %v715_v8 = vld [vmem:[%s266_s28 + $0xc] sm:$0xf]  ;;  %v716_v12 = vld [vmem:[%s266_s28 + $0x10] sm:$0xf]  ;;  %2066 = vmatpush3.bf16.msra.mxu1 %v2166_v3  ;;  %v717_v13 = vld [vmem:[%s266_s28 + $0x14] sm:$0xf]  ;;  %2075 = vmatprep.subr.bf16.mxu0 %v2171_v10 }
  0x51   : > { %v1794_v9 = vcombine.low %v714_v6, %v715_v8  ;;  %v718_v14 = vld [vmem:[%s266_s28 + $0x18] sm:$0xf]  ;;  %2087 = vmatprep.subr.bf16.mxu1 %v2172_v11  ;;  %v1795_v16 = vcombine.low %v716_v12, %v717_v13  ;;  %v719_v17 = vld [vmem:[%s266_s28 + $0x1c] sm:$0xf]  ;;  %v1859_v8 = vld [vmem:[#allocation6 + $0x2] ss:$0 sm:$0xff] }
  0x52   : > { %2055 = vmatprep.mubr.msk.bf16.mxu0 %vm311_vm0, %v1793_v7  ;;  %2067 = vmatprep.mubr.msk.bf16.mxu1 %vm311_vm0, %v1793_v7  ;;  %v1796_v19 = vcombine.low %v718_v14, %v719_v17  ;;  %v1876_v12 = vld [vmem:[#allocation6 + $0x3] ss:$0 sm:$0xff]  ;;  %s1931_s6 = sshll.u32 (%p2532_p10), %s2273_s17, 5 }
  0x53   : > { %2056 = vmatmul.mubr.msk.bf16.vlgmr.msra.gmra.mrb[0].mxu0 %vm311_vm0, %v1794_v9  ;;  %2068 = vmatmul.mubr.msk.bf16.vlgmr.msra.gmra.mrb[0].mxu1 %vm311_vm0, %v1794_v9  ;;  %s1504_s22 = scalar_lea.vmem (%p2532_p10), %s2522_s4, %s1931_s6 }
  0x54   : > { %2076 = vmatpush3.bf16.msra.mxu0 %v2171_v10  ;;  %2088 = vmatpush3.bf16.msra.mxu1 %v2172_v11 }
  0x55   : > { %2059 = vmatprep.mubr.msk.bf16.mxu0 %vm311_vm0, %v1795_v16  ;;  %2071 = vmatprep.mubr.msk.bf16.mxu1 %vm311_vm0, %v1795_v16 }
  0x56   : > { %2077 = vmatprep.subr.bf16.mxu0 %v2177_v15  ;;  %2089 = vmatprep.subr.bf16.mxu1 %v2178_v18 }
  0x58   : > { %2078 = vmatpush3.bf16.msra.mxu0 %v2177_v15  ;;  %2090 = vmatpush3.bf16.msra.mxu1 %v2178_v18 }
  0x5b   : > { %2060 = vmatmul.mubr.msk.bf16.gmra.mrb[4].mxu0 %vm311_vm0, %v1796_v19  ;;  %2072 = vmatmul.mubr.msk.bf16.gmra.mrb[4].mxu1 %vm311_vm0, %v1796_v19 }
  0x5c   : > { %2079 = vmatprep.mubr.msk.bf16.mxu0 %vm311_vm0, %v1793_v7  ;;  %2091 = vmatprep.mubr.msk.bf16.mxu1 %vm311_vm0, %v1793_v7 }
  0x63   : > { %2080 = vmatmul.mubr.msk.bf16.vlgmr.msra.gmra.mrb[8].mxu0 %vm311_vm0, %v1794_v9  ;;  %2092 = vmatmul.mubr.msk.bf16.vlgmr.msra.gmra.mrb[8].mxu1 %vm311_vm0, %v1794_v9 }
  0x64   : > { %2083 = vmatprep.mubr.msk.bf16.mxu0 %vm311_vm0, %v1795_v16  ;;  %2095 = vmatprep.mubr.msk.bf16.mxu1 %vm311_vm0, %v1795_v16 }
  0x6b   : > { %2084 = vmatmul.mubr.msk.bf16.gmra.mrb[12].mxu0 %vm311_vm0, %v1796_v19  ;;  %2096 = vmatmul.mubr.msk.bf16.gmra.mrb[12].mxu1 %vm311_vm0, %v1796_v19 }
 0x126   : > { %v2057_v22 = vpop.f32.mrb[0].mxu0  ;;  %v2069_v24 = vpop.f32.mrb[0].mxu1 }
 0x127   : > { %v1231_v23 = vadd.f32 %v2057_v22, %v1833_v20  ;;  %v845_v25 = vpop.f32.mrb[1].mxu0  ;;  %v1300_v26 = vadd.f32 %v2069_v24, %v1842_v21  ;;  %v952_v28 = vpop.f32.mrb[1].mxu1 }
 0x128   : > { %v1229_v27 = vadd.f32 %v1833_v20, %v845_v25  ;;  %v2058_v29 = vpop.f32.mrb[2].mxu0  ;;  %v1298_v30 = vadd.f32 %v1842_v21, %v952_v28  ;;  %v2070_v32 = vpop.f32.mrb[2].mxu1 }
 0x129   : > { %v1232_v31 = vadd.f32 %v2058_v29, %v1833_v20  ;;  %v848_v33 = vpop.f32.mrb[3].mxu0  ;;  %v1301_v34 = vadd.f32 %v2070_v32, %v1842_v21  ;;  %v955_v36 = vpop.f32.mrb[3].mxu1  ;;  %v1239_v37 = vmax.f32 %v1231_v23, 0.0  ;;  %v1308_v40 = vmax.f32 %v1300_v26, 0.0 }
 0x12a   : > { %v1230_v35 = vadd.f32 %v1833_v20, %v848_v33  ;;  %v1299_v39 = vadd.f32 %v1842_v21, %v955_v36  ;;  %v1237_v41 = vmax.f32 %v1229_v27, 0.0  ;;  %v1306_v44 = vmax.f32 %v1298_v30, 0.0 }
 0x12b   : > { %v1240_v38 = vmax.f32 %v1232_v31, 0.0  ;;  %v1309_v42 = vmax.f32 %v1301_v34, 0.0 }
 0x12c   : > { %v1238_v43 = vmax.f32 %v1230_v35, 0.0  ;;  %v1307_v46 = vmax.f32 %v1299_v39, 0.0 }
 0x12d   : > { %v1940_v45 = vpack.c.bf16 %v1240_v38, %v1239_v37  ;;  %v1960_v47 = vpack.c.bf16 %v1309_v42, %v1308_v40 }
 0x12e   : > { %v1935_v48 = vpack.c.bf16 %v1238_v43, %v1237_v41  ;;  %v2061_v49 = vpop.f32.mrb[4].mxu0  ;;  %v1955_v50 = vpack.c.bf16 %v1307_v46, %v1306_v44  ;;  %v2073_v52 = vpop.f32.mrb[4].mxu1 }
 0x12f   : > { %2012 = vst [vmem:[%s2463_s15 + $0x8] sm:$0xff] %v1940_v45   ;;  %v1235_v51 = vadd.f32 %v2061_v49, %v1833_v20  ;;  %v861_v53 = vpop.f32.mrb[5].mxu0  ;;  %2016 = vst [vmem:[%s2463_s15 + $0x28] sm:$0xff] %v1960_v47   ;;  %v1304_v54 = vadd.f32 %v2073_v52, %v1842_v21  ;;  %v968_v56 = vpop.f32.mrb[5].mxu1 }
 0x130   : > { %1936 = vst [vmem:[%s2463_s15] sm:$0xff] %v1935_v48   ;;  %v1233_v55 = vadd.f32 %v1833_v20, %v861_v53  ;;  %v2062_v57 = vpop.f32.mrb[6].mxu0  ;;  %2015 = vst [vmem:[%s2463_s15 + $0x20] sm:$0xff] %v1955_v50   ;;  %v1302_v58 = vadd.f32 %v1842_v21, %v968_v56  ;;  %v2074_v60 = vpop.f32.mrb[6].mxu1 }
 0x131   : > { %v1236_v59 = vadd.f32 %v2062_v57, %v1833_v20  ;;  %v864_v61 = vpop.f32.mrb[7].mxu0  ;;  %v1305_v62 = vadd.f32 %v2074_v60, %v1842_v21  ;;  %v971_v0 = vpop.f32.mrb[7].mxu1  ;;  %v1243_v1 = vmax.f32 %v1235_v51, 0.0  ;;  %v1312_v4 = vmax.f32 %v1304_v54, 0.0 }
 0x132   : > { %v1234_v63 = vadd.f32 %v1833_v20, %v864_v61  ;;  %v1303_v3 = vadd.f32 %v1842_v21, %v971_v0  ;;  %v1241_v5 = vmax.f32 %v1233_v55, 0.0  ;;  %v1310_v9 = vmax.f32 %v1302_v58, 0.0 }
 0x133   : > { %v1244_v2 = vmax.f32 %v1236_v59, 0.0  ;;  %v1313_v6 = vmax.f32 %v1305_v62, 0.0 }
 0x134   : > { %v1242_v7 = vmax.f32 %v1234_v63, 0.0  ;;  %v1311_v11 = vmax.f32 %v1303_v3, 0.0 }
 0x135   : > { %v1950_v10 = vpack.c.bf16 %v1244_v2, %v1243_v1  ;;  %v1970_v13 = vpack.c.bf16 %v1313_v6, %v1312_v4 }
 0x136   : > { %v1945_v14 = vpack.c.bf16 %v1242_v7, %v1241_v5  ;;  %v2081_v15 = vpop.f32.mrb[8].mxu0  ;;  %v1965_v16 = vpack.c.bf16 %v1311_v11, %v1310_v9  ;;  %v2093_v18 = vpop.f32.mrb[8].mxu1  ;;  %v1524_v9 = vld [vmem:[%s2463_s15 + $0x8] sm:$0xff] (%p2532_p10)  }
 0x137   : > { %2014 = vst [vmem:[%s2463_s15 + $0x18] sm:$0xff] %v1950_v10   ;;  %v1370_v17 = vadd.f32 %v2081_v15, %v1859_v8  ;;  %v1059_v19 = vpop.f32.mrb[9].mxu0  ;;  %2018 = vst [vmem:[%s2463_s15 + $0x38] sm:$0xff] %v1970_v13   ;;  %v1440_v20 = vadd.f32 %v2093_v18, %v1876_v12  ;;  %v1166_v22 = vpop.f32.mrb[9].mxu1  ;;  %v1540_v13 = vld [vmem:[%s2463_s15 + $0x28] sm:$0xff] (%p2532_p10)  }
 0x138   : > { %2013 = vst [vmem:[%s2463_s15 + $0x10] sm:$0xff] %v1945_v14   ;;  %v1368_v21 = vadd.f32 %v1859_v8, %v1059_v19  ;;  %v2082_v23 = vpop.f32.mrb[10].mxu0  ;;  %2017 = vst [vmem:[%s2463_s15 + $0x30] sm:$0xff] %v1965_v16   ;;  %v1438_v24 = vadd.f32 %v1876_v12, %v1166_v22  ;;  %v2094_v26 = vpop.f32.mrb[10].mxu1 }
 0x139   : > { %v1371_v25 = vadd.f32 %v2082_v23, %v1859_v8  ;;  %v1062_v27 = vpop.f32.mrb[11].mxu0  ;;  %v1441_v28 = vadd.f32 %v2094_v26, %v1876_v12  ;;  %v1169_v30 = vpop.f32.mrb[11].mxu1  ;;  %v1378_v31 = vmax.f32 %v1370_v17, 0.0  ;;  %v1448_v34 = vmax.f32 %v1440_v20, 0.0  ;;  %1525 = vst [vmem:[%s1504_s22 + $0x8] sm:$0xff] (%p2532_p10), %v1524_v9   ;;  %1541 = vst [vmem:[%s1504_s22 + $0x48] sm:$0xff] (%p2532_p10), %v1540_v13  }
 0x13a   : > { %v1369_v29 = vadd.f32 %v1859_v8, %v1062_v27  ;;  %v1439_v33 = vadd.f32 %v1876_v12, %v1169_v30  ;;  %v1376_v35 = vmax.f32 %v1368_v21, 0.0  ;;  %v1446_v38 = vmax.f32 %v1438_v24, 0.0 }
 0x13b   : > { %v1379_v32 = vmax.f32 %v1371_v25, 0.0  ;;  %v1449_v36 = vmax.f32 %v1441_v28, 0.0 }
 0x13c   : > { %v1377_v37 = vmax.f32 %v1369_v29, 0.0  ;;  %v1447_v40 = vmax.f32 %v1439_v33, 0.0 }
 0x13d   : > { %v1980_v39 = vpack.c.bf16 %v1379_v32, %v1378_v31  ;;  %v2000_v41 = vpack.c.bf16 %v1449_v36, %v1448_v34 }
 0x13e   : > { %v1975_v42 = vpack.c.bf16 %v1377_v37, %v1376_v35  ;;  %v2085_v43 = vpop.f32.mrb[12].mxu0  ;;  %v1995_v44 = vpack.c.bf16 %v1447_v40, %v1446_v38  ;;  %v2097_v46 = vpop.f32.mrb[12].mxu1  ;;  %v1532_v11 = vld [vmem:[%s2463_s15 + $0x18] sm:$0xff] (%p2532_p10)  }
 0x13f   : > { %2020 = vst [vmem:[%s2463_s15 + $0x48] sm:$0xff] %v1980_v39   ;;  %v1374_v45 = vadd.f32 %v2085_v43, %v1859_v8  ;;  %v1075_v47 = vpop.f32.mrb[13].mxu0  ;;  %2024 = vst [vmem:[%s2463_s15 + $0x68] sm:$0xff] %v2000_v41   ;;  %v1444_v48 = vadd.f32 %v2097_v46, %v1876_v12  ;;  %v1182_v50 = vpop.f32.mrb[13].mxu1  ;;  %v1528_v10 = vld [vmem:[%s2463_s15 + $0x10] sm:$0xff] (%p2532_p10)   ;;  %v1548_v15 = vld [vmem:[%s2463_s15 + $0x38] sm:$0xff] (%p2532_p10)  }
 0x140   : > { %2019 = vst [vmem:[%s2463_s15 + $0x40] sm:$0xff] %v1975_v42   ;;  %v1372_v49 = vadd.f32 %v1859_v8, %v1075_v47  ;;  %v2086_v51 = vpop.f32.mrb[14].mxu0  ;;  %2023 = vst [vmem:[%s2463_s15 + $0x60] sm:$0xff] %v1995_v44   ;;  %v1442_v52 = vadd.f32 %v1876_v12, %v1182_v50  ;;  %v2098_v54 = vpop.f32.mrb[14].mxu1  ;;  %v1544_v14 = vld [vmem:[%s2463_s15 + $0x30] sm:$0xff] (%p2532_p10)  }
 0x141   : > { %v1375_v53 = vadd.f32 %v2086_v51, %v1859_v8  ;;  %v1078_v55 = vpop.f32.mrb[15].mxu0  ;;  %v1445_v56 = vadd.f32 %v2098_v54, %v1876_v12  ;;  %v1185_v58 = vpop.f32.mrb[15].mxu1  ;;  %v1382_v59 = vmax.f32 %v1374_v45, 0.0  ;;  %v1452_v62 = vmax.f32 %v1444_v48, 0.0  ;;  %1529 = vst [vmem:[%s1504_s22 + $0x10] sm:$0xff] (%p2532_p10), %v1528_v10   ;;  %1533 = vst [vmem:[%s1504_s22 + $0x18] sm:$0xff] (%p2532_p10), %v1532_v11  }
 0x142   : > { %v1373_v57 = vadd.f32 %v1859_v8, %v1078_v55  ;;  %v1443_v61 = vadd.f32 %v1876_v12, %v1185_v58  ;;  %v1380_v63 = vmax.f32 %v1372_v49, 0.0  ;;  %v1450_v2 = vmax.f32 %v1442_v52, 0.0  ;;  %1501 = sbr.rel (!%p2532_p10) target bundleno = 338 (0x152), region = 56  ;;  %v1520_v8 = vld [vmem:[%s2463_s15] sm:$0xff] (%p2532_p10)   ;;  %1545 = vst [vmem:[%s1504_s22 + $0x50] sm:$0xff] (%p2532_p10), %v1544_v14   ;;  %1549 = vst [vmem:[%s1504_s22 + $0x58] sm:$0xff] (%p2532_p10), %v1548_v15  }
 0x143   : > { %v1383_v60 = vmax.f32 %v1375_v53, 0.0  ;;  %v1453_v0 = vmax.f32 %v1445_v56, 0.0  ;;  %v1536_v12 = vld [vmem:[%s2463_s15 + $0x20] sm:$0xff] (%p2532_p10)   ;;  %1521 = vst [vmem:[%s1504_s22] sm:$0xff] (%p2532_p10), %v1520_v8  }
 0x144   : > { %v1381_v1 = vmax.f32 %v1373_v57, 0.0  ;;  %v1451_v4 = vmax.f32 %v1443_v61, 0.0  ;;  %1537 = vst [vmem:[%s1504_s22 + $0x40] sm:$0xff] (%p2532_p10), %v1536_v12  }
 0x145   : > { %v1990_v3 = vpack.c.bf16 %v1383_v60, %v1382_v59  ;;  %v2010_v5 = vpack.c.bf16 %v1453_v0, %v1452_v62 }
 0x146   : > { %v1985_v6 = vpack.c.bf16 %v1381_v1, %v1380_v63  ;;  %v2005_v7 = vpack.c.bf16 %v1451_v4, %v1450_v2  ;;  %v1556_v17 = vld [vmem:[%s2463_s15 + $0x48] sm:$0xff] (%p2532_p10)  }
 0x147   : > { %2022 = vst [vmem:[%s2463_s15 + $0x58] sm:$0xff] %v1990_v3   ;;  %2026 = vst [vmem:[%s2463_s15 + $0x78] sm:$0xff] %v2010_v5   ;;  %v1552_v16 = vld [vmem:[%s2463_s15 + $0x40] sm:$0xff] (%p2532_p10)   ;;  %v1572_v21 = vld [vmem:[%s2463_s15 + $0x68] sm:$0xff] (%p2532_p10)  }
 0x148   : > { %2021 = vst [vmem:[%s2463_s15 + $0x50] sm:$0xff] %v1985_v6   ;;  %2025 = vst [vmem:[%s2463_s15 + $0x70] sm:$0xff] %v2005_v7   ;;  %v1568_v20 = vld [vmem:[%s2463_s15 + $0x60] sm:$0xff] (%p2532_p10)  }
 0x149   : > { %1553 = vst [vmem:[%s1504_s22 + $0x80] sm:$0xff] %v1552_v16   ;;  %1557 = vst [vmem:[%s1504_s22 + $0x88] sm:$0xff] %v1556_v17  }
 0x14a   : > { %1569 = vst [vmem:[%s1504_s22 + $0xc0] sm:$0xff] %v1568_v20   ;;  %1573 = vst [vmem:[%s1504_s22 + $0xc8] sm:$0xff] %v1572_v21  }
 0x14e   : > { %v1564_v19 = vld [vmem:[%s2463_s15 + $0x58] sm:$0xff]  }
 0x14f   : > { %v1560_v18 = vld [vmem:[%s2463_s15 + $0x50] sm:$0xff]   ;;  %1565 = vst [vmem:[%s1504_s22 + $0x98] sm:$0xff] %v1564_v19   ;;  %v1580_v23 = vld [vmem:[%s2463_s15 + $0x78] sm:$0xff]  }
 0x150   : > { %1561 = vst [vmem:[%s1504_s22 + $0x90] sm:$0xff] %v1560_v18   ;;  %v1576_v22 = vld [vmem:[%s2463_s15 + $0x70] sm:$0xff]   ;;  %1581 = vst [vmem:[%s1504_s22 + $0xd8] sm:$0xff] %v1580_v23  }
 0x151   : > { %1577 = vst [vmem:[%s1504_s22 + $0xd0] sm:$0xff] %v1576_v22  }
 0x152 PF: > { %s16_s19 = sadd.s32 1, %s2281_s19   ;;  %s2533_s15 = smov %s2269_s16 }
 0x153   : > { %p13_p8 = scmp.ge.s32.totalorder %s16_s19, 4   ;;  %s2534_s16 = smov %s2361_s27 }
 0x154   : > { %s2535_s17 = smov %s2277_s18  ;;  %s2536_s18 = smov %s2538_s21 }
 0x155   :  { %15 = sbr.rel (!%p13_p8) target bundleno = 4 (0x4), region = 138 }
 0x15c   :  { %1680 = vsyncpa [#allocation5], 1 }
 0x15d   :  { %1682 = vsyncpa [#allocation5 + $0x1], 1 }
 0x15e   :  { %1683 = vsyncpa [#allocation7], 1 }

// kernel: aspp_forward.12
= control target key start
LH: loop header
LB: loop body
LE: loop exit
PB: predicated region body
PF: predicated region fallthrough
CT: control target
= control target key end

     0   :  { %s7991_s24 = smov 0   ;;  %s7993_s25 = smov 0   ;;  %s9969_s0 = inlined_call_operand.vmem [shape: bf16[2,18,18,128], index: 0, kind: input, shape index: {}, may-alias: {0,1}]   ;;  %s9970_s1 = inlined_call_operand.vmem [shape: bf16[2,18,18,128], index: 1, kind: input, shape index: {}, may-alias: {0,1}]   ;;  %s9971_s2 = inlined_call_operand.vmem [shape: bf16[2,18,18,128], index: 2, kind: input, shape index: {}, may-alias: {2,3}]   ;;  %s9972_s3 = inlined_call_operand.vmem [shape: bf16[2,18,18,128], index: 3, kind: input, shape index: {}, may-alias: {2,3}]   ;;  %s9973_s4 = inlined_call_operand.vmem [shape: bf16[9,128,256], index: 4, kind: input, shape index: {}]   ;;  %s9974_s5 = inlined_call_operand.vmem [shape: bf16[9,128,256], index: 5, kind: input, shape index: {}]   ;;  %s9975_s6 = inlined_call_operand.vmem [shape: f32[1,256], index: 6, kind: input, shape index: {}]   ;;  %s9976_s7 = inlined_call_operand.vmem [shape: bf16[2,256,256], index: 7, kind: output, shape index: {}]  }
   0x1   :  { %s7995_s26 = smov 0   ;;  %s7997_s27 = smov 0  }
   0x2   :  { %s7999_s28 = smov 0  }
   0x3 LB: > { %s26_s29 = sadd.s32 1, %s7940_s26  ;;  %s29_s30 = sadd.s32 1, %s7944_s27  ;;  %s7948_s28 = sphi %s7999_s28, %s17_s28   ;;  %s7944_s27 = sphi %s7997_s27, %s10043_s27   ;;  %s7940_s26 = sphi %s7995_s26, %s10042_s26   ;;  %s7936_s25 = sphi %s7993_s25, %s10041_s25   ;;  %s7932_s24 = sphi %s7991_s24, %s10040_s24  }
   0x4   : > { %p27_p0 = scmp.ge.s32.totalorder %s26_s29, 2  ;;  %p6153_p1 = scmp.ge.s32.totalorder %s7948_s28, 1 }
   0x5   : > { %p349_p2 = scmp.lt.s32.totalorder %s7948_s28, 5 }
   0x6   : > { %s10045_s29 = smov (%p27_p0, %s26_s29), 0  ;;  %s10047_s30 = smov (!%p27_p0, %s29_s30), %s7944_s27 }
   0x7   : > { %p350_p3 = pnand %p6153_p1, %p349_p2  ;;  %p31_p4 = scmp.ge.s32.totalorder %s10047_s30, 2 }
   0x9   : > { %s10049_s30 = smov (%p31_p4, %s10047_s30), 0  ;;  %353 = sbr.rel (%p350_p3) target bundleno = 842 (0x34a), region = 48 }
  0x10   : > { %v7432_v0 = vld [vmem:[%s9973_s4 + $0x84] ss:$8 sps:$4 sm:$0xff]   ;;  %s8027_s10 = sshll.u32 %s7932_s24, 3  ;;  %v9983_v2 = vmov 0   ;;  %p441_p5 = scmp.lt.s32.totalorder %s7936_s25, 1  ;;  %vm1251_vm3 = vcmask 1042432  }
  0x11   : > { %v7434_v1 = vld [vmem:[%s9974_s5 + $0x4] ss:$8 sps:$4 sm:$0xff]   ;;  %921 = vmatprep.mubr.bf16.mxu1 %v9983_v2  ;;  %3334 = vmatprep.mubr.bf16.mxu0 %v9983_v2  ;;  %p443_p6 = scmp.lt.s32.totalorder %s8027_s10, 17  ;;  %v7436_v3 = vld [vmem:[%s9973_s4 + $0x80] ss:$8 sps:$4 sm:$0xff]   ;;  %vm1252_vm4 = vcmask 1046532  }
  0x12   : > { %889 = vmatprep.subr.bf16.mxu1 %v7432_v0  ;;  %v7437_v4 = vld [vmem:[%s9974_s5] ss:$8 sps:$4 sm:$0xff]   ;;  %3302 = vmatprep.subr.bf16.mxu0 %v7434_v1  ;;  %v7438_v5 = vld [vmem:[%s9973_s4 + $0x94] ss:$8 sps:$4 sm:$0xff]   ;;  %s10051_s25 = smov (!%p441_p5, %s7936_s25), 1  ;;  %vm8608_vm5 = vmor %vm1251_vm3, %vm1252_vm4 }
  0x13   : > { %890 = vmatpush1.bf16.msra.mxu1 %v7436_v3  ;;  %3303 = vmatpush1.bf16.msra.mxu0 %v7437_v4  ;;  %v7440_v6 = vld [vmem:[%s9974_s5 + $0x14] ss:$8 sps:$4 sm:$0xff]   ;;  %v7442_v7 = vld [vmem:[%s9973_s4 + $0x90] ss:$8 sps:$4 sm:$0xff]   ;;  %s444_s23 = scalar_select %p443_p6, %s8027_s10, 17 }
  0x14   : > { %891 = vmatprep.subr.bf16.mxu1 %v7438_v5  ;;  %v7443_v8 = vld [vmem:[%s9974_s5 + $0x10] ss:$8 sps:$4 sm:$0xff]   ;;  %3304 = vmatprep.subr.bf16.mxu0 %v7440_v6  ;;  %v7444_v9 = vld [vmem:[%s9973_s4 + $0xa4] ss:$8 sps:$4 sm:$0xff]   ;;  %s7389_s13 = smul.u32 54, %s10051_s25  ;;  %s6166_s12 = sshll.u32 %s10051_s25, 6 }
  0x15   : > { %v7446_v10 = vld [vmem:[%s9974_s5 + $0x24] ss:$8 sps:$4 sm:$0xff]   ;;  %v7448_v11 = vld [vmem:[%s9973_s4 + $0xa0] ss:$8 sps:$4 sm:$0xff]   ;;  %v7450_v13 = vld [vmem:[%s9973_s4 + $0xb4] ss:$8 sps:$4 sm:$0xff]  }
  0x16   : > { %v7449_v12 = vld [vmem:[%s9974_s5 + $0x20] ss:$8 sps:$4 sm:$0xff]   ;;  %s7388_s22 = smul.u32 3, %s444_s23  ;;  %v7452_v14 = vld [vmem:[%s9974_s5 + $0x34] ss:$8 sps:$4 sm:$0xff]  }
  0x17   : > { %892 = vmatpush1.bf16.msra.mxu1 %v7442_v7  ;;  %3305 = vmatpush1.bf16.msra.mxu0 %v7443_v8  ;;  %v7454_v15 = vld [vmem:[%s9973_s4 + $0xb0] ss:$8 sps:$4 sm:$0xff]   ;;  %v7456_v17 = vld [vmem:[%s9973_s4 + $0xc4] ss:$8 sps:$4 sm:$0xff]   ;;  %v7460_v19 = vld [vmem:[%s9973_s4 + $0xc0] ss:$8 sps:$4 sm:$0xff]  }
  0x18   : > { %893 = vmatprep.subr.bf16.mxu1 %v7444_v9  ;;  %3306 = vmatprep.subr.bf16.mxu0 %v7446_v10  ;;  %v7455_v16 = vld [vmem:[%s9974_s5 + $0x30] ss:$8 sps:$4 sm:$0xff]   ;;  %s8086_s23 = sadd.s32 %s7389_s13, %s7388_s22  ;;  %v7458_v18 = vld [vmem:[%s9974_s5 + $0x44] ss:$8 sps:$4 sm:$0xff]   ;;  %v7461_v20 = vld [vmem:[%s9974_s5 + $0x40] ss:$8 sps:$4 sm:$0xff]  }
  0x19   : > { %s6155_s11 = sshll.u32 %s8086_s23, 2  ;;  %v7462_v21 = vld [vmem:[%s9973_s4 + $0xd4] ss:$8 sps:$4 sm:$0xff]   ;;  %vm565_vm0 = vsmask.f32 3328 }
  0x1a   : > { %v7464_v22 = vld [vmem:[%s9974_s5 + $0x54] ss:$8 sps:$4 sm:$0xff]   ;;  %s8109_s18 = scalar_lea.vmem %s9969_s0, %s6155_s11  ;;  %v7466_v23 = vld [vmem:[%s9973_s4 + $0xd0] ss:$8 sps:$4 sm:$0xff]   ;;  %vm566_vm1 = vsmask.f32 7440  ;;  %s8145_s8 = scalar_lea.vmem %s9971_s2, %s6155_s11 }
  0x1b   : > { %894 = vmatpush1.bf16.msra.mxu1 %v7448_v11  ;;  %3307 = vmatpush1.bf16.msra.mxu0 %v7449_v12  ;;  %v7467_v24 = vld [vmem:[%s9974_s5 + $0x50] ss:$8 sps:$4 sm:$0xff]   ;;  %v7468_v25 = vld [vmem:[%s9973_s4 + $0xe4] ss:$8 sps:$4 sm:$0xff]   ;;  %v8124_v27 = vld [vmem:[%s8109_s18] sm:$0xf] }
  0x1c   : > { %895 = vmatprep.subr.bf16.mxu1 %v7450_v13  ;;  %3308 = vmatprep.subr.bf16.mxu0 %v7452_v14  ;;  %v7470_v26 = vld [vmem:[%s9974_s5 + $0x64] ss:$8 sps:$4 sm:$0xff]   ;;  %v521_v29 = vld [vmem:[%s8109_s18 + $0x8] sm:$0x1]  ;;  %v569_v30 = vshrl.u32 %v8124_v27, 16  ;;  %v572_v31 = vshll.u32 %v8124_v27, 16  ;;  %vm8161_vm2 = vmor %vm565_vm0, %vm566_vm1 }
  0x1d   : > { %v8127_v28 = vld [vmem:[%s8109_s18 + $0x4] sm:$0xf]  ;;  %v7472_v34 = vld [vmem:[%s9973_s4 + $0xe0] ss:$8 sps:$4 sm:$0xff]   ;;  %v588_v35 = vshll.u32 %v521_v29, 16 }
  0x1e   : > { %v578_v32 = vshll.u32 %v8127_v28, 16  ;;  %v582_v33 = vshrl.u32 %v8127_v28, 16  ;;  %v7473_v36 = vld [vmem:[%s9974_s5 + $0x60] ss:$8 sps:$4 sm:$0xff]   ;;  %v571_v37 = vrot.slane %v569_v30, 4  ;;  %v574_v38 = vrot.slane %v572_v31, 5 }
  0x1f   : > { %896 = vmatpush1.bf16.msra.mxu1 %v7454_v15  ;;  %3309 = vmatpush1.bf16.msra.mxu0 %v7455_v16  ;;  %v7474_v41 = vld [vmem:[%s9973_s4 + $0xf4] ss:$8 sps:$4 sm:$0xff]   ;;  %v7478_v43 = vld [vmem:[%s9973_s4 + $0xf0] ss:$8 sps:$4 sm:$0xff]   ;;  %v590_v48 = vrot.slane %v588_v35, 5 }
  0x20   : > { %897 = vmatprep.subr.bf16.mxu1 %v7456_v17  ;;  %3310 = vmatprep.subr.bf16.mxu0 %v7458_v18  ;;  %v580_v39 = vrot.slane %v578_v32, 5  ;;  %v584_v40 = vrot.slane %v582_v33, 4  ;;  %v7476_v42 = vld [vmem:[%s9974_s5 + $0x74] ss:$8 sps:$4 sm:$0xff]   ;;  %v7479_v44 = vld [vmem:[%s9974_s5 + $0x70] ss:$8 sps:$4 sm:$0xff]   ;;  %v575_v46 = vor.u32 %v574_v38, %v571_v37 }
  0x21   : > { %v7482_v49 = vld [vmem:[%s9973_s4 + $0x4] ss:$8 sps:$4 sm:$0xff]   ;;  %v8169_v50 = vld [vmem:[%s8145_s8] sm:$0xf]  ;;  %v8181_v56 = vld [vmem:[%s8109_s18 + $0x10] sm:$0xf] }
  0x22   : > { %v585_v47 = vor.u32 %v584_v40, %v580_v39  ;;  %v8172_v51 = vld [vmem:[%s8109_s18 + $0xc] sm:$0xf]  ;;  %v576_v52 = vrot.slane %v575_v46, 4  ;;  %v8175_v54 = vld [vmem:[%s8145_s8 + $0x4] sm:$0xf]  ;;  %v602_v5 = vshll.u32 %v8181_v56, 16 }
  0x23   : > { %898 = vmatpush1.bf16.msra.mxu1 %v7460_v19  ;;  %3311 = vmatpush1.bf16.msra.mxu0 %v7461_v20  ;;  %v7486_v55 = vld [vmem:[%s9974_s5 + $0x84] ss:$8 sps:$4 sm:$0xff]   ;;  %v524_v57 = vld [vmem:[%s8109_s18 + $0x14] sm:$0x1]  ;;  %v593_v58 = vshrl.u32 %v8172_v51, 16  ;;  %v596_v61 = vshll.u32 %v8172_v51, 16  ;;  %v6480_v0 = vcombine.low %v8169_v50, %v8175_v54 }
  0x24   : > { %899 = vmatprep.subr.bf16.mxu1 %v7462_v21  ;;  %3312 = vmatprep.subr.bf16.mxu0 %v7464_v22  ;;  %v586_v53 = vrot.slane %v585_v47, 4  ;;  %v581_v59 = vsel %vm8161_vm2, %v576_v52, %v580_v39  ;;  %v7480_v63 = vld [vmem:[%s9973_s4] ss:$8 sps:$4 sm:$0xff]   ;;  %v606_v6 = vshrl.u32 %v8181_v56, 16  ;;  %v612_v7 = vshll.u32 %v524_v57, 16 }
  0x25   : > { %v595_v1 = vrot.slane %v593_v58, 4  ;;  %v7484_v3 = vld [vmem:[%s9974_s5 + $0x80] ss:$8 sps:$4 sm:$0xff]   ;;  %v598_v4 = vrot.slane %v596_v61, 5  ;;  %v7489_v8 = vld [vmem:[%s9973_s4 + $0x14] ss:$8 sps:$4 sm:$0xff]  }
  0x26   : > { %v591_v60 = vsel %vm8161_vm2, %v586_v53, %v590_v48  ;;  %v604_v10 = vrot.slane %v602_v5, 5  ;;  %v608_v11 = vrot.slane %v606_v6, 4  ;;  %v7487_v12 = vld [vmem:[%s9973_s4 + $0x10] ss:$8 sps:$4 sm:$0xff]   ;;  %v8207_v13 = vld [vmem:[%s8145_s8 + $0xc] sm:$0xf] }
  0x27   : > { %900 = vmatpush1.bf16.msra.mxu1 %v7466_v23  ;;  %3313 = vmatpush1.bf16.msra.mxu0 %v7467_v24  ;;  %v6184_v62 = vcombine.low %v581_v59, %v591_v60  ;;  %v599_v9 = vor.u32 %v598_v4, %v595_v1  ;;  %v8210_v14 = vld [vmem:[%s8145_s8 + $0x10] sm:$0xf]  ;;  %v7493_v16 = vld [vmem:[%s9974_s5 + $0x94] ss:$8 sps:$4 sm:$0xff]   ;;  %v614_v17 = vrot.slane %v612_v7, 5 }
  0x28   : > { %901 = vmatprep.subr.bf16.mxu1 %v7468_v25  ;;  %3314 = vmatprep.subr.bf16.mxu0 %v7470_v26  ;;  %v7491_v15 = vld [vmem:[%s9974_s5 + $0x90] ss:$8 sps:$4 sm:$0xff]   ;;  %v8222_v19 = vld [vmem:[%s8109_s18 + $0x1c] sm:$0xf]  ;;  %v609_v21 = vor.u32 %v608_v11, %v604_v10  ;;  %v527_v22 = vld [vmem:[%s8109_s18 + $0x20] sm:$0x1]  ;;  %v8238_v35 = vcombine.low %v8207_v13, %v8210_v14 }
  0x29   : > { %v8219_v18 = vld [vmem:[%s8109_s18 + $0x18] sm:$0xf]  ;;  %v600_v20 = vrot.slane %v599_v9, 4  ;;  %v626_v25 = vshll.u32 %v8222_v19, 16  ;;  %v630_v26 = vshrl.u32 %v8222_v19, 16  ;;  %v636_v29 = vshll.u32 %v527_v22, 16 }
  0x2a   : > { %v617_v23 = vshrl.u32 %v8219_v18, 16  ;;  %v620_v24 = vshll.u32 %v8219_v18, 16  ;;  %v610_v31 = vrot.slane %v609_v21, 4  ;;  %v7494_v40 = vld [vmem:[%s9973_s4 + $0x20] ss:$8 sps:$4 sm:$0xff]  }
  0x2b   : > { %902 = vmatpush1.bf16.msra.mxu1 %v7472_v34  ;;  %3315 = vmatpush1.bf16.msra.mxu0 %v7473_v36  ;;  %v605_v30 = vsel %vm8161_vm2, %v600_v20, %v604_v10  ;;  %v7496_v34 = vld [vmem:[%s9973_s4 + $0x24] ss:$8 sps:$4 sm:$0xff]   ;;  %v628_v36 = vrot.slane %v626_v25, 5  ;;  %v632_v37 = vrot.slane %v630_v26, 4  ;;  %v8251_v46 = vld [vmem:[%s8145_s8 + $0x18] sm:$0xf] }
  0x2c   : > { %903 = vmatprep.subr.bf16.mxu1 %v7474_v41  ;;  %3316 = vmatprep.subr.bf16.mxu0 %v7476_v42  ;;  %v619_v32 = vrot.slane %v617_v23, 4  ;;  %v622_v33 = vrot.slane %v620_v24, 5  ;;  %v615_v38 = vsel %vm8161_vm2, %v610_v31, %v614_v17  ;;  %v7498_v41 = vld [vmem:[%s9974_s5 + $0xa0] ss:$8 sps:$4 sm:$0xff]   ;;  %v7500_v47 = vld [vmem:[%s9974_s5 + $0xa4] ss:$8 sps:$4 sm:$0xff]  }
  0x2d   : > { %v8248_v42 = vcombine.low %v605_v30, %v615_v38  ;;  %v8257_v48 = vld [vmem:[%s8109_s18 + $0x24] sm:$0xf]  ;;  %v8260_v52 = vld [vmem:[%s8109_s18 + $0x28] sm:$0xf]  ;;  %v530_v53 = vld [vmem:[%s8109_s18 + $0x2c] sm:$0x1] }
  0x2e   : > { %v623_v39 = vor.u32 %v622_v33, %v619_v32  ;;  %v8267_v58 = vld [vmem:[%s8145_s8 + $0x1c] sm:$0xf]  ;;  %v644_v59 = vshll.u32 %v8257_v48, 16  ;;  %v650_v60 = vshll.u32 %v8260_v52, 16  ;;  %v654_v61 = vshrl.u32 %v8260_v52, 16 }
  0x2f   : > { %904 = vmatpush1.bf16.msra.mxu1 %v7478_v43  ;;  %3317 = vmatpush1.bf16.msra.mxu0 %v7479_v44  ;;  %10005 = vst [vmem:[#allocation2_spill] sm:$0xff] %v8248_v42  ;;  %v633_v43 = vor.u32 %v632_v37, %v628_v36  ;;  %v638_v44 = vrot.slane %v636_v29, 5  ;;  %v7503_v1 = vld [vmem:[%s9973_s4 + $0x34] ss:$8 sps:$4 sm:$0xff]   ;;  %v7501_v7 = vld [vmem:[%s9973_s4 + $0x30] ss:$8 sps:$4 sm:$0xff]  }
  0x30   : > { %1130 = vmatprep.subr.bf16.mxu1 %v7482_v49  ;;  %3768 = vmatprep.subr.bf16.mxu0 %v7486_v55  ;;  %v624_v49 = vrot.slane %v623_v39, 4  ;;  %v641_v55 = vshrl.u32 %v8257_v48, 16  ;;  %v646_v4 = vrot.slane %v644_v59, 5  ;;  %v652_v5 = vrot.slane %v650_v60, 5  ;;  %v7505_v9 = vld [vmem:[%s9974_s5 + $0xb0] ss:$8 sps:$4 sm:$0xff]  }
  0x31   : > { %v634_v57 = vrot.slane %v633_v43, 4  ;;  %v656_v6 = vrot.slane %v654_v61, 4  ;;  %v8297_v17 = vld [vmem:[%s8109_s18 + $0x30] sm:$0xf]  ;;  %v8300_v20 = vld [vmem:[%s8109_s18 + $0x34] sm:$0xf] }
  0x32   : > { %922 = vmatmul.mubr.bf16.vlgmr.msra.gmra.mrb[0].mxu1 %v6184_v62  ;;  %3335 = vmatmul.mubr.bf16.vlgmr.msra.gmra.mrb[0].mxu0 %v6480_v0  ;;  %v629_v62 = vsel %vm8161_vm2, %v624_v49, %v628_v36  ;;  %v660_v0 = vshll.u32 %v530_v53, 16  ;;  %v533_v21 = vld [vmem:[%s8109_s18 + $0x38] sm:$0x1]  ;;  %v665_v22 = vshrl.u32 %v8297_v17, 16  ;;  %v668_v23 = vshll.u32 %v8297_v17, 16 }
  0x33   : > { %1131 = vmatpush1.bf16.msra.mxu1 %v7480_v63  ;;  %3769 = vmatpush1.bf16.msra.mxu0 %v7484_v3  ;;  %v643_v63 = vrot.slane %v641_v55, 4  ;;  %v639_v3 = vsel %vm8161_vm2, %v634_v57, %v638_v44  ;;  %v8306_v26 = vld [vmem:[%s8145_s8 + $0x24] sm:$0xf]  ;;  %v674_v29 = vshll.u32 %v8300_v20, 16  ;;  %v678_v30 = vshrl.u32 %v8300_v20, 16 }
  0x34   : > { %931 = vmatprep.mubr.bf16.mxu1 %v9983_v2  ;;  %3344 = vmatprep.mubr.bf16.mxu0 %v9983_v2  ;;  %v8291_v10 = vcombine.low %v629_v62, %v639_v3  ;;  %v667_v31 = vrot.slane %v665_v22, 4  ;;  %v670_v32 = vrot.slane %v668_v23, 5  ;;  %v684_v33 = vshll.u32 %v533_v21, 16  ;;  %v8320_v38 = vld [vmem:[%s8145_s8 + $0x28] sm:$0xf] }
  0x35   : > { %1132 = vmatprep.subr.bf16.mxu1 %v7489_v8  ;;  %3770 = vmatprep.subr.bf16.mxu0 %v7493_v16  ;;  %v8286_v8 = vcombine.low %v8251_v46, %v8267_v58  ;;  %v647_v11 = vor.u32 %v646_v4, %v643_v63  ;;  %v7507_v16 = vld [vmem:[%s9974_s5 + $0xb4] ss:$8 sps:$4 sm:$0xff]   ;;  %v676_v39 = vrot.slane %v674_v29, 5  ;;  %v7512_v44 = vld [vmem:[%s9974_s5 + $0xc0] ss:$8 sps:$4 sm:$0xff]   ;;  %v8340_v59 = vcombine.low %v8306_v26, %v8320_v38 }
  0x36   : > { %10006 = vst [vmem:[#allocation3_spill] sm:$0xff] %v8291_v10  ;;  %v671_v43 = vor.u32 %v670_v32, %v667_v31  ;;  %v686_v49 = vrot.slane %v684_v33, 5  ;;  %v7514_v53 = vld [vmem:[%s9974_s5 + $0xc4] ss:$8 sps:$4 sm:$0xff]   ;;  %v8334_v55 = vld [vmem:[%s8109_s18 + $0x3c] sm:$0xf] }
  0x37   : > { %1133 = vmatpush1.bf16.msra.mxu1 %v7487_v12  ;;  %3771 = vmatpush1.bf16.msra.mxu0 %v7491_v15  ;;  %v657_v12 = vor.u32 %v656_v6, %v652_v5  ;;  %v662_v15 = vrot.slane %v660_v0, 5  ;;  %v648_v24 = vrot.slane %v647_v11, 4  ;;  %v8343_v61 = vld [vmem:[%s8109_s18 + $0x40] sm:$0xf]  ;;  %v536_v62 = vld [vmem:[%s8109_s18 + $0x44] sm:$0x1] }
  0x38   : > { %1134 = vmatprep.subr.bf16.mxu1 %v7496_v34  ;;  %3772 = vmatprep.subr.bf16.mxu0 %v7500_v47  ;;  %v7508_v34 = vld [vmem:[%s9973_s4 + $0x40] ss:$8 sps:$4 sm:$0xff]   ;;  %v672_v60 = vrot.slane %v671_v43, 4  ;;  %v689_v63 = vshrl.u32 %v8334_v55, 16  ;;  %v698_v3 = vshll.u32 %v8343_v61, 16  ;;  %v702_v4 = vshrl.u32 %v8343_v61, 16 }
  0x39   : > { %v658_v25 = vrot.slane %v657_v12, 4  ;;  %v653_v36 = vsel %vm8161_vm2, %v648_v24, %v652_v5  ;;  %v7517_v6 = vld [vmem:[%s9973_s4 + $0x54] ss:$8 sps:$4 sm:$0xff]   ;;  %v7515_v12 = vld [vmem:[%s9973_s4 + $0x50] ss:$8 sps:$4 sm:$0xff]   ;;  %v708_v23 = vshll.u32 %v536_v62, 16 }
  0x3a   : > { %932 = vmatmul.mubr.bf16.gmra.mrb[4].mxu1 %v8248_v42  ;;  %3345 = vmatmul.mubr.bf16.gmra.mrb[4].mxu0 %v8238_v35  ;;  %v691_v5 = vrot.slane %v689_v63, 4  ;;  %v704_v11 = vrot.slane %v702_v4, 4  ;;  %v8363_v21 = vld [vmem:[%s8145_s8 + $0x30] sm:$0xf]  ;;  %v8366_v22 = vld [vmem:[%s8145_s8 + $0x34] sm:$0xf] }
  0x3b   : > { %941 = vmatprep.mubr.bf16.mxu1 %v9983_v2  ;;  %3354 = vmatprep.mubr.bf16.mxu0 %v9983_v2  ;;  %v663_v37 = vsel %vm8161_vm2, %v658_v25, %v662_v15  ;;  %v677_v15 = vsel %vm8161_vm2, %v672_v60, %v676_v39  ;;  %v7519_v29 = vld [vmem:[%s9974_s5 + $0xd0] ss:$8 sps:$4 sm:$0xff]   ;;  %v8380_v31 = vld [vmem:[%s8109_s18 + $0x48] sm:$0xf]  ;;  %v8383_v32 = vld [vmem:[%s8109_s18 + $0x4c] sm:$0xf] }
  0x3c   : > { %1135 = vmatpush1.bf16.msra.mxu1 %v7494_v40  ;;  %3773 = vmatpush1.bf16.msra.mxu0 %v7498_v41  ;;  %v680_v40 = vrot.slane %v678_v30, 4  ;;  %v7510_v41 = vld [vmem:[%s9973_s4 + $0x44] ss:$8 sps:$4 sm:$0xff]   ;;  %v8336_v57 = vcombine.low %v653_v36, %v663_v37  ;;  %v7521_v30 = vld [vmem:[%s9974_s5 + $0xd4] ss:$8 sps:$4 sm:$0xff]   ;;  %v713_v37 = vshrl.u32 %v8380_v31, 16 }
  0x3d   : > { %1136 = vmatprep.subr.bf16.mxu1 %v7503_v1  ;;  %3774 = vmatprep.subr.bf16.mxu0 %v7507_v16  ;;  %v692_v1 = vshll.u32 %v8334_v55, 16  ;;  %v8392_v36 = vld [vmem:[%s8109_s18 + $0x50] sm:$0x1]  ;;  %v726_v43 = vshrl.u32 %v8383_v32, 16  ;;  %v7524_v63 = vld [vmem:[%s9973_s4 + $0x64] ss:$8 sps:$4 sm:$0xff]  }
  0x3e   : > { %v681_v47 = vor.u32 %v680_v40, %v676_v39  ;;  %10007 = vst [vmem:[#allocation4_spill] sm:$0xff] %v8336_v57  ;;  %v716_v39 = vshll.u32 %v8380_v31, 16  ;;  %v710_v40 = vrot.slane %v708_v23, 5  ;;  %v715_v60 = vrot.slane %v713_v37, 4  ;;  %v7528_v4 = vld [vmem:[%s9974_s5 + $0xe4] ss:$8 sps:$4 sm:$0xff]  }
  0x3f   : > { %v8434_v23 = vld [vmem:[%s8145_s8 + $0x40] sm:$0xf]  ;;  %v7529_v37 = vld [vmem:[%s9973_s4 + $0x70] ss:$8 sps:$4 sm:$0xff]  }
  0x40   : > { %1137 = vmatpush1.bf16.msra.mxu1 %v7501_v7  ;;  %3775 = vmatpush1.bf16.msra.mxu0 %v7505_v9  ;;  %v682_v0 = vrot.slane %v681_v47, 4  ;;  %v694_v7 = vrot.slane %v692_v1, 5  ;;  %v8353_v9 = vrot.slane %v698_v3, 5  ;;  %v8403_v47 = vcombine.low %v8380_v31, %v8383_v32  ;;  %v7526_v3 = vld [vmem:[%s9974_s5 + $0xe0] ss:$8 sps:$4 sm:$0xff]  }
  0x41   : > { %1138 = vmatprep.subr.bf16.mxu1 %v7510_v41  ;;  %3776 = vmatprep.subr.bf16.mxu0 %v7514_v53  ;;  %v722_v41 = vshll.u32 %v8383_v32, 16  ;;  %v718_v62 = vrot.slane %v716_v39, 5  ;;  %v728_v1 = vrot.slane %v726_v43, 4 }
  0x42   : > { %942 = vmatmul.mubr.bf16.gmra.mrb[8].mxu1 %v8291_v10  ;;  %3355 = vmatmul.mubr.bf16.gmra.mrb[8].mxu0 %v8286_v8  ;;  %v687_v16 = vsel %vm8161_vm2, %v682_v0, %v686_v49  ;;  %v695_v24 = vor.u32 %v694_v7, %v691_v5  ;;  %v705_v25 = vor.u32 %v704_v11, %v8353_v9  ;;  %v8418_v7 = vld [vmem:[%s8109_s18 + $0x54] sm:$0xf]  ;;  %v8421_v11 = vld [vmem:[%s8109_s18 + $0x58] sm:$0xf] }
  0x43   : > { %951 = vmatprep.mubr.bf16.mxu1 %v9983_v2  ;;  %3364 = vmatprep.mubr.bf16.mxu0 %v9983_v2  ;;  %v8385_v33 = vcombine.low %v677_v15, %v687_v16  ;;  %v8408_v0 = vrot.slane %v722_v41, 5  ;;  %v719_v5 = vor.u32 %v718_v62, %v715_v60  ;;  %v8431_v16 = vld [vmem:[%s8145_s8 + $0x3c] sm:$0xf]  ;;  %v8448_v39 = vcombine.low %v8418_v7, %v8421_v11  ;;  %v7533_v60 = vld [vmem:[%s9974_s5 + $0xf0] ss:$8 sps:$4 sm:$0xff]  }
  0x44   : > { %1139 = vmatpush1.bf16.msra.mxu1 %v7508_v34  ;;  %3777 = vmatpush1.bf16.msra.mxu0 %v7512_v44  ;;  %v8389_v34 = vcombine.low %v8363_v21, %v8366_v22  ;;  %v7522_v44 = vld [vmem:[%s9973_s4 + $0x60] ss:$8 sps:$4 sm:$0xff]   ;;  %v696_v49 = vrot.slane %v695_v24, 4  ;;  %v706_v53 = vrot.slane %v705_v25, 4  ;;  %v737_v25 = vshrl.u32 %v8418_v7, 16 }
  0x45   : > { %1140 = vmatprep.subr.bf16.mxu1 %v7517_v6  ;;  %10008 = vst [vmem:[#allocation5_spill] sm:$0xff] %v8385_v33  ;;  %3778 = vmatprep.subr.bf16.mxu0 %v7521_v30  ;;  %v732_v6 = vshll.u32 %v8392_v36, 16  ;;  %v729_v24 = vor.u32 %v728_v1, %v8408_v0  ;;  %v746_v30 = vshll.u32 %v8421_v11, 16  ;;  %v720_v41 = vrot.slane %v719_v5, 4  ;;  %v7535_v62 = vld [vmem:[%s9974_s5 + $0xf4] ss:$8 sps:$4 sm:$0xff]  }
  0x46   : > { %v711_v15 = vsel %vm8161_vm2, %v706_v53, %v710_v40  ;;  %v7531_v40 = vld [vmem:[%s9973_s4 + $0x74] ss:$8 sps:$4 sm:$0xff]  }
  0x47   : > { %v734_v43 = vrot.slane %v732_v6, 5  ;;  %v730_v53 = vrot.slane %v729_v24, 4  ;;  %v8466_v5 = vld [vmem:[%s8109_s18 + $0x5c] sm:$0x1]  ;;  %v7539_v6 = vld [vmem:[%s9973_s4 + $0x104] ss:$8 sps:$4 sm:$0xff]  }
  0x48   : > { %1141 = vmatpush1.bf16.msra.mxu1 %v7515_v12  ;;  %3779 = vmatpush1.bf16.msra.mxu0 %v7519_v29  ;;  %v701_v12 = vsel %vm8161_vm2, %v696_v49, %v8353_v9  ;;  %v740_v29 = vshll.u32 %v8418_v7, 16  ;;  %v750_v9 = vshrl.u32 %v8421_v11, 16  ;;  %v8457_v49 = vcombine.low %v8431_v16, %v8434_v23 }
  0x49   : > { %1142 = vmatprep.subr.bf16.mxu1 %v7524_v63  ;;  %3780 = vmatprep.subr.bf16.mxu0 %v7528_v4  ;;  %v739_v63 = vrot.slane %v737_v25, 4  ;;  %v748_v4 = vrot.slane %v746_v30, 5  ;;  %v3457_v24 = vshll.u32 %v8175_v54, 16  ;;  %v3461_v25 = vshrl.u32 %v8175_v54, 16 }
  0x4a   : > { %952 = vmatmul.mubr.bf16.gmra.mrb[12].mxu1 %v8336_v57  ;;  %3365 = vmatmul.mubr.bf16.gmra.mrb[12].mxu0 %v8340_v59  ;;  %10010 = vst [vmem:[#allocation7_spill] sm:$0xff] %v8457_v49  ;;  %v742_v1 = vrot.slane %v740_v29, 5  ;;  %v7542_v29 = vld [vmem:[%s9974_s5 + $0x104] ss:$8 sps:$4 sm:$0xff]   ;;  %v725_v30 = vsel %vm8161_vm2, %v720_v41, %v8408_v0 }
  0x4b   : > { %961 = vmatprep.mubr.bf16.mxu1 %v9983_v2  ;;  %3374 = vmatprep.mubr.bf16.mxu0 %v9983_v2  ;;  %v3459_v41 = vrot.slane %v3457_v24, 5  ;;  %v3463_v57 = vrot.slane %v3461_v25, 4  ;;  %v3485_v24 = vshrl.u32 %v8210_v14, 16  ;;  %v8509_v25 = vld [vmem:[%s8145_s8 + $0x54] sm:$0xf] }
  0x4c   : > { %1143 = vmatpush1.bf16.msra.mxu1 %v7522_v44  ;;  %3781 = vmatpush1.bf16.msra.mxu0 %v7526_v3  ;;  %v8453_v44 = vcombine.low %v701_v12, %v711_v15  ;;  %v752_v3 = vrot.slane %v750_v9, 4  ;;  %v3448_v12 = vshrl.u32 %v8169_v50, 16  ;;  %v3451_v15 = vshll.u32 %v8169_v50, 16 }
  0x4d   : > { %1144 = vmatprep.subr.bf16.mxu1 %v7531_v40  ;;  %3782 = vmatprep.subr.bf16.mxu0 %v7535_v62  ;;  %v735_v9 = vsel %vm8161_vm2, %v730_v53, %v734_v43  ;;  %v8491_v40 = vld [vmem:[%s8145_s8 + $0x4c] sm:$0xf] }
  0x4e   : > { %10009 = vst [vmem:[#allocation6_spill] sm:$0xff] %v8453_v44  ;;  %v753_v62 = vor.u32 %v752_v3, %v748_v4  ;;  %v3453_v0 = vrot.slane %v3451_v15, 5  ;;  %v3475_v15 = vshll.u32 %v8207_v13, 16 }
  0x50   : > { %1145 = vmatpush1.bf16.msra.mxu1 %v7529_v37  ;;  %3783 = vmatpush1.bf16.msra.mxu0 %v7533_v60  ;;  %v8488_v37 = vld [vmem:[%s8145_s8 + $0x48] sm:$0xf]  ;;  %v743_v60 = vor.u32 %v742_v1, %v739_v63  ;;  %v754_v10 = vrot.slane %v753_v62, 4  ;;  %v3477_v42 = vrot.slane %v3475_v15, 5 }
  0x51   : > { %1439 = vmatprep.subr.bf16.mxu1 %v7539_v6  ;;  %4106 = vmatprep.subr.bf16.mxu0 %v7542_v29  ;;  %v8498_v43 = vcombine.low %v8488_v37, %v8491_v40  ;;  %v8501_v1 = vld [vmem:[%s8145_s8 + $0x8] sm:$0x1]  ;;  %v3464_v6 = vor.u32 %v3463_v57, %v3459_v41  ;;  %v10013_v29 = vmov 0  }
  0x52   : > { %962 = vmatmul.mubr.bf16.gmra.mrb[16].mxu1 %v8385_v33  ;;  %3375 = vmatmul.mubr.bf16.gmra.mrb[16].mxu0 %v8389_v34  ;;  %v3450_v33 = vrot.slane %v3448_v12, 4  ;;  %v744_v53 = vrot.slane %v743_v60, 4  ;;  %v3472_v12 = vshrl.u32 %v8207_v13, 16  ;;  %v8518_v13 = vld [vmem:[%s8145_s8 + $0x58] sm:$0xf] }
  0x53   : > { %971 = vmatprep.mubr.bf16.mxu1 %v9983_v2  ;;  %3384 = vmatprep.mubr.bf16.mxu0 %v9983_v2  ;;  %10012 = vst [vmem:[#allocation9_spill] sm:$0xff] %v8498_v43  ;;  %v3465_v60 = vrot.slane %v3464_v6, 4  ;;  %v3509_v6 = vshrl.u32 %v8267_v58, 16 }
  0x54   : > { %v3454_v3 = vor.u32 %v3453_v0, %v3450_v33  ;;  %v749_v57 = vsel %vm8161_vm2, %v744_v53, %v748_v4  ;;  %v8526_v0 = vcombine.low %v8509_v25, %v8518_v13 }
  0x56   : > { %10015 = vst [vmem:[#allocation11_spill] sm:$0xff] %v8526_v0 }
  0x5a   : > { %972 = vmatmul.mubr.bf16.gmra.mrb[20].mxu1 %v8453_v44  ;;  %3385 = vmatmul.mubr.bf16.gmra.mrb[20].mxu0 %v8457_v49  ;;  %v756_v44 = vshll.u32 %v8466_v5, 16  ;;  %v3523_v49 = vshll.u32 %v8306_v26, 16 }
  0x5b   : > { %981 = vmatprep.mubr.bf16.mxu1 %v9983_v2  ;;  %3394 = vmatprep.mubr.bf16.mxu0 %v9983_v2  ;;  %v8494_v2 = vcombine.low %v725_v30, %v735_v9  ;;  %v3481_v30 = vshll.u32 %v8210_v14, 16  ;;  %v3455_v9 = vrot.slane %v3454_v3, 4  ;;  %v3496_v14 = vshrl.u32 %v8251_v46, 16 }
  0x5c   : > { %v758_v63 = vrot.slane %v756_v44, 5  ;;  %v3467_v44 = vshll.u32 %v8501_v1, 16  ;;  %v3499_v3 = vshll.u32 %v8251_v46, 16  ;;  %v3505_v46 = vshll.u32 %v8267_v58, 16 }
  0x5d   : > { %10011 = vst [vmem:[#allocation8_spill] sm:$0xff] %v8494_v2  ;;  %v8528_v53 = vrot.slane %v3481_v30, 5 }
  0x5e   : > { %v759_v33 = vsel %vm8161_vm2, %v754_v10, %v758_v63  ;;  %v3469_v4 = vrot.slane %v3467_v44, 5  ;;  %v3487_v10 = vrot.slane %v3485_v24, 4  ;;  %v8531_v63 = vld [vmem:[%s8145_s8 + $0x14] sm:$0x1] }
  0x5f   : > { %v8522_v62 = vcombine.low %v749_v57, %v759_v33  ;;  %v3491_v24 = vshll.u32 %v8531_v63, 16  ;;  %v3923_v57 = vrot.slane %v8175_v54, 5  ;;  %v6208_v33 = vcombine.low %v8124_v27, %v8127_v28 }
  0x60   : > { %v3470_v15 = vsel %vm8161_vm2, %v3465_v60, %v3469_v4  ;;  %v3498_v60 = vrot.slane %v3496_v14, 4  ;;  %v3501_v4 = vrot.slane %v3499_v3, 5  ;;  %v8559_v54 = vrot.slane %v3505_v46, 5  ;;  %v7549_v14 = vld [vmem:[%s9974_s5 + $0x114] ss:$8 sps:$4 sm:$0xff]  }
  0x61   : > { %10014 = vst [vmem:[#allocation10_spill] sm:$0xff] %v8522_v62  ;;  %v6544_v27 = vrot.slane %v8169_v50, 9  ;;  %v3925_v28 = vrot.slane %v3923_v57, 4  ;;  %v7544_v50 = vld [vmem:[%s9973_s4 + $0x110] ss:$8 sps:$4 sm:$0xff]  }
  0x62   : > { %982 = vmatmul.mubr.bf16.gmra.mrb[24].mxu1 %v8494_v2  ;;  %3395 = vmatmul.mubr.bf16.gmra.mrb[24].mxu0 %v8498_v43  ;;  %v3474_v2 = vrot.slane %v3472_v12, 4  ;;  %v3460_v43 = vsel %vm8161_vm2, %v3455_v9, %v3459_v41  ;;  %v3488_v41 = vor.u32 %v3487_v10, %v8528_v53  ;;  %v8557_v9 = vld [vmem:[%s8145_s8 + $0x20] sm:$0x1]  ;;  %v3493_v10 = vrot.slane %v3491_v24, 5  ;;  %v7547_v24 = vld [vmem:[%s9974_s5 + $0x110] ss:$8 sps:$4 sm:$0xff]  }
  0x63   : > { %991 = vmatprep.mubr.bf16.mxu1 %v10013_v29  ;;  %3404 = vmatprep.mubr.bf16.mxu0 %v10013_v29  ;;  %v6520_v44 = vcombine.low %v3460_v43, %v3470_v15  ;;  %v7546_v43 = vld [vmem:[%s9973_s4 + $0x114] ss:$8 sps:$4 sm:$0xff]   ;;  %v3515_v3 = vshll.u32 %v8557_v9, 16  ;;  %v7553_v46 = vld [vmem:[%s9973_s4 + $0x124] ss:$8 sps:$4 sm:$0xff]  }
  0x64   : > { %v3478_v12 = vor.u32 %v3477_v42, %v3474_v2  ;;  %v7537_v2 = vld [vmem:[%s9973_s4 + $0x100] ss:$8 sps:$4 sm:$0xff]   ;;  %v3489_v58 = vrot.slane %v3488_v41, 4 }
  0x65   : > { %v7540_v42 = vld [vmem:[%s9974_s5 + $0x100] ss:$8 sps:$4 sm:$0xff]  }
  0x66   : > { %v3479_v30 = vrot.slane %v3478_v12, 4  ;;  %v3533_v12 = vshrl.u32 %v8320_v38, 16  ;;  %v3494_v41 = vsel %vm8161_vm2, %v3489_v58, %v3493_v10 }
  0x68   : > { %v3484_v15 = vsel %vm8161_vm2, %v3479_v30, %v8528_v53  ;;  %v8595_v53 = vcombine.low %v8172_v51, %v8181_v56  ;;  %v7556_v30 = vld [vmem:[%s9974_s5 + $0x124] ss:$8 sps:$4 sm:$0xff]   ;;  %v7554_v51 = vld [vmem:[%s9974_s5 + $0x120] ss:$8 sps:$4 sm:$0xff]   ;;  %v3525_v56 = vrot.slane %v3523_v49, 5  ;;  %v3535_v58 = vrot.slane %v3533_v12, 4 }
  0x69   : > { %v7560_v49 = vld [vmem:[%s9973_s4 + $0x134] ss:$8 sps:$4 sm:$0xff]  }
  0x6a   : > { %992 = vmatmul.mubr.bf16.gmra.mrb[28].mxu1 %v8522_v62  ;;  %3405 = vmatmul.mubr.bf16.gmra.mrb[28].mxu0 %v8526_v0  ;;  %v3511_v62 = vrot.slane %v3509_v6, 4  ;;  %v3520_v0 = vshrl.u32 %v8306_v26, 16  ;;  %v3544_v6 = vshrl.u32 %v8363_v21, 16  ;;  %v3502_v26 = vor.u32 %v3501_v4, %v3498_v60  ;;  %v7551_v60 = vld [vmem:[%s9973_s4 + $0x120] ss:$8 sps:$4 sm:$0xff]  }
  0x6b   : > { %1162 = vmatprep.mubr.bf16.mxu1 %v10013_v29  ;;  %3800 = vmatprep.mubr.bf16.mxu0 %v10013_v29  ;;  %v7563_v12 = vld [vmem:[%s9974_s5 + $0x134] ss:$8 sps:$4 sm:$0xff]  }
  0x6c   : > { %v3503_v4 = vrot.slane %v3502_v26, 4  ;;  %v3926_v26 = vrot.slane %v8501_v1, 5  ;;  %v3581_v1 = vshrl.u32 %v8434_v23, 16 }
  0x72   : > { %1163 = vmatmul.mubr.bf16.vlgmr.msra.gmra.mrb[0].mxu1 %v6208_v33  ;;  %3801 = vmatmul.mubr.bf16.vlgmr.msra.gmra.mrb[0].mxu0 %v6520_v44  ;;  %v3512_v33 = vor.u32 %v3511_v62, %v8559_v54  ;;  %v3557_v44 = vshrl.u32 %v8366_v22, 16  ;;  %v3522_v62 = vrot.slane %v3520_v0, 4 }
  0x73   : > { %1440 = vmatpush1.bf16.msra.mxu1 %v7537_v2  ;;  %4107 = vmatpush1.bf16.msra.mxu0 %v7540_v42  ;;  %v3529_v2 = vshll.u32 %v8320_v38, 16  ;;  %v3547_v42 = vshll.u32 %v8363_v21, 16  ;;  %v3517_v38 = vrot.slane %v3515_v3, 5  ;;  %v8600_v21 = vcombine.low %v3484_v15, %v3494_v41 }
  0x74   : > { %1172 = vmatprep.mubr.bf16.mxu1 %v10013_v29  ;;  %3810 = vmatprep.mubr.bf16.mxu0 %v10013_v29  ;;  %v3513_v0 = vrot.slane %v3512_v33, 4  ;;  %v8619_v3 = vsel %vm8608_vm5, %v6544_v27, %v3923_v57  ;;  %v3568_v15 = vshrl.u32 %v8431_v16, 16  ;;  %v3571_v41 = vshll.u32 %v8431_v16, 16  ;;  %v7558_v27 = vld [vmem:[%s9973_s4 + $0x130] ss:$8 sps:$4 sm:$0xff]  }
  0x75   : > { %1441 = vmatprep.subr.bf16.mxu1 %v7546_v43  ;;  %4108 = vmatprep.subr.bf16.mxu0 %v7549_v14  ;;  %10016 = vst [vmem:[#allocation12_spill] sm:$0xff] %v8600_v21  ;;  %v8613_v43 = vld [vmem:[%s8145_s8 + $0x2c] sm:$0x1]  ;;  %v8615_v14 = vrot.slane %v3529_v2, 5  ;;  %v8633_v57 = vsel %vm8608_vm5, %v3925_v28, %v3926_v26  ;;  %v3508_v28 = vsel %vm8161_vm2, %v3503_v4, %v8559_v54  ;;  %v3549_v26 = vrot.slane %v3547_v42, 5 }
  0x76   : > { %v3518_v33 = vsel %vm8161_vm2, %v3513_v0, %v3517_v38  ;;  %v3559_v54 = vrot.slane %v3557_v44, 4  ;;  %v8661_v38 = vld [vmem:[%s8145_s8 + $0x38] sm:$0x1]  ;;  %v7570_v4 = vld [vmem:[%s9974_s5 + $0x144] ss:$8 sps:$4 sm:$0xff]  }
  0x77   : > { %1442 = vmatpush1.bf16.msra.mxu1 %v7544_v50  ;;  %4109 = vmatpush1.bf16.msra.mxu0 %v7547_v24  ;;  %v3553_v50 = vshll.u32 %v8366_v22, 16  ;;  %v3526_v24 = vor.u32 %v3525_v56, %v3522_v62  ;;  %v3539_v22 = vshll.u32 %v8613_v43, 16  ;;  %v3536_v2 = vor.u32 %v3535_v58, %v8615_v14  ;;  %v7567_v62 = vld [vmem:[%s9973_s4 + $0x144] ss:$8 sps:$4 sm:$0xff]   ;;  %v7565_v44 = vld [vmem:[%s9973_s4 + $0x140] ss:$8 sps:$4 sm:$0xff]  }
  0x78   : > { %1443 = vmatprep.subr.bf16.mxu1 %v7553_v46  ;;  %4110 = vmatprep.subr.bf16.mxu0 %v7556_v30  ;;  %v7561_v30 = vld [vmem:[%s9974_s5 + $0x130] ss:$8 sps:$4 sm:$0xff]   ;;  %v3546_v56 = vrot.slane %v3544_v6, 4  ;;  %v3577_v58 = vshll.u32 %v8434_v23, 16  ;;  %v8669_v6 = vcombine.low %v8219_v18, %v8222_v19  ;;  %v7568_v0 = vld [vmem:[%s9974_s5 + $0x140] ss:$8 sps:$4 sm:$0xff]  }
  0x79   : > { %v8658_v46 = vrot.slane %v3553_v50, 5  ;;  %v3527_v42 = vrot.slane %v3526_v24, 4  ;;  %v3570_v50 = vrot.slane %v3568_v15, 4  ;;  %v3573_v18 = vrot.slane %v3571_v41, 5 }
  0x7a   : > { %1173 = vmatmul.mubr.bf16.gmra.mrb[4].mxu1 %v8595_v53  ;;  %3811 = vmatmul.mubr.bf16.gmra.mrb[4].mxu0 %v8600_v21  ;;  %v3550_v19 = vor.u32 %v3549_v26, %v3546_v56  ;;  %v7577_v21 = vld [vmem:[%s9974_s5 + $0x154] ss:$8 sps:$4 sm:$0xff]   ;;  %v3592_v15 = vshrl.u32 %v8488_v37, 16  ;;  %v3595_v41 = vshll.u32 %v8488_v37, 16 }
  0x7b   : > { %1182 = vmatprep.mubr.bf16.mxu1 %v10013_v29  ;;  %3820 = vmatprep.mubr.bf16.mxu0 %v10013_v29  ;;  %v3560_v24 = vor.u32 %v3559_v54, %v8658_v46  ;;  %v3574_v56 = vor.u32 %v3573_v18, %v3570_v50  ;;  %v3629_v50 = vshrl.u32 %v8518_v13, 16 }
  0x7c   : > { %1444 = vmatpush1.bf16.msra.mxu1 %v7551_v60  ;;  %4111 = vmatpush1.bf16.msra.mxu0 %v7554_v51  ;;  %v8671_v60 = vcombine.low %v3508_v28, %v3518_v33  ;;  %v3541_v51 = vrot.slane %v3539_v22, 5  ;;  %v3563_v22 = vshll.u32 %v8661_v38, 16  ;;  %v8685_v28 = vld [vmem:[%s8145_s8 + $0x44] sm:$0x1]  ;;  %v8687_v33 = vrot.slane %v3577_v58, 5 }
  0x7d   : > { %1445 = vmatprep.subr.bf16.mxu1 %v7560_v49  ;;  %4112 = vmatprep.subr.bf16.mxu0 %v7563_v12  ;;  %v3537_v49 = vrot.slane %v3536_v2, 4  ;;  %v7574_v12 = vld [vmem:[%s9973_s4 + $0x154] ss:$8 sps:$4 sm:$0xff]   ;;  %v3583_v2 = vrot.slane %v3581_v1, 4  ;;  %v3532_v1 = vsel %vm8161_vm2, %v3527_v42, %v8615_v14  ;;  %v3587_v26 = vshll.u32 %v8685_v28, 16 }
  0x7e   : > { %10019 = vst [vmem:[#allocation13_spill] sm:$0xff] %v8671_v60  ;;  %v3551_v54 = vrot.slane %v3550_v19, 4  ;;  %v3565_v58 = vrot.slane %v3563_v22, 5  ;;  %v3616_v14 = vshrl.u32 %v8509_v25, 16  ;;  %v8714_v42 = vcombine.low %v8257_v48, %v8260_v52 }
  0x7f   : > { %v3601_v48 = vshll.u32 %v8491_v40, 16  ;;  %v8728_v52 = vrot.slane %v3574_v56, 4  ;;  %v8735_v19 = vrot.slane %v3592_v15, 4  ;;  %v6549_v15 = vrot.slane %v8431_v16, 9  ;;  %v8765_v16 = vld [vmem:[%s8145_s8 + $0x50] sm:$0x1] }
  0x80   : > { %1446 = vmatpush1.bf16.msra.mxu1 %v7558_v27  ;;  %4113 = vmatpush1.bf16.msra.mxu0 %v7561_v30  ;;  %v3605_v27 = vshrl.u32 %v8491_v40, 16  ;;  %v3542_v30 = vsel %vm8161_vm2, %v3537_v49, %v3541_v51  ;;  %v3584_v51 = vor.u32 %v3583_v2, %v8687_v33  ;;  %v7581_v49 = vld [vmem:[%s9973_s4 + $0x164] ss:$8 sps:$4 sm:$0xff]   ;;  %v3556_v22 = vsel %vm8161_vm2, %v3551_v54, %v8658_v46  ;;  %v7588_v46 = vld [vmem:[%s9973_s4 + $0x174] ss:$8 sps:$4 sm:$0xff]  }
  0x81   : > { %1447 = vmatprep.subr.bf16.mxu1 %v7567_v62  ;;  %4114 = vmatprep.subr.bf16.mxu0 %v7570_v4  ;;  %v7572_v62 = vld [vmem:[%s9973_s4 + $0x150] ss:$8 sps:$4 sm:$0xff]   ;;  %v3561_v4 = vrot.slane %v3560_v24, 4  ;;  %v8725_v18 = vcombine.low %v3532_v1, %v3542_v30  ;;  %v8737_v24 = vrot.slane %v3595_v41, 5  ;;  %v7582_v30 = vld [vmem:[%s9974_s5 + $0x160] ss:$8 sps:$4 sm:$0xff]   ;;  %v8752_v41 = vcombine.low %v8297_v17, %v8300_v20 }
  0x82   : > { %1183 = vmatmul.mubr.bf16.gmra.mrb[8].mxu1 %v8669_v6  ;;  %3821 = vmatmul.mubr.bf16.gmra.mrb[8].mxu0 %v8671_v60  ;;  %v7575_v60 = vld [vmem:[%s9974_s5 + $0x150] ss:$8 sps:$4 sm:$0xff]   ;;  %v8744_v1 = vrot.slane %v3605_v27, 4  ;;  %v8754_v56 = vrot.slane %v3584_v51, 4  ;;  %v8767_v17 = vrot.slane %v3601_v48, 5  ;;  %v3958_v27 = vrot.slane %v8434_v23, 5 }
  0x83   : > { %1192 = vmatprep.mubr.bf16.mxu1 %v10013_v29  ;;  %3830 = vmatprep.mubr.bf16.mxu0 %v10013_v29  ;;  %v3566_v2 = vsel %vm8161_vm2, %v3561_v4, %v3565_v58  ;;  %v7586_v20 = vld [vmem:[%s9973_s4 + $0x170] ss:$8 sps:$4 sm:$0xff]   ;;  %v1298_v58 = vrot.slane %v8383_v32, 5  ;;  %v1301_v51 = vrot.slane %v8392_v36, 5  ;;  %v6550_v23 = vrot.slane %v8488_v37, 9 }
  0x84   : > { %1448 = vmatpush1.bf16.msra.mxu1 %v7565_v44  ;;  %4115 = vmatpush1.bf16.msra.mxu0 %v7568_v0  ;;  %v7584_v44 = vld [vmem:[%s9974_s5 + $0x164] ss:$8 sps:$4 sm:$0xff]   ;;  %v3619_v0 = vshll.u32 %v8509_v25, 16  ;;  %v8777_v54 = vcombine.low %v3556_v22, %v3566_v2  ;;  %v7589_v4 = vld [vmem:[%s9974_s5 + $0x170] ss:$8 sps:$4 sm:$0xff]   ;;  %v3965_v32 = vrot.slane %v8491_v40, 5 }
  0x85   : > { %1449 = vmatprep.subr.bf16.mxu1 %v7574_v12  ;;  %4116 = vmatprep.subr.bf16.mxu0 %v7577_v21  ;;  %v8730_v12 = vrot.slane %v3587_v26, 5  ;;  %v7579_v21 = vld [vmem:[%s9973_s4 + $0x160] ss:$8 sps:$4 sm:$0xff]   ;;  %v6238_v26 = vrot.slane %v8380_v31, 9  ;;  %v3580_v31 = vsel %vm8161_vm2, %v8728_v52, %v8687_v33  ;;  %v7597_v36 = vld [vmem:[%s9974_s5 + $0x184] ss:$8 sps:$4 sm:$0xff]  }
  0x86   : > { %10020 = vst [vmem:[#allocation14_spill] sm:$0xff] %v8777_v54  ;;  %v1300_v33 = vrot.slane %v1298_v58, 4  ;;  %v3968_v48 = vrot.slane %v8765_v16, 5  ;;  %v6239_v52 = vrot.slane %v8418_v7, 9  ;;  %v3966_v40 = vsel %vm8608_vm5, %v6550_v23, %v3965_v32 }
  0x87   : > { %v1299_v37 = vsel %vm8608_vm5, %v6238_v26, %v1298_v58  ;;  %v3967_v22 = vrot.slane %v3965_v32, 4  ;;  %v1305_v2 = vrot.slane %v8421_v11, 5  ;;  %v3598_v58 = vor.u32 %v8737_v24, %v8735_v19 }
  0x88   : > { %1450 = vmatpush1.bf16.msra.mxu1 %v7572_v62  ;;  %4117 = vmatpush1.bf16.msra.mxu0 %v7575_v60  ;;  %v7591_v60 = vld [vmem:[%s9974_s5 + $0x174] ss:$8 sps:$4 sm:$0xff]   ;;  %v3961_v62 = vrot.slane %v8685_v28, 5  ;;  %v7594_v28 = vld [vmem:[%s9973_s4 + $0x184] ss:$8 sps:$4 sm:$0xff]   ;;  %v3608_v23 = vor.u32 %v8744_v1, %v8767_v17  ;;  %v3611_v19 = vshll.u32 %v8765_v16, 16  ;;  %v8845_v1 = vcombine.low %v8334_v55, %v8343_v61 }
  0x89   : > { %1451 = vmatprep.subr.bf16.mxu1 %v7581_v49  ;;  %4118 = vmatprep.subr.bf16.mxu0 %v7584_v44  ;;  %v3959_v49 = vsel %vm8608_vm5, %v6549_v15, %v3958_v27  ;;  %v3960_v44 = vrot.slane %v3958_v27, 4  ;;  %v1302_v15 = vsel %vm8608_vm5, %v1300_v33, %v1301_v51  ;;  %v3151_v27 = vld [vmem:[%s8145_s8 + $0x5c] sm:$0x1]  ;;  %v1306_v11 = vsel %vm8608_vm5, %v6239_v52, %v1305_v2 }
  0x8a   : > { %1193 = vmatmul.mubr.bf16.gmra.mrb[12].mxu1 %v8714_v42  ;;  %3831 = vmatmul.mubr.bf16.gmra.mrb[12].mxu0 %v8725_v18  ;;  %v8814_v7 = vcombine.low %v1299_v37, %v1302_v15  ;;  %v1307_v26 = vrot.slane %v1305_v2, 4  ;;  %v3972_v51 = vrot.slane %v8518_v13, 5  ;;  %v3618_v37 = vrot.slane %v3616_v14, 4  ;;  %v7884_v15 = vld [vmem:[%s8109_s18 + $0x4] sm:$0xf] }
  0x8b   : > { %1202 = vmatprep.mubr.bf16.mxu1 %v10013_v29  ;;  %3840 = vmatprep.mubr.bf16.mxu0 %v10013_v29  ;;  %v3621_v52 = vrot.slane %v3619_v0, 5  ;;  %v3631_v55 = vrot.slane %v3629_v50, 4  ;;  %v3635_v0 = vshll.u32 %v3151_v27, 16 }
  0x8c   : > { %1452 = vmatpush1.bf16.msra.mxu1 %v7579_v21  ;;  %4119 = vmatpush1.bf16.msra.mxu0 %v7582_v30  ;;  %v3962_v21 = vsel %vm8608_vm5, %v3960_v44, %v3961_v62  ;;  %v3969_v62 = vsel %vm8608_vm5, %v3967_v22, %v3968_v48  ;;  %v3609_v48 = vrot.slane %v3608_v23, 4 }
  0x8d   : > { %1453 = vmatprep.subr.bf16.mxu1 %v7588_v46  ;;  %4120 = vmatprep.subr.bf16.mxu0 %v7591_v60  ;;  %v8807_v30 = vcombine.low %v3959_v49, %v3962_v21  ;;  %v1308_v46 = vrot.slane %v8466_v5, 5  ;;  %v6551_v60 = vrot.slane %v8509_v25, 9  ;;  %v8822_v5 = vcombine.low %v3966_v40, %v3969_v62 }
  0x8e   : > { %v3622_v14 = vor.u32 %v3621_v52, %v3618_v37  ;;  %v3637_v22 = vrot.slane %v3635_v0, 5  ;;  %v7890_v37 = vld [vmem:[%s8109_s18 + $0x14] sm:$0x1] }
  0x8f   : > { %v1309_v24 = vsel %vm8608_vm5, %v1307_v26, %v1308_v46  ;;  %v3973_v44 = vsel %vm8608_vm5, %v6551_v60, %v3972_v51  ;;  %v1256_v46 = vrot.slane %v7884_v15, 5  ;;  %v7600_v52 = vld [vmem:[%s9973_s4 + $0x194] ss:$8 sps:$4 sm:$0xff]  }
  0x90   : > { %1454 = vmatpush1.bf16.msra.mxu1 %v7586_v20  ;;  %4121 = vmatpush1.bf16.msra.mxu0 %v7589_v4  ;;  %v3975_v20 = vrot.slane %v3151_v27, 5  ;;  %v3590_v4 = vsel %vm8161_vm2, %v8754_v56, %v8730_v12  ;;  %v8839_v49 = vcombine.low %v1306_v11, %v1309_v24  ;;  %v3974_v12 = vrot.slane %v3972_v51, 4  ;;  %v7885_v27 = vld [vmem:[%s8109_s18 + $0x8] sm:$0x1]  ;;  %v7886_v11 = vld [vmem:[%s8109_s18] sm:$0xf] }
  0x91   : > { %1687 = vmatprep.subr.bf16.mxu1 %v7594_v28  ;;  %4354 = vmatprep.subr.bf16.mxu0 %v7597_v36  ;;  %v3625_v28 = vshll.u32 %v8518_v13, 16  ;;  %v3599_v56 = vrot.slane %v3598_v58, 4  ;;  %v8849_v32 = vcombine.low %v3580_v31, %v3590_v4  ;;  %v3613_v36 = vrot.slane %v3611_v19, 5  ;;  %v7887_v51 = vld [vmem:[%s8109_s18 + $0x10] sm:$0xf] }
  0x92   : > { %1203 = vmatmul.mubr.bf16.gmra.mrb[16].mxu1 %v8752_v41  ;;  %3841 = vmatmul.mubr.bf16.gmra.mrb[16].mxu0 %v8777_v54  ;;  %v3976_v16 = vsel %vm8608_vm5, %v3974_v12, %v3975_v20  ;;  %v3623_v31 = vrot.slane %v3622_v14, 4  ;;  %v1259_v62 = vrot.slane %v7885_v27, 5  ;;  %v6232_v26 = vrot.slane %v7886_v11, 9  ;;  %v7888_v19 = vld [vmem:[%s8145_s8 + $0x10] sm:$0xf] }
  0x93   : > { %1212 = vmatprep.mubr.bf16.mxu1 %v10013_v29  ;;  %3850 = vmatprep.mubr.bf16.mxu0 %v10013_v29  ;;  %10021 = vst [vmem:[#allocation15_spill] sm:$0xff] %v8849_v32  ;;  %v8853_v33 = vcombine.low %v3973_v44, %v3976_v16  ;;  %v3627_v21 = vrot.slane %v3625_v28, 5  ;;  %v3604_v61 = vsel %vm8161_vm2, %v3599_v56, %v8767_v17  ;;  %v1258_v58 = vrot.slane %v1256_v46, 4  ;;  %v7592_v28 = vld [vmem:[%s9973_s4 + $0x180] ss:$8 sps:$4 sm:$0xff]  }
  0x94   : > { %v3614_v25 = vsel %vm8161_vm2, %v3609_v48, %v3613_v36  ;;  %v1263_v20 = vrot.slane %v7887_v51, 5  ;;  %v1257_v4 = vsel %vm8608_vm5, %v6232_v26, %v1256_v46  ;;  %v3930_v24 = vrot.slane %v7888_v19, 5  ;;  %v7595_v44 = vld [vmem:[%s9974_s5 + $0x180] ss:$8 sps:$4 sm:$0xff]   ;;  %v7889_v56 = vld [vmem:[%s8109_s18 + $0xc] sm:$0xf] }
  0x95   : > { %v3632_v13 = vor.u32 %v3631_v55, %v3627_v21  ;;  %v8868_v50 = vcombine.low %v3604_v61, %v3614_v25  ;;  %v3628_v17 = vsel %vm8161_vm2, %v3623_v31, %v3627_v21  ;;  %v1260_v23 = vsel %vm8608_vm5, %v1258_v58, %v1259_v62  ;;  %v7891_v21 = vld [vmem:[%s8145_s8 + $0xc] sm:$0xf]  ;;  %v7603_v14 = vld [vmem:[%s9974_s5 + $0x194] ss:$8 sps:$4 sm:$0xff]   ;;  %v7894_v62 = vld [vmem:[%s8109_s18 + $0x18] sm:$0xf] }
  0x96   : > { %v6256_v12 = vcombine.low %v1257_v4, %v1260_v23  ;;  %v6233_v16 = vrot.slane %v7889_v56, 9  ;;  %v1265_v36 = vrot.slane %v1263_v20, 4  ;;  %v1266_v48 = vrot.slane %v7890_v37, 5  ;;  %v7893_v15 = vld [vmem:[%s8145_s8 + $0x1c] sm:$0xf] }
  0x97   : > { %v3633_v40 = vrot.slane %v3632_v13, 4  ;;  %v6545_v55 = vrot.slane %v7891_v21, 9  ;;  %v3932_v61 = vrot.slane %v3930_v24, 4  ;;  %v3933_v25 = vrot.slane %v8531_v63, 5  ;;  %v7601_v63 = vld [vmem:[%s9974_s5 + $0x190] ss:$8 sps:$4 sm:$0xff]  }
  0x98   : > { %v10022_v13 = vcombine.low %v8619_v3, %v8633_v57  ;;  %v1264_v0 = vsel %vm8608_vm5, %v6233_v16, %v1263_v20  ;;  %v1267_v31 = vsel %vm8608_vm5, %v1265_v36, %v1266_v48  ;;  %v7606_v3 = vld [vmem:[%s9973_s4 + $0x1a4] ss:$8 sps:$4 sm:$0xff]   ;;  %v3937_v46 = vrot.slane %v7893_v15, 5  ;;  %v7895_v51 = vld [vmem:[%s8109_s18 + $0x20] sm:$0x1] }
  0x99   : > { %v3638_v2 = vsel %vm8161_vm2, %v3633_v40, %v3637_v22  ;;  %v7598_v40 = vld [vmem:[%s9973_s4 + $0x190] ss:$8 sps:$4 sm:$0xff]   ;;  %v3931_v57 = vsel %vm8608_vm5, %v6545_v55, %v3930_v24  ;;  %v3934_v22 = vsel %vm8608_vm5, %v3932_v61, %v3933_v25  ;;  %v7609_v27 = vld [vmem:[%s9974_s5 + $0x1a4] ss:$8 sps:$4 sm:$0xff]   ;;  %v6234_v11 = vrot.slane %v7894_v62, 9 }
  0x9a   : > { %1213 = vmatmul.mubr.bf16.gmra.mrb[20].mxu1 %v8845_v1  ;;  %3851 = vmatmul.mubr.bf16.gmra.mrb[20].mxu0 %v8849_v32  ;;  %v8879_v60 = vcombine.low %v3628_v17, %v3638_v2  ;;  %v7892_v17 = vld [vmem:[%s8109_s18 + $0x1c] sm:$0xf]  ;;  %v8937_v26 = vcombine.low %v1264_v0, %v1267_v31  ;;  %v8939_v58 = vcombine.low %v3931_v57, %v3934_v22  ;;  %v1273_v20 = vrot.slane %v7895_v51, 5  ;;  %v7604_v4 = vld [vmem:[%s9973_s4 + $0x1a0] ss:$8 sps:$4 sm:$0xff]  }
  0x9b   : > { %1222 = vmatprep.mubr.bf16.mxu1 %v10013_v29  ;;  %3860 = vmatprep.mubr.bf16.mxu0 %v10013_v29  ;;  %v1270_v2 = vrot.slane %v7892_v17, 5  ;;  %v7896_v23 = vld [vmem:[%s8145_s8 + $0x18] sm:$0xf]  ;;  %v7607_v24 = vld [vmem:[%s9974_s5 + $0x1a0] ss:$8 sps:$4 sm:$0xff]  }
  0x9c   : > { %v6546_v19 = vrot.slane %v7896_v23, 9  ;;  %v7612_v56 = vld [vmem:[%s9973_s4 + $0x1b4] ss:$8 sps:$4 sm:$0xff]   ;;  %v7610_v48 = vld [vmem:[%s9973_s4 + $0x1b0] ss:$8 sps:$4 sm:$0xff]  }
  0x9d   : > { %v7615_v16 = vld [vmem:[%s9974_s5 + $0x1b4] ss:$8 sps:$4 sm:$0xff]   ;;  %v1271_v36 = vsel %vm8608_vm5, %v6234_v11, %v1270_v2  ;;  %v7898_v25 = vld [vmem:[%s8145_s8 + $0x28] sm:$0xf]  ;;  %v7621_v0 = vld [vmem:[%s9974_s5 + $0x1c4] ss:$8 sps:$4 sm:$0xff]  }
  0x9e   : > { %v3938_v55 = vsel %vm8608_vm5, %v6546_v19, %v3937_v46  ;;  %v7899_v31 = vld [vmem:[%s8109_s18 + $0x24] sm:$0xf]  ;;  %v7900_v22 = vld [vmem:[%s8109_s18 + $0x2c] sm:$0x1]  ;;  %v7619_v15 = vld [vmem:[%s9974_s5 + $0x1c0] ss:$8 sps:$4 sm:$0xff]  }
  0x9f   : > { %v1280_v17 = vrot.slane %v7900_v22, 5  ;;  %v3947_v11 = vrot.slane %v8613_v43, 5  ;;  %v7624_v51 = vld [vmem:[%s9973_s4 + $0x1d4] ss:$8 sps:$4 sm:$0xff]   ;;  %v7622_v23 = vld [vmem:[%s9973_s4 + $0x1d0] ss:$8 sps:$4 sm:$0xff]  }
  0xa0   : > { %v7625_v19 = vld [vmem:[%s9974_s5 + $0x1d0] ss:$8 sps:$4 sm:$0xff]   ;;  %v7636_v22 = vld [vmem:[%s9973_s4 + $0x1f4] ss:$8 sps:$4 sm:$0xff]  }
  0xa2   : > { %1223 = vmatmul.mubr.bf16.gmra.mrb[24].mxu1 %v8403_v47  ;;  %3861 = vmatmul.mubr.bf16.gmra.mrb[24].mxu0 %v8868_v50 }
  0xa3   : > { %1232 = vmatprep.mubr.bf16.mxu1 %v10013_v29  ;;  %3870 = vmatprep.mubr.bf16.mxu0 %v10013_v29 }
  0xaa   : > { %1233 = vmatmul.mubr.bf16.gmra.mrb[28].mxu1 %v8448_v39  ;;  %3871 = vmatmul.mubr.bf16.gmra.mrb[28].mxu0 %v8879_v60 }
  0xab   : > { %1471 = vmatprep.mubr.bf16.mxu1 %v10013_v29  ;;  %4138 = vmatprep.mubr.bf16.mxu0 %v10013_v29 }
  0xb2   : > { %1472 = vmatmul.mubr.bf16.vlgmr.msra.gmra.mrb[0].mxu1 %v6256_v12  ;;  %4139 = vmatmul.mubr.bf16.vlgmr.msra.gmra.mrb[0].mxu0 %v10022_v13  ;;  %v3940_v12 = vrot.slane %v8557_v9, 5  ;;  %v7897_v9 = vld [vmem:[%s8109_s18 + $0x28] sm:$0xf]  ;;  %v7618_v13 = vld [vmem:[%s9973_s4 + $0x1c4] ss:$8 sps:$4 sm:$0xff]  }
  0xb3   : > { %1688 = vmatpush1.bf16.msra.mxu1 %v7592_v28  ;;  %4355 = vmatpush1.bf16.msra.mxu0 %v7595_v44  ;;  %v1272_v28 = vrot.slane %v1270_v2, 4  ;;  %v3939_v44 = vrot.slane %v3937_v46, 4  ;;  %v1277_v37 = vrot.slane %v7897_v9, 5  ;;  %v7616_v2 = vld [vmem:[%s9973_s4 + $0x1c0] ss:$8 sps:$4 sm:$0xff]  }
  0xb4   : > { %1481 = vmatprep.mubr.bf16.mxu1 %v10013_v29  ;;  %4148 = vmatprep.mubr.bf16.mxu0 %v10013_v29  ;;  %v7901_v46 = vld [vmem:[%s8145_s8 + $0x24] sm:$0xf] }
  0xb5   : > { %1689 = vmatprep.subr.bf16.mxu1 %v7600_v52  ;;  %4356 = vmatprep.subr.bf16.mxu0 %v7603_v14  ;;  %v7613_v52 = vld [vmem:[%s9974_s5 + $0x1b0] ss:$8 sps:$4 sm:$0xff]   ;;  %v1274_v21 = vsel %vm8608_vm5, %v1272_v28, %v1273_v20  ;;  %v3941_v61 = vsel %vm8608_vm5, %v3939_v44, %v3940_v12  ;;  %v3944_v14 = vrot.slane %v7898_v25, 5  ;;  %v1279_v57 = vrot.slane %v1277_v37, 4  ;;  %v7627_v20 = vld [vmem:[%s9974_s5 + $0x1d4] ss:$8 sps:$4 sm:$0xff]  }
  0xb6   : > { %v7902_v44 = vld [vmem:[%s8109_s18 + $0x34] sm:$0xf]  ;;  %v7633_v9 = vld [vmem:[%s9974_s5 + $0x1e4] ss:$8 sps:$4 sm:$0xff]   ;;  %v7906_v25 = vld [vmem:[%s8145_s8 + $0x30] sm:$0xf] }
  0xb7   : > { %1690 = vmatpush1.bf16.msra.mxu1 %v7598_v40  ;;  %4357 = vmatpush1.bf16.msra.mxu0 %v7601_v63  ;;  %v6235_v40 = vrot.slane %v7899_v31, 9  ;;  %v8983_v63 = vcombine.low %v1271_v36, %v1274_v21  ;;  %v3946_v62 = vrot.slane %v3944_v14, 4  ;;  %v1284_v12 = vrot.slane %v7902_v44, 5  ;;  %v7630_v36 = vld [vmem:[%s9973_s4 + $0x1e4] ss:$8 sps:$4 sm:$0xff]  }
  0xb8   : > { %1691 = vmatprep.subr.bf16.mxu1 %v7606_v3  ;;  %4358 = vmatprep.subr.bf16.mxu0 %v7609_v27  ;;  %v8985_v3 = vcombine.low %v3938_v55, %v3941_v61  ;;  %v6547_v27 = vrot.slane %v7901_v46, 9  ;;  %v7905_v55 = vld [vmem:[%s8109_s18 + $0x38] sm:$0x1]  ;;  %v7909_v44 = vld [vmem:[%s8109_s18 + $0x44] sm:$0x1] }
  0xb9   : > { %v1278_v43 = vsel %vm8608_vm5, %v6235_v40, %v1277_v37  ;;  %v3948_v28 = vsel %vm8608_vm5, %v3946_v62, %v3947_v11  ;;  %v7904_v37 = vld [vmem:[%s8109_s18 + $0x30] sm:$0xf]  ;;  %v1287_v61 = vrot.slane %v7905_v55, 5  ;;  %v1286_v31 = vrot.slane %v1284_v12, 4  ;;  %v7907_v11 = vld [vmem:[%s8109_s18 + $0x40] sm:$0xf] }
  0xba   : > { %1482 = vmatmul.mubr.bf16.gmra.mrb[4].mxu1 %v8937_v26  ;;  %4149 = vmatmul.mubr.bf16.gmra.mrb[4].mxu0 %v8939_v58  ;;  %v7651_v55 = vld [vmem:[%s9974_s5 + $0x214] ss:$8 sps:$4 sm:$0xff]  }
  0xbb   : > { %1491 = vmatprep.mubr.bf16.mxu1 %v10013_v29  ;;  %4158 = vmatprep.mubr.bf16.mxu0 %v10013_v29  ;;  %v1288_v46 = vsel %vm8608_vm5, %v1286_v31, %v1287_v61  ;;  %v7646_v61 = vld [vmem:[%s9973_s4 + $0x210] ss:$8 sps:$4 sm:$0xff]   ;;  %v7663_v31 = vld [vmem:[%s9974_s5 + $0x234] ss:$8 sps:$4 sm:$0xff]  }
  0xbc   : > { %1692 = vmatpush1.bf16.msra.mxu1 %v7604_v4  ;;  %4359 = vmatpush1.bf16.msra.mxu0 %v7607_v24  ;;  %v1281_v4 = vsel %vm8608_vm5, %v1279_v57, %v1280_v17  ;;  %v3945_v24 = vsel %vm8608_vm5, %v6547_v27, %v3944_v14  ;;  %v6548_v14 = vrot.slane %v7906_v25, 9  ;;  %v3954_v57 = vrot.slane %v8661_v38, 5  ;;  %v7639_v17 = vld [vmem:[%s9974_s5 + $0x1f4] ss:$8 sps:$4 sm:$0xff]   ;;  %v7649_v25 = vld [vmem:[%s9974_s5 + $0x210] ss:$8 sps:$4 sm:$0xff]  }
  0xbd   : > { %1693 = vmatprep.subr.bf16.mxu1 %v7612_v56  ;;  %4360 = vmatprep.subr.bf16.mxu0 %v7615_v16  ;;  %v7903_v56 = vld [vmem:[%s8145_s8 + $0x34] sm:$0xf]  ;;  %v9031_v21 = vcombine.low %v3945_v24, %v3948_v28 }
  0xbe   : > { %v3951_v16 = vrot.slane %v7903_v56, 5 }
  0xc0   : > { %1694 = vmatpush1.bf16.msra.mxu1 %v7610_v48  ;;  %4361 = vmatpush1.bf16.msra.mxu0 %v7613_v52  ;;  %v6236_v48 = vrot.slane %v7904_v37, 9  ;;  %v9029_v52 = vcombine.low %v1278_v43, %v1281_v4  ;;  %v3953_v40 = vrot.slane %v3951_v16, 4  ;;  %v3952_v27 = vsel %vm8608_vm5, %v6548_v14, %v3951_v16  ;;  %v7645_v43 = vld [vmem:[%s9974_s5 + $0x204] ss:$8 sps:$4 sm:$0xff]   ;;  %v7643_v37 = vld [vmem:[%s9974_s5 + $0x200] ss:$8 sps:$4 sm:$0xff]  }
  0xc1   : > { %1695 = vmatprep.subr.bf16.mxu1 %v7618_v13  ;;  %4362 = vmatprep.subr.bf16.mxu0 %v7621_v0  ;;  %v7628_v13 = vld [vmem:[%s9973_s4 + $0x1e0] ss:$8 sps:$4 sm:$0xff]  }
  0xc2   : > { %1492 = vmatmul.mubr.bf16.gmra.mrb[8].mxu1 %v8983_v63  ;;  %4159 = vmatmul.mubr.bf16.gmra.mrb[8].mxu0 %v8985_v3  ;;  %v7631_v0 = vld [vmem:[%s9974_s5 + $0x1e0] ss:$8 sps:$4 sm:$0xff]   ;;  %v1285_v38 = vsel %vm8608_vm5, %v6236_v48, %v1284_v12  ;;  %v3955_v62 = vsel %vm8608_vm5, %v3953_v40, %v3954_v57  ;;  %v1294_v12 = vrot.slane %v7909_v44, 5  ;;  %v7648_v48 = vld [vmem:[%s9973_s4 + $0x214] ss:$8 sps:$4 sm:$0xff]  }
  0xc3   : > { %1501 = vmatprep.mubr.bf16.mxu1 %v10013_v29  ;;  %4168 = vmatprep.mubr.bf16.mxu0 %v10013_v29  ;;  %v9073_v4 = vcombine.low %v1285_v38, %v1288_v46  ;;  %v7652_v14 = vld [vmem:[%s9973_s4 + $0x220] ss:$8 sps:$4 sm:$0xff]   ;;  %v7658_v40 = vld [vmem:[%s9973_s4 + $0x230] ss:$8 sps:$4 sm:$0xff]   ;;  %v7675_v46 = vld [vmem:[%s9974_s5 + $0x254] ss:$8 sps:$4 sm:$0xff]  }
  0xc4   : > { %1696 = vmatpush1.bf16.msra.mxu1 %v7616_v2  ;;  %4363 = vmatpush1.bf16.msra.mxu0 %v7619_v15  ;;  %v7634_v2 = vld [vmem:[%s9973_s4 + $0x1f0] ss:$8 sps:$4 sm:$0xff]   ;;  %v7664_v38 = vld [vmem:[%s9973_s4 + $0x240] ss:$8 sps:$4 sm:$0xff]  }
  0xc5   : > { %1697 = vmatprep.subr.bf16.mxu1 %v7624_v51  ;;  %4364 = vmatprep.subr.bf16.mxu0 %v7627_v20  ;;  %v7637_v15 = vld [vmem:[%s9974_s5 + $0x1f0] ss:$8 sps:$4 sm:$0xff]   ;;  %v1291_v51 = vrot.slane %v7907_v11, 5  ;;  %v7642_v20 = vld [vmem:[%s9973_s4 + $0x204] ss:$8 sps:$4 sm:$0xff]  }
  0xc6   : > { %v7661_v57 = vld [vmem:[%s9974_s5 + $0x230] ss:$8 sps:$4 sm:$0xff]   ;;  %v7678_v11 = vld [vmem:[%s9973_s4 + $0x264] ss:$8 sps:$4 sm:$0xff]  }
  0xc7   : > { %v1293_v28 = vrot.slane %v1291_v51, 4  ;;  %v7687_v44 = vld [vmem:[%s9974_s5 + $0x270] ss:$8 sps:$4 sm:$0xff]  }
  0xc8   : > { %1698 = vmatpush1.bf16.msra.mxu1 %v7622_v23  ;;  %4365 = vmatpush1.bf16.msra.mxu0 %v7625_v19  ;;  %v9075_v23 = vcombine.low %v3952_v27, %v3955_v62  ;;  %v7908_v19 = vld [vmem:[%s8109_s18 + $0x3c] sm:$0xf]  ;;  %v7670_v27 = vld [vmem:[%s9973_s4 + $0x250] ss:$8 sps:$4 sm:$0xff]   ;;  %s6841_s18 = sadd.s32 8, %s8027_s10 }
  0xc9   : > { %1699 = vmatprep.subr.bf16.mxu1 %v7630_v36  ;;  %4366 = vmatprep.subr.bf16.mxu0 %v7633_v9  ;;  %v6237_v24 = vrot.slane %v7908_v19, 9  ;;  %v1295_v16 = vsel %vm8608_vm5, %v1293_v28, %v1294_v12  ;;  %v7640_v9 = vld [vmem:[%s9973_s4 + $0x200] ss:$8 sps:$4 sm:$0xff]   ;;  %v7673_v62 = vld [vmem:[%s9974_s5 + $0x250] ss:$8 sps:$4 sm:$0xff]   ;;  %p461_p7 = scmp.lt.s32.totalorder %s6841_s18, 17 }
  0xca   : > { %1502 = vmatmul.mubr.bf16.gmra.mrb[12].mxu1 %v9029_v52  ;;  %4169 = vmatmul.mubr.bf16.gmra.mrb[12].mxu0 %v9031_v21  ;;  %v7685_v19 = vld [vmem:[%s9973_s4 + $0x274] ss:$8 sps:$4 sm:$0xff]   ;;  %v7683_v28 = vld [vmem:[%s9973_s4 + $0x270] ss:$8 sps:$4 sm:$0xff]   ;;  %v7692_v12 = vld [vmem:[%s9973_s4 + $0x284] ss:$8 sps:$4 sm:$0xff]  }
  0xcb   : > { %1511 = vmatprep.mubr.bf16.mxu1 %v10013_v29  ;;  %4178 = vmatprep.mubr.bf16.mxu0 %v10013_v29  ;;  %v1292_v56 = vsel %vm8608_vm5, %v6237_v24, %v1291_v51  ;;  %v7681_v51 = vld [vmem:[%s9974_s5 + $0x264] ss:$8 sps:$4 sm:$0xff]   ;;  %v7689_v24 = vld [vmem:[%s9974_s5 + $0x274] ss:$8 sps:$4 sm:$0xff]   ;;  %s10053_s18 = smov (!%p461_p7, %s6841_s18), 17 }
  0xcc   : > { %1700 = vmatpush1.bf16.msra.mxu1 %v7628_v13  ;;  %4367 = vmatpush1.bf16.msra.mxu0 %v7631_v0  ;;  %v9087_v36 = vcombine.low %v1292_v56, %v1295_v16  ;;  %v7655_v13 = vld [vmem:[%s9974_s5 + $0x220] ss:$8 sps:$4 sm:$0xff]   ;;  %v7660_v0 = vld [vmem:[%s9973_s4 + $0x234] ss:$8 sps:$4 sm:$0xff]   ;;  %v7695_v56 = vld [vmem:[%s9974_s5 + $0x284] ss:$8 sps:$4 sm:$0xff]  }
  0xcd   : > { %1701 = vmatprep.subr.bf16.mxu1 %v7636_v22  ;;  %4368 = vmatprep.subr.bf16.mxu0 %v7639_v17  ;;  %v7666_v22 = vld [vmem:[%s9973_s4 + $0x244] ss:$8 sps:$4 sm:$0xff]   ;;  %s7390_s16 = smul.u32 3, %s10053_s18 }
  0xce   : > { %v7669_v17 = vld [vmem:[%s9974_s5 + $0x244] ss:$8 sps:$4 sm:$0xff]  }
  0xcf   : > { %v10023_v16 = vld [vmem:[#allocation7_spill] sm:$0xff]  ;;  %s465_s23 = sadd.s32 %s7390_s16, %s7389_s13 }
  0xd0   : > { %1702 = vmatpush1.bf16.msra.mxu1 %v7634_v2  ;;  %4369 = vmatpush1.bf16.msra.mxu0 %v7637_v15  ;;  %v7667_v2 = vld [vmem:[%s9974_s5 + $0x240] ss:$8 sps:$4 sm:$0xff]   ;;  %v7672_v15 = vld [vmem:[%s9973_s4 + $0x254] ss:$8 sps:$4 sm:$0xff]   ;;  %s6158_s17 = sshll.u32 %s465_s23, 2 }
  0xd1   : > { %1957 = vmatprep.subr.bf16.mxu1 %v7642_v20  ;;  %4624 = vmatprep.subr.bf16.mxu0 %v7645_v43  ;;  %v7676_v20 = vld [vmem:[%s9973_s4 + $0x260] ss:$8 sps:$4 sm:$0xff]   ;;  %s9227_s20 = scalar_lea.vmem %s9970_s1, %s6158_s17  ;;  %s9232_s13 = scalar_lea.vmem %s9972_s3, %s6158_s17 }
  0xd2   : > { %1512 = vmatmul.mubr.bf16.gmra.mrb[16].mxu1 %v9073_v4  ;;  %4179 = vmatmul.mubr.bf16.gmra.mrb[16].mxu0 %v9075_v23  ;;  %v7679_v43 = vld [vmem:[%s9974_s5 + $0x260] ss:$8 sps:$4 sm:$0xff]  }
  0xd3   : > { %1521 = vmatprep.mubr.bf16.mxu1 %v10013_v29  ;;  %4188 = vmatprep.mubr.bf16.mxu0 %v10013_v29 }
  0xda   : > { %1522 = vmatmul.mubr.bf16.gmra.mrb[20].mxu1 %v9087_v36  ;;  %4189 = vmatmul.mubr.bf16.gmra.mrb[20].mxu0 %v8807_v30 }
  0xdb   : > { %1531 = vmatprep.mubr.bf16.mxu1 %v10013_v29  ;;  %4198 = vmatprep.mubr.bf16.mxu0 %v10013_v29 }
  0xe2   : > { %1532 = vmatmul.mubr.bf16.gmra.mrb[24].mxu1 %v8814_v7  ;;  %4199 = vmatmul.mubr.bf16.gmra.mrb[24].mxu0 %v8822_v5 }
  0xe3   : > { %1541 = vmatprep.mubr.bf16.mxu1 %v10013_v29  ;;  %4208 = vmatprep.mubr.bf16.mxu0 %v10013_v29 }
  0xea   : > { %1542 = vmatmul.mubr.bf16.gmra.mrb[28].mxu1 %v8839_v49  ;;  %4209 = vmatmul.mubr.bf16.gmra.mrb[28].mxu0 %v8853_v33 }
  0xeb   : > { %1719 = vmatprep.mubr.bf16.mxu1 %v10013_v29  ;;  %4386 = vmatprep.mubr.bf16.mxu0 %v10013_v29 }
  0xf2   : > { %1720 = vmatmul.mubr.bf16.vlgmr.msra.gmra.mrb[0].mxu1 %v8595_v53  ;;  %4387 = vmatmul.mubr.bf16.vlgmr.msra.gmra.mrb[0].mxu0 %v8238_v35  ;;  %v7654_v53 = vld [vmem:[%s9973_s4 + $0x224] ss:$8 sps:$4 sm:$0xff]  }
  0xf3   : > { %1958 = vmatpush1.bf16.msra.mxu1 %v7640_v9  ;;  %4625 = vmatpush1.bf16.msra.mxu0 %v7643_v37  ;;  %v7657_v35 = vld [vmem:[%s9974_s5 + $0x224] ss:$8 sps:$4 sm:$0xff]   ;;  %v10024_v9 = vld [vmem:[#allocation9_spill] sm:$0xff] }
  0xf4   : > { %1729 = vmatprep.mubr.bf16.mxu1 %v10013_v29  ;;  %4396 = vmatprep.mubr.bf16.mxu0 %v10013_v29  ;;  %v10025_v37 = vld [vmem:[#allocation11_spill] sm:$0xff] }
  0xf5   : > { %1959 = vmatprep.subr.bf16.mxu1 %v7648_v48  ;;  %4626 = vmatprep.subr.bf16.mxu0 %v7651_v55  ;;  %v9237_v48 = vld [vmem:[%s9227_s20] sm:$0xf]  ;;  %v9242_v55 = vld [vmem:[%s9227_s20 + $0x4] sm:$0xf] }
  0xf7   : > { %1960 = vmatpush1.bf16.msra.mxu1 %v7646_v61  ;;  %4627 = vmatpush1.bf16.msra.mxu0 %v7649_v25  ;;  %v9245_v61 = vld [vmem:[%s9232_s13] sm:$0xf]  ;;  %v9248_v25 = vld [vmem:[%s9232_s13 + $0x4] sm:$0xf] }
  0xf8   : > { %1961 = vmatprep.subr.bf16.mxu1 %v7654_v53  ;;  %4628 = vmatprep.subr.bf16.mxu0 %v7657_v35  ;;  %v9252_v53 = vcombine.low %v9237_v48, %v9242_v55  ;;  %v9256_v35 = vcombine.low %v9245_v61, %v9248_v25 }
  0xfa   : > { %1730 = vmatmul.mubr.bf16.gmra.mrb[4].mxu1 %v8669_v6  ;;  %4397 = vmatmul.mubr.bf16.gmra.mrb[4].mxu0 %v8286_v8 }
  0xfb   : > { %1739 = vmatprep.mubr.bf16.mxu1 %v10013_v29  ;;  %4406 = vmatprep.mubr.bf16.mxu0 %v10013_v29 }
  0xfc   : > { %1962 = vmatpush1.bf16.msra.mxu1 %v7652_v14  ;;  %4629 = vmatpush1.bf16.msra.mxu0 %v7655_v13  ;;  %v7690_v14 = vld [vmem:[%s9973_s4 + $0x280] ss:$8 sps:$4 sm:$0xff]  }
  0xfd   : > { %1963 = vmatprep.subr.bf16.mxu1 %v7660_v0  ;;  %4630 = vmatprep.subr.bf16.mxu0 %v7663_v31  ;;  %v7693_v13 = vld [vmem:[%s9974_s5 + $0x280] ss:$8 sps:$4 sm:$0xff]   ;;  %v7698_v0 = vld [vmem:[%s9973_s4 + $0x294] ss:$8 sps:$4 sm:$0xff]  }
  0xfe   : > { %v7701_v31 = vld [vmem:[%s9974_s5 + $0x294] ss:$8 sps:$4 sm:$0xff]  }
 0x100   : > { %1964 = vmatpush1.bf16.msra.mxu1 %v7658_v40  ;;  %4631 = vmatpush1.bf16.msra.mxu0 %v7661_v57  ;;  %v10026_v40 = vld [vmem:[#allocation2_spill] sm:$0xff]  ;;  %v10027_v57 = vld [vmem:[#allocation12_spill] sm:$0xff] }
 0x101   : > { %1965 = vmatprep.subr.bf16.mxu1 %v7666_v22  ;;  %4632 = vmatprep.subr.bf16.mxu0 %v7669_v17  ;;  %v7696_v22 = vld [vmem:[%s9973_s4 + $0x290] ss:$8 sps:$4 sm:$0xff]  }
 0x102   : > { %1740 = vmatmul.mubr.bf16.gmra.mrb[8].mxu1 %v8714_v42  ;;  %4407 = vmatmul.mubr.bf16.gmra.mrb[8].mxu0 %v8340_v59  ;;  %v7699_v17 = vld [vmem:[%s9974_s5 + $0x290] ss:$8 sps:$4 sm:$0xff]  }
 0x103   : > { %1749 = vmatprep.mubr.bf16.mxu1 %v10013_v29  ;;  %4416 = vmatprep.mubr.bf16.mxu0 %v10013_v29 }
 0x104   : > { %1966 = vmatpush1.bf16.msra.mxu1 %v7664_v38  ;;  %4633 = vmatpush1.bf16.msra.mxu0 %v7667_v2  ;;  %v7704_v38 = vld [vmem:[%s9973_s4 + $0x2a4] ss:$8 sps:$4 sm:$0xff]  }
 0x105   : > { %1967 = vmatprep.subr.bf16.mxu1 %v7672_v15  ;;  %4634 = vmatprep.subr.bf16.mxu0 %v7675_v46  ;;  %v7707_v2 = vld [vmem:[%s9974_s5 + $0x2a4] ss:$8 sps:$4 sm:$0xff]   ;;  %v7702_v15 = vld [vmem:[%s9973_s4 + $0x2a0] ss:$8 sps:$4 sm:$0xff]  }
 0x106   : > { %v7705_v46 = vld [vmem:[%s9974_s5 + $0x2a0] ss:$8 sps:$4 sm:$0xff]  }
 0x108   : > { %1968 = vmatpush1.bf16.msra.mxu1 %v7670_v27  ;;  %4635 = vmatpush1.bf16.msra.mxu0 %v7673_v62  ;;  %v7710_v27 = vld [vmem:[%s9973_s4 + $0x2b4] ss:$8 sps:$4 sm:$0xff]  }
 0x109   : > { %1969 = vmatprep.subr.bf16.mxu1 %v7678_v11  ;;  %4636 = vmatprep.subr.bf16.mxu0 %v7681_v51  ;;  %v7713_v62 = vld [vmem:[%s9974_s5 + $0x2b4] ss:$8 sps:$4 sm:$0xff]   ;;  %v10028_v11 = vld [vmem:[#allocation3_spill] sm:$0xff] }
 0x10a   : > { %1750 = vmatmul.mubr.bf16.gmra.mrb[12].mxu1 %v8752_v41  ;;  %4417 = vmatmul.mubr.bf16.gmra.mrb[12].mxu0 %v8389_v34  ;;  %v10029_v51 = vld [vmem:[#allocation13_spill] sm:$0xff] }
 0x10b   : > { %1759 = vmatprep.mubr.bf16.mxu1 %v10013_v29  ;;  %4426 = vmatprep.mubr.bf16.mxu0 %v10013_v29 }
 0x10c   : > { %1970 = vmatpush1.bf16.msra.mxu1 %v7676_v20  ;;  %4637 = vmatpush1.bf16.msra.mxu0 %v7679_v43  ;;  %v7708_v20 = vld [vmem:[%s9973_s4 + $0x2b0] ss:$8 sps:$4 sm:$0xff]  }
 0x10d   : > { %1971 = vmatprep.subr.bf16.mxu1 %v7685_v19  ;;  %4638 = vmatprep.subr.bf16.mxu0 %v7689_v24  ;;  %v7711_v43 = vld [vmem:[%s9974_s5 + $0x2b0] ss:$8 sps:$4 sm:$0xff]   ;;  %v7716_v19 = vld [vmem:[%s9973_s4 + $0x2c4] ss:$8 sps:$4 sm:$0xff]  }
 0x10e   : > { %v7719_v24 = vld [vmem:[%s9974_s5 + $0x2c4] ss:$8 sps:$4 sm:$0xff]  }
 0x110   : > { %1972 = vmatpush1.bf16.msra.mxu1 %v7683_v28  ;;  %4639 = vmatpush1.bf16.msra.mxu0 %v7687_v44  ;;  %v7714_v28 = vld [vmem:[%s9973_s4 + $0x2c0] ss:$8 sps:$4 sm:$0xff]  }
 0x111   : > { %2211 = vmatprep.subr.bf16.mxu1 %v7692_v12  ;;  %4878 = vmatprep.subr.bf16.mxu0 %v7695_v56  ;;  %v7717_v44 = vld [vmem:[%s9974_s5 + $0x2c0] ss:$8 sps:$4 sm:$0xff]   ;;  %v7722_v12 = vld [vmem:[%s9973_s4 + $0x2d4] ss:$8 sps:$4 sm:$0xff]  }
 0x112   : > { %1760 = vmatmul.mubr.bf16.gmra.mrb[16].mxu1 %v8845_v1  ;;  %4427 = vmatmul.mubr.bf16.gmra.mrb[16].mxu0 %v10023_v16  ;;  %v7725_v56 = vld [vmem:[%s9974_s5 + $0x2d4] ss:$8 sps:$4 sm:$0xff]  }
 0x113   : > { %1769 = vmatprep.mubr.bf16.mxu1 %v10013_v29  ;;  %4436 = vmatprep.mubr.bf16.mxu0 %v10013_v29 }
 0x11a   : > { %1770 = vmatmul.mubr.bf16.gmra.mrb[20].mxu1 %v8403_v47  ;;  %4437 = vmatmul.mubr.bf16.gmra.mrb[20].mxu0 %v10024_v9 }
 0x11b   : > { %1779 = vmatprep.mubr.bf16.mxu1 %v10013_v29  ;;  %4446 = vmatprep.mubr.bf16.mxu0 %v10013_v29 }
 0x122   : > { %1780 = vmatmul.mubr.bf16.gmra.mrb[24].mxu1 %v8448_v39  ;;  %4447 = vmatmul.mubr.bf16.gmra.mrb[24].mxu0 %v10025_v37 }
 0x123   : > { %1789 = vmatprep.mubr.bf16.mxu1 %v10013_v29  ;;  %4456 = vmatprep.mubr.bf16.mxu0 %v10013_v29 }
 0x12a   : > { %1790 = vmatmul.mubr.bf16.gmra.mrb[28].mxu1 %v9252_v53  ;;  %4457 = vmatmul.mubr.bf16.gmra.mrb[28].mxu0 %v9256_v35 }
 0x12b   : > { %1989 = vmatprep.mubr.bf16.mxu1 %v10013_v29  ;;  %4656 = vmatprep.mubr.bf16.mxu0 %v10013_v29 }
 0x132   : > { %1990 = vmatmul.mubr.bf16.vlgmr.msra.gmra.mrb[0].mxu1 %v10026_v40  ;;  %4657 = vmatmul.mubr.bf16.vlgmr.msra.gmra.mrb[0].mxu0 %v10027_v57  ;;  %v7731_v40 = vld [vmem:[%s9974_s5 + $0x2e4] ss:$8 sps:$4 sm:$0xff]   ;;  %v7726_v57 = vld [vmem:[%s9973_s4 + $0x2e0] ss:$8 sps:$4 sm:$0xff]  }
 0x133   : > { %2212 = vmatpush1.bf16.msra.mxu1 %v7690_v14  ;;  %4879 = vmatpush1.bf16.msra.mxu0 %v7693_v13  ;;  %v10030_v14 = vld [vmem:[#allocation4_spill] sm:$0xff] }
 0x134   : > { %1999 = vmatprep.mubr.bf16.mxu1 %v10013_v29  ;;  %4666 = vmatprep.mubr.bf16.mxu0 %v10013_v29  ;;  %v7720_v13 = vld [vmem:[%s9973_s4 + $0x2d0] ss:$8 sps:$4 sm:$0xff]  }
 0x135   : > { %2213 = vmatprep.subr.bf16.mxu1 %v7698_v0  ;;  %4880 = vmatprep.subr.bf16.mxu0 %v7701_v31  ;;  %v7723_v0 = vld [vmem:[%s9974_s5 + $0x2d0] ss:$8 sps:$4 sm:$0xff]   ;;  %v7728_v31 = vld [vmem:[%s9973_s4 + $0x2e4] ss:$8 sps:$4 sm:$0xff]  }
 0x137   : > { %2214 = vmatpush1.bf16.msra.mxu1 %v7696_v22  ;;  %4881 = vmatpush1.bf16.msra.mxu0 %v7699_v17  ;;  %v7729_v22 = vld [vmem:[%s9974_s5 + $0x2e0] ss:$8 sps:$4 sm:$0xff]   ;;  %v7734_v17 = vld [vmem:[%s9973_s4 + $0x2f4] ss:$8 sps:$4 sm:$0xff]  }
 0x138   : > { %2215 = vmatprep.subr.bf16.mxu1 %v7704_v38  ;;  %4882 = vmatprep.subr.bf16.mxu0 %v7707_v2  ;;  %v7737_v38 = vld [vmem:[%s9974_s5 + $0x2f4] ss:$8 sps:$4 sm:$0xff]  }
 0x139   : > { %v10031_v2 = vld [vmem:[#allocation5_spill] sm:$0xff] }
 0x13a   : > { %2000 = vmatmul.mubr.bf16.gmra.mrb[4].mxu1 %v10028_v11  ;;  %4667 = vmatmul.mubr.bf16.gmra.mrb[4].mxu0 %v10029_v51 }
 0x13b   : > { %2009 = vmatprep.mubr.bf16.mxu1 %v10013_v29  ;;  %4676 = vmatprep.mubr.bf16.mxu0 %v10013_v29 }
 0x13c   : > { %2216 = vmatpush1.bf16.msra.mxu1 %v7702_v15  ;;  %4883 = vmatpush1.bf16.msra.mxu0 %v7705_v46  ;;  %v7732_v15 = vld [vmem:[%s9973_s4 + $0x2f0] ss:$8 sps:$4 sm:$0xff]  }
 0x13d   : > { %2217 = vmatprep.subr.bf16.mxu1 %v7710_v27  ;;  %4884 = vmatprep.subr.bf16.mxu0 %v7713_v62  ;;  %v7735_v46 = vld [vmem:[%s9974_s5 + $0x2f0] ss:$8 sps:$4 sm:$0xff]   ;;  %v7740_v27 = vld [vmem:[%s9973_s4 + $0x304] ss:$8 sps:$4 sm:$0xff]  }
 0x13e   : > { %v7743_v62 = vld [vmem:[%s9974_s5 + $0x304] ss:$8 sps:$4 sm:$0xff]  }
 0x140   : > { %2218 = vmatpush1.bf16.msra.mxu1 %v7708_v20  ;;  %4885 = vmatpush1.bf16.msra.mxu0 %v7711_v43  ;;  %v1833_v20 = vshrl.u32 %v9237_v48, 16  ;;  %v1836_v43 = vshll.u32 %v9237_v48, 16 }
 0x141   : > { %2219 = vmatprep.subr.bf16.mxu1 %v7716_v19  ;;  %4886 = vmatprep.subr.bf16.mxu0 %v7719_v24  ;;  %v1846_v19 = vshrl.u32 %v9242_v55, 16  ;;  %v10032_v24 = vld [vmem:[#allocation6_spill] sm:$0xff] }
 0x142   : > { %2010 = vmatmul.mubr.bf16.gmra.mrb[8].mxu1 %v10030_v14  ;;  %4677 = vmatmul.mubr.bf16.gmra.mrb[8].mxu0 %v8725_v18 }
 0x143   : > { %2019 = vmatprep.mubr.bf16.mxu1 %v10013_v29  ;;  %4686 = vmatprep.mubr.bf16.mxu0 %v10013_v29 }
 0x144   : > { %2220 = vmatpush1.bf16.msra.mxu1 %v7714_v28  ;;  %4887 = vmatpush1.bf16.msra.mxu0 %v7717_v44  ;;  %v1842_v28 = vshll.u32 %v9242_v55, 16  ;;  %v4500_v44 = vshrl.u32 %v9245_v61, 16 }
 0x145   : > { %2221 = vmatprep.subr.bf16.mxu1 %v7722_v12  ;;  %4888 = vmatprep.subr.bf16.mxu0 %v7725_v56  ;;  %v4503_v12 = vshll.u32 %v9245_v61, 16  ;;  %v4513_v56 = vshrl.u32 %v9248_v25, 16 }
 0x148   : > { %2222 = vmatpush1.bf16.msra.mxu1 %v7720_v13  ;;  %4889 = vmatpush1.bf16.msra.mxu0 %v7723_v0  ;;  %v4509_v13 = vshll.u32 %v9248_v25, 16  ;;  %v1835_v0 = vrot.slane %v1833_v20, 4 }
 0x149   : > { %2223 = vmatprep.subr.bf16.mxu1 %v7728_v31  ;;  %4890 = vmatprep.subr.bf16.mxu0 %v7731_v40  ;;  %v1838_v31 = vrot.slane %v1836_v43, 5  ;;  %v1844_v40 = vrot.slane %v1842_v28, 5 }
 0x14a   : > { %2020 = vmatmul.mubr.bf16.gmra.mrb[12].mxu1 %v10031_v2  ;;  %4687 = vmatmul.mubr.bf16.gmra.mrb[12].mxu0 %v8777_v54  ;;  %v10034_v2 = vld [vmem:[#allocation10_spill] sm:$0xff] }
 0x14b   : > { %2029 = vmatprep.mubr.bf16.mxu1 %v10013_v29  ;;  %4696 = vmatprep.mubr.bf16.mxu0 %v10013_v29 }
 0x14c   : > { %2224 = vmatpush1.bf16.msra.mxu1 %v7726_v57  ;;  %4891 = vmatpush1.bf16.msra.mxu0 %v7729_v22  ;;  %v1848_v57 = vrot.slane %v1846_v19, 4  ;;  %v4502_v22 = vrot.slane %v4500_v44, 4 }
 0x14d   : > { %2225 = vmatprep.subr.bf16.mxu1 %v7734_v17  ;;  %4892 = vmatprep.subr.bf16.mxu0 %v7737_v38  ;;  %v4505_v17 = vrot.slane %v4503_v12, 5  ;;  %v4511_v38 = vrot.slane %v4509_v13, 5 }
 0x14f   : > { %v4506_v43 = vor.u32 %v4505_v17, %v4502_v22  ;;  %v7746_v17 = vld [vmem:[%s9973_s4 + $0x314] ss:$8 sps:$4 sm:$0xff]  }
 0x150   : > { %2226 = vmatpush1.bf16.msra.mxu1 %v7732_v15  ;;  %4893 = vmatpush1.bf16.msra.mxu0 %v7735_v46  ;;  %v4515_v15 = vrot.slane %v4513_v56, 4  ;;  %v9387_v46 = vld [vmem:[%s9227_s20 + $0x8] sm:$0x1] }
 0x151   : > { %2459 = vmatprep.subr.bf16.mxu1 %v7740_v27  ;;  %5126 = vmatprep.subr.bf16.mxu0 %v7743_v62  ;;  %v9390_v27 = vld [vmem:[%s9232_s13 + $0x8] sm:$0x1]  ;;  %v10033_v62 = vld [vmem:[#allocation8_spill] sm:$0xff]  ;;  %v1852_v20 = vshll.u32 %v9387_v46, 16  ;;  %v4507_v13 = vrot.slane %v4506_v43, 4 }
 0x152   : > { %2030 = vmatmul.mubr.bf16.gmra.mrb[16].mxu1 %v10032_v24  ;;  %4697 = vmatmul.mubr.bf16.gmra.mrb[16].mxu0 %v8849_v32  ;;  %v1839_v32 = vor.u32 %v1838_v31, %v1835_v0  ;;  %v1849_v24 = vor.u32 %v1848_v57, %v1844_v40  ;;  %v4516_v19 = vor.u32 %v4515_v15, %v4511_v38  ;;  %v4519_v28 = vshll.u32 %v9390_v27, 16  ;;  %v7744_v15 = vld [vmem:[%s9973_s4 + $0x310] ss:$8 sps:$4 sm:$0xff]   ;;  %v7753_v43 = vld [vmem:[%s9974_s5 + $0x320] ss:$8 sps:$4 sm:$0xff]  }
 0x153   : > { %2039 = vmatprep.mubr.bf16.mxu1 %v10013_v29  ;;  %4706 = vmatprep.mubr.bf16.mxu0 %v10013_v29  ;;  %v1854_v56 = vrot.slane %v1852_v20, 5  ;;  %v7750_v20 = vld [vmem:[%s9973_s4 + $0x320] ss:$8 sps:$4 sm:$0xff]  }
 0x154   : > { %v1840_v44 = vrot.slane %v1839_v32, 4  ;;  %v1850_v12 = vrot.slane %v1849_v24, 4  ;;  %v4517_v54 = vrot.slane %v4516_v19, 4  ;;  %v4512_v32 = vsel %vm8161_vm2, %v4507_v13, %v4511_v38  ;;  %v7749_v38 = vld [vmem:[%s9974_s5 + $0x314] ss:$8 sps:$4 sm:$0xff]  }
 0x155   : > { %v7758_v19 = vld [vmem:[%s9973_s4 + $0x334] ss:$8 sps:$4 sm:$0xff]   ;;  %v7767_v13 = vld [vmem:[%s9974_s5 + $0x344] ss:$8 sps:$4 sm:$0xff]  }
 0x156   : > { %v1845_v0 = vsel %vm8161_vm2, %v1840_v44, %v1844_v40  ;;  %v1855_v31 = vsel %vm8161_vm2, %v1850_v12, %v1854_v56  ;;  %v7738_v40 = vld [vmem:[%s9973_s4 + $0x300] ss:$8 sps:$4 sm:$0xff]   ;;  %v7756_v44 = vld [vmem:[%s9973_s4 + $0x330] ss:$8 sps:$4 sm:$0xff]   ;;  %v7764_v56 = vld [vmem:[%s9973_s4 + $0x344] ss:$8 sps:$4 sm:$0xff]  }
 0x157   : > { %v9410_v57 = vcombine.low %v1845_v0, %v1855_v31  ;;  %v7759_v12 = vld [vmem:[%s9974_s5 + $0x330] ss:$8 sps:$4 sm:$0xff]   ;;  %v7762_v0 = vld [vmem:[%s9973_s4 + $0x340] ss:$8 sps:$4 sm:$0xff]  }
 0x158   : > { %v7765_v31 = vld [vmem:[%s9974_s5 + $0x340] ss:$8 sps:$4 sm:$0xff]  }
 0x15a   : > { %2040 = vmatmul.mubr.bf16.gmra.mrb[20].mxu1 %v10033_v62  ;;  %4707 = vmatmul.mubr.bf16.gmra.mrb[20].mxu0 %v8868_v50  ;;  %v4521_v62 = vrot.slane %v4519_v28, 5  ;;  %v7761_v28 = vld [vmem:[%s9974_s5 + $0x334] ss:$8 sps:$4 sm:$0xff]  }
 0x15b   : > { %2049 = vmatprep.mubr.bf16.mxu1 %v10013_v29  ;;  %4716 = vmatprep.mubr.bf16.mxu0 %v10013_v29 }
 0x15c   : > { %v4522_v24 = vsel %vm8161_vm2, %v4517_v54, %v4521_v62  ;;  %v7741_v54 = vld [vmem:[%s9974_s5 + $0x300] ss:$8 sps:$4 sm:$0xff]   ;;  %v7747_v62 = vld [vmem:[%s9974_s5 + $0x310] ss:$8 sps:$4 sm:$0xff]  }
 0x15d   : > { %v9412_v22 = vcombine.low %v4512_v32, %v4522_v24  ;;  %v7770_v32 = vld [vmem:[%s9973_s4 + $0x354] ss:$8 sps:$4 sm:$0xff]  }
 0x15e   : > { %v7773_v24 = vld [vmem:[%s9974_s5 + $0x354] ss:$8 sps:$4 sm:$0xff]  }
 0x162   : > { %2050 = vmatmul.mubr.bf16.gmra.mrb[24].mxu1 %v10034_v2  ;;  %4717 = vmatmul.mubr.bf16.gmra.mrb[24].mxu0 %v8879_v60 }
 0x163   : > { %2059 = vmatprep.mubr.bf16.mxu1 %v10013_v29  ;;  %4726 = vmatprep.mubr.bf16.mxu0 %v10013_v29 }
 0x16a   : > { %2060 = vmatmul.mubr.bf16.gmra.mrb[28].mxu1 %v9410_v57  ;;  %4727 = vmatmul.mubr.bf16.gmra.mrb[28].mxu0 %v9412_v22 }
 0x16b   : > { %2243 = vmatprep.mubr.bf16.mxu1 %v10013_v29  ;;  %4910 = vmatprep.mubr.bf16.mxu0 %v10013_v29 }
 0x172   : > { %2244 = vmatmul.mubr.bf16.vlgmr.msra.gmra.mrb[0].mxu1 %v8937_v26  ;;  %4911 = vmatmul.mubr.bf16.vlgmr.msra.gmra.mrb[0].mxu0 %v8939_v58  ;;  %v7752_v26 = vld [vmem:[%s9973_s4 + $0x324] ss:$8 sps:$4 sm:$0xff]  }
 0x173   : > { %2460 = vmatpush1.bf16.msra.mxu1 %v7738_v40  ;;  %5127 = vmatpush1.bf16.msra.mxu0 %v7741_v54  ;;  %v7755_v58 = vld [vmem:[%s9974_s5 + $0x324] ss:$8 sps:$4 sm:$0xff]   ;;  %v7768_v40 = vld [vmem:[%s9973_s4 + $0x350] ss:$8 sps:$4 sm:$0xff]  }
 0x174   : > { %2253 = vmatprep.mubr.bf16.mxu1 %v10013_v29  ;;  %4920 = vmatprep.mubr.bf16.mxu0 %v10013_v29  ;;  %v7771_v54 = vld [vmem:[%s9974_s5 + $0x350] ss:$8 sps:$4 sm:$0xff]  }
 0x175   : > { %2461 = vmatprep.subr.bf16.mxu1 %v7746_v17  ;;  %5128 = vmatprep.subr.bf16.mxu0 %v7749_v38  ;;  %v7776_v17 = vld [vmem:[%s9973_s4 + $0x364] ss:$8 sps:$4 sm:$0xff]  }
 0x176   : > { %v7779_v38 = vld [vmem:[%s9974_s5 + $0x364] ss:$8 sps:$4 sm:$0xff]  }
 0x177   : > { %2462 = vmatpush1.bf16.msra.mxu1 %v7744_v15  ;;  %5129 = vmatpush1.bf16.msra.mxu0 %v7747_v62  ;;  %v7774_v15 = vld [vmem:[%s9973_s4 + $0x360] ss:$8 sps:$4 sm:$0xff]  }
 0x178   : > { %2463 = vmatprep.subr.bf16.mxu1 %v7752_v26  ;;  %5130 = vmatprep.subr.bf16.mxu0 %v7755_v58  ;;  %v7777_v62 = vld [vmem:[%s9974_s5 + $0x360] ss:$8 sps:$4 sm:$0xff]   ;;  %v7782_v26 = vld [vmem:[%s9973_s4 + $0x374] ss:$8 sps:$4 sm:$0xff]  }
 0x179   : > { %v7785_v58 = vld [vmem:[%s9974_s5 + $0x374] ss:$8 sps:$4 sm:$0xff]  }
 0x17a   : > { %2254 = vmatmul.mubr.bf16.gmra.mrb[4].mxu1 %v8983_v63  ;;  %4921 = vmatmul.mubr.bf16.gmra.mrb[4].mxu0 %v8985_v3 }
 0x17b   : > { %2263 = vmatprep.mubr.bf16.mxu1 %v10013_v29  ;;  %4930 = vmatprep.mubr.bf16.mxu0 %v10013_v29 }
 0x17c   : > { %2464 = vmatpush1.bf16.msra.mxu1 %v7750_v20  ;;  %5131 = vmatpush1.bf16.msra.mxu0 %v7753_v43  ;;  %v7780_v20 = vld [vmem:[%s9973_s4 + $0x370] ss:$8 sps:$4 sm:$0xff]  }
 0x17d   : > { %2465 = vmatprep.subr.bf16.mxu1 %v7758_v19  ;;  %5132 = vmatprep.subr.bf16.mxu0 %v7761_v28  ;;  %v7783_v43 = vld [vmem:[%s9974_s5 + $0x370] ss:$8 sps:$4 sm:$0xff]   ;;  %v7788_v19 = vld [vmem:[%s9973_s4 + $0x384] ss:$8 sps:$4 sm:$0xff]  }
 0x17e   : > { %v7791_v28 = vld [vmem:[%s9974_s5 + $0x384] ss:$8 sps:$4 sm:$0xff]  }
 0x180   : > { %2466 = vmatpush1.bf16.msra.mxu1 %v7756_v44  ;;  %5133 = vmatpush1.bf16.msra.mxu0 %v7759_v12  ;;  %v2105_v44 = vrot.slane %v9242_v55, 5  ;;  %v4772_v12 = vrot.slane %v9248_v25, 5 }
 0x181   : > { %2467 = vmatprep.subr.bf16.mxu1 %v7764_v56  ;;  %5134 = vmatprep.subr.bf16.mxu0 %v7767_v13  ;;  %v6346_v56 = vrot.slane %v9237_v48, 9  ;;  %v2108_v13 = vrot.slane %v9387_v46, 5 }
 0x182   : > { %2264 = vmatmul.mubr.bf16.gmra.mrb[8].mxu1 %v9029_v52  ;;  %4931 = vmatmul.mubr.bf16.gmra.mrb[8].mxu0 %v9031_v21 }
 0x183   : > { %2273 = vmatprep.mubr.bf16.mxu1 %v10013_v29  ;;  %4940 = vmatprep.mubr.bf16.mxu0 %v10013_v29 }
 0x184   : > { %2468 = vmatpush1.bf16.msra.mxu1 %v7762_v0  ;;  %5135 = vmatpush1.bf16.msra.mxu0 %v7765_v31  ;;  %v2107_v0 = vrot.slane %v2105_v44, 4  ;;  %v6658_v31 = vrot.slane %v9245_v61, 9 }
 0x185   : > { %2469 = vmatprep.subr.bf16.mxu1 %v7770_v32  ;;  %5136 = vmatprep.subr.bf16.mxu0 %v7773_v24  ;;  %v4774_v32 = vrot.slane %v4772_v12, 4  ;;  %v4775_v24 = vrot.slane %v9390_v27, 5  ;;  %v7786_v27 = vld [vmem:[%s9973_s4 + $0x380] ss:$8 sps:$4 sm:$0xff]  }
 0x186   : > { %v2109_v48 = vsel %vm8608_vm5, %v2107_v0, %v2108_v13  ;;  %v4773_v55 = vsel %vm8608_vm5, %v6658_v31, %v4772_v12  ;;  %v7813_v12 = vld [vmem:[%s9974_s5 + $0x3c0] ss:$8 sps:$4 sm:$0xff]   ;;  %v7821_v13 = vld [vmem:[%s9974_s5 + $0x3d4] ss:$8 sps:$4 sm:$0xff]   ;;  %v7816_v0 = vld [vmem:[%s9973_s4 + $0x3d0] ss:$8 sps:$4 sm:$0xff]  }
 0x187   : > { %v4776_v61 = vsel %vm8608_vm5, %v4774_v32, %v4775_v24  ;;  %v7819_v31 = vld [vmem:[%s9974_s5 + $0x3d0] ss:$8 sps:$4 sm:$0xff]   ;;  %v7822_v32 = vld [vmem:[%s9973_s4 + $0x3e0] ss:$8 sps:$4 sm:$0xff]  }
 0x188   : > { %2470 = vmatpush1.bf16.msra.mxu1 %v7768_v40  ;;  %5137 = vmatpush1.bf16.msra.mxu0 %v7771_v54  ;;  %v2106_v40 = vsel %vm8608_vm5, %v6346_v56, %v2105_v44  ;;  %v9558_v46 = vcombine.low %v4773_v55, %v4776_v61  ;;  %v7789_v54 = vld [vmem:[%s9974_s5 + $0x380] ss:$8 sps:$4 sm:$0xff]   ;;  %v7818_v56 = vld [vmem:[%s9973_s4 + $0x3d4] ss:$8 sps:$4 sm:$0xff]   ;;  %v7829_v55 = vld [vmem:[%s9973_s4 + $0x3f0] ss:$8 sps:$4 sm:$0xff]  }
 0x189   : > { %2471 = vmatprep.subr.bf16.mxu1 %v7776_v17  ;;  %5138 = vmatprep.subr.bf16.mxu0 %v7779_v38  ;;  %v9556_v25 = vcombine.low %v2106_v40, %v2109_v48  ;;  %v7794_v17 = vld [vmem:[%s9973_s4 + $0x394] ss:$8 sps:$4 sm:$0xff]   ;;  %v7810_v44 = vld [vmem:[%s9973_s4 + $0x3c0] ss:$8 sps:$4 sm:$0xff]   ;;  %v7833_v61 = vld [vmem:[%s9974_s5 + $0x3f0] ss:$8 sps:$4 sm:$0xff]  }
 0x18a   : > { %2274 = vmatmul.mubr.bf16.gmra.mrb[12].mxu1 %v9073_v4  ;;  %4941 = vmatmul.mubr.bf16.gmra.mrb[12].mxu0 %v9075_v23  ;;  %v7797_v38 = vld [vmem:[%s9974_s5 + $0x394] ss:$8 sps:$4 sm:$0xff]   ;;  %v7825_v24 = vld [vmem:[%s9974_s5 + $0x3e0] ss:$8 sps:$4 sm:$0xff]  }
 0x18b   : > { %2283 = vmatprep.mubr.bf16.mxu1 %v10013_v29  ;;  %4950 = vmatprep.mubr.bf16.mxu0 %v10013_v29  ;;  %v7831_v40 = vld [vmem:[%s9973_s4 + $0x3f4] ss:$8 sps:$4 sm:$0xff]  }
 0x18c   : > { %2472 = vmatpush1.bf16.msra.mxu1 %v7774_v15  ;;  %5139 = vmatpush1.bf16.msra.mxu0 %v7777_v62  ;;  %v7792_v15 = vld [vmem:[%s9973_s4 + $0x390] ss:$8 sps:$4 sm:$0xff]   ;;  %v7835_v48 = vld [vmem:[%s9974_s5 + $0x3f4] ss:$8 sps:$4 sm:$0xff]  }
 0x18d   : > { %2473 = vmatprep.subr.bf16.mxu1 %v7782_v26  ;;  %5140 = vmatprep.subr.bf16.mxu0 %v7785_v58  ;;  %v7795_v62 = vld [vmem:[%s9974_s5 + $0x390] ss:$8 sps:$4 sm:$0xff]   ;;  %v7798_v26 = vld [vmem:[%s9973_s4 + $0x3a0] ss:$8 sps:$4 sm:$0xff]  }
 0x18e   : > { %v7801_v58 = vld [vmem:[%s9974_s5 + $0x3a0] ss:$8 sps:$4 sm:$0xff]  }
 0x190   : > { %2474 = vmatpush1.bf16.msra.mxu1 %v7780_v20  ;;  %5141 = vmatpush1.bf16.msra.mxu0 %v7783_v43  ;;  %v7806_v20 = vld [vmem:[%s9973_s4 + $0x3b4] ss:$8 sps:$4 sm:$0xff]  }
 0x191   : > { %2729 = vmatprep.subr.bf16.mxu1 %v7788_v19  ;;  %5396 = vmatprep.subr.bf16.mxu0 %v7791_v28  ;;  %v7809_v43 = vld [vmem:[%s9974_s5 + $0x3b4] ss:$8 sps:$4 sm:$0xff]   ;;  %v7804_v19 = vld [vmem:[%s9973_s4 + $0x3b0] ss:$8 sps:$4 sm:$0xff]  }
 0x192   : > { %2284 = vmatmul.mubr.bf16.gmra.mrb[16].mxu1 %v9087_v36  ;;  %4951 = vmatmul.mubr.bf16.gmra.mrb[16].mxu0 %v8807_v30  ;;  %v7807_v28 = vld [vmem:[%s9974_s5 + $0x3b0] ss:$8 sps:$4 sm:$0xff]  }
 0x193   : > { %2293 = vmatprep.mubr.bf16.mxu1 %v10013_v29  ;;  %4960 = vmatprep.mubr.bf16.mxu0 %v10013_v29 }
 0x19a   : > { %2294 = vmatmul.mubr.bf16.gmra.mrb[20].mxu1 %v8814_v7  ;;  %4961 = vmatmul.mubr.bf16.gmra.mrb[20].mxu0 %v8822_v5 }
 0x19b   : > { %2303 = vmatprep.mubr.bf16.mxu1 %v10013_v29  ;;  %4970 = vmatprep.mubr.bf16.mxu0 %v10013_v29 }
 0x1a2   : > { %2304 = vmatmul.mubr.bf16.gmra.mrb[24].mxu1 %v8839_v49  ;;  %4971 = vmatmul.mubr.bf16.gmra.mrb[24].mxu0 %v8853_v33 }
 0x1a3   : > { %2313 = vmatprep.mubr.bf16.mxu1 %v10013_v29  ;;  %4980 = vmatprep.mubr.bf16.mxu0 %v10013_v29 }
 0x1aa   : > { %2314 = vmatmul.mubr.bf16.gmra.mrb[28].mxu1 %v9556_v25  ;;  %4981 = vmatmul.mubr.bf16.gmra.mrb[28].mxu0 %v9558_v46 }
 0x1ab   : > { %2491 = vmatprep.mubr.bf16.mxu1 %v10013_v29  ;;  %5158 = vmatprep.mubr.bf16.mxu0 %v10013_v29 }
 0x1b2   : > { %2492 = vmatmul.mubr.bf16.vlgmr.msra.gmra.mrb[0].mxu1 %v8669_v6  ;;  %5159 = vmatmul.mubr.bf16.vlgmr.msra.gmra.mrb[0].mxu0 %v8286_v8  ;;  %v7800_v6 = vld [vmem:[%s9973_s4 + $0x3a4] ss:$8 sps:$4 sm:$0xff]  }
 0x1b3   : > { %2730 = vmatpush1.bf16.msra.mxu1 %v7786_v27  ;;  %5397 = vmatpush1.bf16.msra.mxu0 %v7789_v54  ;;  %v7803_v8 = vld [vmem:[%s9974_s5 + $0x3a4] ss:$8 sps:$4 sm:$0xff]   ;;  %v7839_v54 = vld [vmem:[%s9974_s5 + $0x400] ss:$8 sps:$4 sm:$0xff]  }
 0x1b4   : > { %2501 = vmatprep.mubr.bf16.mxu1 %v10013_v29  ;;  %5168 = vmatprep.mubr.bf16.mxu0 %v10013_v29  ;;  %v9687_v27 = vld [vmem:[%s9227_s20 + $0xc] sm:$0xf] }
 0x1b5   : > { %2731 = vmatprep.subr.bf16.mxu1 %v7794_v17  ;;  %5398 = vmatprep.subr.bf16.mxu0 %v7797_v38  ;;  %v7844_v17 = vld [vmem:[%s9973_s4 + $0x414] ss:$8 sps:$4 sm:$0xff]  }
 0x1b6   : > { %v7847_v38 = vld [vmem:[%s9974_s5 + $0x414] ss:$8 sps:$4 sm:$0xff]  }
 0x1b7   : > { %2732 = vmatpush1.bf16.msra.mxu1 %v7792_v15  ;;  %5399 = vmatpush1.bf16.msra.mxu0 %v7795_v62  ;;  %v7842_v15 = vld [vmem:[%s9973_s4 + $0x410] ss:$8 sps:$4 sm:$0xff]  }
 0x1b8   : > { %2733 = vmatprep.subr.bf16.mxu1 %v7800_v6  ;;  %5400 = vmatprep.subr.bf16.mxu0 %v7803_v8  ;;  %v7845_v62 = vld [vmem:[%s9974_s5 + $0x410] ss:$8 sps:$4 sm:$0xff]   ;;  %v7848_v6 = vld [vmem:[%s9973_s4 + $0x420] ss:$8 sps:$4 sm:$0xff]  }
 0x1b9   : > { %v7851_v8 = vld [vmem:[%s9974_s5 + $0x420] ss:$8 sps:$4 sm:$0xff]  }
 0x1ba   : > { %2502 = vmatmul.mubr.bf16.gmra.mrb[4].mxu1 %v8714_v42  ;;  %5169 = vmatmul.mubr.bf16.gmra.mrb[4].mxu0 %v8340_v59  ;;  %v7812_v59 = vld [vmem:[%s9973_s4 + $0x3c4] ss:$8 sps:$4 sm:$0xff]  }
 0x1bb   : > { %2511 = vmatprep.mubr.bf16.mxu1 %v10013_v29  ;;  %5178 = vmatprep.mubr.bf16.mxu0 %v10013_v29  ;;  %v7815_v42 = vld [vmem:[%s9974_s5 + $0x3c4] ss:$8 sps:$4 sm:$0xff]  }
 0x1bc   : > { %2734 = vmatpush1.bf16.msra.mxu1 %v7798_v26  ;;  %5401 = vmatpush1.bf16.msra.mxu0 %v7801_v58  ;;  %v7856_v26 = vld [vmem:[%s9973_s4 + $0x434] ss:$8 sps:$4 sm:$0xff]  }
 0x1bd   : > { %2735 = vmatprep.subr.bf16.mxu1 %v7806_v20  ;;  %5402 = vmatprep.subr.bf16.mxu0 %v7809_v43  ;;  %v7859_v58 = vld [vmem:[%s9974_s5 + $0x434] ss:$8 sps:$4 sm:$0xff]   ;;  %v7854_v20 = vld [vmem:[%s9973_s4 + $0x430] ss:$8 sps:$4 sm:$0xff]  }
 0x1be   : > { %v7857_v43 = vld [vmem:[%s9974_s5 + $0x430] ss:$8 sps:$4 sm:$0xff]  }
 0x1c0   : > { %2736 = vmatpush1.bf16.msra.mxu1 %v7804_v19  ;;  %5403 = vmatpush1.bf16.msra.mxu0 %v7807_v28  ;;  %v7860_v19 = vld [vmem:[%s9973_s4 + $0x440] ss:$8 sps:$4 sm:$0xff]  }
 0x1c1   : > { %2737 = vmatprep.subr.bf16.mxu1 %v7812_v59  ;;  %5404 = vmatprep.subr.bf16.mxu0 %v7815_v42  ;;  %v7863_v28 = vld [vmem:[%s9974_s5 + $0x440] ss:$8 sps:$4 sm:$0xff]   ;;  %v7868_v59 = vld [vmem:[%s9973_s4 + $0x454] ss:$8 sps:$4 sm:$0xff]  }
 0x1c2   : > { %2512 = vmatmul.mubr.bf16.gmra.mrb[8].mxu1 %v8752_v41  ;;  %5179 = vmatmul.mubr.bf16.gmra.mrb[8].mxu0 %v8389_v34  ;;  %v7824_v34 = vld [vmem:[%s9973_s4 + $0x3e4] ss:$8 sps:$4 sm:$0xff]   ;;  %v7871_v42 = vld [vmem:[%s9974_s5 + $0x454] ss:$8 sps:$4 sm:$0xff]  }
 0x1c3   : > { %2521 = vmatprep.mubr.bf16.mxu1 %v10013_v29  ;;  %5188 = vmatprep.mubr.bf16.mxu0 %v10013_v29  ;;  %v7827_v41 = vld [vmem:[%s9974_s5 + $0x3e4] ss:$8 sps:$4 sm:$0xff]  }
 0x1c4   : > { %2738 = vmatpush1.bf16.msra.mxu1 %v7810_v44  ;;  %5405 = vmatpush1.bf16.msra.mxu0 %v7813_v12  ;;  %v10035_v44 = vld [vmem:[#allocation5_spill] sm:$0xff]  ;;  %v10036_v12 = vld [vmem:[#allocation14_spill] sm:$0xff] }
 0x1c5   : > { %2739 = vmatprep.subr.bf16.mxu1 %v7818_v56  ;;  %5406 = vmatprep.subr.bf16.mxu0 %v7821_v13  ;;  %v7866_v56 = vld [vmem:[%s9973_s4 + $0x450] ss:$8 sps:$4 sm:$0xff]  }
 0x1c6   : > { %v7869_v13 = vld [vmem:[%s9974_s5 + $0x450] ss:$8 sps:$4 sm:$0xff]  }
 0x1c8   : > { %2740 = vmatpush1.bf16.msra.mxu1 %v7816_v0  ;;  %5407 = vmatpush1.bf16.msra.mxu0 %v7819_v31  ;;  %v7874_v0 = vld [vmem:[%s9973_s4 + $0x464] ss:$8 sps:$4 sm:$0xff]  }
 0x1c9   : > { %2741 = vmatprep.subr.bf16.mxu1 %v7824_v34  ;;  %5408 = vmatprep.subr.bf16.mxu0 %v7827_v41  ;;  %v7877_v31 = vld [vmem:[%s9974_s5 + $0x464] ss:$8 sps:$4 sm:$0xff]   ;;  %v7872_v34 = vld [vmem:[%s9973_s4 + $0x460] ss:$8 sps:$4 sm:$0xff]  }
 0x1ca   : > { %2522 = vmatmul.mubr.bf16.gmra.mrb[12].mxu1 %v8845_v1  ;;  %5189 = vmatmul.mubr.bf16.gmra.mrb[12].mxu0 %v10023_v16  ;;  %v7838_v1 = vld [vmem:[%s9973_s4 + $0x404] ss:$8 sps:$4 sm:$0xff]   ;;  %v7875_v41 = vld [vmem:[%s9974_s5 + $0x460] ss:$8 sps:$4 sm:$0xff]  }
 0x1cb   : > { %2531 = vmatprep.mubr.bf16.mxu1 %v10013_v29  ;;  %5198 = vmatprep.mubr.bf16.mxu0 %v10013_v29  ;;  %v7841_v16 = vld [vmem:[%s9974_s5 + $0x404] ss:$8 sps:$4 sm:$0xff]  }
 0x1cc   : > { %2742 = vmatpush1.bf16.msra.mxu1 %v7822_v32  ;;  %5409 = vmatpush1.bf16.msra.mxu0 %v7825_v24  ;;  %v7880_v32 = vld [vmem:[%s9973_s4 + $0x474] ss:$8 sps:$4 sm:$0xff]  }
 0x1cd   : > { %2743 = vmatprep.subr.bf16.mxu1 %v7831_v40  ;;  %5410 = vmatprep.subr.bf16.mxu0 %v7835_v48  ;;  %v7883_v24 = vld [vmem:[%s9974_s5 + $0x474] ss:$8 sps:$4 sm:$0xff]   ;;  %v10037_v40 = vld [vmem:[#allocation6_spill] sm:$0xff]  ;;  %v10038_v48 = vld [vmem:[#allocation15_spill] sm:$0xff] }
 0x1d0   : > { %2744 = vmatpush1.bf16.msra.mxu1 %v7829_v55  ;;  %5411 = vmatpush1.bf16.msra.mxu0 %v7833_v61  ;;  %v7878_v55 = vld [vmem:[%s9973_s4 + $0x470] ss:$8 sps:$4 sm:$0xff]  }
 0x1d1   : > { %2983 = vmatprep.subr.bf16.mxu1 %v7838_v1  ;;  %5650 = vmatprep.subr.bf16.mxu0 %v7841_v16  ;;  %v7881_v61 = vld [vmem:[%s9974_s5 + $0x470] ss:$8 sps:$4 sm:$0xff]   ;;  %v2605_v1 = vshrl.u32 %v9687_v27, 16  ;;  %v2608_v16 = vshll.u32 %v9687_v27, 16 }
 0x1d2   : > { %2532 = vmatmul.mubr.bf16.gmra.mrb[16].mxu1 %v8403_v47  ;;  %5199 = vmatmul.mubr.bf16.gmra.mrb[16].mxu0 %v10024_v9  ;;  %v9692_v47 = vld [vmem:[%s9227_s20 + $0x10] sm:$0xf]  ;;  %v9695_v9 = vld [vmem:[%s9232_s13 + $0xc] sm:$0xf] }
 0x1d3   : > { %2541 = vmatprep.mubr.bf16.mxu1 %v10013_v29  ;;  %5208 = vmatprep.mubr.bf16.mxu0 %v10013_v29  ;;  %v2877_v45 = vrot.slane %v9692_v47, 5 }
 0x1da   : > { %2542 = vmatmul.mubr.bf16.gmra.mrb[20].mxu1 %v8448_v39  ;;  %5209 = vmatmul.mubr.bf16.gmra.mrb[20].mxu0 %v10025_v37  ;;  %v9698_v39 = vld [vmem:[%s9232_s13 + $0x10] sm:$0xf]  ;;  %v6396_v37 = vcombine.low %v9687_v27, %v9692_v47 }
 0x1db   : > { %2551 = vmatprep.mubr.bf16.mxu1 %v10013_v29  ;;  %5218 = vmatprep.mubr.bf16.mxu0 %v10013_v29 }
 0x1e2   : > { %2552 = vmatmul.mubr.bf16.gmra.mrb[24].mxu1 %v9252_v53  ;;  %5219 = vmatmul.mubr.bf16.gmra.mrb[24].mxu0 %v9256_v35  ;;  %v6708_v53 = vcombine.low %v9695_v9, %v9698_v39  ;;  %v7836_v35 = vld [vmem:[%s9973_s4 + $0x400] ss:$8 sps:$4 sm:$0xff]  }
 0x1e3   : > { %2561 = vmatprep.mubr.bf16.mxu1 %v10013_v29  ;;  %5228 = vmatprep.mubr.bf16.mxu0 %v10013_v29 }
 0x1ea   : > { %2562 = vmatmul.mubr.bf16.gmra.mrb[28].mxu1 %v6396_v37  ;;  %5229 = vmatmul.mubr.bf16.gmra.mrb[28].mxu0 %v6708_v53  ;;  %v2618_v37 = vshrl.u32 %v9692_v47, 16  ;;  %v10039_v53 = vld [vmem:[#allocation8_spill] sm:$0xff] }
 0x1eb   : > { %2761 = vmatprep.mubr.bf16.mxu1 %v10013_v29  ;;  %5428 = vmatprep.mubr.bf16.mxu0 %v10013_v29 }
 0x1f2   : > { %2762 = vmatmul.mubr.bf16.vlgmr.msra.gmra.mrb[0].mxu1 %v10028_v11  ;;  %5429 = vmatmul.mubr.bf16.vlgmr.msra.gmra.mrb[0].mxu0 %v10029_v51  ;;  %v7850_v11 = vld [vmem:[%s9973_s4 + $0x424] ss:$8 sps:$4 sm:$0xff]  }
 0x1f3   : > { %2984 = vmatpush1.bf16.msra.mxu1 %v7836_v35  ;;  %5651 = vmatpush1.bf16.msra.mxu0 %v7839_v54  ;;  %v7853_v51 = vld [vmem:[%s9974_s5 + $0x424] ss:$8 sps:$4 sm:$0xff]   ;;  %v2614_v35 = vshll.u32 %v9692_v47, 16  ;;  %v5272_v54 = vshrl.u32 %v9695_v9, 16 }
 0x1f4   : > { %2771 = vmatprep.mubr.bf16.mxu1 %v10013_v29  ;;  %5438 = vmatprep.mubr.bf16.mxu0 %v10013_v29 }
 0x1f5   : > { %2985 = vmatprep.subr.bf16.mxu1 %v7844_v17  ;;  %5652 = vmatprep.subr.bf16.mxu0 %v7847_v38  ;;  %v5275_v17 = vshll.u32 %v9695_v9, 16  ;;  %v5285_v38 = vshrl.u32 %v9698_v39, 16 }
 0x1f7   : > { %2986 = vmatpush1.bf16.msra.mxu1 %v7842_v15  ;;  %5653 = vmatpush1.bf16.msra.mxu0 %v7845_v62  ;;  %v5281_v15 = vshll.u32 %v9698_v39, 16  ;;  %v2607_v62 = vrot.slane %v2605_v1, 4 }
 0x1f8   : > { %2987 = vmatprep.subr.bf16.mxu1 %v7850_v11  ;;  %5654 = vmatprep.subr.bf16.mxu0 %v7853_v51  ;;  %v2610_v11 = vrot.slane %v2608_v16, 5  ;;  %v2616_v51 = vrot.slane %v2614_v35, 5 }
 0x1fa   : > { %2772 = vmatmul.mubr.bf16.gmra.mrb[4].mxu1 %v10030_v14  ;;  %5439 = vmatmul.mubr.bf16.gmra.mrb[4].mxu0 %v8725_v18  ;;  %v7862_v18 = vld [vmem:[%s9973_s4 + $0x444] ss:$8 sps:$4 sm:$0xff]  }
 0x1fb   : > { %2781 = vmatprep.mubr.bf16.mxu1 %v10013_v29  ;;  %5448 = vmatprep.mubr.bf16.mxu0 %v10013_v29  ;;  %v7865_v14 = vld [vmem:[%s9974_s5 + $0x444] ss:$8 sps:$4 sm:$0xff]  }
 0x1fc   : > { %2988 = vmatpush1.bf16.msra.mxu1 %v7848_v6  ;;  %5655 = vmatpush1.bf16.msra.mxu0 %v7851_v8  ;;  %v5274_v6 = vrot.slane %v5272_v54, 4  ;;  %v5277_v8 = vrot.slane %v5275_v17, 5 }
 0x1fd   : > { %2989 = vmatprep.subr.bf16.mxu1 %v7856_v26  ;;  %5656 = vmatprep.subr.bf16.mxu0 %v7859_v58  ;;  %v5283_v26 = vrot.slane %v5281_v15, 5  ;;  %v5287_v58 = vrot.slane %v5285_v38, 4 }
 0x200   : > { %2990 = vmatpush1.bf16.msra.mxu1 %v7854_v20  ;;  %5657 = vmatpush1.bf16.msra.mxu0 %v7857_v43  ;;  %v9825_v20 = vld [vmem:[%s9227_s20 + $0x14] sm:$0x1]  ;;  %s6164_s20 = sshll.u32 %s7932_s24, 4 }
 0x201   : > { %2991 = vmatprep.subr.bf16.mxu1 %v7862_v18  ;;  %5658 = vmatprep.subr.bf16.mxu0 %v7865_v14  ;;  %v9828_v43 = vld [vmem:[%s9232_s13 + $0x14] sm:$0x1]  ;;  %v2611_v18 = vor.u32 %v2610_v11, %v2607_v62  ;;  %p510_p8 = scmp.lt.s32.totalorder %s6164_s20, 31 }
 0x202   : > { %2782 = vmatmul.mubr.bf16.gmra.mrb[8].mxu1 %v10035_v44  ;;  %5449 = vmatmul.mubr.bf16.gmra.mrb[8].mxu0 %v10036_v12 }
 0x203   : > { %2791 = vmatprep.mubr.bf16.mxu1 %v10013_v29  ;;  %5458 = vmatprep.mubr.bf16.mxu0 %v10013_v29  ;;  %v2612_v44 = vrot.slane %v2611_v18, 4  ;;  %s10055_s20 = smov (!%p510_p8, %s6164_s20), 31 }
 0x204   : > { %2992 = vmatpush1.bf16.msra.mxu1 %v7860_v19  ;;  %5659 = vmatpush1.bf16.msra.mxu0 %v7863_v28  ;;  %v2624_v19 = vshll.u32 %v9825_v20, 16  ;;  %v5278_v28 = vor.u32 %v5277_v8, %v5274_v6  ;;  %s6165_s22 = sshll.u32 %s10055_s20, 1 }
 0x205   : > { %2993 = vmatprep.subr.bf16.mxu1 %v7868_v59  ;;  %5660 = vmatprep.subr.bf16.mxu0 %v7871_v42  ;;  %v5288_v59 = vor.u32 %v5287_v58, %v5283_v26  ;;  %v5291_v42 = vshll.u32 %v9828_v43, 16  ;;  %s514_s24 = sadd.s32 %s6166_s12, %s6165_s22 }
 0x206   : > { %s6167_s14 = sshll.u32 %s514_s24, 2 }
 0x207   : > { %s9908_s8 = scalar_lea.vmem %s9976_s7, %s6167_s14 }
 0x208   : > { %2994 = vmatpush1.bf16.msra.mxu1 %v7866_v56  ;;  %5661 = vmatpush1.bf16.msra.mxu0 %v7869_v13  ;;  %v2626_v56 = vrot.slane %v2624_v19, 5  ;;  %v5279_v13 = vrot.slane %v5278_v28, 4 }
 0x209   : > { %2995 = vmatprep.subr.bf16.mxu1 %v7874_v0  ;;  %5662 = vmatprep.subr.bf16.mxu0 %v7877_v31  ;;  %v5289_v0 = vrot.slane %v5288_v59, 4 }
 0x20a   : > { %2792 = vmatmul.mubr.bf16.gmra.mrb[12].mxu1 %v10037_v40  ;;  %5459 = vmatmul.mubr.bf16.gmra.mrb[12].mxu0 %v10038_v48 }
 0x20b   : > { %2801 = vmatprep.mubr.bf16.mxu1 %v10013_v29  ;;  %5468 = vmatprep.mubr.bf16.mxu0 %v10013_v29 }
 0x20c   : > { %2996 = vmatpush1.bf16.msra.mxu1 %v7872_v34  ;;  %5663 = vmatpush1.bf16.msra.mxu0 %v7875_v41  ;;  %v5284_v34 = vsel %vm8161_vm2, %v5279_v13, %v5283_v26 }
 0x20d   : > { %2997 = vmatprep.subr.bf16.mxu1 %v7880_v32  ;;  %5664 = vmatprep.subr.bf16.mxu0 %v7883_v24 }
 0x210   : > { %2998 = vmatpush1.bf16.msra.mxu1 %v7878_v55  ;;  %5665 = vmatpush1.bf16.msra.mxu0 %v7881_v61 }
 0x212   : > { %2802 = vmatmul.mubr.bf16.gmra.mrb[16].mxu1 %v10039_v53  ;;  %5469 = vmatmul.mubr.bf16.gmra.mrb[16].mxu0 %v8868_v50  ;;  %v2620_v50 = vrot.slane %v2618_v37, 4 }
 0x213   : > { %2811 = vmatprep.mubr.bf16.mxu1 %v10013_v29  ;;  %5478 = vmatprep.mubr.bf16.mxu0 %v10013_v29 }
 0x214   : > { %v2621_v14 = vor.u32 %v2620_v50, %v2616_v51 }
 0x216   : > { %v2622_v12 = vrot.slane %v2621_v14, 4 }
 0x218   : > { %v2627_v31 = vsel %vm8161_vm2, %v2622_v12, %v2626_v56 }
 0x21a   : > { %2812 = vmatmul.mubr.bf16.gmra.mrb[20].mxu1 %v10034_v2  ;;  %5479 = vmatmul.mubr.bf16.gmra.mrb[20].mxu0 %v8879_v60  ;;  %v5293_v2 = vrot.slane %v5291_v42, 5  ;;  %v2617_v60 = vsel %vm8161_vm2, %v2612_v44, %v2616_v51 }
 0x21b   : > { %2821 = vmatprep.mubr.bf16.mxu1 %v10013_v29  ;;  %5488 = vmatprep.mubr.bf16.mxu0 %v10013_v29  ;;  %v6429_v32 = vcombine.low %v2617_v60, %v2627_v31 }
 0x21c   : > { %v5294_v41 = vsel %vm8161_vm2, %v5289_v0, %v5293_v2 }
 0x222   : > { %2822 = vmatmul.mubr.bf16.gmra.mrb[24].mxu1 %v9410_v57  ;;  %5489 = vmatmul.mubr.bf16.gmra.mrb[24].mxu0 %v9412_v22  ;;  %v6741_v57 = vcombine.low %v5284_v34, %v5294_v41 }
 0x223   : > { %2831 = vmatprep.mubr.bf16.mxu1 %v10013_v29  ;;  %5498 = vmatprep.mubr.bf16.mxu0 %v10013_v29 }
 0x22a   : > { %2832 = vmatmul.mubr.bf16.gmra.mrb[28].mxu1 %v6429_v32  ;;  %5499 = vmatmul.mubr.bf16.gmra.mrb[28].mxu0 %v6741_v57 }
 0x22b   : > { %3015 = vmatprep.mubr.bf16.mxu1 %v10013_v29  ;;  %5682 = vmatprep.mubr.bf16.mxu0 %v10013_v29 }
 0x232   : > { %3016 = vmatmul.mubr.bf16.vlgmr.msra.gmra.mrb[0].mxu1 %v8983_v63  ;;  %5683 = vmatmul.mubr.bf16.vlgmr.msra.gmra.mrb[0].mxu0 %v8985_v3  ;;  %v2879_v63 = vrot.slane %v2877_v45, 4  ;;  %v6758_v3 = vrot.slane %v9695_v9, 9 }
 0x233   : > { %3025 = vmatprep.mubr.bf16.mxu1 %v10013_v29  ;;  %5692 = vmatprep.mubr.bf16.mxu0 %v10013_v29 }
 0x23a   : > { %3026 = vmatmul.mubr.bf16.gmra.mrb[4].mxu1 %v9029_v52  ;;  %5693 = vmatmul.mubr.bf16.gmra.mrb[4].mxu0 %v9031_v21 }
 0x23b   : > { %3035 = vmatprep.mubr.bf16.mxu1 %v10013_v29  ;;  %5702 = vmatprep.mubr.bf16.mxu0 %v10013_v29 }
 0x242   : > { %3036 = vmatmul.mubr.bf16.gmra.mrb[8].mxu1 %v9073_v4  ;;  %5703 = vmatmul.mubr.bf16.gmra.mrb[8].mxu0 %v9075_v23 }
 0x243   : > { %3045 = vmatprep.mubr.bf16.mxu1 %v10013_v29  ;;  %5712 = vmatprep.mubr.bf16.mxu0 %v10013_v29 }
 0x24a   : > { %3046 = vmatmul.mubr.bf16.gmra.mrb[12].mxu1 %v9087_v36  ;;  %5713 = vmatmul.mubr.bf16.gmra.mrb[12].mxu0 %v8807_v30  ;;  %v5544_v30 = vrot.slane %v9698_v39, 5 }
 0x24b   : > { %3055 = vmatprep.mubr.bf16.mxu1 %v10013_v29  ;;  %5722 = vmatprep.mubr.bf16.mxu0 %v10013_v29 }
 0x24c   : > { %v5546_v52 = vrot.slane %v5544_v30, 4  ;;  %v5545_v4 = vsel %vm8608_vm5, %v6758_v3, %v5544_v30 }
 0x252   : > { %3056 = vmatmul.mubr.bf16.gmra.mrb[16].mxu1 %v8814_v7  ;;  %5723 = vmatmul.mubr.bf16.gmra.mrb[16].mxu0 %v8822_v5  ;;  %v6446_v7 = vrot.slane %v9687_v27, 9  ;;  %v2880_v5 = vrot.slane %v9825_v20, 5  ;;  %v5795_v27 = vld [vmem:[%s9975_s6] sm:$0x3] }
 0x253   : > { %3065 = vmatprep.mubr.bf16.mxu1 %v10013_v29  ;;  %5732 = vmatprep.mubr.bf16.mxu0 %v10013_v29 }
 0x254   : > { %v2881_v21 = vsel %vm8608_vm5, %v2879_v63, %v2880_v5 }
 0x25a   : > { %3066 = vmatmul.mubr.bf16.gmra.mrb[20].mxu1 %v8839_v49  ;;  %5733 = vmatmul.mubr.bf16.gmra.mrb[20].mxu0 %v8853_v33  ;;  %v5547_v49 = vrot.slane %v9828_v43, 5  ;;  %v2878_v33 = vsel %vm8608_vm5, %v6446_v7, %v2877_v45 }
 0x25b   : > { %3075 = vmatprep.mubr.bf16.mxu1 %v10013_v29  ;;  %5742 = vmatprep.mubr.bf16.mxu0 %v10013_v29  ;;  %v6463_v36 = vcombine.low %v2878_v33, %v2881_v21 }
 0x25c   : > { %v5548_v23 = vsel %vm8608_vm5, %v5546_v52, %v5547_v49 }
 0x25d   : > { %v6775_v22 = vcombine.low %v5545_v4, %v5548_v23 }
 0x262   : > { %3076 = vmatmul.mubr.bf16.gmra.mrb[24].mxu1 %v9556_v25  ;;  %5743 = vmatmul.mubr.bf16.gmra.mrb[24].mxu0 %v9558_v46  ;;  %v5797_v25 = vlaneseq }
 0x263   : > { %3085 = vmatprep.mubr.bf16.mxu1 %v10013_v29  ;;  %5752 = vmatprep.mubr.bf16.mxu0 %v10013_v29 }
 0x264   : > { %v5798_v46 = vshrl.u32 %v5797_v25, 7 }
 0x266   : > { %v5799_v29 = vsub.s32 0, %v5798_v46  ;;  %v5803_v47 = vsub.s32 1, %v5798_v46 }
 0x268   : > { %v9897_v9 = vrot.slane %v5795_v27, %v5799_v29  ;;  %v9899_v24 = vrot.slane %v5795_v27, %v5803_v47 }
 0x26a   : > { %3086 = vmatmul.mubr.bf16.gmra.mrb[28].mxu1 %v6463_v36  ;;  %5753 = vmatmul.mubr.bf16.gmra.mrb[28].mxu0 %v6775_v22 }
 0x305   : > { %v3017_v10 = vpop.f32.mrb[0].mxu1  ;;  %v5684_v39 = vpop.f32.mrb[0].mxu0 }
 0x306   : > { %v6844_v40 = vadd.f32 %v5684_v39, %v3017_v10  ;;  %v3019_v48 = vpop.f32.mrb[1].mxu1  ;;  %v5686_v55 = vpop.f32.mrb[1].mxu0 }
 0x307   : > { %v6845_v61 = vadd.f32 %v5686_v55, %v3019_v48  ;;  %v3021_v1 = vpop.f32.mrb[2].mxu1  ;;  %v5688_v16 = vpop.f32.mrb[2].mxu0 }
 0x308   : > { %v5807_v37 = vadd.f32 %v6844_v40, %v9897_v9  ;;  %v6846_v53 = vadd.f32 %v5688_v16, %v3021_v1  ;;  %v3023_v35 = vpop.f32.mrb[3].mxu1  ;;  %v5690_v54 = vpop.f32.mrb[3].mxu0 }
 0x309   : > { %v5808_v17 = vadd.f32 %v6845_v61, %v9899_v24  ;;  %v6847_v38 = vadd.f32 %v5690_v54, %v3023_v35 }
 0x30a   : > { %v5839_v15 = vmax.f32 %v5807_v37, 0.0  ;;  %v5809_v62 = vadd.f32 %v6846_v53, %v9897_v9 }
 0x30b   : > { %v5840_v11 = vmax.f32 %v5808_v17, 0.0  ;;  %v5810_v51 = vadd.f32 %v6847_v38, %v9899_v24 }
 0x30c   : > { %v5841_v50 = vmax.f32 %v5809_v62, 0.0 }
 0x30d   : > { %v6824_v6 = vpack.c.bf16 %v5840_v11, %v5839_v15  ;;  %v5842_v8 = vmax.f32 %v5810_v51, 0.0  ;;  %v3027_v26 = vpop.f32.mrb[4].mxu1  ;;  %v5694_v58 = vpop.f32.mrb[4].mxu0 }
 0x30e   : > { %v6848_v20 = vadd.f32 %v5694_v58, %v3027_v26  ;;  %v3029_v43 = vpop.f32.mrb[5].mxu1  ;;  %v5696_v18 = vpop.f32.mrb[5].mxu0 }
 0x30f   : > { %5967 = vst [vmem:[%s9908_s8] sm:$0xff] %v6824_v6  ;;  %v6825_v14 = vpack.c.bf16 %v5842_v8, %v5841_v50  ;;  %v6849_v19 = vadd.f32 %v5696_v18, %v3029_v43  ;;  %v3031_v28 = vpop.f32.mrb[6].mxu1  ;;  %v5698_v59 = vpop.f32.mrb[6].mxu0 }
 0x310   : > { %v5811_v42 = vadd.f32 %v6848_v20, %v9897_v9  ;;  %v6850_v44 = vadd.f32 %v5698_v59, %v3031_v28  ;;  %v3033_v12 = vpop.f32.mrb[7].mxu1  ;;  %v5700_v56 = vpop.f32.mrb[7].mxu0 }
 0x311   : > { %5968 = vst [vmem:[%s9908_s8 + $0x8] sm:$0xff] %v6825_v14  ;;  %v5812_v13 = vadd.f32 %v6849_v19, %v9899_v24  ;;  %v6851_v0 = vadd.f32 %v5700_v56, %v3033_v12 }
 0x312   : > { %v5843_v2 = vmax.f32 %v5811_v42, 0.0  ;;  %v5813_v60 = vadd.f32 %v6850_v44, %v9897_v9 }
 0x313   : > { %v5844_v31 = vmax.f32 %v5812_v13, 0.0  ;;  %v5814_v34 = vadd.f32 %v6851_v0, %v9899_v24 }
 0x314   : > { %v5845_v41 = vmax.f32 %v5813_v60, 0.0 }
 0x315   : > { %v6826_v32 = vpack.c.bf16 %v5844_v31, %v5843_v2  ;;  %v5846_v57 = vmax.f32 %v5814_v34, 0.0  ;;  %v3037_v45 = vpop.f32.mrb[8].mxu1  ;;  %v5704_v30 = vpop.f32.mrb[8].mxu0 }
 0x316   : > { %v6852_v7 = vadd.f32 %v5704_v30, %v3037_v45  ;;  %v3039_v5 = vpop.f32.mrb[9].mxu1  ;;  %v5706_v63 = vpop.f32.mrb[9].mxu0 }
 0x317   : > { %5969 = vst [vmem:[%s9908_s8 + $0x10] sm:$0xff] %v6826_v32  ;;  %v6827_v3 = vpack.c.bf16 %v5846_v57, %v5845_v41  ;;  %v6853_v52 = vadd.f32 %v5706_v63, %v3039_v5  ;;  %v3041_v49 = vpop.f32.mrb[10].mxu1  ;;  %v5708_v33 = vpop.f32.mrb[10].mxu0 }
 0x318   : > { %v5815_v21 = vadd.f32 %v6852_v7, %v9897_v9  ;;  %v6854_v4 = vadd.f32 %v5708_v33, %v3041_v49  ;;  %v3043_v23 = vpop.f32.mrb[11].mxu1  ;;  %v5710_v36 = vpop.f32.mrb[11].mxu0 }
 0x319   : > { %5970 = vst [vmem:[%s9908_s8 + $0x18] sm:$0xff] %v6827_v3  ;;  %v5816_v22 = vadd.f32 %v6853_v52, %v9899_v24  ;;  %v6855_v25 = vadd.f32 %v5710_v36, %v3043_v23 }
 0x31a   : > { %v5847_v46 = vmax.f32 %v5815_v21, 0.0  ;;  %v5817_v29 = vadd.f32 %v6854_v4, %v9897_v9 }
 0x31b   : > { %v5848_v27 = vmax.f32 %v5816_v22, 0.0  ;;  %v5818_v47 = vadd.f32 %v6855_v25, %v9899_v24 }
 0x31c   : > { %v5849_v10 = vmax.f32 %v5817_v29, 0.0 }
 0x31d   : > { %v6828_v39 = vpack.c.bf16 %v5848_v27, %v5847_v46  ;;  %v5850_v40 = vmax.f32 %v5818_v47, 0.0  ;;  %v3047_v48 = vpop.f32.mrb[12].mxu1  ;;  %v5714_v55 = vpop.f32.mrb[12].mxu0 }
 0x31e   : > { %v6856_v61 = vadd.f32 %v5714_v55, %v3047_v48  ;;  %v3049_v1 = vpop.f32.mrb[13].mxu1  ;;  %v5716_v16 = vpop.f32.mrb[13].mxu0 }
 0x31f   : > { %5971 = vst [vmem:[%s9908_s8 + $0x20] sm:$0xff] %v6828_v39  ;;  %v6829_v37 = vpack.c.bf16 %v5850_v40, %v5849_v10  ;;  %v6857_v53 = vadd.f32 %v5716_v16, %v3049_v1  ;;  %v3051_v35 = vpop.f32.mrb[14].mxu1  ;;  %v5718_v54 = vpop.f32.mrb[14].mxu0 }
 0x320   : > { %v5819_v17 = vadd.f32 %v6856_v61, %v9897_v9  ;;  %v6858_v38 = vadd.f32 %v5718_v54, %v3051_v35  ;;  %v3053_v15 = vpop.f32.mrb[15].mxu1  ;;  %v5720_v62 = vpop.f32.mrb[15].mxu0 }
 0x321   : > { %5972 = vst [vmem:[%s9908_s8 + $0x28] sm:$0xff] %v6829_v37  ;;  %v5820_v11 = vadd.f32 %v6857_v53, %v9899_v24  ;;  %v6859_v51 = vadd.f32 %v5720_v62, %v3053_v15 }
 0x322   : > { %v5851_v50 = vmax.f32 %v5819_v17, 0.0  ;;  %v5821_v6 = vadd.f32 %v6858_v38, %v9897_v9 }
 0x323   : > { %v5852_v8 = vmax.f32 %v5820_v11, 0.0  ;;  %v5822_v26 = vadd.f32 %v6859_v51, %v9899_v24 }
 0x324   : > { %v5853_v58 = vmax.f32 %v5821_v6, 0.0 }
 0x325   : > { %v6830_v20 = vpack.c.bf16 %v5852_v8, %v5851_v50  ;;  %v5854_v43 = vmax.f32 %v5822_v26, 0.0  ;;  %v3057_v18 = vpop.f32.mrb[16].mxu1  ;;  %v5724_v14 = vpop.f32.mrb[16].mxu0 }
 0x326   : > { %v6860_v19 = vadd.f32 %v5724_v14, %v3057_v18  ;;  %v3059_v28 = vpop.f32.mrb[17].mxu1  ;;  %v5726_v59 = vpop.f32.mrb[17].mxu0 }
 0x327   : > { %5973 = vst [vmem:[%s9908_s8 + $0x30] sm:$0xff] %v6830_v20  ;;  %v6831_v42 = vpack.c.bf16 %v5854_v43, %v5853_v58  ;;  %v6861_v44 = vadd.f32 %v5726_v59, %v3059_v28  ;;  %v3061_v12 = vpop.f32.mrb[18].mxu1  ;;  %v5728_v56 = vpop.f32.mrb[18].mxu0 }
 0x328   : > { %v5823_v13 = vadd.f32 %v6860_v19, %v9897_v9  ;;  %v6862_v0 = vadd.f32 %v5728_v56, %v3061_v12  ;;  %v3063_v2 = vpop.f32.mrb[19].mxu1  ;;  %v5730_v60 = vpop.f32.mrb[19].mxu0 }
 0x329   : > { %5974 = vst [vmem:[%s9908_s8 + $0x38] sm:$0xff] %v6831_v42  ;;  %v5824_v31 = vadd.f32 %v6861_v44, %v9899_v24  ;;  %v6863_v34 = vadd.f32 %v5730_v60, %v3063_v2 }
 0x32a   : > { %v5855_v41 = vmax.f32 %v5823_v13, 0.0  ;;  %v5825_v32 = vadd.f32 %v6862_v0, %v9897_v9 }
 0x32b   : > { %v5856_v57 = vmax.f32 %v5824_v31, 0.0  ;;  %v5826_v45 = vadd.f32 %v6863_v34, %v9899_v24 }
 0x32c   : > { %v5857_v30 = vmax.f32 %v5825_v32, 0.0 }
 0x32d   : > { %v6832_v7 = vpack.c.bf16 %v5856_v57, %v5855_v41  ;;  %v5858_v5 = vmax.f32 %v5826_v45, 0.0  ;;  %v3067_v63 = vpop.f32.mrb[20].mxu1  ;;  %v5734_v3 = vpop.f32.mrb[20].mxu0 }
 0x32e   : > { %v6864_v52 = vadd.f32 %v5734_v3, %v3067_v63  ;;  %v3069_v49 = vpop.f32.mrb[21].mxu1  ;;  %v5736_v33 = vpop.f32.mrb[21].mxu0 }
 0x32f   : > { %5975 = vst [vmem:[%s9908_s8 + $0x40] sm:$0xff] %v6832_v7  ;;  %v6833_v21 = vpack.c.bf16 %v5858_v5, %v5857_v30  ;;  %v6865_v4 = vadd.f32 %v5736_v33, %v3069_v49  ;;  %v3071_v23 = vpop.f32.mrb[22].mxu1  ;;  %v5738_v36 = vpop.f32.mrb[22].mxu0 }
 0x330   : > { %v5827_v22 = vadd.f32 %v6864_v52, %v9897_v9  ;;  %v6866_v25 = vadd.f32 %v5738_v36, %v3071_v23  ;;  %v3073_v46 = vpop.f32.mrb[23].mxu1  ;;  %v5740_v29 = vpop.f32.mrb[23].mxu0 }
 0x331   : > { %5976 = vst [vmem:[%s9908_s8 + $0x48] sm:$0xff] %v6833_v21  ;;  %v5828_v27 = vadd.f32 %v6865_v4, %v9899_v24  ;;  %v6867_v47 = vadd.f32 %v5740_v29, %v3073_v46 }
 0x332   : > { %v5859_v10 = vmax.f32 %v5827_v22, 0.0  ;;  %v5829_v39 = vadd.f32 %v6866_v25, %v9897_v9 }
 0x333   : > { %v5860_v40 = vmax.f32 %v5828_v27, 0.0  ;;  %v5830_v48 = vadd.f32 %v6867_v47, %v9899_v24 }
 0x334   : > { %v5861_v55 = vmax.f32 %v5829_v39, 0.0 }
 0x335   : > { %v6834_v61 = vpack.c.bf16 %v5860_v40, %v5859_v10  ;;  %v5862_v1 = vmax.f32 %v5830_v48, 0.0  ;;  %v3077_v16 = vpop.f32.mrb[24].mxu1  ;;  %v5744_v37 = vpop.f32.mrb[24].mxu0 }
 0x336   : > { %v6868_v53 = vadd.f32 %v5744_v37, %v3077_v16  ;;  %v3079_v35 = vpop.f32.mrb[25].mxu1  ;;  %v5746_v54 = vpop.f32.mrb[25].mxu0 }
 0x337   : > { %5977 = vst [vmem:[%s9908_s8 + $0x50] sm:$0xff] %v6834_v61  ;;  %v6835_v17 = vpack.c.bf16 %v5862_v1, %v5861_v55  ;;  %v6869_v38 = vadd.f32 %v5746_v54, %v3079_v35  ;;  %v3081_v15 = vpop.f32.mrb[26].mxu1  ;;  %v5748_v62 = vpop.f32.mrb[26].mxu0 }
 0x338   : > { %v5831_v11 = vadd.f32 %v6868_v53, %v9897_v9  ;;  %v6870_v51 = vadd.f32 %v5748_v62, %v3081_v15  ;;  %v3083_v50 = vpop.f32.mrb[27].mxu1  ;;  %v5750_v6 = vpop.f32.mrb[27].mxu0 }
 0x339   : > { %5978 = vst [vmem:[%s9908_s8 + $0x58] sm:$0xff] %v6835_v17  ;;  %v5832_v8 = vadd.f32 %v6869_v38, %v9899_v24  ;;  %v6871_v26 = vadd.f32 %v5750_v6, %v3083_v50 }
 0x33a   : > { %v5863_v58 = vmax.f32 %v5831_v11, 0.0  ;;  %v5833_v20 = vadd.f32 %v6870_v51, %v9897_v9 }
 0x33b   : > { %v5864_v43 = vmax.f32 %v5832_v8, 0.0  ;;  %v5834_v18 = vadd.f32 %v6871_v26, %v9899_v24 }
 0x33c   : > { %v5865_v14 = vmax.f32 %v5833_v20, 0.0 }
 0x33d   : > { %v6836_v19 = vpack.c.bf16 %v5864_v43, %v5863_v58  ;;  %v5866_v28 = vmax.f32 %v5834_v18, 0.0  ;;  %v3087_v59 = vpop.f32.mrb[28].mxu1  ;;  %v5754_v42 = vpop.f32.mrb[28].mxu0 }
 0x33e   : > { %v6872_v44 = vadd.f32 %v5754_v42, %v3087_v59  ;;  %v3089_v12 = vpop.f32.mrb[29].mxu1  ;;  %v5756_v56 = vpop.f32.mrb[29].mxu0 }
 0x33f   : > { %5979 = vst [vmem:[%s9908_s8 + $0x60] sm:$0xff] %v6836_v19  ;;  %v6837_v13 = vpack.c.bf16 %v5866_v28, %v5865_v14  ;;  %v6873_v0 = vadd.f32 %v5756_v56, %v3089_v12  ;;  %v3091_v2 = vpop.f32.mrb[30].mxu1  ;;  %v5758_v60 = vpop.f32.mrb[30].mxu0 }
 0x340   : > { %v5835_v31 = vadd.f32 %v6872_v44, %v9897_v9  ;;  %v6874_v34 = vadd.f32 %v5758_v60, %v3091_v2  ;;  %v3093_v41 = vpop.f32.mrb[31].mxu1  ;;  %v5760_v32 = vpop.f32.mrb[31].mxu0 }
 0x341   : > { %5980 = vst [vmem:[%s9908_s8 + $0x68] sm:$0xff] %v6837_v13  ;;  %v5836_v57 = vadd.f32 %v6873_v0, %v9899_v24  ;;  %v6875_v45 = vadd.f32 %v5760_v32, %v3093_v41 }
 0x342   : > { %v5867_v30 = vmax.f32 %v5835_v31, 0.0  ;;  %v5837_v7 = vadd.f32 %v6874_v34, %v9897_v9 }
 0x343   : > { %v5868_v5 = vmax.f32 %v5836_v57, 0.0  ;;  %v5838_v63 = vadd.f32 %v6875_v45, %v9899_v24 }
 0x344   : > { %v5869_v3 = vmax.f32 %v5837_v7, 0.0 }
 0x345   : > { %v6838_v52 = vpack.c.bf16 %v5868_v5, %v5867_v30  ;;  %v5870_v49 = vmax.f32 %v5838_v63, 0.0 }
 0x347   : > { %5981 = vst [vmem:[%s9908_s8 + $0x70] sm:$0xff] %v6838_v52  ;;  %v6839_v33 = vpack.c.bf16 %v5870_v49, %v5869_v3 }
 0x349   : > { %5982 = vst [vmem:[%s9908_s8 + $0x78] sm:$0xff] %v6839_v33 }
 0x34a PF: > { %s17_s28 = sadd.s32 1, %s7948_s28   ;;  %s10040_s24 = smov %s7940_s26 }
 0x34b   : > { %p14_p9 = scmp.ge.s32.totalorder %s17_s28, 6   ;;  %s10041_s25 = smov %s7944_s27 }
 0x34c   : > { %s10042_s26 = smov %s10045_s29  ;;  %s10043_s27 = smov %s10049_s30 }
 0x34d   :  { %16 = sbr.rel (!%p14_p9) target bundleno = 3 (0x3), region = 103 }

// kernel: aspp_forward.13
= control target key start
LH: loop header
LB: loop body
LE: loop exit
PB: predicated region body
PF: predicated region fallthrough
CT: control target
= control target key end

     0   :  { %s5750_s15 = smov 0   ;;  %s5752_s16 = smov 0   ;;  %s7430_s0 = inlined_call_operand.vmem [shape: bf16[2,18,18,256], index: 0, kind: input, shape index: {}, may-alias: {0,1}]   ;;  %s7431_s1 = inlined_call_operand.vmem [shape: bf16[2,18,18,256], index: 1, kind: input, shape index: {}, may-alias: {0,1}]   ;;  %s7432_s2 = inlined_call_operand.vmem [shape: bf16[9,256,256], index: 2, kind: input, shape index: {}]   ;;  %s7433_s3 = inlined_call_operand.vmem [shape: f32[1,256], index: 3, kind: input, shape index: {}]   ;;  %s7434_s4 = inlined_call_operand.vmem [shape: bf16[2,256,256], index: 4, kind: output, shape index: {}]  }
   0x1   :  { %s5754_s17 = smov 0   ;;  %s5756_s18 = smov 0  }
   0x2   :  { %s5758_s19 = smov 0  }
   0x3 LB: > { %s23_s20 = sadd.s32 1, %s5715_s17  ;;  %s26_s21 = sadd.s32 1, %s5719_s18  ;;  %s5723_s19 = sphi %s5758_s19, %s14_s19   ;;  %s5719_s18 = sphi %s5756_s18, %s7452_s18   ;;  %s5715_s17 = sphi %s5754_s17, %s7451_s17   ;;  %s5711_s16 = sphi %s5752_s16, %s7450_s16   ;;  %s5707_s15 = sphi %s5750_s15, %s7449_s15  }
   0x4   : > { %p24_p0 = scmp.ge.s32.totalorder %s23_s20, 2  ;;  %p4232_p1 = scmp.ge.s32.totalorder %s5723_s19, 1 }
   0x5   : > { %p222_p2 = scmp.lt.s32.totalorder %s5723_s19, 5 }
   0x6   : > { %s7454_s20 = smov (%p24_p0, %s23_s20), 0  ;;  %s7456_s21 = smov (!%p24_p0, %s26_s21), %s5719_s18 }
   0x7   : > { %p223_p3 = pnand %p4232_p1, %p222_p2  ;;  %p28_p4 = scmp.ge.s32.totalorder %s7456_s21, 2 }
   0x9   : > { %s7458_s21 = smov (%p28_p4, %s7456_s21), 0  ;;  %226 = sbr.rel (%p223_p3) target bundleno = 586 (0x24a), region = 36 }
  0x10   : > { %v5230_v0 = vld [vmem:[%s7432_s2 + $0x104] ss:$8 sps:$4 sm:$0xff]   ;;  %v5234_v2 = vld [vmem:[%s7432_s2 + $0x100] ss:$8 sps:$4 sm:$0xff]   ;;  %v5236_v4 = vld [vmem:[%s7432_s2 + $0x114] ss:$8 sps:$4 sm:$0xff]  }
  0x11   : > { %v5232_v1 = vld [vmem:[%s7432_s2 + $0x404] ss:$8 sps:$4 sm:$0xff]   ;;  %839 = vmatprep.subr.bf16.mxu1 %v5230_v0  ;;  %v5235_v3 = vld [vmem:[%s7432_s2 + $0x400] ss:$8 sps:$4 sm:$0xff]   ;;  %v5238_v5 = vld [vmem:[%s7432_s2 + $0x414] ss:$8 sps:$4 sm:$0xff]  }
  0x12   : > { %2347 = vmatprep.subr.bf16.mxu0 %v5232_v1  ;;  %840 = vmatpush1.bf16.msra.mxu1 %v5234_v2  ;;  %v5240_v6 = vld [vmem:[%s7432_s2 + $0x110] ss:$8 sps:$4 sm:$0xff]   ;;  %v5242_v8 = vld [vmem:[%s7432_s2 + $0x124] ss:$8 sps:$4 sm:$0xff]   ;;  %v5246_v10 = vld [vmem:[%s7432_s2 + $0x120] ss:$8 sps:$4 sm:$0xff]  }
  0x13   : > { %2348 = vmatpush1.bf16.msra.mxu0 %v5235_v3  ;;  %841 = vmatprep.subr.bf16.mxu1 %v5236_v4  ;;  %v5241_v7 = vld [vmem:[%s7432_s2 + $0x410] ss:$8 sps:$4 sm:$0xff]   ;;  %v5244_v9 = vld [vmem:[%s7432_s2 + $0x424] ss:$8 sps:$4 sm:$0xff]   ;;  %v5247_v11 = vld [vmem:[%s7432_s2 + $0x420] ss:$8 sps:$4 sm:$0xff]  }
  0x14   : > { %2349 = vmatprep.subr.bf16.mxu0 %v5238_v5  ;;  %v5248_v12 = vld [vmem:[%s7432_s2 + $0x134] ss:$8 sps:$4 sm:$0xff]   ;;  %v5252_v14 = vld [vmem:[%s7432_s2 + $0x130] ss:$8 sps:$4 sm:$0xff]   ;;  %v5254_v16 = vld [vmem:[%s7432_s2 + $0x144] ss:$8 sps:$4 sm:$0xff]  }
  0x15   : > { %v5250_v13 = vld [vmem:[%s7432_s2 + $0x434] ss:$8 sps:$4 sm:$0xff]   ;;  %v5253_v15 = vld [vmem:[%s7432_s2 + $0x430] ss:$8 sps:$4 sm:$0xff]   ;;  %v5256_v17 = vld [vmem:[%s7432_s2 + $0x444] ss:$8 sps:$4 sm:$0xff]  }
  0x16   : > { %842 = vmatpush1.bf16.msra.mxu1 %v5240_v6  ;;  %v5258_v18 = vld [vmem:[%s7432_s2 + $0x140] ss:$8 sps:$4 sm:$0xff]   ;;  %v5260_v20 = vld [vmem:[%s7432_s2 + $0x154] ss:$8 sps:$4 sm:$0xff]   ;;  %s5851_s28 = sshll.u32 %s5707_s15, 3  ;;  %p283_p5 = scmp.lt.s32.totalorder %s5711_s16, 1 }
  0x17   : > { %2350 = vmatpush1.bf16.msra.mxu0 %v5241_v7  ;;  %843 = vmatprep.subr.bf16.mxu1 %v5242_v8  ;;  %v5259_v19 = vld [vmem:[%s7432_s2 + $0x440] ss:$8 sps:$4 sm:$0xff]   ;;  %v5262_v21 = vld [vmem:[%s7432_s2 + $0x454] ss:$8 sps:$4 sm:$0xff]   ;;  %v5264_v22 = vld [vmem:[%s7432_s2 + $0x150] ss:$8 sps:$4 sm:$0xff]  }
  0x18   : > { %2351 = vmatprep.subr.bf16.mxu0 %v5244_v9  ;;  %v5265_v23 = vld [vmem:[%s7432_s2 + $0x450] ss:$8 sps:$4 sm:$0xff]   ;;  %v5266_v24 = vld [vmem:[%s7432_s2 + $0x164] ss:$8 sps:$4 sm:$0xff]   ;;  %p285_p6 = scmp.lt.s32.totalorder %s5851_s28, 17  ;;  %s7460_s16 = smov (!%p283_p5, %s5711_s16), 1 }
  0x19   : > { %v5268_v25 = vld [vmem:[%s7432_s2 + $0x464] ss:$8 sps:$4 sm:$0xff]   ;;  %v5270_v26 = vld [vmem:[%s7432_s2 + $0x160] ss:$8 sps:$4 sm:$0xff]   ;;  %v5272_v28 = vld [vmem:[%s7432_s2 + $0x174] ss:$8 sps:$4 sm:$0xff]  }
  0x1a   : > { %844 = vmatpush1.bf16.msra.mxu1 %v5246_v10  ;;  %v5271_v27 = vld [vmem:[%s7432_s2 + $0x460] ss:$8 sps:$4 sm:$0xff]   ;;  %v5274_v29 = vld [vmem:[%s7432_s2 + $0x474] ss:$8 sps:$4 sm:$0xff]   ;;  %s286_s26 = scalar_select %p285_p6, %s5851_s28, 17  ;;  %vm1313_vm2 = vcmask 1042432  }
  0x1b   : > { %2352 = vmatpush1.bf16.msra.mxu0 %v5247_v11  ;;  %845 = vmatprep.subr.bf16.mxu1 %v5248_v12  ;;  %v5276_v30 = vld [vmem:[%s7432_s2 + $0x170] ss:$8 sps:$4 sm:$0xff]   ;;  %v5278_v32 = vld [vmem:[%s7432_s2 + $0x184] ss:$8 sps:$4 sm:$0xff]   ;;  %s5188_s8 = smul.u32 108, %s7460_s16  ;;  %vm1314_vm3 = vcmask 1046532  }
  0x1c   : > { %2353 = vmatprep.subr.bf16.mxu0 %v5250_v13  ;;  %v5277_v31 = vld [vmem:[%s7432_s2 + $0x470] ss:$8 sps:$4 sm:$0xff]   ;;  %v5280_v33 = vld [vmem:[%s7432_s2 + $0x484] ss:$8 sps:$4 sm:$0xff]   ;;  %s5187_s11 = smul.u32 6, %s286_s26  ;;  %vm6022_vm5 = vmor %vm1313_vm2, %vm1314_vm3  ;;  %s4898_s6 = sadd.s32 8, %s5851_s28 }
  0x1d   : > { %v5282_v34 = vld [vmem:[%s7432_s2 + $0x180] ss:$8 sps:$4 sm:$0xff]   ;;  %v5284_v36 = vld [vmem:[%s7432_s2 + $0x194] ss:$8 sps:$4 sm:$0xff]   ;;  %v5288_v38 = vld [vmem:[%s7432_s2 + $0x190] ss:$8 sps:$4 sm:$0xff]  }
  0x1e   : > { %846 = vmatpush1.bf16.msra.mxu1 %v5252_v14  ;;  %v5283_v35 = vld [vmem:[%s7432_s2 + $0x480] ss:$8 sps:$4 sm:$0xff]   ;;  %v5286_v37 = vld [vmem:[%s7432_s2 + $0x494] ss:$8 sps:$4 sm:$0xff]   ;;  %s289_s26 = sadd.s32 %s5188_s8, %s5187_s11  ;;  %v5289_v39 = vld [vmem:[%s7432_s2 + $0x490] ss:$8 sps:$4 sm:$0xff]  }
  0x1f   : > { %2354 = vmatpush1.bf16.msra.mxu0 %v5253_v15  ;;  %847 = vmatprep.subr.bf16.mxu1 %v5254_v16  ;;  %v5290_v40 = vld [vmem:[%s7432_s2 + $0x1a4] ss:$8 sps:$4 sm:$0xff]   ;;  %s4234_s10 = sshll.u32 %s289_s26, 2  ;;  %v5294_v42 = vld [vmem:[%s7432_s2 + $0x1a0] ss:$8 sps:$4 sm:$0xff]   ;;  %p6116_p7 = scmp.lt.s32.totalorder %s4898_s6, 17 }
  0x20   : > { %2355 = vmatprep.subr.bf16.mxu0 %v5256_v17  ;;  %v5292_v41 = vld [vmem:[%s7432_s2 + $0x4a4] ss:$8 sps:$4 sm:$0xff]   ;;  %v5295_v43 = vld [vmem:[%s7432_s2 + $0x4a0] ss:$8 sps:$4 sm:$0xff]   ;;  %s5931_s27 = scalar_lea.vmem %s7430_s0, %s4234_s10  ;;  %v5296_v44 = vld [vmem:[%s7432_s2 + $0x1b4] ss:$8 sps:$4 sm:$0xff]  }
  0x21   : > { %vm387_vm0 = vsmask.f32 3328  ;;  %v5298_v45 = vld [vmem:[%s7432_s2 + $0x4b4] ss:$8 sps:$4 sm:$0xff]   ;;  %vm388_vm1 = vsmask.f32 7440 }
  0x22   : > { %848 = vmatpush1.bf16.msra.mxu1 %v5258_v18  ;;  %v5300_v46 = vld [vmem:[%s7432_s2 + $0x1b0] ss:$8 sps:$4 sm:$0xff]   ;;  %v325_v48 = vld [vmem:[%s5931_s27] sm:$0xff]  ;;  %v326_v51 = vld [vmem:[%s5931_s27 + $0x8] sm:$0xff]  ;;  %s7462_s6 = smov (!%p6116_p7, %s4898_s6), 17 }
  0x23   : > { %2356 = vmatpush1.bf16.msra.mxu0 %v5259_v19  ;;  %849 = vmatprep.subr.bf16.mxu1 %v5260_v20  ;;  %v5301_v47 = vld [vmem:[%s7432_s2 + $0x4b0] ss:$8 sps:$4 sm:$0xff]   ;;  %v5302_v49 = vld [vmem:[%s7432_s2 + $0x1c4] ss:$8 sps:$4 sm:$0xff]   ;;  %v391_v53 = vshrl.u32 %v325_v48, 16  ;;  %v394_v54 = vshll.u32 %v325_v48, 16  ;;  %vm5975_vm4 = vmor %vm387_vm0, %vm388_vm1 }
  0x24   : > { %2357 = vmatprep.subr.bf16.mxu0 %v5262_v21  ;;  %v5304_v50 = vld [vmem:[%s7432_s2 + $0x4c4] ss:$8 sps:$4 sm:$0xff]   ;;  %v327_v52 = vld [vmem:[%s5931_s27 + $0x10] sm:$0x11]  ;;  %v400_v55 = vshll.u32 %v326_v51, 16  ;;  %v404_v56 = vshrl.u32 %v326_v51, 16 }
  0x25   : > { %v410_v57 = vshll.u32 %v327_v52, 16  ;;  %v5955_v58 = vld [vmem:[%s5931_s27 + $0x18] sm:$0xff]  ;;  %v5958_v59 = vld [vmem:[%s5931_s27 + $0x20] sm:$0xff]  ;;  %v393_v60 = vrot.slane %v391_v53, 4  ;;  %v396_v61 = vrot.slane %v394_v54, 5  ;;  %s5189_s13 = smul.u32 6, %s7462_s6 }
  0x26   : > { %850 = vmatpush1.bf16.msra.mxu1 %v5264_v22  ;;  %v5961_v62 = vld [vmem:[%s5931_s27 + $0x28] sm:$0x11]  ;;  %v415_v63 = vshrl.u32 %v5955_v58, 16  ;;  %v418_v0 = vshll.u32 %v5955_v58, 16  ;;  %v402_v2 = vrot.slane %v400_v55, 5  ;;  %v406_v3 = vrot.slane %v404_v56, 4 }
  0x27   : > { %2358 = vmatpush1.bf16.msra.mxu0 %v5265_v23  ;;  %851 = vmatprep.subr.bf16.mxu1 %v5266_v24  ;;  %v5306_v1 = vld [vmem:[%s7432_s2 + $0x1c0] ss:$8 sps:$4 sm:$0xff]   ;;  %v424_v4 = vshll.u32 %v5958_v59, 16  ;;  %v397_v6 = vor.u32 %v396_v61, %v393_v60  ;;  %v428_v9 = vshrl.u32 %v5958_v59, 16  ;;  %v412_v12 = vrot.slane %v410_v57, 5  ;;  %s6323_s26 = sadd.s32 %s5189_s13, %s5188_s8  ;;  %s4238_s6 = sshll.u32 %s5707_s15, 4 }
  0x28   : > { %2359 = vmatprep.subr.bf16.mxu0 %v5268_v25  ;;  %v5307_v5 = vld [vmem:[%s7432_s2 + $0x4c0] ss:$8 sps:$4 sm:$0xff]   ;;  %v417_v7 = vrot.slane %v415_v63, 4  ;;  %v420_v8 = vrot.slane %v418_v0, 5  ;;  %v407_v11 = vor.u32 %v406_v3, %v402_v2  ;;  %v434_v14 = vshll.u32 %v5961_v62, 16  ;;  %s4237_s13 = sshll.u32 %s6323_s26, 2 }
  0x29   : > { %v426_v13 = vrot.slane %v424_v4, 5  ;;  %v5308_v15 = vld [vmem:[%s7432_s2 + $0x1d4] ss:$8 sps:$4 sm:$0xff]   ;;  %v398_v17 = vrot.slane %v397_v6, 4  ;;  %v430_v19 = vrot.slane %v428_v9, 4  ;;  %v5994_v23 = vcombine.high %v5955_v58, %v5958_v59  ;;  %s6401_s24 = scalar_lea.vmem %s7431_s1, %s4237_s13  ;;  %p317_p8 = scmp.lt.s32.totalorder %s4238_s6, 31 }
  0x2a   : > { %852 = vmatpush1.bf16.msra.mxu1 %v5270_v26  ;;  %v5310_v16 = vld [vmem:[%s7432_s2 + $0x4d4] ss:$8 sps:$4 sm:$0xff]   ;;  %v421_v18 = vor.u32 %v420_v8, %v417_v7  ;;  %v5312_v20 = vld [vmem:[%s7432_s2 + $0x1d0] ss:$8 sps:$4 sm:$0xff]   ;;  %v408_v22 = vrot.slane %v407_v11, 4  ;;  %v5998_v24 = vcombine.low %v5955_v58, %v5958_v59  ;;  %v1328_v63 = vrot.slane %v5961_v62, 5 }
  0x2b   : > { %2360 = vmatpush1.bf16.msra.mxu0 %v5271_v27  ;;  %853 = vmatprep.subr.bf16.mxu1 %v5272_v28  ;;  %v5313_v21 = vld [vmem:[%s7432_s2 + $0x4d0] ss:$8 sps:$4 sm:$0xff]   ;;  %v5314_v25 = vld [vmem:[%s7432_s2 + $0x1e4] ss:$8 sps:$4 sm:$0xff]   ;;  %v6008_v27 = vsel %vm5975_vm4, %v398_v17, %v402_v2  ;;  %v5322_v51 = vld [vmem:[%s7432_s2 + $0x4f4] ss:$8 sps:$4 sm:$0xff]  }
  0x2c   : > { %2361 = vmatprep.subr.bf16.mxu0 %v5274_v29  ;;  %v5316_v26 = vld [vmem:[%s7432_s2 + $0x4e4] ss:$8 sps:$4 sm:$0xff]   ;;  %v422_v28 = vrot.slane %v421_v18, 4  ;;  %v431_v29 = vor.u32 %v430_v19, %v426_v13  ;;  %v5325_v60 = vld [vmem:[%s7432_s2 + $0x4f0] ss:$8 sps:$4 sm:$0xff]   ;;  %s7464_s6 = smov (!%p317_p8, %s4238_s6), 31 }
  0x2d   : > { %v5328_v3 = vld [vmem:[%s7432_s2 + $0x4] ss:$8 sps:$4 sm:$0xff]   ;;  %v6089_v8 = vld [vmem:[%s5931_s27 + $0x50] sm:$0xff]  ;;  %v6092_v9 = vld [vmem:[%s5931_s27 + $0x58] sm:$0x11]  ;;  %s4239_s12 = sshll.u32 %s7464_s6, 1 }
  0x2e   : > { %854 = vmatpush1.bf16.msra.mxu1 %v5276_v30  ;;  %v436_v30 = vrot.slane %v434_v14, 5  ;;  %v5331_v4 = vld [vmem:[%s7432_s2 + $0x504] ss:$8 sps:$4 sm:$0xff]   ;;  %v482_v17 = vshll.u32 %v6092_v9, 16  ;;  %v5326_v18 = vld [vmem:[%s7432_s2] ss:$8 sps:$4 sm:$0xff]  }
  0x2f   : > { %2362 = vmatpush1.bf16.msra.mxu0 %v5277_v31  ;;  %855 = vmatprep.subr.bf16.mxu1 %v5278_v32  ;;  %v6012_v31 = vsel %vm5975_vm4, %v408_v22, %v412_v12  ;;  %v6015_v32 = vld [vmem:[%s5931_s27 + $0x30] sm:$0xff]  ;;  %v6086_v62 = vld [vmem:[%s5931_s27 + $0x48] sm:$0xff]  ;;  %s4240_s13 = sshll.u32 %s7460_s16, 6 }
  0x30   : > { %2363 = vmatprep.subr.bf16.mxu0 %v5280_v33  ;;  %v6018_v33 = vld [vmem:[%s5931_s27 + $0x38] sm:$0xff]  ;;  %v463_v11 = vshrl.u32 %v6086_v62, 16  ;;  %v466_v12 = vshll.u32 %v6086_v62, 16  ;;  %v4372_v22 = vrot.slane %v6015_v32, 9  ;;  %s321_s11 = sadd.s32 %s4240_s13, %s4239_s12 }
  0x31   : > { %v6073_v0 = vcombine.low %v6015_v32, %v6018_v33  ;;  %v5673_v10 = vld [vmem:[%s7432_s2 + $0x8d0] ss:$8 sps:$4 sm:$0xff]   ;;  %s4241_s16 = sshll.u32 %s321_s11, 2 }
  0x32   : > { %856 = vmatpush1.bf16.msra.mxu1 %v5282_v34  ;;  %v465_v19 = vrot.slane %v463_v11, 4  ;;  %v5341_v11 = vld [vmem:[%s7432_s2 + $0x520] ss:$8 sps:$4 sm:$0xff]   ;;  %v5578_v34 = vld [vmem:[%s7432_s2 + $0x374] ss:$8 sps:$4 sm:$0xff]   ;;  %s7349_s28 = scalar_lea.vmem %s7434_s4, %s4241_s16 }
  0x33   : > { %2364 = vmatpush1.bf16.msra.mxu0 %v5283_v35  ;;  %857 = vmatprep.subr.bf16.mxu1 %v5284_v36  ;;  %v4371_v35 = vrot.slane %v5955_v58, 9  ;;  %v1325_v36 = vrot.slane %v5958_v59, 5  ;;  %v6061_v58 = vcombine.high %v6015_v32, %v6018_v33  ;;  %v5324_v59 = vld [vmem:[%s7432_s2 + $0x1f0] ss:$8 sps:$4 sm:$0xff]  }
  0x34   : > { %2365 = vmatprep.subr.bf16.mxu0 %v5286_v37  ;;  %v4275_v37 = vcombine.high %v6008_v27, %v6012_v31 }
  0x35   : > { %v1327_v55 = vrot.slane %v1325_v36, 4 }
  0x36   : > { %858 = vmatpush1.bf16.msra.mxu1 %v5288_v38  ;;  %v427_v38 = vsel %vm5975_vm4, %v422_v28, %v426_v13  ;;  %871 = vmatprep.mubr.bf16.mxu1 %v4275_v37 }
  0x37   : > { %2366 = vmatpush1.bf16.msra.mxu0 %v5289_v39  ;;  %859 = vmatprep.subr.bf16.mxu1 %v5290_v40  ;;  %v432_v39 = vrot.slane %v431_v29, 4  ;;  %v6033_v40 = vld [vmem:[%s5931_s27 + $0x40] sm:$0x11]  ;;  %v1329_v13 = vsel %vm6022_vm5, %v1327_v55, %v1328_v63 }
  0x38   : > { %2367 = vmatprep.subr.bf16.mxu0 %v5292_v41  ;;  %v5318_v41 = vld [vmem:[%s7432_s2 + $0x1e0] ss:$8 sps:$4 sm:$0xff]   ;;  %v5340_v55 = vld [vmem:[%s7432_s2 + $0x24] ss:$8 sps:$4 sm:$0xff]  }
  0x39   : > { %v437_v48 = vsel %vm5975_vm4, %v432_v39, %v436_v30  ;;  %v5329_v29 = vld [vmem:[%s7432_s2 + $0x500] ss:$8 sps:$4 sm:$0xff]   ;;  %v1335_v39 = vrot.slane %v6033_v40, 5 }
  0x3a   : > { %860 = vmatpush1.bf16.msra.mxu1 %v5294_v42  ;;  %v5319_v42 = vld [vmem:[%s7432_s2 + $0x4e0] ss:$8 sps:$4 sm:$0xff]   ;;  %v6056_v52 = vcombine.high %v427_v38, %v437_v48  ;;  %v6077_v2 = vcombine.low %v427_v38, %v437_v48 }
  0x3b   : > { %2368 = vmatpush1.bf16.msra.mxu0 %v5295_v43  ;;  %861 = vmatprep.subr.bf16.mxu1 %v5296_v44  ;;  %v439_v43 = vshrl.u32 %v6015_v32, 16  ;;  %v442_v44 = vshll.u32 %v6015_v32, 16  ;;  %v1332_v32 = vrot.slane %v6018_v33, 5  ;;  %v6153_v48 = vld [vmem:[%s5931_s27 + $0x68] sm:$0xff] }
  0x3c   : > { %2369 = vmatprep.subr.bf16.mxu0 %v5298_v45  ;;  %v448_v45 = vshll.u32 %v6018_v33, 16  ;;  %2379 = vmatprep.mubr.bf16.mxu0 %v6056_v52 }
  0x3d   : > { %v441_v53 = vrot.slane %v439_v43, 4  ;;  %v444_v54 = vrot.slane %v442_v44, 5 }
  0x3e   : > { %862 = vmatpush1.bf16.msra.mxu1 %v5300_v46  ;;  %v452_v46 = vshrl.u32 %v6018_v33, 16  ;;  %v450_v56 = vrot.slane %v448_v45, 5  ;;  %v6132_v33 = vcombine.high %v6086_v62, %v6089_v8  ;;  %v1333_v45 = vsel %vm6022_vm5, %v4372_v22, %v1332_v32  ;;  %v5344_v22 = vld [vmem:[%s7432_s2 + $0x30] ss:$8 sps:$4 sm:$0xff]  }
  0x3f   : > { %2370 = vmatpush1.bf16.msra.mxu0 %v5301_v47  ;;  %863 = vmatprep.subr.bf16.mxu1 %v5302_v49  ;;  %v5320_v47 = vld [vmem:[%s7432_s2 + $0x1f4] ss:$8 sps:$4 sm:$0xff]   ;;  %v458_v49 = vshll.u32 %v6033_v40, 16  ;;  %v445_v61 = vor.u32 %v444_v54, %v441_v53  ;;  %v6146_v40 = vcombine.low %v6086_v62, %v6089_v8  ;;  %v496_v54 = vshll.u32 %v6153_v48, 16 }
  0x40   : > { %2371 = vmatprep.subr.bf16.mxu0 %v5304_v50  ;;  %v1326_v50 = vsel %vm6022_vm5, %v4371_v35, %v1325_v36  ;;  %v454_v57 = vrot.slane %v452_v46, 4  ;;  %v5334_v35 = vld [vmem:[%s7432_s2 + $0x14] ss:$8 sps:$4 sm:$0xff]  }
  0x41   : > { %v460_v6 = vrot.slane %v458_v49, 5  ;;  %v446_v7 = vrot.slane %v445_v61, 4  ;;  %v5337_v36 = vld [vmem:[%s7432_s2 + $0x514] ss:$8 sps:$4 sm:$0xff]   ;;  %v6127_v38 = vcombine.high %v1326_v50, %v1329_v13 }
  0x42   : > { %864 = vmatpush1.bf16.msra.mxu1 %v5306_v1  ;;  %v4274_v1 = vcombine.low %v6008_v27, %v6012_v31  ;;  %v484_v31 = vrot.slane %v482_v17, 5  ;;  %v6156_v49 = vld [vmem:[%s5931_s27 + $0x70] sm:$0x11] }
  0x43   : > { %2372 = vmatpush1.bf16.msra.mxu0 %v5307_v5  ;;  %865 = vmatprep.subr.bf16.mxu1 %v5308_v15  ;;  %v455_v5 = vor.u32 %v454_v57, %v450_v56  ;;  %v472_v15 = vshll.u32 %v6089_v8, 16  ;;  %v500_v57 = vshrl.u32 %v6153_v48, 16  ;;  %v5349_v17 = vld [vmem:[%s7432_s2 + $0x534] ss:$8 sps:$4 sm:$0xff]  }
  0x44   : > { %2373 = vmatprep.subr.bf16.mxu0 %v5310_v16  ;;  %v476_v16 = vshrl.u32 %v6089_v8, 16 }
  0x45   : > { %v456_v14 = vrot.slane %v455_v5, 4  ;;  %v474_v27 = vrot.slane %v472_v15, 5  ;;  %v4373_v15 = vrot.slane %v6086_v62, 9 }
  0x46   : > { %866 = vmatpush1.bf16.msra.mxu1 %v5312_v20  ;;  %v468_v20 = vrot.slane %v466_v12, 5  ;;  %v478_v28 = vrot.slane %v476_v16, 4  ;;  %v5346_v12 = vld [vmem:[%s7432_s2 + $0x34] ss:$8 sps:$4 sm:$0xff]  }
  0x47   : > { %2374 = vmatpush1.bf16.msra.mxu0 %v5313_v21  ;;  %867 = vmatprep.subr.bf16.mxu1 %v5314_v25  ;;  %v6104_v21 = vcombine.low %v1326_v50, %v1329_v13  ;;  %v451_v25 = vsel %vm5975_vm4, %v446_v7, %v450_v56  ;;  %v1334_v50 = vrot.slane %v1332_v32, 4  ;;  %v5343_v56 = vld [vmem:[%s7432_s2 + $0x524] ss:$8 sps:$4 sm:$0xff]  }
  0x48   : > { %2375 = vmatprep.subr.bf16.mxu0 %v5316_v26  ;;  %v461_v26 = vsel %vm5975_vm4, %v456_v14, %v460_v6  ;;  %v469_v30 = vor.u32 %v468_v20, %v465_v19  ;;  %v479_v37 = vor.u32 %v478_v28, %v474_v27  ;;  %v498_v6 = vrot.slane %v496_v54, 5  ;;  %v6220_v28 = vld [vmem:[%s5931_s27 + $0x78] sm:$0xff] }
  0x49   : > { %v6140_v43 = vcombine.high %v451_v25, %v461_v26  ;;  %v6173_v61 = vcombine.low %v451_v25, %v461_v26  ;;  %v1339_v20 = vrot.slane %v6089_v8, 5  ;;  %v5347_v25 = vld [vmem:[%s7432_s2 + $0x530] ss:$8 sps:$4 sm:$0xff]   ;;  %v6226_v8 = vld [vmem:[%s5931_s27 + $0x88] sm:$0x11]  ;;  %v511_v32 = vshrl.u32 %v6220_v28, 16 }
  0x4a   : > { %868 = vmatpush1.bf16.msra.mxu1 %v5318_v41  ;;  %v5332_v41 = vld [vmem:[%s7432_s2 + $0x10] ss:$8 sps:$4 sm:$0xff]   ;;  %v470_v44 = vrot.slane %v469_v30, 4  ;;  %v480_v46 = vrot.slane %v479_v37, 4  ;;  %v1342_v30 = vrot.slane %v6092_v9, 5 }
  0x4b   : > { %2376 = vmatpush1.bf16.msra.mxu0 %v5319_v42  ;;  %869 = vmatprep.subr.bf16.mxu1 %v5320_v47  ;;  %v5335_v42 = vld [vmem:[%s7432_s2 + $0x510] ss:$8 sps:$4 sm:$0xff]   ;;  %v6150_v47 = vld [vmem:[%s5931_s27 + $0x60] sm:$0xff] }
  0x4c   : > { %2377 = vmatprep.subr.bf16.mxu0 %v5322_v51  ;;  %v487_v51 = vshrl.u32 %v6150_v47, 16  ;;  %v490_v53 = vshll.u32 %v6150_v47, 16  ;;  %v475_v63 = vsel %vm5975_vm4, %v470_v44, %v474_v27  ;;  %v485_v5 = vsel %vm5975_vm4, %v480_v46, %v484_v31  ;;  %v5352_v37 = vld [vmem:[%s7432_s2 + $0x44] ss:$8 sps:$4 sm:$0xff]  }
  0x4d   : > { %v6195_v16 = vcombine.high %v6150_v47, %v6153_v48  ;;  %v6209_v62 = vcombine.low %v6150_v47, %v6153_v48  ;;  %v6217_v26 = vcombine.high %v475_v63, %v485_v5  ;;  %v5355_v9 = vld [vmem:[%s7432_s2 + $0x544] ss:$8 sps:$4 sm:$0xff]  }
  0x4e   : > { %870 = vmatpush1.bf16.msra.mxu1 %v5324_v59  ;;  %v506_v59 = vshll.u32 %v6156_v49, 16 }
  0x4f   : > { %2378 = vmatpush1.bf16.msra.mxu0 %v5325_v60  ;;  %1192 = vmatprep.subr.bf16.mxu1 %v5328_v3  ;;  %v1336_v60 = vsel %vm6022_vm5, %v1334_v50, %v1335_v39  ;;  %v492_v3 = vrot.slane %v490_v53, 5  ;;  %v6255_v53 = vcombine.low %v475_v63, %v485_v5 }
  0x50   : > { %2701 = vmatprep.subr.bf16.mxu0 %v5331_v4  ;;  %v5338_v4 = vld [vmem:[%s7432_s2 + $0x20] ss:$8 sps:$4 sm:$0xff]   ;;  %v6182_v7 = vcombine.high %v1333_v45, %v1336_v60  ;;  %v6190_v14 = vcombine.low %v1333_v45, %v1336_v60  ;;  %v508_v19 = vrot.slane %v506_v59, 5  ;;  %v513_v45 = vrot.slane %v511_v32, 4 }
  0x51   : > { %872 = vmatmul.mubr.bf16.vlgmr.msra.gmra.mrb[0].mxu1 %v4274_v1  ;;  %v489_v1 = vrot.slane %v487_v51, 4  ;;  %v5350_v51 = vld [vmem:[%s7432_s2 + $0x40] ss:$8 sps:$4 sm:$0xff]   ;;  %7443 = vst [vmem:[#allocation2_spill] sm:$0xff] %v6255_v53  ;;  %v1341_v59 = vrot.slane %v1339_v20, 4 }
  0x52   : > { %2380 = vmatmul.mubr.bf16.vlgmr.msra.gmra.mrb[0].mxu0 %v6077_v2  ;;  %1193 = vmatpush1.bf16.msra.mxu1 %v5326_v18 }
  0x53   : > { %2702 = vmatpush1.bf16.msra.mxu0 %v5329_v29  ;;  %1194 = vmatprep.subr.bf16.mxu1 %v5334_v35  ;;  %v493_v13 = vor.u32 %v492_v3, %v489_v1  ;;  %v6223_v29 = vld [vmem:[%s5931_s27 + $0x80] sm:$0xff]  ;;  %v514_v35 = vshll.u32 %v6220_v28, 16  ;;  %v5361_v1 = vld [vmem:[%s7432_s2 + $0x554] ss:$8 sps:$4 sm:$0xff]  }
  0x54   : > { %2703 = vmatprep.subr.bf16.mxu0 %v5337_v36  ;;  %881 = vmatprep.mubr.bf16.mxu1 %v6056_v52  ;;  %v502_v52 = vrot.slane %v500_v57, 4  ;;  %v520_v36 = vshll.u32 %v6223_v29, 16  ;;  %v524_v39 = vshrl.u32 %v6223_v29, 16  ;;  %v6265_v60 = vcombine.high %v6220_v28, %v6223_v29 }
  0x55   : > { %2389 = vmatprep.mubr.bf16.mxu0 %v6140_v43  ;;  %v494_v27 = vrot.slane %v493_v13, 4  ;;  %v516_v46 = vrot.slane %v514_v35, 5  ;;  %v6269_v63 = vcombine.low %v6220_v28, %v6223_v29  ;;  %v4374_v13 = vrot.slane %v6150_v47, 9  ;;  %v5364_v47 = vld [vmem:[%s7432_s2 + $0x64] ss:$8 sps:$4 sm:$0xff]  }
  0x56   : > { %1195 = vmatpush1.bf16.msra.mxu1 %v5332_v41  ;;  %v503_v18 = vor.u32 %v502_v52, %v498_v6  ;;  %v530_v41 = vshll.u32 %v6226_v8, 16  ;;  %v522_v50 = vrot.slane %v520_v36, 5  ;;  %v526_v54 = vrot.slane %v524_v39, 4  ;;  %v6277_v52 = vld [vmem:[%s5931_s27 + $0x90] sm:$0xff]  ;;  %v5367_v39 = vld [vmem:[%s7432_s2 + $0x564] ss:$8 sps:$4 sm:$0xff]  }
  0x57   : > { %2704 = vmatpush1.bf16.msra.mxu0 %v5335_v42  ;;  %1196 = vmatprep.subr.bf16.mxu1 %v5340_v55  ;;  %v6246_v42 = vsel %vm6022_vm5, %v4373_v15, %v1339_v20  ;;  %v5353_v55 = vld [vmem:[%s7432_s2 + $0x540] ss:$8 sps:$4 sm:$0xff]   ;;  %v517_v57 = vor.u32 %v516_v46, %v513_v45  ;;  %v5356_v15 = vld [vmem:[%s7432_s2 + $0x50] ss:$8 sps:$4 sm:$0xff]   ;;  %v538_v20 = vshll.u32 %v6277_v52, 16 }
  0x58   : > { %2705 = vmatprep.subr.bf16.mxu0 %v5343_v56  ;;  %v504_v31 = vrot.slane %v503_v18, 4  ;;  %v5358_v56 = vld [vmem:[%s7432_s2 + $0x54] ss:$8 sps:$4 sm:$0xff]   ;;  %v6293_v18 = vld [vmem:[%s5931_s27 + $0xa0] sm:$0x11] }
  0x59   : > { %882 = vmatmul.mubr.bf16.gmra.mrb[4].mxu1 %v6077_v2  ;;  %v499_v2 = vsel %vm5975_vm4, %v494_v27, %v498_v6  ;;  %v518_v5 = vrot.slane %v517_v57, 4  ;;  %v532_v6 = vrot.slane %v530_v41, 5  ;;  %v540_v35 = vrot.slane %v538_v20, 5 }
  0x5a   : > { %2390 = vmatmul.mubr.bf16.gmra.mrb[4].mxu0 %v6173_v61  ;;  %1197 = vmatpush1.bf16.msra.mxu1 %v5338_v4  ;;  %v509_v44 = vsel %vm5975_vm4, %v504_v31, %v508_v19  ;;  %v527_v4 = vor.u32 %v526_v54, %v522_v50  ;;  %v535_v19 = vshrl.u32 %v6277_v52, 16  ;;  %v554_v31 = vshll.u32 %v6293_v18, 16  ;;  %v5370_v54 = vld [vmem:[%s7432_s2 + $0x74] ss:$8 sps:$4 sm:$0xff]  }
  0x5b   : > { %2706 = vmatpush1.bf16.msra.mxu0 %v5341_v11  ;;  %1198 = vmatprep.subr.bf16.mxu1 %v5346_v12  ;;  %v6274_v3 = vcombine.high %v499_v2, %v509_v44  ;;  %v6280_v11 = vld [vmem:[%s5931_s27 + $0x98] sm:$0xff]  ;;  %v1343_v12 = vsel %vm6022_vm5, %v1341_v59, %v1342_v30  ;;  %v6317_v41 = vsel %vm5975_vm4, %v518_v5, %v522_v50 }
  0x5c   : > { %2707 = vmatprep.subr.bf16.mxu0 %v5349_v17  ;;  %891 = vmatprep.mubr.bf16.mxu1 %v6140_v43  ;;  %v5359_v17 = vld [vmem:[%s7432_s2 + $0x550] ss:$8 sps:$4 sm:$0xff]   ;;  %v528_v27 = vrot.slane %v527_v4, 4  ;;  %v548_v30 = vshrl.u32 %v6280_v11, 16  ;;  %v6307_v32 = vcombine.high %v6246_v42, %v1343_v12  ;;  %v6334_v46 = vcombine.low %v6246_v42, %v1343_v12  ;;  %v5373_v42 = vld [vmem:[%s7432_s2 + $0x574] ss:$8 sps:$4 sm:$0xff]  }
  0x5d   : > { %2399 = vmatprep.mubr.bf16.mxu0 %v6217_v26  ;;  %7444 = vst [vmem:[#allocation3_spill] sm:$0xff] %v6274_v3  ;;  %v556_v57 = vrot.slane %v554_v31, 5  ;;  %v6345_v59 = vcombine.high %v6277_v52, %v6280_v11  ;;  %v6351_v4 = vld [vmem:[%s5931_s27 + $0xa8] sm:$0xff]  ;;  %v6359_v12 = vcombine.low %v6277_v52, %v6280_v11  ;;  %v5371_v31 = vld [vmem:[%s7432_s2 + $0x570] ss:$8 sps:$4 sm:$0xff]  }
  0x5e   : > { %1199 = vmatpush1.bf16.msra.mxu1 %v5344_v22  ;;  %v544_v22 = vshll.u32 %v6280_v11, 16  ;;  %v550_v45 = vrot.slane %v548_v30, 4  ;;  %v562_v20 = vshll.u32 %v6351_v4, 16  ;;  %v5368_v30 = vld [vmem:[%s7432_s2 + $0x70] ss:$8 sps:$4 sm:$0xff]  }
  0x5f   : > { %2708 = vmatpush1.bf16.msra.mxu0 %v5347_v25  ;;  %1200 = vmatprep.subr.bf16.mxu1 %v5352_v37  ;;  %v1346_v25 = vrot.slane %v6153_v48, 5  ;;  %v537_v48 = vrot.slane %v535_v19, 4  ;;  %v1349_v37 = vrot.slane %v6156_v49, 5  ;;  %v5362_v49 = vld [vmem:[%s7432_s2 + $0x60] ss:$8 sps:$4 sm:$0xff]   ;;  %v559_v19 = vshrl.u32 %v6351_v4, 16 }
  0x60   : > { %2709 = vmatprep.subr.bf16.mxu0 %v5355_v9  ;;  %v546_v36 = vrot.slane %v544_v22, 5  ;;  %v6310_v9 = vcombine.low %v499_v2, %v509_v44  ;;  %v5365_v2 = vld [vmem:[%s7432_s2 + $0x560] ss:$8 sps:$4 sm:$0xff]  }
  0x61   : > { %892 = vmatmul.mubr.bf16.gmra.mrb[8].mxu1 %v6173_v61  ;;  %v541_v44 = vor.u32 %v540_v35, %v537_v48  ;;  %v1347_v50 = vsel %vm6022_vm5, %v4374_v13, %v1346_v25  ;;  %v561_v35 = vrot.slane %v559_v19, 4  ;;  %v5382_v19 = vld [vmem:[%s7432_s2 + $0x94] ss:$8 sps:$4 sm:$0xff]  }
  0x62   : > { %2400 = vmatmul.mubr.bf16.gmra.mrb[8].mxu0 %v6255_v53  ;;  %1201 = vmatpush1.bf16.msra.mxu1 %v5350_v51  ;;  %7445 = vst [vmem:[#allocation4_spill] sm:$0xff] %v6310_v9  ;;  %v1348_v51 = vrot.slane %v1346_v25, 4 }
  0x63   : > { %2710 = vmatpush1.bf16.msra.mxu0 %v5353_v55  ;;  %1202 = vmatprep.subr.bf16.mxu1 %v5358_v56  ;;  %v533_v55 = vsel %vm5975_vm4, %v528_v27, %v532_v6  ;;  %v551_v56 = vor.u32 %v550_v45, %v546_v36  ;;  %v4375_v6 = vrot.slane %v6220_v28, 9 }
  0x64   : > { %2711 = vmatprep.subr.bf16.mxu0 %v5361_v1  ;;  %901 = vmatprep.mubr.bf16.mxu1 %v6217_v26  ;;  %v542_v1 = vrot.slane %v541_v44, 4  ;;  %v1350_v5 = vsel %vm6022_vm5, %v1348_v51, %v1349_v37  ;;  %v6372_v25 = vcombine.high %v6317_v41, %v533_v55  ;;  %v564_v37 = vrot.slane %v562_v20, 5  ;;  %v6435_v20 = vld [vmem:[%s6401_s24] sm:$0xff] }
  0x65   : > { %2409 = vmatprep.mubr.bf16.mxu0 %v6274_v3  ;;  %v552_v13 = vrot.slane %v551_v56, 4  ;;  %v6369_v22 = vcombine.high %v1347_v50, %v1350_v5 }
  0x66   : > { %1203 = vmatpush1.bf16.msra.mxu1 %v5356_v15  ;;  %v6362_v15 = vld [vmem:[%s5931_s27 + $0xb0] sm:$0xff]  ;;  %v6387_v48 = vsel %vm5975_vm4, %v542_v1, %v546_v36  ;;  %v5376_v36 = vld [vmem:[%s7432_s2 + $0x84] ss:$8 sps:$4 sm:$0xff]   ;;  %v1356_v1 = vrot.slane %v6226_v8, 5 }
  0x67   : > { %2712 = vmatpush1.bf16.msra.mxu0 %v5359_v17  ;;  %1204 = vmatprep.subr.bf16.mxu1 %v5364_v47  ;;  %v6365_v17 = vld [vmem:[%s5931_s27 + $0xb8] sm:$0x11]  ;;  %v568_v28 = vshll.u32 %v6362_v15, 16  ;;  %v572_v27 = vshrl.u32 %v6362_v15, 16  ;;  %v1353_v47 = vrot.slane %v6223_v29, 5  ;;  %v6393_v29 = vsel %vm5975_vm4, %v552_v13, %v556_v57 }
  0x68   : > { %2713 = vmatprep.subr.bf16.mxu0 %v5367_v39  ;;  %v6389_v39 = vcombine.low %v1347_v50, %v1350_v5  ;;  %v578_v51 = vshll.u32 %v6365_v17, 16  ;;  %v6413_v56 = vcombine.high %v6351_v4, %v6362_v15  ;;  %v6423_v5 = vcombine.low %v6351_v4, %v6362_v15  ;;  %v5377_v13 = vld [vmem:[%s7432_s2 + $0x580] ss:$8 sps:$4 sm:$0xff]   ;;  %v5385_v8 = vld [vmem:[%s7432_s2 + $0x594] ss:$8 sps:$4 sm:$0xff]  }
  0x69   : > { %902 = vmatmul.mubr.bf16.gmra.mrb[12].mxu1 %v6255_v53  ;;  %v570_v45 = vrot.slane %v568_v28, 5  ;;  %v574_v44 = vrot.slane %v572_v27, 4  ;;  %v1354_v50 = vsel %vm6022_vm5, %v4375_v6, %v1353_v47  ;;  %v6426_v6 = vcombine.low %v6317_v41, %v533_v55  ;;  %v6441_v41 = vld [vmem:[%s6401_s24 + $0x8] sm:$0xff] }
  0x6a   : > { %2410 = vmatmul.mubr.bf16.gmra.mrb[12].mxu0 %v6310_v9  ;;  %1205 = vmatpush1.bf16.msra.mxu1 %v5362_v49  ;;  %v5379_v49 = vld [vmem:[%s7432_s2 + $0x584] ss:$8 sps:$4 sm:$0xff]   ;;  %v580_v28 = vrot.slane %v578_v51, 5  ;;  %v2123_v55 = vshrl.u32 %v6435_v20, 16  ;;  %v2126_v27 = vshll.u32 %v6435_v20, 16 }
  0x6b   : > { %2714 = vmatpush1.bf16.msra.mxu0 %v5365_v2  ;;  %1206 = vmatprep.subr.bf16.mxu1 %v5370_v54  ;;  %v565_v2 = vor.u32 %v564_v37, %v561_v35  ;;  %v5374_v54 = vld [vmem:[%s7432_s2 + $0x80] ss:$8 sps:$4 sm:$0xff]   ;;  %v575_v57 = vor.u32 %v574_v44, %v570_v45  ;;  %v2132_v35 = vshll.u32 %v6441_v41, 16  ;;  %v2136_v37 = vshrl.u32 %v6441_v41, 16  ;;  %v5380_v44 = vld [vmem:[%s7432_s2 + $0x90] ss:$8 sps:$4 sm:$0xff]  }
  0x6c   : > { %2715 = vmatprep.subr.bf16.mxu0 %v5373_v42  ;;  %911 = vmatprep.mubr.bf16.mxu1 %v6274_v3  ;;  %v1355_v42 = vrot.slane %v1353_v47, 4  ;;  %v6457_v3 = vld [vmem:[%s6401_s24 + $0x10] sm:$0x11]  ;;  %v2125_v53 = vrot.slane %v2123_v55, 4  ;;  %v5391_v55 = vld [vmem:[%s7432_s2 + $0x5a4] ss:$8 sps:$4 sm:$0xff]  }
  0x6d   : > { %2419 = vmatprep.mubr.bf16.mxu0 %v6372_v25  ;;  %v576_v51 = vrot.slane %v575_v57, 4  ;;  %v5388_v57 = vld [vmem:[%s7432_s2 + $0xa4] ss:$8 sps:$4 sm:$0xff]  }
  0x6e   : > { %1207 = vmatpush1.bf16.msra.mxu1 %v5368_v30  ;;  %v1357_v47 = vsel %vm6022_vm5, %v1355_v42, %v1356_v1  ;;  %v6449_v30 = vcombine.high %v6387_v48, %v6393_v29  ;;  %v2128_v42 = vrot.slane %v2126_v27, 5  ;;  %v2138_v1 = vrot.slane %v2136_v37, 4 }
  0x6f   : > { %2716 = vmatpush1.bf16.msra.mxu0 %v5371_v31  ;;  %1208 = vmatprep.subr.bf16.mxu1 %v5376_v36  ;;  %v566_v31 = vrot.slane %v565_v2, 4  ;;  %v6459_v36 = vcombine.high %v1354_v50, %v1357_v47  ;;  %v6466_v2 = vrot.slane %v2132_v35, 5  ;;  %v6474_v27 = vcombine.low %v1354_v50, %v1357_v47  ;;  %v5386_v50 = vld [vmem:[%s7432_s2 + $0xa0] ss:$8 sps:$4 sm:$0xff]  }
  0x70   : > { %2717 = vmatprep.subr.bf16.mxu0 %v5379_v49  ;;  %v5383_v49 = vld [vmem:[%s7432_s2 + $0x590] ss:$8 sps:$4 sm:$0xff]   ;;  %v2142_v35 = vshll.u32 %v6457_v3, 16  ;;  %v6491_v47 = vcombine.low %v6387_v48, %v6393_v29  ;;  %v1363_v48 = vrot.slane %v6293_v18, 5 }
  0x71   : > { %912 = vmatmul.mubr.bf16.gmra.mrb[16].mxu1 %v6310_v9  ;;  %v571_v9 = vsel %vm5975_vm4, %v566_v31, %v570_v45  ;;  %v2139_v45 = vor.u32 %v2138_v1, %v6466_v2  ;;  %v5392_v18 = vld [vmem:[%s7432_s2 + $0xb0] ss:$8 sps:$4 sm:$0xff]  }
  0x72   : > { %2420 = vmatmul.mubr.bf16.gmra.mrb[16].mxu0 %v6426_v6  ;;  %1209 = vmatpush1.bf16.msra.mxu1 %v5374_v54  ;;  %v4376_v54 = vrot.slane %v6277_v52, 9  ;;  %v5389_v52 = vld [vmem:[%s7432_s2 + $0x5a0] ss:$8 sps:$4 sm:$0xff]   ;;  %v2144_v37 = vrot.slane %v2142_v35, 5  ;;  %v5400_v35 = vld [vmem:[%s7432_s2 + $0xc4] ss:$8 sps:$4 sm:$0xff]  }
  0x73   : > { %2718 = vmatpush1.bf16.msra.mxu0 %v5377_v13  ;;  %1210 = vmatprep.subr.bf16.mxu1 %v5382_v19  ;;  %v1360_v13 = vrot.slane %v6280_v11, 5  ;;  %v581_v19 = vsel %vm5975_vm4, %v576_v51, %v580_v28  ;;  %v5394_v11 = vld [vmem:[%s7432_s2 + $0xb4] ss:$8 sps:$4 sm:$0xff]   ;;  %v4377_v51 = vrot.slane %v6351_v4, 9  ;;  %v5395_v4 = vld [vmem:[%s7432_s2 + $0x5b0] ss:$8 sps:$4 sm:$0xff]  }
  0x74   : > { %2719 = vmatprep.subr.bf16.mxu0 %v5385_v8  ;;  %921 = vmatprep.mubr.bf16.mxu1 %v6372_v25  ;;  %v2129_v8 = vor.u32 %v2128_v42, %v2125_v53  ;;  %v5397_v53 = vld [vmem:[%s7432_s2 + $0x5b4] ss:$8 sps:$4 sm:$0xff]   ;;  %v6505_v29 = vcombine.high %v571_v9, %v581_v19  ;;  %v1367_v42 = vrot.slane %v6362_v15, 5 }
  0x75   : > { %2429 = vmatprep.mubr.bf16.mxu0 %v6449_v30  ;;  %v1361_v31 = vsel %vm6022_vm5, %v4376_v54, %v1360_v13  ;;  %v1362_v28 = vrot.slane %v1360_v13, 4  ;;  %v2140_v54 = vrot.slane %v2139_v45, 4  ;;  %v4590_v13 = vrot.slane %v6435_v20, 9  ;;  %v5403_v45 = vld [vmem:[%s7432_s2 + $0x5c4] ss:$8 sps:$4 sm:$0xff]  }
  0x76   : > { %1211 = vmatpush1.bf16.msra.mxu1 %v5380_v44  ;;  %v2130_v1 = vrot.slane %v2129_v8, 4  ;;  %v2495_v8 = vrot.slane %v6441_v41, 5 }
  0x77   : > { %2720 = vmatpush1.bf16.msra.mxu0 %v5383_v49  ;;  %1212 = vmatprep.subr.bf16.mxu1 %v5388_v57  ;;  %v1364_v44 = vsel %vm6022_vm5, %v1362_v28, %v1363_v48  ;;  %v1370_v49 = vrot.slane %v6365_v17, 5  ;;  %v1369_v17 = vrot.slane %v1367_v42, 4  ;;  %v5398_v48 = vld [vmem:[%s7432_s2 + $0xc0] ss:$8 sps:$4 sm:$0xff]  }
  0x78   : > { %2721 = vmatprep.subr.bf16.mxu0 %v5391_v55  ;;  %v6520_v15 = vcombine.high %v1361_v31, %v1364_v44  ;;  %v6522_v57 = vcombine.low %v1361_v31, %v1364_v44  ;;  %v1368_v55 = vsel %vm6022_vm5, %v4377_v51, %v1367_v42  ;;  %v6548_v51 = vcombine.low %v571_v9, %v581_v19 }
  0x79   : > { %922 = vmatmul.mubr.bf16.gmra.mrb[20].mxu1 %v6426_v6  ;;  %v1371_v31 = vsel %vm6022_vm5, %v1369_v17, %v1370_v49  ;;  %v2135_v42 = vsel %vm5975_vm4, %v2130_v1, %v6466_v2  ;;  %v2145_v44 = vsel %vm5975_vm4, %v2140_v54, %v2144_v37  ;;  %v5406_v49 = vld [vmem:[%s7432_s2 + $0xd4] ss:$8 sps:$4 sm:$0xff]   ;;  %v6565_v19 = vcombine.high %v6435_v20, %v6441_v41  ;;  %v5410_v17 = vld [vmem:[%s7432_s2 + $0xe0] ss:$8 sps:$4 sm:$0xff]  }
  0x7a   : > { %2430 = vmatmul.mubr.bf16.gmra.mrb[20].mxu0 %v6491_v47  ;;  %1213 = vmatpush1.bf16.msra.mxu1 %v5386_v50  ;;  %v2498_v50 = vrot.slane %v6457_v3, 5  ;;  %v6541_v28 = vcombine.low %v1368_v55, %v1371_v31  ;;  %v5401_v3 = vld [vmem:[%s7432_s2 + $0x5c0] ss:$8 sps:$4 sm:$0xff]   ;;  %v5409_v2 = vld [vmem:[%s7432_s2 + $0x5d4] ss:$8 sps:$4 sm:$0xff]   ;;  %v6574_v54 = vcombine.high %v2135_v42, %v2145_v44 }
  0x7b   : > { %2722 = vmatpush1.bf16.msra.mxu0 %v5389_v52  ;;  %1214 = vmatprep.subr.bf16.mxu1 %v5394_v11  ;;  %v6539_v52 = vcombine.high %v1368_v55, %v1371_v31  ;;  %v2496_v11 = vsel %vm6022_vm5, %v4590_v13, %v2495_v8  ;;  %v5407_v55 = vld [vmem:[%s7432_s2 + $0x5d0] ss:$8 sps:$4 sm:$0xff]   ;;  %v5413_v13 = vld [vmem:[%s7432_s2 + $0x5e0] ss:$8 sps:$4 sm:$0xff]  }
  0x7c   : > { %2723 = vmatprep.subr.bf16.mxu0 %v5397_v53  ;;  %931 = vmatprep.mubr.bf16.mxu1 %v6449_v30  ;;  %v2497_v53 = vrot.slane %v2495_v8, 4  ;;  %v5418_v8 = vld [vmem:[%s7432_s2 + $0xf4] ss:$8 sps:$4 sm:$0xff]   ;;  %v6611_v31 = vld [vmem:[%s5931_s27] sm:$0xff] }
  0x7d   : > { %2439 = vmatprep.mubr.bf16.mxu0 %v6505_v29 }
  0x7e   : > { %1215 = vmatpush1.bf16.msra.mxu1 %v5392_v18  ;;  %v2499_v9 = vsel %vm6022_vm5, %v2497_v53, %v2498_v50  ;;  %v6578_v18 = vcombine.low %v6435_v20, %v6441_v41  ;;  %v5412_v20 = vld [vmem:[%s7432_s2 + $0xe4] ss:$8 sps:$4 sm:$0xff]   ;;  %v5416_v53 = vld [vmem:[%s7432_s2 + $0xf0] ss:$8 sps:$4 sm:$0xff]  }
  0x7f   : > { %2724 = vmatpush1.bf16.msra.mxu0 %v5395_v4  ;;  %1216 = vmatprep.subr.bf16.mxu1 %v5400_v35  ;;  %v6570_v37 = vcombine.high %v2496_v11, %v2499_v9  ;;  %v6572_v1 = vcombine.low %v2496_v11, %v2499_v9  ;;  %v5404_v4 = vld [vmem:[%s7432_s2 + $0xd0] ss:$8 sps:$4 sm:$0xff]   ;;  %v5415_v41 = vld [vmem:[%s7432_s2 + $0x5e4] ss:$8 sps:$4 sm:$0xff]   ;;  %v6599_v35 = vcombine.low %v2135_v42, %v2145_v44  ;;  %v5427_v9 = vld [vmem:[%s7432_s2 + $0x600] ss:$8 sps:$4 sm:$0xff]  }
  0x80   : > { %2725 = vmatprep.subr.bf16.mxu0 %v5403_v45  ;;  %v5421_v45 = vld [vmem:[%s7432_s2 + $0x5f4] ss:$8 sps:$4 sm:$0xff]   ;;  %v6614_v50 = vld [vmem:[%s5931_s27 + $0x8] sm:$0xff] }
  0x81   : > { %932 = vmatmul.mubr.bf16.gmra.mrb[24].mxu1 %v6491_v47  ;;  %v4323_v11 = vcombine.high %v6611_v31, %v6614_v50  ;;  %v5429_v42 = vld [vmem:[%s7432_s2 + $0x604] ss:$8 sps:$4 sm:$0xff]   ;;  %v4322_v44 = vcombine.low %v6611_v31, %v6614_v50 }
  0x82   : > { %2440 = vmatmul.mubr.bf16.gmra.mrb[24].mxu0 %v6548_v51  ;;  %1217 = vmatpush1.bf16.msra.mxu1 %v5398_v48  ;;  %v5419_v48 = vld [vmem:[%s7432_s2 + $0x5f0] ss:$8 sps:$4 sm:$0xff]  }
  0x83   : > { %2726 = vmatpush1.bf16.msra.mxu0 %v5401_v3  ;;  %1218 = vmatprep.subr.bf16.mxu1 %v5406_v49  ;;  %v5426_v3 = vld [vmem:[%s7432_s2 + $0x204] ss:$8 sps:$4 sm:$0xff]   ;;  %v5424_v49 = vld [vmem:[%s7432_s2 + $0x200] ss:$8 sps:$4 sm:$0xff]  }
  0x84   : > { %2727 = vmatprep.subr.bf16.mxu0 %v5409_v2  ;;  %941 = vmatprep.mubr.bf16.mxu1 %v6505_v29  ;;  %v5432_v2 = vld [vmem:[%s7432_s2 + $0x214] ss:$8 sps:$4 sm:$0xff]  }
  0x85   : > { %2449 = vmatprep.mubr.bf16.mxu0 %v6574_v54 }
  0x86   : > { %1219 = vmatpush1.bf16.msra.mxu1 %v5404_v4  ;;  %v5435_v4 = vld [vmem:[%s7432_s2 + $0x614] ss:$8 sps:$4 sm:$0xff]  }
  0x87   : > { %2728 = vmatpush1.bf16.msra.mxu0 %v5407_v55  ;;  %1220 = vmatprep.subr.bf16.mxu1 %v5412_v20  ;;  %v5430_v55 = vld [vmem:[%s7432_s2 + $0x210] ss:$8 sps:$4 sm:$0xff]  }
  0x88   : > { %2729 = vmatprep.subr.bf16.mxu0 %v5415_v41  ;;  %v5433_v20 = vld [vmem:[%s7432_s2 + $0x610] ss:$8 sps:$4 sm:$0xff]   ;;  %v5440_v41 = vld [vmem:[%s7432_s2 + $0x224] ss:$8 sps:$4 sm:$0xff]  }
  0x89   : > { %942 = vmatmul.mubr.bf16.gmra.mrb[28].mxu1 %v6548_v51 }
  0x8a   : > { %2450 = vmatmul.mubr.bf16.gmra.mrb[28].mxu0 %v6599_v35  ;;  %1221 = vmatpush1.bf16.msra.mxu1 %v5410_v17  ;;  %v5443_v17 = vld [vmem:[%s7432_s2 + $0x624] ss:$8 sps:$4 sm:$0xff]  }
  0x8b   : > { %2730 = vmatpush1.bf16.msra.mxu0 %v5413_v13  ;;  %1222 = vmatprep.subr.bf16.mxu1 %v5418_v8  ;;  %v5438_v13 = vld [vmem:[%s7432_s2 + $0x220] ss:$8 sps:$4 sm:$0xff]  }
  0x8c   : > { %2731 = vmatprep.subr.bf16.mxu0 %v5421_v45  ;;  %1224 = vmatprep.mubr.bf16.mxu1 %v4323_v11  ;;  %v5441_v8 = vld [vmem:[%s7432_s2 + $0x620] ss:$8 sps:$4 sm:$0xff]   ;;  %v5446_v45 = vld [vmem:[%s7432_s2 + $0x234] ss:$8 sps:$4 sm:$0xff]  }
  0x8d   : > { %2733 = vmatprep.mubr.bf16.mxu0 %v6127_v38  ;;  %v5449_v11 = vld [vmem:[%s7432_s2 + $0x634] ss:$8 sps:$4 sm:$0xff]  }
  0x8e   : > { %1223 = vmatpush1.bf16.msra.mxu1 %v5416_v53  ;;  %v5444_v53 = vld [vmem:[%s7432_s2 + $0x230] ss:$8 sps:$4 sm:$0xff]  }
  0x8f   : > { %2732 = vmatpush1.bf16.msra.mxu0 %v5419_v48  ;;  %1629 = vmatprep.subr.bf16.mxu1 %v5426_v3  ;;  %v5447_v48 = vld [vmem:[%s7432_s2 + $0x630] ss:$8 sps:$4 sm:$0xff]   ;;  %v5454_v3 = vld [vmem:[%s7432_s2 + $0x244] ss:$8 sps:$4 sm:$0xff]  }
  0x90   : > { %3049 = vmatprep.subr.bf16.mxu0 %v5429_v42  ;;  %v5457_v42 = vld [vmem:[%s7432_s2 + $0x644] ss:$8 sps:$4 sm:$0xff]  }
  0x91   : > { %1225 = vmatmul.mubr.bf16.vlgmr.msra.gmra.mrb[0].mxu1 %v4322_v44  ;;  %v5452_v44 = vld [vmem:[%s7432_s2 + $0x240] ss:$8 sps:$4 sm:$0xff]  }
  0x92   : > { %2734 = vmatmul.mubr.bf16.vlgmr.msra.gmra.mrb[0].mxu0 %v6104_v21  ;;  %1630 = vmatpush1.bf16.msra.mxu1 %v5424_v49  ;;  %v5455_v49 = vld [vmem:[%s7432_s2 + $0x640] ss:$8 sps:$4 sm:$0xff]  }
  0x93   : > { %3050 = vmatpush1.bf16.msra.mxu0 %v5427_v9  ;;  %1631 = vmatprep.subr.bf16.mxu1 %v5432_v2  ;;  %v5460_v9 = vld [vmem:[%s7432_s2 + $0x254] ss:$8 sps:$4 sm:$0xff]  }
  0x94   : > { %3051 = vmatprep.subr.bf16.mxu0 %v5435_v4  ;;  %1234 = vmatprep.mubr.bf16.mxu1 %v5994_v23  ;;  %v5463_v2 = vld [vmem:[%s7432_s2 + $0x654] ss:$8 sps:$4 sm:$0xff]   ;;  %v5458_v4 = vld [vmem:[%s7432_s2 + $0x250] ss:$8 sps:$4 sm:$0xff]  }
  0x95   : > { %2743 = vmatprep.mubr.bf16.mxu0 %v6182_v7 }
  0x96   : > { %1632 = vmatpush1.bf16.msra.mxu1 %v5430_v55  ;;  %v5461_v55 = vld [vmem:[%s7432_s2 + $0x650] ss:$8 sps:$4 sm:$0xff]  }
  0x97   : > { %3052 = vmatpush1.bf16.msra.mxu0 %v5433_v20  ;;  %1633 = vmatprep.subr.bf16.mxu1 %v5440_v41  ;;  %v5468_v20 = vld [vmem:[%s7432_s2 + $0x264] ss:$8 sps:$4 sm:$0xff]  }
  0x98   : > { %3053 = vmatprep.subr.bf16.mxu0 %v5443_v17  ;;  %v5471_v41 = vld [vmem:[%s7432_s2 + $0x664] ss:$8 sps:$4 sm:$0xff]   ;;  %v5466_v17 = vld [vmem:[%s7432_s2 + $0x260] ss:$8 sps:$4 sm:$0xff]  }
  0x99   : > { %1235 = vmatmul.mubr.bf16.gmra.mrb[4].mxu1 %v5998_v24 }
  0x9a   : > { %2744 = vmatmul.mubr.bf16.gmra.mrb[4].mxu0 %v6190_v14  ;;  %1634 = vmatpush1.bf16.msra.mxu1 %v5438_v13  ;;  %v5469_v13 = vld [vmem:[%s7432_s2 + $0x660] ss:$8 sps:$4 sm:$0xff]  }
  0x9b   : > { %3054 = vmatpush1.bf16.msra.mxu0 %v5441_v8  ;;  %1635 = vmatprep.subr.bf16.mxu1 %v5446_v45  ;;  %v5474_v8 = vld [vmem:[%s7432_s2 + $0x274] ss:$8 sps:$4 sm:$0xff]  }
  0x9c   : > { %3055 = vmatprep.subr.bf16.mxu0 %v5449_v11  ;;  %1244 = vmatprep.mubr.bf16.mxu1 %v6061_v58  ;;  %v5477_v45 = vld [vmem:[%s7432_s2 + $0x674] ss:$8 sps:$4 sm:$0xff]   ;;  %v5472_v11 = vld [vmem:[%s7432_s2 + $0x270] ss:$8 sps:$4 sm:$0xff]  }
  0x9d   : > { %2753 = vmatprep.mubr.bf16.mxu0 %v6307_v32 }
  0x9e   : > { %1636 = vmatpush1.bf16.msra.mxu1 %v5444_v53  ;;  %v5475_v53 = vld [vmem:[%s7432_s2 + $0x670] ss:$8 sps:$4 sm:$0xff]  }
  0x9f   : > { %3056 = vmatpush1.bf16.msra.mxu0 %v5447_v48  ;;  %1637 = vmatprep.subr.bf16.mxu1 %v5454_v3  ;;  %v5482_v48 = vld [vmem:[%s7432_s2 + $0x284] ss:$8 sps:$4 sm:$0xff]  }
  0xa0   : > { %3057 = vmatprep.subr.bf16.mxu0 %v5457_v42  ;;  %v5485_v3 = vld [vmem:[%s7432_s2 + $0x684] ss:$8 sps:$4 sm:$0xff]   ;;  %v5480_v42 = vld [vmem:[%s7432_s2 + $0x280] ss:$8 sps:$4 sm:$0xff]  }
  0xa1   : > { %1245 = vmatmul.mubr.bf16.gmra.mrb[8].mxu1 %v6073_v0 }
  0xa2   : > { %2754 = vmatmul.mubr.bf16.gmra.mrb[8].mxu0 %v6334_v46  ;;  %1638 = vmatpush1.bf16.msra.mxu1 %v5452_v44  ;;  %v5483_v44 = vld [vmem:[%s7432_s2 + $0x680] ss:$8 sps:$4 sm:$0xff]  }
  0xa3   : > { %3058 = vmatpush1.bf16.msra.mxu0 %v5455_v49  ;;  %1639 = vmatprep.subr.bf16.mxu1 %v5460_v9  ;;  %v5488_v49 = vld [vmem:[%s7432_s2 + $0x294] ss:$8 sps:$4 sm:$0xff]  }
  0xa4   : > { %3059 = vmatprep.subr.bf16.mxu0 %v5463_v2  ;;  %1254 = vmatprep.mubr.bf16.mxu1 %v6132_v33  ;;  %v5491_v9 = vld [vmem:[%s7432_s2 + $0x694] ss:$8 sps:$4 sm:$0xff]   ;;  %v5486_v2 = vld [vmem:[%s7432_s2 + $0x290] ss:$8 sps:$4 sm:$0xff]  }
  0xa5   : > { %2763 = vmatprep.mubr.bf16.mxu0 %v6369_v22 }
  0xa6   : > { %1640 = vmatpush1.bf16.msra.mxu1 %v5458_v4  ;;  %v5489_v4 = vld [vmem:[%s7432_s2 + $0x690] ss:$8 sps:$4 sm:$0xff]  }
  0xa7   : > { %3060 = vmatpush1.bf16.msra.mxu0 %v5461_v55  ;;  %1641 = vmatprep.subr.bf16.mxu1 %v5468_v20  ;;  %v5496_v55 = vld [vmem:[%s7432_s2 + $0x2a4] ss:$8 sps:$4 sm:$0xff]  }
  0xa8   : > { %3061 = vmatprep.subr.bf16.mxu0 %v5471_v41  ;;  %v5499_v20 = vld [vmem:[%s7432_s2 + $0x6a4] ss:$8 sps:$4 sm:$0xff]   ;;  %v5494_v41 = vld [vmem:[%s7432_s2 + $0x2a0] ss:$8 sps:$4 sm:$0xff]  }
  0xa9   : > { %1255 = vmatmul.mubr.bf16.gmra.mrb[12].mxu1 %v6146_v40 }
  0xaa   : > { %2764 = vmatmul.mubr.bf16.gmra.mrb[12].mxu0 %v6389_v39  ;;  %1642 = vmatpush1.bf16.msra.mxu1 %v5466_v17  ;;  %v5497_v17 = vld [vmem:[%s7432_s2 + $0x6a0] ss:$8 sps:$4 sm:$0xff]  }
  0xab   : > { %3062 = vmatpush1.bf16.msra.mxu0 %v5469_v13  ;;  %1643 = vmatprep.subr.bf16.mxu1 %v5474_v8  ;;  %v5502_v13 = vld [vmem:[%s7432_s2 + $0x2b4] ss:$8 sps:$4 sm:$0xff]  }
  0xac   : > { %3063 = vmatprep.subr.bf16.mxu0 %v5477_v45  ;;  %1264 = vmatprep.mubr.bf16.mxu1 %v6195_v16  ;;  %v5505_v8 = vld [vmem:[%s7432_s2 + $0x6b4] ss:$8 sps:$4 sm:$0xff]   ;;  %v5500_v45 = vld [vmem:[%s7432_s2 + $0x2b0] ss:$8 sps:$4 sm:$0xff]  }
  0xad   : > { %2773 = vmatprep.mubr.bf16.mxu0 %v6459_v36 }
  0xae   : > { %1644 = vmatpush1.bf16.msra.mxu1 %v5472_v11  ;;  %v5503_v11 = vld [vmem:[%s7432_s2 + $0x6b0] ss:$8 sps:$4 sm:$0xff]  }
  0xaf   : > { %3064 = vmatpush1.bf16.msra.mxu0 %v5475_v53  ;;  %1645 = vmatprep.subr.bf16.mxu1 %v5482_v48  ;;  %v5510_v53 = vld [vmem:[%s7432_s2 + $0x2c4] ss:$8 sps:$4 sm:$0xff]  }
  0xb0   : > { %3065 = vmatprep.subr.bf16.mxu0 %v5485_v3  ;;  %v5513_v48 = vld [vmem:[%s7432_s2 + $0x6c4] ss:$8 sps:$4 sm:$0xff]   ;;  %v5508_v3 = vld [vmem:[%s7432_s2 + $0x2c0] ss:$8 sps:$4 sm:$0xff]  }
  0xb1   : > { %1265 = vmatmul.mubr.bf16.gmra.mrb[16].mxu1 %v6209_v62 }
  0xb2   : > { %2774 = vmatmul.mubr.bf16.gmra.mrb[16].mxu0 %v6474_v27  ;;  %1646 = vmatpush1.bf16.msra.mxu1 %v5480_v42  ;;  %v5511_v42 = vld [vmem:[%s7432_s2 + $0x6c0] ss:$8 sps:$4 sm:$0xff]  }
  0xb3   : > { %3066 = vmatpush1.bf16.msra.mxu0 %v5483_v44  ;;  %1647 = vmatprep.subr.bf16.mxu1 %v5488_v49  ;;  %v1318_v44 = vrot.slane %v6614_v50, 5  ;;  %v5516_v49 = vld [vmem:[%s7432_s2 + $0x2d4] ss:$8 sps:$4 sm:$0xff]   ;;  %v5514_v50 = vld [vmem:[%s7432_s2 + $0x2d0] ss:$8 sps:$4 sm:$0xff]  }
  0xb4   : > { %3067 = vmatprep.subr.bf16.mxu0 %v5491_v9  ;;  %1274 = vmatprep.mubr.bf16.mxu1 %v6265_v60  ;;  %v5519_v9 = vld [vmem:[%s7432_s2 + $0x6d4] ss:$8 sps:$4 sm:$0xff]  }
  0xb5   : > { %2783 = vmatprep.mubr.bf16.mxu0 %v6520_v15 }
  0xb6   : > { %1648 = vmatpush1.bf16.msra.mxu1 %v5486_v2  ;;  %v5684_v2 = vld [vmem:[%s5931_s27 + $0x10] sm:$0x11] }
  0xb7   : > { %3068 = vmatpush1.bf16.msra.mxu0 %v5489_v4  ;;  %1649 = vmatprep.subr.bf16.mxu1 %v5496_v55  ;;  %v1321_v4 = vrot.slane %v5684_v2, 5  ;;  %v4370_v55 = vrot.slane %v6611_v31, 9  ;;  %v5527_v31 = vld [vmem:[%s7432_s2 + $0x6e4] ss:$8 sps:$4 sm:$0xff]  }
  0xb8   : > { %3069 = vmatprep.subr.bf16.mxu0 %v5499_v20  ;;  %v5517_v20 = vld [vmem:[%s7432_s2 + $0x6d0] ss:$8 sps:$4 sm:$0xff]  }
  0xb9   : > { %1275 = vmatmul.mubr.bf16.gmra.mrb[20].mxu1 %v6269_v63 }
  0xba   : > { %2784 = vmatmul.mubr.bf16.gmra.mrb[20].mxu0 %v6522_v57  ;;  %1650 = vmatpush1.bf16.msra.mxu1 %v5494_v41  ;;  %v1320_v41 = vrot.slane %v1318_v44, 4 }
  0xbb   : > { %3070 = vmatpush1.bf16.msra.mxu0 %v5497_v17  ;;  %1651 = vmatprep.subr.bf16.mxu1 %v5502_v13  ;;  %v5524_v17 = vld [vmem:[%s7432_s2 + $0x2e4] ss:$8 sps:$4 sm:$0xff]   ;;  %v1319_v13 = vsel %vm6022_vm5, %v4370_v55, %v1318_v44  ;;  %v5531_v44 = vld [vmem:[%s7432_s2 + $0x6f0] ss:$8 sps:$4 sm:$0xff]   ;;  %v5537_v55 = vld [vmem:[%s7432_s2 + $0x700] ss:$8 sps:$4 sm:$0xff]  }
  0xbc   : > { %3071 = vmatprep.subr.bf16.mxu0 %v5505_v8  ;;  %1284 = vmatprep.mubr.bf16.mxu1 %v6345_v59  ;;  %v1322_v8 = vsel %vm6022_vm5, %v1320_v41, %v1321_v4  ;;  %v5534_v4 = vld [vmem:[%s7432_s2 + $0x300] ss:$8 sps:$4 sm:$0xff]   ;;  %v5540_v41 = vld [vmem:[%s7432_s2 + $0x310] ss:$8 sps:$4 sm:$0xff]  }
  0xbd   : > { %2793 = vmatprep.mubr.bf16.mxu0 %v6539_v52  ;;  %v4410_v2 = vcombine.low %v1319_v13, %v1322_v8 }
  0xbe   : > { %1652 = vmatpush1.bf16.msra.mxu1 %v5500_v45  ;;  %v5522_v45 = vld [vmem:[%s7432_s2 + $0x2e0] ss:$8 sps:$4 sm:$0xff]  }
  0xbf   : > { %3072 = vmatpush1.bf16.msra.mxu0 %v5503_v11  ;;  %1653 = vmatprep.subr.bf16.mxu1 %v5510_v53  ;;  %v5525_v11 = vld [vmem:[%s7432_s2 + $0x6e0] ss:$8 sps:$4 sm:$0xff]   ;;  %v5530_v53 = vld [vmem:[%s7432_s2 + $0x2f4] ss:$8 sps:$4 sm:$0xff]  }
  0xc0   : > { %3073 = vmatprep.subr.bf16.mxu0 %v5513_v48  ;;  %v5533_v48 = vld [vmem:[%s7432_s2 + $0x6f4] ss:$8 sps:$4 sm:$0xff]  }
  0xc1   : > { %1285 = vmatmul.mubr.bf16.gmra.mrb[24].mxu1 %v6359_v12 }
  0xc2   : > { %2794 = vmatmul.mubr.bf16.gmra.mrb[24].mxu0 %v6541_v28  ;;  %1654 = vmatpush1.bf16.msra.mxu1 %v5508_v3  ;;  %v4411_v3 = vcombine.high %v1319_v13, %v1322_v8  ;;  %v5551_v13 = vld [vmem:[%s7432_s2 + $0x724] ss:$8 sps:$4 sm:$0xff]   ;;  %v5546_v8 = vld [vmem:[%s7432_s2 + $0x320] ss:$8 sps:$4 sm:$0xff]  }
  0xc3   : > { %3074 = vmatpush1.bf16.msra.mxu0 %v5511_v42  ;;  %1655 = vmatprep.subr.bf16.mxu1 %v5516_v49  ;;  %v5528_v42 = vld [vmem:[%s7432_s2 + $0x2f0] ss:$8 sps:$4 sm:$0xff]   ;;  %v5536_v49 = vld [vmem:[%s7432_s2 + $0x304] ss:$8 sps:$4 sm:$0xff]  }
  0xc4   : > { %3075 = vmatprep.subr.bf16.mxu0 %v5519_v9  ;;  %1294 = vmatprep.mubr.bf16.mxu1 %v6413_v56  ;;  %v5539_v9 = vld [vmem:[%s7432_s2 + $0x704] ss:$8 sps:$4 sm:$0xff]  }
  0xc5   : > { %2803 = vmatprep.mubr.bf16.mxu0 %v6570_v37 }
  0xc6   : > { %1656 = vmatpush1.bf16.msra.mxu1 %v5514_v50  ;;  %v5542_v50 = vld [vmem:[%s7432_s2 + $0x314] ss:$8 sps:$4 sm:$0xff]  }
  0xc7   : > { %3076 = vmatpush1.bf16.msra.mxu0 %v5517_v20  ;;  %1657 = vmatprep.subr.bf16.mxu1 %v5524_v17  ;;  %v5545_v20 = vld [vmem:[%s7432_s2 + $0x714] ss:$8 sps:$4 sm:$0xff]   ;;  %v5543_v17 = vld [vmem:[%s7432_s2 + $0x710] ss:$8 sps:$4 sm:$0xff]  }
  0xc8   : > { %3077 = vmatprep.subr.bf16.mxu0 %v5527_v31  ;;  %v5548_v31 = vld [vmem:[%s7432_s2 + $0x324] ss:$8 sps:$4 sm:$0xff]  }
  0xc9   : > { %1295 = vmatmul.mubr.bf16.gmra.mrb[28].mxu1 %v6423_v5 }
  0xca   : > { %2804 = vmatmul.mubr.bf16.gmra.mrb[28].mxu0 %v6572_v1  ;;  %1658 = vmatpush1.bf16.msra.mxu1 %v5522_v45  ;;  %v5549_v45 = vld [vmem:[%s7432_s2 + $0x720] ss:$8 sps:$4 sm:$0xff]  }
  0xcb   : > { %3078 = vmatpush1.bf16.msra.mxu0 %v5525_v11  ;;  %1659 = vmatprep.subr.bf16.mxu1 %v5530_v53  ;;  %v5554_v11 = vld [vmem:[%s7432_s2 + $0x334] ss:$8 sps:$4 sm:$0xff]   ;;  %v5552_v53 = vld [vmem:[%s7432_s2 + $0x330] ss:$8 sps:$4 sm:$0xff]  }
  0xcc   : > { %3079 = vmatprep.subr.bf16.mxu0 %v5533_v48  ;;  %1661 = vmatprep.mubr.bf16.mxu1 %v4411_v3  ;;  %v5555_v48 = vld [vmem:[%s7432_s2 + $0x730] ss:$8 sps:$4 sm:$0xff]   ;;  %v5563_v3 = vld [vmem:[%s7432_s2 + $0x744] ss:$8 sps:$4 sm:$0xff]  }
  0xcd   : > { %3081 = vmatprep.mubr.bf16.mxu0 %v6061_v58 }
  0xce   : > { %1660 = vmatpush1.bf16.msra.mxu1 %v5528_v42  ;;  %v5558_v42 = vld [vmem:[%s7432_s2 + $0x340] ss:$8 sps:$4 sm:$0xff]  }
  0xcf   : > { %3080 = vmatpush1.bf16.msra.mxu0 %v5531_v44  ;;  %1977 = vmatprep.subr.bf16.mxu1 %v5536_v49  ;;  %v5561_v44 = vld [vmem:[%s7432_s2 + $0x740] ss:$8 sps:$4 sm:$0xff]   ;;  %v5566_v49 = vld [vmem:[%s7432_s2 + $0x354] ss:$8 sps:$4 sm:$0xff]  }
  0xd0   : > { %3419 = vmatprep.subr.bf16.mxu0 %v5539_v9  ;;  %v5569_v9 = vld [vmem:[%s7432_s2 + $0x754] ss:$8 sps:$4 sm:$0xff]  }
  0xd1   : > { %1662 = vmatmul.mubr.bf16.vlgmr.msra.gmra.mrb[0].mxu1 %v4410_v2  ;;  %v6932_v2 = vld [vmem:[%s6401_s24 + $0x20] sm:$0xff] }
  0xd2   : > { %3082 = vmatmul.mubr.bf16.vlgmr.msra.gmra.mrb[0].mxu0 %v6073_v0  ;;  %1978 = vmatpush1.bf16.msra.mxu1 %v5534_v4  ;;  %v6937_v4 = vld [vmem:[%s6401_s24 + $0x18] sm:$0xff] }
  0xd3   : > { %3420 = vmatpush1.bf16.msra.mxu0 %v5537_v55  ;;  %1979 = vmatprep.subr.bf16.mxu1 %v5542_v50  ;;  %v6940_v55 = vld [vmem:[%s6401_s24 + $0x28] sm:$0x11]  ;;  %v3567_v50 = vrot.slane %v6932_v2, 5 }
  0xd4   : > { %3421 = vmatprep.subr.bf16.mxu0 %v5545_v20  ;;  %1671 = vmatprep.mubr.bf16.mxu1 %v6127_v38  ;;  %v5557_v38 = vld [vmem:[%s7432_s2 + $0x734] ss:$8 sps:$4 sm:$0xff]   ;;  %v5564_v20 = vld [vmem:[%s7432_s2 + $0x350] ss:$8 sps:$4 sm:$0xff]  }
  0xd5   : > { %3091 = vmatprep.mubr.bf16.mxu0 %v6132_v33 }
  0xd6   : > { %1980 = vmatpush1.bf16.msra.mxu1 %v5540_v41  ;;  %v5567_v41 = vld [vmem:[%s7432_s2 + $0x750] ss:$8 sps:$4 sm:$0xff]  }
  0xd7   : > { %3422 = vmatpush1.bf16.msra.mxu0 %v5543_v17  ;;  %1981 = vmatprep.subr.bf16.mxu1 %v5548_v31  ;;  %v4789_v17 = vrot.slane %v6937_v4, 9  ;;  %v3570_v31 = vrot.slane %v6940_v55, 5 }
  0xd8   : > { %3423 = vmatprep.subr.bf16.mxu0 %v5551_v13  ;;  %v5572_v13 = vld [vmem:[%s7432_s2 + $0x364] ss:$8 sps:$4 sm:$0xff]  }
  0xd9   : > { %1672 = vmatmul.mubr.bf16.gmra.mrb[4].mxu1 %v6104_v21  ;;  %v5560_v21 = vld [vmem:[%s7432_s2 + $0x344] ss:$8 sps:$4 sm:$0xff]  }
  0xda   : > { %3092 = vmatmul.mubr.bf16.gmra.mrb[4].mxu0 %v6146_v40  ;;  %1982 = vmatpush1.bf16.msra.mxu1 %v5546_v8  ;;  %v5575_v8 = vld [vmem:[%s7432_s2 + $0x764] ss:$8 sps:$4 sm:$0xff]  }
  0xdb   : > { %3424 = vmatpush1.bf16.msra.mxu0 %v5549_v45  ;;  %1983 = vmatprep.subr.bf16.mxu1 %v5554_v11  ;;  %v3569_v45 = vrot.slane %v3567_v50, 4  ;;  %v6961_v11 = vsel %vm6022_vm5, %v4789_v17, %v3567_v50  ;;  %v5587_v50 = vld [vmem:[%s7432_s2 + $0x784] ss:$8 sps:$4 sm:$0xff]   ;;  %v5590_v17 = vld [vmem:[%s7432_s2 + $0x394] ss:$8 sps:$4 sm:$0xff]  }
  0xdc   : > { %3425 = vmatprep.subr.bf16.mxu0 %v5557_v38  ;;  %1681 = vmatprep.mubr.bf16.mxu1 %v6182_v7 }
  0xdd   : > { %3101 = vmatprep.mubr.bf16.mxu0 %v6195_v16  ;;  %v6965_v38 = vsel %vm6022_vm5, %v3569_v45, %v3570_v31  ;;  %v5593_v31 = vld [vmem:[%s7432_s2 + $0x794] ss:$8 sps:$4 sm:$0xff]   ;;  %v5596_v45 = vld [vmem:[%s7432_s2 + $0x3a4] ss:$8 sps:$4 sm:$0xff]  }
  0xde   : > { %1984 = vmatpush1.bf16.msra.mxu1 %v5552_v53  ;;  %v5570_v53 = vld [vmem:[%s7432_s2 + $0x360] ss:$8 sps:$4 sm:$0xff]  }
  0xdf   : > { %3426 = vmatpush1.bf16.msra.mxu0 %v5555_v48  ;;  %1985 = vmatprep.subr.bf16.mxu1 %v5560_v21  ;;  %v5573_v48 = vld [vmem:[%s7432_s2 + $0x760] ss:$8 sps:$4 sm:$0xff]   ;;  %v4823_v21 = vcombine.high %v6961_v11, %v6965_v38 }
  0xe0   : > { %3427 = vmatprep.subr.bf16.mxu0 %v5563_v3  ;;  %v5581_v3 = vld [vmem:[%s7432_s2 + $0x774] ss:$8 sps:$4 sm:$0xff]  }
  0xe1   : > { %1682 = vmatmul.mubr.bf16.gmra.mrb[8].mxu1 %v6190_v14 }
  0xe2   : > { %3102 = vmatmul.mubr.bf16.gmra.mrb[8].mxu0 %v6209_v62  ;;  %1986 = vmatpush1.bf16.msra.mxu1 %v5558_v42  ;;  %v4822_v42 = vcombine.low %v6961_v11, %v6965_v38 }
  0xe3   : > { %3428 = vmatpush1.bf16.msra.mxu0 %v5561_v44  ;;  %1987 = vmatprep.subr.bf16.mxu1 %v5566_v49  ;;  %v5576_v44 = vld [vmem:[%s7432_s2 + $0x370] ss:$8 sps:$4 sm:$0xff]  }
  0xe4   : > { %3429 = vmatprep.subr.bf16.mxu0 %v5569_v9  ;;  %1691 = vmatprep.mubr.bf16.mxu1 %v6307_v32  ;;  %v5579_v49 = vld [vmem:[%s7432_s2 + $0x770] ss:$8 sps:$4 sm:$0xff]   ;;  %v5584_v9 = vld [vmem:[%s7432_s2 + $0x384] ss:$8 sps:$4 sm:$0xff]  }
  0xe5   : > { %3111 = vmatprep.mubr.bf16.mxu0 %v6265_v60 }
  0xe6   : > { %1988 = vmatpush1.bf16.msra.mxu1 %v5564_v20  ;;  %v5582_v20 = vld [vmem:[%s7432_s2 + $0x380] ss:$8 sps:$4 sm:$0xff]  }
  0xe7   : > { %3430 = vmatpush1.bf16.msra.mxu0 %v5567_v41  ;;  %1989 = vmatprep.subr.bf16.mxu1 %v5572_v13  ;;  %v5585_v41 = vld [vmem:[%s7432_s2 + $0x780] ss:$8 sps:$4 sm:$0xff]   ;;  %v5588_v13 = vld [vmem:[%s7432_s2 + $0x390] ss:$8 sps:$4 sm:$0xff]  }
  0xe8   : > { %3431 = vmatprep.subr.bf16.mxu0 %v5575_v8  ;;  %v5591_v8 = vld [vmem:[%s7432_s2 + $0x790] ss:$8 sps:$4 sm:$0xff]  }
  0xe9   : > { %1692 = vmatmul.mubr.bf16.gmra.mrb[12].mxu1 %v6334_v46 }
  0xea   : > { %3112 = vmatmul.mubr.bf16.gmra.mrb[12].mxu0 %v6269_v63  ;;  %1990 = vmatpush1.bf16.msra.mxu1 %v5570_v53  ;;  %v5599_v53 = vld [vmem:[%s7432_s2 + $0x7a4] ss:$8 sps:$4 sm:$0xff]  }
  0xeb   : > { %3432 = vmatpush1.bf16.msra.mxu0 %v5573_v48  ;;  %1991 = vmatprep.subr.bf16.mxu1 %v5578_v34  ;;  %v5594_v48 = vld [vmem:[%s7432_s2 + $0x3a0] ss:$8 sps:$4 sm:$0xff]  }
  0xec   : > { %3433 = vmatprep.subr.bf16.mxu0 %v5581_v3  ;;  %1701 = vmatprep.mubr.bf16.mxu1 %v6369_v22  ;;  %v5597_v34 = vld [vmem:[%s7432_s2 + $0x7a0] ss:$8 sps:$4 sm:$0xff]   ;;  %v5602_v3 = vld [vmem:[%s7432_s2 + $0x3b4] ss:$8 sps:$4 sm:$0xff]  }
  0xed   : > { %3121 = vmatprep.mubr.bf16.mxu0 %v6345_v59 }
  0xee   : > { %1992 = vmatpush1.bf16.msra.mxu1 %v5576_v44  ;;  %v5605_v44 = vld [vmem:[%s7432_s2 + $0x7b4] ss:$8 sps:$4 sm:$0xff]  }
  0xef   : > { %3434 = vmatpush1.bf16.msra.mxu0 %v5579_v49  ;;  %1993 = vmatprep.subr.bf16.mxu1 %v5584_v9  ;;  %v5600_v49 = vld [vmem:[%s7432_s2 + $0x3b0] ss:$8 sps:$4 sm:$0xff]  }
  0xf0   : > { %3435 = vmatprep.subr.bf16.mxu0 %v5587_v50  ;;  %v5603_v9 = vld [vmem:[%s7432_s2 + $0x7b0] ss:$8 sps:$4 sm:$0xff]   ;;  %v5609_v50 = vld [vmem:[%s7432_s2 + $0x3c4] ss:$8 sps:$4 sm:$0xff]  }
  0xf1   : > { %1702 = vmatmul.mubr.bf16.gmra.mrb[16].mxu1 %v6389_v39 }
  0xf2   : > { %3122 = vmatmul.mubr.bf16.gmra.mrb[16].mxu0 %v6359_v12  ;;  %1994 = vmatpush1.bf16.msra.mxu1 %v5582_v20  ;;  %v5613_v20 = vld [vmem:[%s7432_s2 + $0x7c4] ss:$8 sps:$4 sm:$0xff]  }
  0xf3   : > { %3436 = vmatpush1.bf16.msra.mxu0 %v5585_v41  ;;  %1995 = vmatprep.subr.bf16.mxu1 %v5590_v17  ;;  %v5607_v41 = vld [vmem:[%s7432_s2 + $0x3c0] ss:$8 sps:$4 sm:$0xff]  }
  0xf4   : > { %3437 = vmatprep.subr.bf16.mxu0 %v5593_v31  ;;  %1711 = vmatprep.mubr.bf16.mxu1 %v6459_v36  ;;  %v5611_v17 = vld [vmem:[%s7432_s2 + $0x7c0] ss:$8 sps:$4 sm:$0xff]   ;;  %v5616_v31 = vld [vmem:[%s7432_s2 + $0x3d4] ss:$8 sps:$4 sm:$0xff]  }
  0xf5   : > { %3131 = vmatprep.mubr.bf16.mxu0 %v6413_v56 }
  0xf6   : > { %1996 = vmatpush1.bf16.msra.mxu1 %v5588_v13  ;;  %v5619_v13 = vld [vmem:[%s7432_s2 + $0x7d4] ss:$8 sps:$4 sm:$0xff]  }
  0xf7   : > { %3438 = vmatpush1.bf16.msra.mxu0 %v5591_v8  ;;  %1997 = vmatprep.subr.bf16.mxu1 %v5596_v45  ;;  %v4690_v8 = vcombine.high %v6937_v4, %v6932_v2  ;;  %v5614_v45 = vld [vmem:[%s7432_s2 + $0x3d0] ss:$8 sps:$4 sm:$0xff]  }
  0xf8   : > { %3439 = vmatprep.subr.bf16.mxu0 %v5599_v53  ;;  %v5617_v53 = vld [vmem:[%s7432_s2 + $0x7d0] ss:$8 sps:$4 sm:$0xff]  }
  0xf9   : > { %1712 = vmatmul.mubr.bf16.gmra.mrb[20].mxu1 %v6474_v27 }
  0xfa   : > { %3132 = vmatmul.mubr.bf16.gmra.mrb[20].mxu0 %v6423_v5  ;;  %1998 = vmatpush1.bf16.msra.mxu1 %v5594_v48  ;;  %v5623_v48 = vld [vmem:[%s7432_s2 + $0x3e4] ss:$8 sps:$4 sm:$0xff]  }
  0xfb   : > { %3440 = vmatpush1.bf16.msra.mxu0 %v5597_v34  ;;  %1999 = vmatprep.subr.bf16.mxu1 %v5602_v3  ;;  %v5627_v34 = vld [vmem:[%s7432_s2 + $0x7e4] ss:$8 sps:$4 sm:$0xff]   ;;  %v4689_v3 = vcombine.low %v6937_v4, %v6932_v2 }
  0xfc   : > { %3441 = vmatprep.subr.bf16.mxu0 %v5605_v44  ;;  %1721 = vmatprep.mubr.bf16.mxu1 %v6520_v15  ;;  %v5621_v44 = vld [vmem:[%s7432_s2 + $0x3e0] ss:$8 sps:$4 sm:$0xff]  }
  0xfd   : > { %3141 = vmatprep.mubr.bf16.mxu0 %v6565_v19 }
  0xfe   : > { %2000 = vmatpush1.bf16.msra.mxu1 %v5600_v49  ;;  %v5625_v49 = vld [vmem:[%s7432_s2 + $0x7e0] ss:$8 sps:$4 sm:$0xff]  }
  0xff   : > { %3442 = vmatpush1.bf16.msra.mxu0 %v5603_v9  ;;  %2001 = vmatprep.subr.bf16.mxu1 %v5609_v50  ;;  %v5630_v9 = vld [vmem:[%s7432_s2 + $0x3f4] ss:$8 sps:$4 sm:$0xff]  }
 0x100   : > { %3443 = vmatprep.subr.bf16.mxu0 %v5613_v20  ;;  %v5633_v50 = vld [vmem:[%s7432_s2 + $0x7f4] ss:$8 sps:$4 sm:$0xff]   ;;  %v5628_v20 = vld [vmem:[%s7432_s2 + $0x3f0] ss:$8 sps:$4 sm:$0xff]  }
 0x101   : > { %1722 = vmatmul.mubr.bf16.gmra.mrb[24].mxu1 %v6522_v57 }
 0x102   : > { %3142 = vmatmul.mubr.bf16.gmra.mrb[24].mxu0 %v6578_v18  ;;  %2002 = vmatpush1.bf16.msra.mxu1 %v5607_v41  ;;  %v5631_v41 = vld [vmem:[%s7432_s2 + $0x7f0] ss:$8 sps:$4 sm:$0xff]  }
 0x103   : > { %3444 = vmatpush1.bf16.msra.mxu0 %v5611_v17  ;;  %2003 = vmatprep.subr.bf16.mxu1 %v5616_v31  ;;  %v5636_v17 = vld [vmem:[%s7432_s2 + $0x804] ss:$8 sps:$4 sm:$0xff]   ;;  %v5634_v31 = vld [vmem:[%s7432_s2 + $0x800] ss:$8 sps:$4 sm:$0xff]  }
 0x104   : > { %3445 = vmatprep.subr.bf16.mxu0 %v5619_v13  ;;  %1731 = vmatprep.mubr.bf16.mxu1 %v6539_v52  ;;  %v5639_v13 = vld [vmem:[%s7432_s2 + $0x814] ss:$8 sps:$4 sm:$0xff]  }
 0x105   : > { %3151 = vmatprep.mubr.bf16.mxu0 %v4690_v8  ;;  %v7446_v8 = vld [vmem:[#allocation2_spill] sm:$0xff] }
 0x106   : > { %2004 = vmatpush1.bf16.msra.mxu1 %v5614_v45  ;;  %v7447_v45 = vld [vmem:[#allocation3_spill] sm:$0xff] }
 0x107   : > { %3446 = vmatpush1.bf16.msra.mxu0 %v5617_v53  ;;  %2005 = vmatprep.subr.bf16.mxu1 %v5623_v48  ;;  %v5651_v53 = vld [vmem:[%s7432_s2 + $0x854] ss:$8 sps:$4 sm:$0xff]  }
 0x108   : > { %3447 = vmatprep.subr.bf16.mxu0 %v5627_v34  ;;  %v7448_v48 = vld [vmem:[#allocation4_spill] sm:$0xff]  ;;  %v5654_v34 = vld [vmem:[%s7432_s2 + $0x864] ss:$8 sps:$4 sm:$0xff]  }
 0x109   : > { %1732 = vmatmul.mubr.bf16.gmra.mrb[28].mxu1 %v6541_v28 }
 0x10a   : > { %3152 = vmatmul.mubr.bf16.gmra.mrb[28].mxu0 %v4689_v3  ;;  %2006 = vmatpush1.bf16.msra.mxu1 %v5621_v44  ;;  %v5657_v3 = vld [vmem:[%s7432_s2 + $0x874] ss:$8 sps:$4 sm:$0xff]   ;;  %v3204_v44 = vshll.u32 %v6932_v2, 16 }
 0x10b   : > { %3448 = vmatpush1.bf16.msra.mxu0 %v5625_v49  ;;  %2007 = vmatprep.subr.bf16.mxu1 %v5630_v9  ;;  %v3208_v49 = vshrl.u32 %v6932_v2, 16  ;;  %v5658_v9 = vld [vmem:[%s7432_s2 + $0x880] ss:$8 sps:$4 sm:$0xff]  }
 0x10c   : > { %3449 = vmatprep.subr.bf16.mxu0 %v5633_v50  ;;  %2009 = vmatprep.mubr.bf16.mxu1 %v5994_v23  ;;  %v5637_v23 = vld [vmem:[%s7432_s2 + $0x810] ss:$8 sps:$4 sm:$0xff]   ;;  %v3206_v50 = vrot.slane %v3204_v44, 5 }
 0x10d   : > { %3451 = vmatprep.mubr.bf16.mxu0 %v6140_v43  ;;  %v5642_v43 = vld [vmem:[%s7432_s2 + $0x824] ss:$8 sps:$4 sm:$0xff]   ;;  %v3210_v2 = vrot.slane %v3208_v49, 4 }
 0x10e   : > { %2008 = vmatpush1.bf16.msra.mxu1 %v5628_v20  ;;  %v5661_v20 = vld [vmem:[%s7432_s2 + $0x890] ss:$8 sps:$4 sm:$0xff]  }
 0x10f   : > { %3450 = vmatpush1.bf16.msra.mxu0 %v5631_v41  ;;  %4899 = vmatprep.subr.bf16.mxu1 %v5636_v17  ;;  %v5666_v41 = vld [vmem:[%s7432_s2 + $0x8a4] ss:$8 sps:$4 sm:$0xff]  }
 0x110   : > { %3773 = vmatprep.subr.bf16.mxu0 %v5636_v17  ;;  %v3214_v17 = vshll.u32 %v6940_v55, 16  ;;  %v5667_v55 = vld [vmem:[%s7432_s2 + $0x8b0] ss:$8 sps:$4 sm:$0xff]  }
 0x111   : > { %2010 = vmatmul.mubr.bf16.vlgmr.msra.gmra.mrb[0].mxu1 %v5998_v24  ;;  %v5640_v24 = vld [vmem:[%s7432_s2 + $0x820] ss:$8 sps:$4 sm:$0xff]  }
 0x112   : > { %3452 = vmatmul.mubr.bf16.vlgmr.msra.gmra.mrb[0].mxu0 %v6173_v61  ;;  %4915 = vmatpush1.bf16.msra.mxu1 %v5634_v31  ;;  %v5645_v61 = vld [vmem:[%s7432_s2 + $0x834] ss:$8 sps:$4 sm:$0xff]  }
 0x113   : > { %3774 = vmatpush1.bf16.msra.mxu0 %v5634_v31  ;;  %4900 = vmatprep.subr.bf16.mxu1 %v5639_v13  ;;  %v5664_v31 = vld [vmem:[%s7432_s2 + $0x8a0] ss:$8 sps:$4 sm:$0xff]  }
 0x114   : > { %3775 = vmatprep.subr.bf16.mxu0 %v5639_v13  ;;  %2019 = vmatprep.mubr.bf16.mxu1 %v6061_v58  ;;  %v5643_v58 = vld [vmem:[%s7432_s2 + $0x830] ss:$8 sps:$4 sm:$0xff]   ;;  %v5669_v13 = vld [vmem:[%s7432_s2 + $0x8b4] ss:$8 sps:$4 sm:$0xff]  }
 0x115   : > { %3461 = vmatprep.mubr.bf16.mxu0 %v6217_v26  ;;  %v5648_v26 = vld [vmem:[%s7432_s2 + $0x844] ss:$8 sps:$4 sm:$0xff]  }
 0x116   : > { %4916 = vmatpush1.bf16.msra.mxu1 %v5637_v23 }
 0x117   : > { %3776 = vmatpush1.bf16.msra.mxu0 %v5637_v23  ;;  %4901 = vmatprep.subr.bf16.mxu1 %v5642_v43  ;;  %v3216_v23 = vrot.slane %v3214_v17, 5 }
 0x118   : > { %3777 = vmatprep.subr.bf16.mxu0 %v5642_v43  ;;  %v5672_v43 = vld [vmem:[%s7432_s2 + $0x8c4] ss:$8 sps:$4 sm:$0xff]  }
 0x119   : > { %2020 = vmatmul.mubr.bf16.gmra.mrb[4].mxu1 %v6073_v0  ;;  %v5646_v0 = vld [vmem:[%s7432_s2 + $0x840] ss:$8 sps:$4 sm:$0xff]  }
 0x11a   : > { %3462 = vmatmul.mubr.bf16.gmra.mrb[4].mxu0 %v7446_v8  ;;  %4917 = vmatpush1.bf16.msra.mxu1 %v5640_v24 }
 0x11b   : > { %3778 = vmatpush1.bf16.msra.mxu0 %v5640_v24  ;;  %4902 = vmatprep.subr.bf16.mxu1 %v5645_v61  ;;  %v5670_v24 = vld [vmem:[%s7432_s2 + $0x8c0] ss:$8 sps:$4 sm:$0xff]  }
 0x11c   : > { %3779 = vmatprep.subr.bf16.mxu0 %v5645_v61  ;;  %2029 = vmatprep.mubr.bf16.mxu1 %v6132_v33  ;;  %v5649_v33 = vld [vmem:[%s7432_s2 + $0x850] ss:$8 sps:$4 sm:$0xff]  }
 0x11d   : > { %3471 = vmatprep.mubr.bf16.mxu0 %v7447_v45 }
 0x11e   : > { %4918 = vmatpush1.bf16.msra.mxu1 %v5643_v58 }
 0x11f   : > { %3780 = vmatpush1.bf16.msra.mxu0 %v5643_v58  ;;  %4903 = vmatprep.subr.bf16.mxu1 %v5648_v26 }
 0x120   : > { %3781 = vmatprep.subr.bf16.mxu0 %v5648_v26 }
 0x121   : > { %2030 = vmatmul.mubr.bf16.gmra.mrb[8].mxu1 %v6146_v40  ;;  %v5652_v40 = vld [vmem:[%s7432_s2 + $0x860] ss:$8 sps:$4 sm:$0xff]  }
 0x122   : > { %3472 = vmatmul.mubr.bf16.gmra.mrb[8].mxu0 %v7448_v48  ;;  %4919 = vmatpush1.bf16.msra.mxu1 %v5646_v0 }
 0x123   : > { %3782 = vmatpush1.bf16.msra.mxu0 %v5646_v0  ;;  %4904 = vmatprep.subr.bf16.mxu1 %v5651_v53 }
 0x124   : > { %3783 = vmatprep.subr.bf16.mxu0 %v5651_v53  ;;  %2039 = vmatprep.mubr.bf16.mxu1 %v6195_v16  ;;  %v5655_v16 = vld [vmem:[%s7432_s2 + $0x870] ss:$8 sps:$4 sm:$0xff]  }
 0x125   : > { %3481 = vmatprep.mubr.bf16.mxu0 %v6372_v25  ;;  %v5660_v25 = vld [vmem:[%s7432_s2 + $0x884] ss:$8 sps:$4 sm:$0xff]  }
 0x126   : > { %4920 = vmatpush1.bf16.msra.mxu1 %v5649_v33 }
 0x127   : > { %3784 = vmatpush1.bf16.msra.mxu0 %v5649_v33  ;;  %4905 = vmatprep.subr.bf16.mxu1 %v5654_v34 }
 0x128   : > { %3785 = vmatprep.subr.bf16.mxu0 %v5654_v34 }
 0x129   : > { %2040 = vmatmul.mubr.bf16.gmra.mrb[12].mxu1 %v6209_v62  ;;  %v3195_v62 = vshrl.u32 %v6937_v4, 16 }
 0x12a   : > { %3482 = vmatmul.mubr.bf16.gmra.mrb[12].mxu0 %v6426_v6  ;;  %4921 = vmatpush1.bf16.msra.mxu1 %v5652_v40  ;;  %v3198_v6 = vshll.u32 %v6937_v4, 16 }
 0x12b   : > { %3786 = vmatpush1.bf16.msra.mxu0 %v5652_v40  ;;  %4906 = vmatprep.subr.bf16.mxu1 %v5657_v3 }
 0x12c   : > { %3787 = vmatprep.subr.bf16.mxu0 %v5657_v3  ;;  %2049 = vmatprep.mubr.bf16.mxu1 %v6265_v60  ;;  %v5663_v60 = vld [vmem:[%s7432_s2 + $0x894] ss:$8 sps:$4 sm:$0xff]   ;;  %v3200_v4 = vrot.slane %v3198_v6, 5 }
 0x12d   : > { %3491 = vmatprep.mubr.bf16.mxu0 %v6449_v30  ;;  %v3197_v30 = vrot.slane %v3195_v62, 4 }
 0x12e   : > { %4922 = vmatpush1.bf16.msra.mxu1 %v5655_v16 }
 0x12f   : > { %3788 = vmatpush1.bf16.msra.mxu0 %v5655_v16  ;;  %4907 = vmatprep.subr.bf16.mxu1 %v5660_v25 }
 0x130   : > { %3789 = vmatprep.subr.bf16.mxu0 %v5660_v25 }
 0x131   : > { %2050 = vmatmul.mubr.bf16.gmra.mrb[16].mxu1 %v6269_v63  ;;  %v3201_v63 = vor.u32 %v3200_v4, %v3197_v30 }
 0x132   : > { %3492 = vmatmul.mubr.bf16.gmra.mrb[16].mxu0 %v6491_v47  ;;  %4923 = vmatpush1.bf16.msra.mxu1 %v5658_v9  ;;  %v3211_v47 = vor.u32 %v3210_v2, %v3206_v50 }
 0x133   : > { %3790 = vmatpush1.bf16.msra.mxu0 %v5658_v9  ;;  %4908 = vmatprep.subr.bf16.mxu1 %v5663_v60 }
 0x134   : > { %3791 = vmatprep.subr.bf16.mxu0 %v5663_v60  ;;  %2059 = vmatprep.mubr.bf16.mxu1 %v6345_v59  ;;  %v3202_v59 = vrot.slane %v3201_v63, 4 }
 0x135   : > { %3501 = vmatprep.mubr.bf16.mxu0 %v6505_v29  ;;  %v3212_v29 = vrot.slane %v3211_v47, 4 }
 0x136   : > { %4924 = vmatpush1.bf16.msra.mxu1 %v5661_v20 }
 0x137   : > { %3792 = vmatpush1.bf16.msra.mxu0 %v5661_v20  ;;  %4909 = vmatprep.subr.bf16.mxu1 %v5666_v41 }
 0x138   : > { %3793 = vmatprep.subr.bf16.mxu0 %v5666_v41 }
 0x139   : > { %2060 = vmatmul.mubr.bf16.gmra.mrb[20].mxu1 %v6359_v12  ;;  %v3207_v12 = vsel %vm5975_vm4, %v3202_v59, %v3206_v50 }
 0x13a   : > { %3502 = vmatmul.mubr.bf16.gmra.mrb[20].mxu0 %v6548_v51  ;;  %4925 = vmatpush1.bf16.msra.mxu1 %v5664_v31  ;;  %v3217_v51 = vsel %vm5975_vm4, %v3212_v29, %v3216_v23 }
 0x13b   : > { %3794 = vmatpush1.bf16.msra.mxu0 %v5664_v31  ;;  %4910 = vmatprep.subr.bf16.mxu1 %v5669_v13  ;;  %v4756_v61 = vcombine.high %v3207_v12, %v3217_v51  ;;  %v4755_v8 = vcombine.low %v3207_v12, %v3217_v51 }
 0x13c   : > { %3795 = vmatprep.subr.bf16.mxu0 %v5669_v13  ;;  %2069 = vmatprep.mubr.bf16.mxu1 %v6413_v56  ;;  %v5675_v56 = vld [vmem:[%s7432_s2 + $0x8d4] ss:$8 sps:$4 sm:$0xff]  }
 0x13d   : > { %3511 = vmatprep.mubr.bf16.mxu0 %v6574_v54  ;;  %v5678_v54 = vld [vmem:[%s7432_s2 + $0x8e4] ss:$8 sps:$4 sm:$0xff]  }
 0x13e   : > { %4926 = vmatpush1.bf16.msra.mxu1 %v5667_v55 }
 0x13f   : > { %3796 = vmatpush1.bf16.msra.mxu0 %v5667_v55  ;;  %4911 = vmatprep.subr.bf16.mxu1 %v5672_v43  ;;  %v3920_v55 = vlaneseq }
 0x140   : > { %3797 = vmatprep.subr.bf16.mxu0 %v5672_v43 }
 0x141   : > { %2070 = vmatmul.mubr.bf16.gmra.mrb[24].mxu1 %v6423_v5  ;;  %v5676_v5 = vld [vmem:[%s7432_s2 + $0x8e0] ss:$8 sps:$4 sm:$0xff]   ;;  %v3921_v12 = vshrl.u32 %v3920_v55, 7 }
 0x142   : > { %3512 = vmatmul.mubr.bf16.gmra.mrb[24].mxu0 %v6599_v35  ;;  %4927 = vmatpush1.bf16.msra.mxu1 %v5670_v24  ;;  %v5681_v35 = vld [vmem:[%s7432_s2 + $0x8f4] ss:$8 sps:$4 sm:$0xff]  }
 0x143   : > { %3798 = vmatpush1.bf16.msra.mxu0 %v5670_v24  ;;  %4912 = vmatprep.subr.bf16.mxu1 %v5675_v56 }
 0x144   : > { %3799 = vmatprep.subr.bf16.mxu0 %v5675_v56  ;;  %2079 = vmatprep.mubr.bf16.mxu1 %v6565_v19  ;;  %v5679_v19 = vld [vmem:[%s7432_s2 + $0x8f0] ss:$8 sps:$4 sm:$0xff]  }
 0x145   : > { %3521 = vmatprep.mubr.bf16.mxu0 %v4756_v61 }
 0x146   : > { %4928 = vmatpush1.bf16.msra.mxu1 %v5673_v10 }
 0x147   : > { %3800 = vmatpush1.bf16.msra.mxu0 %v5673_v10  ;;  %4913 = vmatprep.subr.bf16.mxu1 %v5678_v54 }
 0x148   : > { %3801 = vmatprep.subr.bf16.mxu0 %v5678_v54 }
 0x149   : > { %2080 = vmatmul.mubr.bf16.gmra.mrb[28].mxu1 %v6578_v18 }
 0x14a   : > { %3522 = vmatmul.mubr.bf16.gmra.mrb[28].mxu0 %v4755_v8  ;;  %4929 = vmatpush1.bf16.msra.mxu1 %v5676_v5 }
 0x14b   : > { %3802 = vmatpush1.bf16.msra.mxu0 %v5676_v5  ;;  %4914 = vmatprep.subr.bf16.mxu1 %v5681_v35 }
 0x14c   : > { %3803 = vmatprep.subr.bf16.mxu0 %v5681_v35  ;;  %3805 = vmatprep.mubr.bf16.mxu0 %v6182_v7 }
 0x14d   : > { %3845 = vmatprep.mubr.bf16.mxu1 %v6520_v15 }
 0x14e   : > { %4930 = vmatpush1.bf16.msra.mxu1 %v5679_v19 }
 0x14f   : > { %3804 = vmatpush1.bf16.msra.mxu0 %v5679_v19 }
 0x151   : > { %3846 = vmatmul.mubr.bf16.vlgmr.msra.gmra.mrb[32].mxu1 %v6522_v57 }
 0x152   : > { %3806 = vmatmul.mubr.bf16.vlgmr.msra.gmra.mrb[0].mxu0 %v6190_v14  ;;  %3855 = vmatprep.mubr.bf16.mxu1 %v6539_v52 }
 0x153   : > { %3815 = vmatprep.mubr.bf16.mxu0 %v6307_v32 }
 0x159   : > { %3856 = vmatmul.mubr.bf16.gmra.mrb[36].mxu1 %v6541_v28 }
 0x15a   : > { %3816 = vmatmul.mubr.bf16.gmra.mrb[4].mxu0 %v6334_v46  ;;  %3865 = vmatprep.mubr.bf16.mxu1 %v6570_v37 }
 0x15b   : > { %3825 = vmatprep.mubr.bf16.mxu0 %v6369_v22 }
 0x161   : > { %3866 = vmatmul.mubr.bf16.gmra.mrb[40].mxu1 %v6572_v1 }
 0x162   : > { %3826 = vmatmul.mubr.bf16.gmra.mrb[8].mxu0 %v6389_v39  ;;  %3875 = vmatprep.mubr.bf16.mxu1 %v4823_v21 }
 0x163   : > { %3835 = vmatprep.mubr.bf16.mxu0 %v6459_v36 }
 0x169   : > { %3876 = vmatmul.mubr.bf16.gmra.mrb[44].mxu1 %v4822_v42 }
 0x16a   : > { %3836 = vmatmul.mubr.bf16.gmra.mrb[12].mxu0 %v6474_v27 }
 0x1e4   : > { %v7260_v7 = vpop.f32.mrb[0].mxu1 }
 0x1e5   : > { %v7262_v14 = vpop.f32.mrb[1].mxu1 }
 0x1e6   : > { %v7264_v32 = vpop.f32.mrb[2].mxu1 }
 0x1e7   : > { %v7266_v46 = vpop.f32.mrb[3].mxu1 }
 0x1ec   : > { %v7268_v22 = vpop.f32.mrb[4].mxu1 }
 0x1ed   : > { %v7270_v39 = vpop.f32.mrb[5].mxu1 }
 0x1ee   : > { %v7272_v36 = vpop.f32.mrb[6].mxu1 }
 0x1ef   : > { %v7274_v15 = vpop.f32.mrb[7].mxu1 }
 0x1f4   : > { %v7276_v27 = vpop.f32.mrb[8].mxu1 }
 0x1f5   : > { %v7278_v57 = vpop.f32.mrb[9].mxu1 }
 0x1f6   : > { %v7280_v52 = vpop.f32.mrb[10].mxu1 }
 0x1f7   : > { %v7282_v28 = vpop.f32.mrb[11].mxu1 }
 0x1fc   : > { %v7284_v37 = vpop.f32.mrb[12].mxu1 }
 0x1fd   : > { %v7286_v1 = vpop.f32.mrb[13].mxu1 }
 0x1fe   : > { %v7288_v18 = vpop.f32.mrb[14].mxu1 }
 0x1ff   : > { %v7290_v11 = vpop.f32.mrb[15].mxu1 }
 0x204   : > { %v2051_v38 = vpop.f32.mrb[16].mxu1 }
 0x205   : > { %v3493_v21 = vpop.f32.mrb[16].mxu0  ;;  %v2053_v58 = vpop.f32.mrb[17].mxu1 }
 0x206   : > { %v4947_v42 = vadd.f32 %v3493_v21, %v2051_v38  ;;  %v3495_v26 = vpop.f32.mrb[17].mxu0  ;;  %v2055_v0 = vpop.f32.mrb[18].mxu1  ;;  %v3922_v21 = vsub.s32 0, %v3921_v12 }
 0x207   : > { %v7292_v45 = vadd.f32 %v3495_v26, %v2053_v58  ;;  %v3497_v53 = vpop.f32.mrb[18].mxu0  ;;  %v2057_v33 = vpop.f32.mrb[19].mxu1  ;;  %v3918_v26 = vld [vmem:[%s7433_s3] sm:$0x3] }
 0x208   : > { %v7294_v48 = vadd.f32 %v3497_v53, %v2055_v0  ;;  %v3499_v34 = vpop.f32.mrb[19].mxu0  ;;  %v3926_v0 = vsub.s32 1, %v3921_v12  ;;  %v7327_v53 = vrot.slane %v3918_v26, %v3922_v21 }
 0x209   : > { %v7296_v40 = vadd.f32 %v3499_v34, %v2057_v33 }
 0x20c   : > { %v2061_v3 = vpop.f32.mrb[20].mxu1 }
 0x20d   : > { %v3503_v16 = vpop.f32.mrb[20].mxu0  ;;  %v2063_v62 = vpop.f32.mrb[21].mxu1 }
 0x20e   : > { %v7298_v25 = vadd.f32 %v3503_v16, %v2061_v3  ;;  %v3505_v6 = vpop.f32.mrb[21].mxu0  ;;  %v2065_v49 = vpop.f32.mrb[22].mxu1  ;;  %v7329_v3 = vrot.slane %v3918_v26, %v3926_v0 }
 0x20f   : > { %v7300_v44 = vadd.f32 %v3505_v6, %v2063_v62  ;;  %v3507_v9 = vpop.f32.mrb[22].mxu0  ;;  %v2067_v30 = vpop.f32.mrb[23].mxu1 }
 0x210   : > { %v7302_v60 = vadd.f32 %v3507_v9, %v2065_v49  ;;  %v3509_v4 = vpop.f32.mrb[23].mxu0 }
 0x211   : > { %v7304_v50 = vadd.f32 %v3509_v4, %v2067_v30 }
 0x214   : > { %v2071_v2 = vpop.f32.mrb[24].mxu1 }
 0x215   : > { %v3513_v20 = vpop.f32.mrb[24].mxu0  ;;  %v2073_v63 = vpop.f32.mrb[25].mxu1 }
 0x216   : > { %v7306_v41 = vadd.f32 %v3513_v20, %v2071_v2  ;;  %v3515_v47 = vpop.f32.mrb[25].mxu0  ;;  %v2075_v31 = vpop.f32.mrb[26].mxu1 }
 0x217   : > { %v7308_v17 = vadd.f32 %v3515_v47, %v2073_v63  ;;  %v3517_v13 = vpop.f32.mrb[26].mxu0  ;;  %v2077_v29 = vpop.f32.mrb[27].mxu1 }
 0x218   : > { %v7310_v59 = vadd.f32 %v3517_v13, %v2075_v31  ;;  %v3519_v23 = vpop.f32.mrb[27].mxu0 }
 0x219   : > { %v7313_v43 = vadd.f32 %v3519_v23, %v2077_v29 }
 0x21c   : > { %v2081_v51 = vpop.f32.mrb[28].mxu1 }
 0x21d   : > { %v3523_v24 = vpop.f32.mrb[28].mxu0  ;;  %v2083_v61 = vpop.f32.mrb[29].mxu1 }
 0x21e   : > { %v7315_v56 = vadd.f32 %v3523_v24, %v2081_v51  ;;  %v3525_v10 = vpop.f32.mrb[29].mxu0  ;;  %v2085_v8 = vpop.f32.mrb[30].mxu1 }
 0x21f   : > { %v7317_v54 = vadd.f32 %v3525_v10, %v2083_v61  ;;  %v3527_v5 = vpop.f32.mrb[30].mxu0  ;;  %v2087_v19 = vpop.f32.mrb[31].mxu1 }
 0x220   : > { %v7319_v35 = vadd.f32 %v3527_v5, %v2085_v8  ;;  %v3529_v38 = vpop.f32.mrb[31].mxu0 }
 0x221   : > { %v7321_v58 = vadd.f32 %v3529_v38, %v2087_v19 }
 0x224   : > { %v3847_v34 = vpop.f32.mrb[32].mxu1 }
 0x225   : > { %v3807_v33 = vpop.f32.mrb[0].mxu0  ;;  %v4948_v62 = vadd.f32 %v4947_v42, %v3847_v34  ;;  %v3849_v49 = vpop.f32.mrb[33].mxu1 }
 0x226   : > { %v4931_v16 = vadd.f32 %v3807_v33, %v7260_v7  ;;  %v3809_v6 = vpop.f32.mrb[1].mxu0  ;;  %v4950_v30 = vadd.f32 %v7292_v45, %v3849_v49  ;;  %v3851_v2 = vpop.f32.mrb[34].mxu1 }
 0x227   : > { %v4932_v9 = vadd.f32 %v3809_v6, %v7262_v14  ;;  %v3811_v4 = vpop.f32.mrb[2].mxu0  ;;  %v3946_v63 = vadd.f32 %v4948_v62, %v7327_v53  ;;  %v4952_v31 = vadd.f32 %v7294_v48, %v3851_v2  ;;  %v3853_v7 = vpop.f32.mrb[35].mxu1 }
 0x228   : > { %v3930_v20 = vadd.f32 %v4931_v16, %v7327_v53  ;;  %v4933_v47 = vadd.f32 %v3811_v4, %v7264_v32  ;;  %v3813_v13 = vpop.f32.mrb[3].mxu0  ;;  %v3947_v29 = vadd.f32 %v4950_v30, %v7329_v3  ;;  %v4954_v45 = vadd.f32 %v7296_v40, %v3853_v7 }
 0x229   : > { %v3931_v42 = vadd.f32 %v4932_v9, %v7329_v3  ;;  %v4934_v14 = vadd.f32 %v3813_v13, %v7266_v46  ;;  %v3978_v55 = vmax.f32 %v3946_v63, 0.0  ;;  %v3948_v51 = vadd.f32 %v4952_v31, %v7327_v53 }
 0x22a   : > { %v3962_v23 = vmax.f32 %v3930_v20, 0.0  ;;  %v3932_v12 = vadd.f32 %v4933_v47, %v7327_v53  ;;  %v3979_v24 = vmax.f32 %v3947_v29, 0.0  ;;  %v3949_v61 = vadd.f32 %v4954_v45, %v7329_v3 }
 0x22b   : > { %v3963_v32 = vmax.f32 %v3931_v42, 0.0  ;;  %v3933_v48 = vadd.f32 %v4934_v14, %v7329_v3  ;;  %v3980_v40 = vmax.f32 %v3948_v51, 0.0 }
 0x22c   : > { %v3964_v46 = vmax.f32 %v3932_v12, 0.0  ;;  %v4889_v8 = vpack.c.bf16 %v3979_v24, %v3978_v55  ;;  %v3981_v19 = vmax.f32 %v3949_v61, 0.0  ;;  %v3857_v21 = vpop.f32.mrb[36].mxu1 }
 0x22d   : > { %v4881_v10 = vpack.c.bf16 %v3963_v32, %v3962_v23  ;;  %v3965_v5 = vmax.f32 %v3933_v48, 0.0  ;;  %v3817_v38 = vpop.f32.mrb[4].mxu0  ;;  %v4956_v0 = vadd.f32 %v7298_v25, %v3857_v21  ;;  %v3859_v34 = vpop.f32.mrb[37].mxu1 }
 0x22e   : > { %v4935_v26 = vadd.f32 %v3817_v38, %v7268_v22  ;;  %v3819_v33 = vpop.f32.mrb[5].mxu0  ;;  %4098 = vst [vmem:[%s7349_s28 + $0x40] sm:$0xff] %v4889_v8  ;;  %v4890_v62 = vpack.c.bf16 %v3981_v19, %v3980_v40  ;;  %v4958_v49 = vadd.f32 %v7300_v44, %v3859_v34  ;;  %v3861_v30 = vpop.f32.mrb[38].mxu1 }
 0x22f   : > { %4090 = vst [vmem:[%s7349_s28] sm:$0xff] %v4881_v10  ;;  %v4882_v16 = vpack.c.bf16 %v3965_v5, %v3964_v46  ;;  %v4936_v6 = vadd.f32 %v3819_v33, %v7270_v39  ;;  %v3821_v9 = vpop.f32.mrb[6].mxu0  ;;  %v3950_v22 = vadd.f32 %v4956_v0, %v7327_v53  ;;  %v4960_v2 = vadd.f32 %v7302_v60, %v3861_v30  ;;  %v3863_v63 = vpop.f32.mrb[39].mxu1 }
 0x230   : > { %v3934_v4 = vadd.f32 %v4935_v26, %v7327_v53  ;;  %v4937_v25 = vadd.f32 %v3821_v9, %v7272_v36  ;;  %v3823_v20 = vpop.f32.mrb[7].mxu0  ;;  %4099 = vst [vmem:[%s7349_s28 + $0x48] sm:$0xff] %v4890_v62  ;;  %v3951_v39 = vadd.f32 %v4958_v49, %v7329_v3  ;;  %v4962_v31 = vadd.f32 %v7304_v50, %v3863_v63 }
 0x231   : > { %4091 = vst [vmem:[%s7349_s28 + $0x8] sm:$0xff] %v4882_v16  ;;  %v3935_v47 = vadd.f32 %v4936_v6, %v7329_v3  ;;  %v4938_v44 = vadd.f32 %v3823_v20, %v7274_v15  ;;  %v3982_v7 = vmax.f32 %v3950_v22, 0.0  ;;  %v3952_v36 = vadd.f32 %v4960_v2, %v7327_v53 }
 0x232   : > { %v3966_v13 = vmax.f32 %v3934_v4, 0.0  ;;  %v3936_v42 = vadd.f32 %v4937_v25, %v7327_v53  ;;  %v3983_v60 = vmax.f32 %v3951_v39, 0.0  ;;  %v3953_v45 = vadd.f32 %v4962_v31, %v7329_v3 }
 0x233   : > { %v3967_v29 = vmax.f32 %v3935_v47, 0.0  ;;  %v3937_v14 = vadd.f32 %v4938_v44, %v7329_v3  ;;  %v3984_v55 = vmax.f32 %v3952_v36, 0.0 }
 0x234   : > { %v3968_v23 = vmax.f32 %v3936_v42, 0.0  ;;  %v4891_v15 = vpack.c.bf16 %v3983_v60, %v3982_v7  ;;  %v3985_v50 = vmax.f32 %v3953_v45, 0.0  ;;  %v3867_v24 = vpop.f32.mrb[40].mxu1 }
 0x235   : > { %v4883_v12 = vpack.c.bf16 %v3967_v29, %v3966_v13  ;;  %v3969_v51 = vmax.f32 %v3937_v14, 0.0  ;;  %v3827_v32 = vpop.f32.mrb[8].mxu0  ;;  %v4964_v61 = vadd.f32 %v7306_v41, %v3867_v24  ;;  %v3869_v40 = vpop.f32.mrb[41].mxu1 }
 0x236   : > { %v4939_v48 = vadd.f32 %v3827_v32, %v7276_v27  ;;  %v3829_v46 = vpop.f32.mrb[9].mxu0  ;;  %4100 = vst [vmem:[%s7349_s28 + $0x50] sm:$0xff] %v4891_v15  ;;  %v4892_v8 = vpack.c.bf16 %v3985_v50, %v3984_v55  ;;  %v4966_v19 = vadd.f32 %v7308_v17, %v3869_v40  ;;  %v3871_v21 = vpop.f32.mrb[42].mxu1 }
 0x237   : > { %4092 = vst [vmem:[%s7349_s28 + $0x10] sm:$0xff] %v4883_v12  ;;  %v4884_v10 = vpack.c.bf16 %v3969_v51, %v3968_v23  ;;  %v4940_v5 = vadd.f32 %v3829_v46, %v7278_v57  ;;  %v3831_v38 = vpop.f32.mrb[10].mxu0  ;;  %v3954_v27 = vadd.f32 %v4964_v61, %v7327_v53  ;;  %v4968_v0 = vadd.f32 %v7310_v59, %v3871_v21  ;;  %v3873_v34 = vpop.f32.mrb[43].mxu1 }
 0x238   : > { %v3938_v26 = vadd.f32 %v4939_v48, %v7327_v53  ;;  %v4941_v41 = vadd.f32 %v3831_v38, %v7280_v52  ;;  %v3833_v33 = vpop.f32.mrb[11].mxu0  ;;  %4101 = vst [vmem:[%s7349_s28 + $0x58] sm:$0xff] %v4892_v8  ;;  %v3955_v57 = vadd.f32 %v4966_v19, %v7329_v3  ;;  %v4970_v62 = vadd.f32 %v7313_v43, %v3873_v34 }
 0x239   : > { %4093 = vst [vmem:[%s7349_s28 + $0x18] sm:$0xff] %v4884_v10  ;;  %v3939_v16 = vadd.f32 %v4940_v5, %v7329_v3  ;;  %v4942_v17 = vadd.f32 %v3833_v33, %v7282_v28  ;;  %v3986_v49 = vmax.f32 %v3954_v27, 0.0  ;;  %v3956_v52 = vadd.f32 %v4968_v0, %v7327_v53 }
 0x23a   : > { %v3970_v6 = vmax.f32 %v3938_v26, 0.0  ;;  %v3940_v9 = vadd.f32 %v4941_v41, %v7327_v53  ;;  %v3987_v59 = vmax.f32 %v3955_v57, 0.0  ;;  %v3957_v22 = vadd.f32 %v4970_v62, %v7329_v3 }
 0x23b   : > { %v3971_v30 = vmax.f32 %v3939_v16, 0.0  ;;  %v3941_v4 = vadd.f32 %v4942_v17, %v7329_v3  ;;  %v3988_v2 = vmax.f32 %v3956_v52, 0.0 }
 0x23c   : > { %v3972_v25 = vmax.f32 %v3940_v9, 0.0  ;;  %v4893_v28 = vpack.c.bf16 %v3987_v59, %v3986_v49  ;;  %v3989_v43 = vmax.f32 %v3957_v22, 0.0  ;;  %v3877_v39 = vpop.f32.mrb[44].mxu1 }
 0x23d   : > { %v4885_v20 = vpack.c.bf16 %v3971_v30, %v3970_v6  ;;  %v3973_v63 = vmax.f32 %v3941_v4, 0.0  ;;  %v3837_v47 = vpop.f32.mrb[12].mxu0  ;;  %v4972_v31 = vadd.f32 %v7315_v56, %v3877_v39  ;;  %v3879_v7 = vpop.f32.mrb[45].mxu1 }
 0x23e   : > { %v4943_v44 = vadd.f32 %v3837_v47, %v7284_v37  ;;  %v3839_v13 = vpop.f32.mrb[13].mxu0  ;;  %4102 = vst [vmem:[%s7349_s28 + $0x60] sm:$0xff] %v4893_v28  ;;  %v4894_v36 = vpack.c.bf16 %v3989_v43, %v3988_v2  ;;  %v4974_v60 = vadd.f32 %v7317_v54, %v3879_v7  ;;  %v3881_v45 = vpop.f32.mrb[46].mxu1 }
 0x23f   : > { %4094 = vst [vmem:[%s7349_s28 + $0x20] sm:$0xff] %v4885_v20  ;;  %v4886_v42 = vpack.c.bf16 %v3973_v63, %v3972_v25  ;;  %v4944_v29 = vadd.f32 %v3839_v13, %v7286_v1  ;;  %v3841_v14 = vpop.f32.mrb[14].mxu0  ;;  %v3958_v37 = vadd.f32 %v4972_v31, %v7327_v53  ;;  %v4976_v55 = vadd.f32 %v7319_v35, %v3881_v45  ;;  %v3883_v15 = vpop.f32.mrb[47].mxu1 }
 0x240   : > { %v3942_v23 = vadd.f32 %v4943_v44, %v7327_v53  ;;  %v4945_v56 = vadd.f32 %v3841_v14, %v7288_v18  ;;  %v3843_v12 = vpop.f32.mrb[15].mxu0  ;;  %4103 = vst [vmem:[%s7349_s28 + $0x68] sm:$0xff] %v4894_v36  ;;  %v3959_v1 = vadd.f32 %v4974_v60, %v7329_v3  ;;  %v4978_v50 = vadd.f32 %v7321_v58, %v3883_v15 }
 0x241   : > { %4095 = vst [vmem:[%s7349_s28 + $0x28] sm:$0xff] %v4886_v42  ;;  %v3943_v51 = vadd.f32 %v4944_v29, %v7329_v3  ;;  %v4946_v54 = vadd.f32 %v3843_v12, %v7290_v11  ;;  %v3990_v24 = vmax.f32 %v3958_v37, 0.0  ;;  %v3960_v35 = vadd.f32 %v4976_v55, %v7327_v53 }
 0x242   : > { %v3974_v32 = vmax.f32 %v3942_v23, 0.0  ;;  %v3944_v18 = vadd.f32 %v4945_v56, %v7327_v53  ;;  %v3991_v61 = vmax.f32 %v3959_v1, 0.0  ;;  %v3961_v40 = vadd.f32 %v4978_v50, %v7329_v3 }
 0x243   : > { %v3975_v48 = vmax.f32 %v3943_v51, 0.0  ;;  %v3945_v46 = vadd.f32 %v4946_v54, %v7329_v3  ;;  %v3992_v11 = vmax.f32 %v3960_v35, 0.0 }
 0x244   : > { %v3976_v10 = vmax.f32 %v3944_v18, 0.0  ;;  %v4895_v5 = vpack.c.bf16 %v3991_v61, %v3990_v24  ;;  %v3993_v19 = vmax.f32 %v3961_v40, 0.0 }
 0x245   : > { %v4887_v8 = vpack.c.bf16 %v3975_v48, %v3974_v32  ;;  %v3977_v58 = vmax.f32 %v3945_v46, 0.0 }
 0x246   : > { %4104 = vst [vmem:[%s7349_s28 + $0x70] sm:$0xff] %v4895_v5  ;;  %v4896_v21 = vpack.c.bf16 %v3993_v19, %v3992_v11 }
 0x247   : > { %4096 = vst [vmem:[%s7349_s28 + $0x30] sm:$0xff] %v4887_v8  ;;  %v4888_v38 = vpack.c.bf16 %v3977_v58, %v3976_v10 }
 0x248   : > { %4105 = vst [vmem:[%s7349_s28 + $0x78] sm:$0xff] %v4896_v21 }
 0x249   : > { %4097 = vst [vmem:[%s7349_s28 + $0x38] sm:$0xff] %v4888_v38 }
 0x24a PF: > { %s14_s19 = sadd.s32 1, %s5723_s19   ;;  %s7449_s15 = smov %s5715_s17 }
 0x24b   : > { %p11_p9 = scmp.ge.s32.totalorder %s14_s19, 6   ;;  %s7450_s16 = smov %s5719_s18 }
 0x24c   : > { %s7451_s17 = smov %s7454_s20  ;;  %s7452_s18 = smov %s7458_s21 }
 0x24d   :  { %13 = sbr.rel (!%p11_p9) target bundleno = 3 (0x3), region = 77 }

</bundles_post_ra>
